<compile_context>
chip_gen: v6e
topology: v6e:2x2x1
jax: 0.10.0
libtpu: 0.0.40
codegen_flags: <defaults>
</compile_context>

<pallas_src>
import functools

import jax
import jax.numpy as jnp
from jax.experimental import pallas as pl
from jax.experimental.pallas import tpu as pltpu


# ----------------------------------------------------------------------------
# Small helpers
# ----------------------------------------------------------------------------
def _round_up(x, m):
    return ((x + m - 1) // m) * m


def _pick_row_tile(M, target=512, cap=2048):
    """Pick a sublane-aligned row tile; prefer an exact divisor of M (no pad)."""
    best = None
    d = 16
    while d <= min(M, cap):
        if M % d == 0 and d >= 128:
            if best is None or abs(d - target) < abs(best - target):
                best = d
        d += 16
    if best is not None:
        return best, M
    tm = min(cap, _round_up(min(M, target), 16))
    return tm, _round_up(M, tm)


# ----------------------------------------------------------------------------
# Fused matmul + BN-affine + IF-neuron Pallas kernel
# ----------------------------------------------------------------------------
def _if_epilogue(y, t, T, inv_T, spk_ref, fr_ref, v_ref):
    """IFNode step: v += y; spike = (v >= 1); hard reset to 0; accumulate rate."""
    v = v_ref[...] + y
    spk = (v >= 1.0).astype(jnp.float32)
    v_ref[...] = v * (1.0 - spk)                 # hard reset (v_reset = 0.0)
    spk_ref[...] = spk.astype(spk_ref.dtype)
    fr_ref[...] = fr_ref[...] + spk

    @pl.when(t == T - 1)
    def _():
        fr_ref[...] = fr_ref[...] * inv_T        # mean over T


def make_fused_kernel(T, cache_matmul):
    inv_T = 1.0 / float(T)

    if cache_matmul:
        # Drive is constant over time: do the matmul once (t == 0) and reuse
        # the cached BN-affined result from VMEM for the remaining timesteps.
        def kernel(x_ref, w_ref, s_ref, b_ref, spk_ref, fr_ref, v_ref, y_ref):
            t = pl.program_id(1)

            @pl.when(t == 0)
            def _():
                v_ref[...] = jnp.zeros_like(v_ref)
                fr_ref[...] = jnp.zeros_like(fr_ref)
                acc = jnp.dot(x_ref[...], w_ref[...],
                              preferred_element_type=jnp.float32)
                y_ref[...] = acc * s_ref[...] + b_ref[...]

            _if_epilogue(y_ref[...], t, T, inv_T, spk_ref, fr_ref, v_ref)

    else:
        def kernel(x_ref, w_ref, s_ref, b_ref, spk_ref, fr_ref, v_ref):
            t = pl.program_id(1)

            @pl.when(t == 0)
            def _():
                v_ref[...] = jnp.zeros_like(v_ref)
                fr_ref[...] = jnp.zeros_like(fr_ref)

            acc = jnp.dot(x_ref[...], w_ref[...],
                          preferred_element_type=jnp.float32)
            y = acc * s_ref[...] + b_ref[...]
            _if_epilogue(y, t, T, inv_T, spk_ref, fr_ref, v_ref)

    return kernel


def matmul_bn_if(x, w, scale, shift, T, *, time_varying, pad_n=False,
                 target_tm=512, spike_dtype=jnp.bfloat16):
    """Fused  spk_t = IF((x_t @ w) * scale + shift)  over T timesteps.

    x: (T, M, K) if time_varying else (M, K) (same drive at every timestep).
    Returns (spike sequence (T, M, Nout'), firing rate (M, Nout')) where
    Nout' = Nout padded to a multiple of 128 when pad_n=True (padded columns
    are exactly zero).
    """
    if time_varying:
        Tx, M, K = x.shape
        assert Tx == T
    else:
        M, K = x.shape
    Kw, Nout = w.shape
    assert K == Kw

    # Lane-dense output columns (unmasked 128-lane stores) for the FC layers.
    if pad_n:
        n_pad = _round_up(Nout, 128)
        if n_pad != Nout:
            w = jnp.pad(w, ((0, 0), (0, n_pad - Nout)))
            scale = jnp.pad(scale, (0, n_pad - Nout), constant_values=1.0)
            shift = jnp.pad(shift, (0, n_pad - Nout))
            Nout = n_pad

    # Bounded, sublane-aligned row tiles (no full-M fallback; v7x-safe VMEM).
    tm, M_pad = _pick_row_tile(M, target=target_tm)
    if M_pad != M:
        pad_rows = (((0, 0), (0, M_pad - M), (0, 0)) if time_varying
                    else ((0, M_pad - M), (0, 0)))
        x = jnp.pad(x, pad_rows)

    x = x.astype(jnp.bfloat16)                 # spikes/pixels exact-ish in bf16
    w = w.astype(jnp.bfloat16)
    scale2 = scale.reshape(1, Nout).astype(jnp.float32)
    shift2 = shift.reshape(1, Nout).astype(jnp.float32)

    if time_varying:
        x_spec = pl.BlockSpec((None, tm, K), lambda i, t: (t, i, 0))
    else:
        # Same block at every timestep: no T-fold broadcast in HBM.
        x_spec = pl.BlockSpec((tm, K), lambda i, t: (i, 0))

    scratch = [pltpu.VMEM((tm, Nout), jnp.float32)]          # membrane v
    if not time_varying:
        scratch.append(pltpu.VMEM((tm, Nout), jnp.float32))  # cached drive

    spk, fr = pl.pallas_call(
        make_fused_kernel(T, cache_matmul=not time_varying),
        out_shape=(
            jax.ShapeDtypeStruct((T, M_pad, Nout), spike_dtype),
            jax.ShapeDtypeStruct((M_pad, Nout), jnp.float32),
        ),
        grid_spec=pltpu.PrefetchScalarGridSpec(
            num_scalar_prefetch=0,
            grid=(M_pad // tm, T),               # T trailing (reduction axis)
            in_specs=[
                x_spec,
                pl.BlockSpec((K, Nout), lambda i, t: (0, 0)),
                pl.BlockSpec((1, Nout), lambda i, t: (0, 0)),
                pl.BlockSpec((1, Nout), lambda i, t: (0, 0)),
            ],
            out_specs=[
                pl.BlockSpec((None, tm, Nout), lambda i, t: (t, i, 0)),
                pl.BlockSpec((tm, Nout), lambda i, t: (i, 0)),   # resident acc
            ],
            scratch_shapes=scratch,
        ),
        compiler_params=pltpu.CompilerParams(
            dimension_semantics=("parallel", "arbitrary")),
    )(x, w, scale2, shift2)

    if M_pad != M:
        spk = spk[:, :M, :]
        fr = fr[:M, :]
    return spk, fr


# ----------------------------------------------------------------------------
# Glue (layout plumbing only)
# ----------------------------------------------------------------------------
def im2col_3x3_pad1(x):
    """x: (B, H, W, C) -> (B*H*W, 9*C); patch order (kh, kw, cin)."""
    B, H, W, C = x.shape
    xp = jnp.pad(x, ((0, 0), (1, 1), (1, 1), (0, 0)))
    cols = [xp[:, i:i + H, j:j + W, :] for i in range(3) for j in range(3)]
    patches = jnp.stack(cols, axis=-2)            # (B, H, W, 9, C)
    return patches.reshape(B * H * W, 9 * C)


def avgpool2x2(x):
    B, H, W, C = x.shape
    return x.reshape(B, H // 2, 2, W // 2, 2, C).mean(axis=(2, 4))


def fold_bn(gamma, beta, mean, var, eps=1e-5):
    s = gamma / jnp.sqrt(var + eps)
    b = beta - mean * s
    return s, b


# ----------------------------------------------------------------------------
# CSNN forward
# ----------------------------------------------------------------------------
def csnn_forward(x, params, T):
    """x: (N, 1, 28, 28) float32 (NCHW, like the PyTorch module) -> (N, 10) firing rate."""
    N = x.shape[0]
    C = params["w1"].shape[1]          # static Python int (fixes traced-shape error)

    xh = jnp.transpose(x, (0, 2, 3, 1))                        # (N, 28, 28, 1)

    # --- Conv1 (1->C, 3x3, pad 1) + BN1 + IF1 (drive constant over T) ---
    p1 = im2col_3x3_pad1(xh)                                   # (N*784, 9)
    s1, b1 = fold_bn(params["bn1_g"], params["bn1_b"],
                     params["bn1_m"], params["bn1_v"])
    spk1, _ = matmul_bn_if(p1, params["w1"], s1, b1, T, time_varying=False)
    # spk1: (T, N*784, C) bf16

    # --- AvgPool 2x2: 28 -> 14 ---
    pool1 = avgpool2x2(spk1.reshape(T * N, 28, 28, C))         # (T*N, 14, 14, C)

    # --- Conv2 (C->C) + BN2 + IF2 ---
    p2 = im2col_3x3_pad1(pool1)                                # (T*N*196, 9*C)
    s2, b2 = fold_bn(params["bn2_g"], params["bn2_b"],
                     params["bn2_m"], params["bn2_v"])
    spk2, _ = matmul_bn_if(p2.reshape(T, N * 196, 9 * C), params["w2"],
                           s2, b2, T, time_varying=True)
    # spk2: (T, N*196, C)

    # --- AvgPool 2x2: 14 -> 7; flatten channels-last (w_fc1 rows pre-permuted) ---
    pool2 = avgpool2x2(spk2.reshape(T * N, 14, 14, C))         # (T*N, 7, 7, C)
    flat = pool2.reshape(T, N, 49 * C)

    # --- Linear1 (49C -> 16C) + IF3; output columns padded to 128 lanes ---
    F1 = params["w_fc1"].shape[1]
    spk3, _ = matmul_bn_if(flat, params["w_fc1"],
                           jnp.ones((F1,), jnp.float32),
                           jnp.zeros((F1,), jnp.float32),
                           T, time_varying=True, pad_n=True)
    # spk3: (T, N, 128) with columns >= 16C exactly zero

    # --- Linear2 (16C -> 10) + IF4; firing rate = mean over T ---
    w_fc2 = params["w_fc2"]
    k2 = spk3.shape[2]
    w_fc2 = jnp.pad(w_fc2, ((0, k2 - w_fc2.shape[0]), (0, 0)))  # match padded K
    _, fr = matmul_bn_if(spk3, w_fc2,
                         jnp.ones((10,), jnp.float32),
                         jnp.zeros((10,), jnp.float32),
                         T, time_varying=True, pad_n=True)
    return fr[:, :10]


def init_params(key, channels):
    C = channels
    ks = jax.random.split(key, 12)
    # Conv weights in im2col layout (kh*kw*Cin, Cout).  A PyTorch Conv2d weight
    # (Cout, Cin, kH, kW) maps via transpose(2, 3, 1, 0).reshape(kH*kW*Cin, Cout).
    w1 = jax.random.normal(ks[0], (3, 3, 1, C), jnp.float32) * 0.5
    w2 = jax.random.normal(ks[1], (3, 3, C, C), jnp.float32) * 0.3
    # w_fc1 rows are stored in channels-last (h, w, c) flatten order so pooled
    # activations flatten without a transpose.  A PyTorch Linear weight
    # (Fout, C*7*7) maps via W.reshape(Fout, C, 7, 7).transpose(2, 3, 1, 0)
    # .reshape(49*C, Fout).
    w_fc1 = jax.random.normal(ks[8], (C * 49, C * 16), jnp.float32) * 0.2
    w_fc2 = jax.random.normal(ks[9], (C * 16, 10), jnp.float32) * 0.3
    return {
        "w1": w1.reshape(9 * 1, C),
        "w2": w2.reshape(9 * C, C),
        "bn1_g": jax.random.uniform(ks[2], (C,), jnp.float32, 0.5, 1.5),
        "bn1_b": jax.random.normal(ks[3], (C,), jnp.float32) * 0.1,
        "bn1_m": jax.random.normal(ks[4], (C,), jnp.float32) * 0.1,
        "bn1_v": jax.random.uniform(ks[5], (C,), jnp.float32, 0.5, 1.5),
        "bn2_g": jax.random.uniform(ks[6], (C,), jnp.float32, 0.5, 1.5),
        "bn2_b": jax.random.normal(ks[7], (C,), jnp.float32) * 0.1,
        "bn2_m": jax.random.normal(ks[10], (C,), jnp.float32) * 0.1,
        "bn2_v": jax.random.uniform(ks[11], (C,), jnp.float32, 0.5, 1.5),
        "w_fc1": w_fc1,
        "w_fc2": w_fc2,
    }


if __name__ == "__main__":
    T = 4
    channels = 4
    N = 2

    key = jax.random.PRNGKey(0)
    k_x, k_p = jax.random.split(key)
    # MNIST-like input (N, 1, 28, 28) in NCHW, values in [0, 1)
    x = jax.random.uniform(k_x, (N, 1, 28, 28), jnp.float32)
    params = init_params(k_p, channels)

    fwd = jax.jit(functools.partial(csnn_forward, T=T))
    fr = fwd(x, params)
    jax.block_until_ready(fr)
    assert fr.shape == (N, 10)
    print("KERNEL_OK")
</pallas_src>

<mosaic_0001>
module attributes {stable_mosaic.version = 11 : i64} {
  func.func @kernel(%arg0: i32, %arg1: i32, %arg2: memref<784x9xbf16, #tpu.memory_space<vmem>>, %arg3: memref<9x4xbf16, #tpu.memory_space<vmem>>, %arg4: memref<1x4xf32, #tpu.memory_space<vmem>>, %arg5: memref<1x4xf32, #tpu.memory_space<vmem>>, %arg6: memref<1x784x4xbf16, #tpu.memory_space<vmem>>, %arg7: memref<784x4xf32, #tpu.memory_space<vmem>>, %arg8: memref<784x4xf32, #tpu.memory_space<vmem>>, %arg9: memref<784x4xf32, #tpu.memory_space<vmem>>) attributes {dimension_semantics = [#tpu.dimension_semantics<parallel>, #tpu.dimension_semantics<arbitrary>], iteration_bounds = array<i64: 2, 4>, scalar_prefetch = 0 : i64, scratch_operands = 2 : i64, tpu.core_type = #tpu.core_type<tc>, window_params = [{transform_indices = @transform_0, window_bounds = array<i64: 784, 9>}, {pipeline_mode = #tpu.pipeline_mode<synchronous>, transform_indices = @transform_1, window_bounds = array<i64: 9, 4>}, {pipeline_mode = #tpu.pipeline_mode<synchronous>, transform_indices = @transform_2, window_bounds = array<i64: 1, 4>}, {pipeline_mode = #tpu.pipeline_mode<synchronous>, transform_indices = @transform_3, window_bounds = array<i64: 1, 4>}, {transform_indices = @transform_4, window_bounds = array<i64: 1, 784, 4>}, {transform_indices = @transform_5, window_bounds = array<i64: 784, 4>}]} {
    %c0_i32 = arith.constant 0 : i32
    %0 = arith.cmpi eq, %arg1, %c0_i32 : i32
    %1 = arith.extui %0 : i1 to i32
    %c0_i32_0 = arith.constant 0 : i32
    %2 = arith.cmpi ne, %1, %c0_i32_0 : i32
    scf.if %2 {
      %cst_15 = arith.constant 0.000000e+00 : f32
      %24 = vector.broadcast %cst_15 : f32 to vector<784x4xf32>
      %c0_16 = arith.constant 0 : index
      %c0_17 = arith.constant 0 : index
      %25 = vector.load %arg8[%c0_16, %c0_17] : memref<784x4xf32, #tpu.memory_space<vmem>>, vector<784x4xf32>
      tpu.vector_store %arg8[%c0_16, %c0_17], %24 {strides = array<i32>} : memref<784x4xf32, #tpu.memory_space<vmem>>, vector<784x4xf32>,
      %cst_18 = arith.constant 0.000000e+00 : f32
      %26 = vector.broadcast %cst_18 : f32 to vector<784x4xf32>
      %c0_19 = arith.constant 0 : index
      %c0_20 = arith.constant 0 : index
      %27 = vector.load %arg7[%c0_19, %c0_20] : memref<784x4xf32, #tpu.memory_space<vmem>>, vector<784x4xf32>
      tpu.vector_store %arg7[%c0_19, %c0_20], %26 {strides = array<i32>} : memref<784x4xf32, #tpu.memory_space<vmem>>, vector<784x4xf32>,
      %c0_21 = arith.constant 0 : index
      %c0_22 = arith.constant 0 : index
      %28 = vector.load %arg2[%c0_21, %c0_22] : memref<784x9xbf16, #tpu.memory_space<vmem>>, vector<784x9xbf16>
      %c0_23 = arith.constant 0 : index
      %c0_24 = arith.constant 0 : index
      %29 = vector.load %arg3[%c0_23, %c0_24] : memref<9x4xbf16, #tpu.memory_space<vmem>>, vector<9x4xbf16>
      %cst_25 = arith.constant dense<0.000000e+00> : vector<784x4xf32>
      %30 = tpu.matmul %28, %29, %cst_25 {dimension_numbers = #tpu.dot_dimension_numbers<[1], [0], [0], [1], [0, 0, 1, 1], [], []>} : vector<784x9xbf16>, vector<9x4xbf16>, vector<784x4xf32> -> vector<784x4xf32>
      %c0_26 = arith.constant 0 : index
      %c0_27 = arith.constant 0 : index
      %31 = vector.load %arg4[%c0_26, %c0_27] : memref<1x4xf32, #tpu.memory_space<vmem>>, vector<1x4xf32>
      %32 = vector.broadcast %31 : vector<1x4xf32> to vector<784x4xf32>
      %33 = arith.mulf %30, %32 : vector<784x4xf32>
      %c0_28 = arith.constant 0 : index
      %c0_29 = arith.constant 0 : index
      %34 = vector.load %arg5[%c0_28, %c0_29] : memref<1x4xf32, #tpu.memory_space<vmem>>, vector<1x4xf32>
      %35 = vector.broadcast %34 : vector<1x4xf32> to vector<784x4xf32>
      %36 = arith.addf %33, %35 : vector<784x4xf32>
      %c0_30 = arith.constant 0 : index
      %c0_31 = arith.constant 0 : index
      %37 = vector.load %arg9[%c0_30, %c0_31] : memref<784x4xf32, #tpu.memory_space<vmem>>, vector<784x4xf32>
      tpu.vector_store %arg9[%c0_30, %c0_31], %36 {strides = array<i32>} : memref<784x4xf32, #tpu.memory_space<vmem>>, vector<784x4xf32>,
    } else {
    }
    %c0 = arith.constant 0 : index
    %c0_1 = arith.constant 0 : index
    %3 = vector.load %arg9[%c0, %c0_1] : memref<784x4xf32, #tpu.memory_space<vmem>>, vector<784x4xf32>
    %c0_2 = arith.constant 0 : index
    %c0_3 = arith.constant 0 : index
    %4 = vector.load %arg8[%c0_2, %c0_3] : memref<784x4xf32, #tpu.memory_space<vmem>>, vector<784x4xf32>
    %5 = arith.addf %4, %3 : vector<784x4xf32>
    %cst = arith.constant 1.000000e+00 : f32
    %6 = vector.broadcast %cst : f32 to vector<784x4xf32>
    %7 = arith.cmpf oge, %5, %6 : vector<784x4xf32>
    %8 = arith.extui %7 : vector<784x4xi1> to vector<784x4xi32>
    %9 = arith.sitofp %8 : vector<784x4xi32> to vector<784x4xf32>
    %cst_4 = arith.constant 1.000000e+00 : f32
    %10 = vector.broadcast %cst_4 : f32 to vector<784x4xf32>
    %11 = arith.subf %10, %9 : vector<784x4xf32>
    %12 = arith.mulf %5, %11 : vector<784x4xf32>
    %c0_5 = arith.constant 0 : index
    %c0_6 = arith.constant 0 : index
    %13 = vector.load %arg8[%c0_5, %c0_6] : memref<784x4xf32, #tpu.memory_space<vmem>>, vector<784x4xf32>
    tpu.vector_store %arg8[%c0_5, %c0_6], %12 {strides = array<i32>} : memref<784x4xf32, #tpu.memory_space<vmem>>, vector<784x4xf32>,
    %14 = arith.truncf %9 : vector<784x4xf32> to vector<784x4xbf16>
    %c0_7 = arith.constant 0 : index
    %c0_8 = arith.constant 0 : index
    %c0_9 = arith.constant 0 : index
    %15 = vector.load %arg6[%c0_7, %c0_8, %c0_9] : memref<1x784x4xbf16, #tpu.memory_space<vmem>>, vector<1x784x4xbf16>
    %16 = vector.shape_cast %15 : vector<1x784x4xbf16> to vector<784x4xbf16>
    %17 = vector.shape_cast %14 : vector<784x4xbf16> to vector<1x784x4xbf16>
    tpu.vector_store %arg6[%c0_7, %c0_8, %c0_9], %17 {strides = array<i32>} : memref<1x784x4xbf16, #tpu.memory_space<vmem>>, vector<1x784x4xbf16>,
    %c0_10 = arith.constant 0 : index
    %c0_11 = arith.constant 0 : index
    %18 = vector.load %arg7[%c0_10, %c0_11] : memref<784x4xf32, #tpu.memory_space<vmem>>, vector<784x4xf32>
    %19 = arith.addf %18, %9 : vector<784x4xf32>
    %c0_12 = arith.constant 0 : index
    %c0_13 = arith.constant 0 : index
    %20 = vector.load %arg7[%c0_12, %c0_13] : memref<784x4xf32, #tpu.memory_space<vmem>>, vector<784x4xf32>
    tpu.vector_store %arg7[%c0_12, %c0_13], %19 {strides = array<i32>} : memref<784x4xf32, #tpu.memory_space<vmem>>, vector<784x4xf32>,
    %c3_i32 = arith.constant 3 : i32
    %21 = arith.cmpi eq, %arg1, %c3_i32 : i32
    %22 = arith.extui %21 : i1 to i32
    %c0_i32_14 = arith.constant 0 : i32
    %23 = arith.cmpi ne, %22, %c0_i32_14 : i32
    scf.if %23 {
      %c0_15 = arith.constant 0 : index
      %c0_16 = arith.constant 0 : index
      %24 = vector.load %arg7[%c0_15, %c0_16] : memref<784x4xf32, #tpu.memory_space<vmem>>, vector<784x4xf32>
      %cst_17 = arith.constant 2.500000e-01 : f32
      %25 = vector.broadcast %cst_17 : f32 to vector<784x4xf32>
      %26 = arith.mulf %24, %25 : vector<784x4xf32>
      %c0_18 = arith.constant 0 : index
      %c0_19 = arith.constant 0 : index
      %27 = vector.load %arg7[%c0_18, %c0_19] : memref<784x4xf32, #tpu.memory_space<vmem>>, vector<784x4xf32>
      tpu.vector_store %arg7[%c0_18, %c0_19], %26 {strides = array<i32>} : memref<784x4xf32, #tpu.memory_space<vmem>>, vector<784x4xf32>,
    } else {
    }
    return
  }
  func.func @transform_0(%arg0: i32, %arg1: i32) -> (i32, i32) {
    %c0_i32 = arith.constant 0 : i32
    %c0_i32_0 = arith.constant 0 : i32
    return %arg0, %c0_i32 : i32, i32
  }
  func.func @transform_1(%arg0: i32, %arg1: i32) -> (i32, i32) {
    %c0_i32 = arith.constant 0 : i32
    %c0_i32_0 = arith.constant 0 : i32
    %c0_i32_1 = arith.constant 0 : i32
    return %c0_i32, %c0_i32_0 : i32, i32
  }
  func.func @transform_2(%arg0: i32, %arg1: i32) -> (i32, i32) {
    %c0_i32 = arith.constant 0 : i32
    %c0_i32_0 = arith.constant 0 : i32
    %c0_i32_1 = arith.constant 0 : i32
    return %c0_i32, %c0_i32_0 : i32, i32
  }
  func.func @transform_3(%arg0: i32, %arg1: i32) -> (i32, i32) {
    %c0_i32 = arith.constant 0 : i32
    %c0_i32_0 = arith.constant 0 : i32
    %c0_i32_1 = arith.constant 0 : i32
    return %c0_i32, %c0_i32_0 : i32, i32
  }
  func.func @transform_4(%arg0: i32, %arg1: i32) -> (i32, i32, i32) {
    %c0_i32 = arith.constant 0 : i32
    %c0_i32_0 = arith.constant 0 : i32
    return %arg1, %arg0, %c0_i32 : i32, i32, i32
  }
  func.func @transform_5(%arg0: i32, %arg1: i32) -> (i32, i32) {
    %c0_i32 = arith.constant 0 : i32
    %c0_i32_0 = arith.constant 0 : i32
    return %arg0, %c0_i32 : i32, i32
  }
}

module attributes {stable_mosaic.version = 11 : i64} {
  func.func @kernel(%arg0: i32, %arg1: i32, %arg2: memref<1x400x36xbf16, #tpu.memory_space<vmem>>, %arg3: memref<36x4xbf16, #tpu.memory_space<vmem>>, %arg4: memref<1x4xf32, #tpu.memory_space<vmem>>, %arg5: memref<1x4xf32, #tpu.memory_space<vmem>>, %arg6: memref<1x400x4xbf16, #tpu.memory_space<vmem>>, %arg7: memref<400x4xf32, #tpu.memory_space<vmem>>, %arg8: memref<400x4xf32, #tpu.memory_space<vmem>>) attributes {dimension_semantics = [#tpu.dimension_semantics<parallel>, #tpu.dimension_semantics<arbitrary>], iteration_bounds = array<i64: 1, 4>, scalar_prefetch = 0 : i64, scratch_operands = 1 : i64, tpu.core_type = #tpu.core_type<tc>, window_params = [{transform_indices = @transform_0, window_bounds = array<i64: 1, 400, 36>}, {pipeline_mode = #tpu.pipeline_mode<synchronous>, transform_indices = @transform_1, window_bounds = array<i64: 36, 4>}, {pipeline_mode = #tpu.pipeline_mode<synchronous>, transform_indices = @transform_2, window_bounds = array<i64: 1, 4>}, {pipeline_mode = #tpu.pipeline_mode<synchronous>, transform_indices = @transform_3, window_bounds = array<i64: 1, 4>}, {transform_indices = @transform_4, window_bounds = array<i64: 1, 400, 4>}, {transform_indices = @transform_5, window_bounds = array<i64: 400, 4>}]} {
    %c0_i32 = arith.constant 0 : i32
    %0 = arith.cmpi eq, %arg1, %c0_i32 : i32
    %1 = arith.extui %0 : i1 to i32
    %c0_i32_0 = arith.constant 0 : i32
    %2 = arith.cmpi ne, %1, %c0_i32_0 : i32
    scf.if %2 {
      %cst_23 = arith.constant 0.000000e+00 : f32
      %33 = vector.broadcast %cst_23 : f32 to vector<400x4xf32>
      %c0_24 = arith.constant 0 : index
      %c0_25 = arith.constant 0 : index
      %34 = vector.load %arg8[%c0_24, %c0_25] : memref<400x4xf32, #tpu.memory_space<vmem>>, vector<400x4xf32>
      tpu.vector_store %arg8[%c0_24, %c0_25], %33 {strides = array<i32>} : memref<400x4xf32, #tpu.memory_space<vmem>>, vector<400x4xf32>,
      %cst_26 = arith.constant 0.000000e+00 : f32
      %35 = vector.broadcast %cst_26 : f32 to vector<400x4xf32>
      %c0_27 = arith.constant 0 : index
      %c0_28 = arith.constant 0 : index
      %36 = vector.load %arg7[%c0_27, %c0_28] : memref<400x4xf32, #tpu.memory_space<vmem>>, vector<400x4xf32>
      tpu.vector_store %arg7[%c0_27, %c0_28], %35 {strides = array<i32>} : memref<400x4xf32, #tpu.memory_space<vmem>>, vector<400x4xf32>,
    } else {
    }
    %c0 = arith.constant 0 : index
    %c0_1 = arith.constant 0 : index
    %c0_2 = arith.constant 0 : index
    %3 = vector.load %arg2[%c0, %c0_1, %c0_2] : memref<1x400x36xbf16, #tpu.memory_space<vmem>>, vector<1x400x36xbf16>
    %4 = vector.shape_cast %3 : vector<1x400x36xbf16> to vector<400x36xbf16>
    %c0_3 = arith.constant 0 : index
    %c0_4 = arith.constant 0 : index
    %5 = vector.load %arg3[%c0_3, %c0_4] : memref<36x4xbf16, #tpu.memory_space<vmem>>, vector<36x4xbf16>
    %cst = arith.constant dense<0.000000e+00> : vector<400x4xf32>
    %6 = tpu.matmul %4, %5, %cst {dimension_numbers = #tpu.dot_dimension_numbers<[1], [0], [0], [1], [0, 0, 1, 1], [], []>} : vector<400x36xbf16>, vector<36x4xbf16>, vector<400x4xf32> -> vector<400x4xf32>
    %c0_5 = arith.constant 0 : index
    %c0_6 = arith.constant 0 : index
    %7 = vector.load %arg4[%c0_5, %c0_6] : memref<1x4xf32, #tpu.memory_space<vmem>>, vector<1x4xf32>
    %8 = vector.broadcast %7 : vector<1x4xf32> to vector<400x4xf32>
    %9 = arith.mulf %6, %8 : vector<400x4xf32>
    %c0_7 = arith.constant 0 : index
    %c0_8 = arith.constant 0 : index
    %10 = vector.load %arg5[%c0_7, %c0_8] : memref<1x4xf32, #tpu.memory_space<vmem>>, vector<1x4xf32>
    %11 = vector.broadcast %10 : vector<1x4xf32> to vector<400x4xf32>
    %12 = arith.addf %9, %11 : vector<400x4xf32>
    %c0_9 = arith.constant 0 : index
    %c0_10 = arith.constant 0 : index
    %13 = vector.load %arg8[%c0_9, %c0_10] : memref<400x4xf32, #tpu.memory_space<vmem>>, vector<400x4xf32>
    %14 = arith.addf %13, %12 : vector<400x4xf32>
    %cst_11 = arith.constant 1.000000e+00 : f32
    %15 = vector.broadcast %cst_11 : f32 to vector<400x4xf32>
    %16 = arith.cmpf oge, %14, %15 : vector<400x4xf32>
    %17 = arith.extui %16 : vector<400x4xi1> to vector<400x4xi32>
    %18 = arith.sitofp %17 : vector<400x4xi32> to vector<400x4xf32>
    %cst_12 = arith.constant 1.000000e+00 : f32
    %19 = vector.broadcast %cst_12 : f32 to vector<400x4xf32>
    %20 = arith.subf %19, %18 : vector<400x4xf32>
    %21 = arith.mulf %14, %20 : vector<400x4xf32>
    %c0_13 = arith.constant 0 : index
    %c0_14 = arith.constant 0 : index
    %22 = vector.load %arg8[%c0_13, %c0_14] : memref<400x4xf32, #tpu.memory_space<vmem>>, vector<400x4xf32>
    tpu.vector_store %arg8[%c0_13, %c0_14], %21 {strides = array<i32>} : memref<400x4xf32, #tpu.memory_space<vmem>>, vector<400x4xf32>,
    %23 = arith.truncf %18 : vector<400x4xf32> to vector<400x4xbf16>
    %c0_15 = arith.constant 0 : index
    %c0_16 = arith.constant 0 : index
    %c0_17 = arith.constant 0 : index
    %24 = vector.load %arg6[%c0_15, %c0_16, %c0_17] : memref<1x400x4xbf16, #tpu.memory_space<vmem>>, vector<1x400x4xbf16>
    %25 = vector.shape_cast %24 : vector<1x400x4xbf16> to vector<400x4xbf16>
    %26 = vector.shape_cast %23 : vector<400x4xbf16> to vector<1x400x4xbf16>
    tpu.vector_store %arg6[%c0_15, %c0_16, %c0_17], %26 {strides = array<i32>} : memref<1x400x4xbf16, #tpu.memory_space<vmem>>, vector<1x400x4xbf16>,
    %c0_18 = arith.constant 0 : index
    %c0_19 = arith.constant 0 : index
    %27 = vector.load %arg7[%c0_18, %c0_19] : memref<400x4xf32, #tpu.memory_space<vmem>>, vector<400x4xf32>
    %28 = arith.addf %27, %18 : vector<400x4xf32>
    %c0_20 = arith.constant 0 : index
    %c0_21 = arith.constant 0 : index
    %29 = vector.load %arg7[%c0_20, %c0_21] : memref<400x4xf32, #tpu.memory_space<vmem>>, vector<400x4xf32>
    tpu.vector_store %arg7[%c0_20, %c0_21], %28 {strides = array<i32>} : memref<400x4xf32, #tpu.memory_space<vmem>>, vector<400x4xf32>,
    %c3_i32 = arith.constant 3 : i32
    %30 = arith.cmpi eq, %arg1, %c3_i32 : i32
    %31 = arith.extui %30 : i1 to i32
    %c0_i32_22 = arith.constant 0 : i32
    %32 = arith.cmpi ne, %31, %c0_i32_22 : i32
    scf.if %32 {
      %c0_23 = arith.constant 0 : index
      %c0_24 = arith.constant 0 : index
      %33 = vector.load %arg7[%c0_23, %c0_24] : memref<400x4xf32, #tpu.memory_space<vmem>>, vector<400x4xf32>
      %cst_25 = arith.constant 2.500000e-01 : f32
      %34 = vector.broadcast %cst_25 : f32 to vector<400x4xf32>
      %35 = arith.mulf %33, %34 : vector<400x4xf32>
      %c0_26 = arith.constant 0 : index
      %c0_27 = arith.constant 0 : index
      %36 = vector.load %arg7[%c0_26, %c0_27] : memref<400x4xf32, #tpu.memory_space<vmem>>, vector<400x4xf32>
      tpu.vector_store %arg7[%c0_26, %c0_27], %35 {strides = array<i32>} : memref<400x4xf32, #tpu.memory_space<vmem>>, vector<400x4xf32>,
    } else {
    }
    return
  }
  func.func @transform_0(%arg0: i32, %arg1: i32) -> (i32, i32, i32) {
    %c0_i32 = arith.constant 0 : i32
    %c0_i32_0 = arith.constant 0 : i32
    return %arg1, %arg0, %c0_i32 : i32, i32, i32
  }
  func.func @transform_1(%arg0: i32, %arg1: i32) -> (i32, i32) {
    %c0_i32 = arith.constant 0 : i32
    %c0_i32_0 = arith.constant 0 : i32
    %c0_i32_1 = arith.constant 0 : i32
    return %c0_i32, %c0_i32_0 : i32, i32
  }
  func.func @transform_2(%arg0: i32, %arg1: i32) -> (i32, i32) {
    %c0_i32 = arith.constant 0 : i32
    %c0_i32_0 = arith.constant 0 : i32
    %c0_i32_1 = arith.constant 0 : i32
    return %c0_i32, %c0_i32_0 : i32, i32
  }
  func.func @transform_3(%arg0: i32, %arg1: i32) -> (i32, i32) {
    %c0_i32 = arith.constant 0 : i32
    %c0_i32_0 = arith.constant 0 : i32
    %c0_i32_1 = arith.constant 0 : i32
    return %c0_i32, %c0_i32_0 : i32, i32
  }
  func.func @transform_4(%arg0: i32, %arg1: i32) -> (i32, i32, i32) {
    %c0_i32 = arith.constant 0 : i32
    %c0_i32_0 = arith.constant 0 : i32
    return %arg1, %arg0, %c0_i32 : i32, i32, i32
  }
  func.func @transform_5(%arg0: i32, %arg1: i32) -> (i32, i32) {
    %c0_i32 = arith.constant 0 : i32
    %c0_i32_0 = arith.constant 0 : i32
    return %arg0, %c0_i32 : i32, i32
  }
}

module attributes {stable_mosaic.version = 11 : i64} {
  func.func @kernel(%arg0: i32, %arg1: i32, %arg2: memref<1x16x196xbf16, #tpu.memory_space<vmem>>, %arg3: memref<196x128xbf16, #tpu.memory_space<vmem>>, %arg4: memref<1x128xf32, #tpu.memory_space<vmem>>, %arg5: memref<1x128xf32, #tpu.memory_space<vmem>>, %arg6: memref<1x16x128xbf16, #tpu.memory_space<vmem>>, %arg7: memref<16x128xf32, #tpu.memory_space<vmem>>, %arg8: memref<16x128xf32, #tpu.memory_space<vmem>>) attributes {dimension_semantics = [#tpu.dimension_semantics<parallel>, #tpu.dimension_semantics<arbitrary>], iteration_bounds = array<i64: 1, 4>, scalar_prefetch = 0 : i64, scratch_operands = 1 : i64, tpu.core_type = #tpu.core_type<tc>, window_params = [{transform_indices = @transform_0, window_bounds = array<i64: 1, 16, 196>}, {pipeline_mode = #tpu.pipeline_mode<synchronous>, transform_indices = @transform_1, window_bounds = array<i64: 196, 128>}, {pipeline_mode = #tpu.pipeline_mode<synchronous>, transform_indices = @transform_2, window_bounds = array<i64: 1, 128>}, {pipeline_mode = #tpu.pipeline_mode<synchronous>, transform_indices = @transform_3, window_bounds = array<i64: 1, 128>}, {transform_indices = @transform_4, window_bounds = array<i64: 1, 16, 128>}, {transform_indices = @transform_5, window_bounds = array<i64: 16, 128>}]} {
    %c0_i32 = arith.constant 0 : i32
    %0 = arith.cmpi eq, %arg1, %c0_i32 : i32
    %1 = arith.extui %0 : i1 to i32
    %c0_i32_0 = arith.constant 0 : i32
    %2 = arith.cmpi ne, %1, %c0_i32_0 : i32
    scf.if %2 {
      %cst_23 = arith.constant 0.000000e+00 : f32
      %33 = vector.broadcast %cst_23 : f32 to vector<16x128xf32>
      %c0_24 = arith.constant 0 : index
      %c0_25 = arith.constant 0 : index
      %34 = vector.load %arg8[%c0_24, %c0_25] : memref<16x128xf32, #tpu.memory_space<vmem>>, vector<16x128xf32>
      tpu.vector_store %arg8[%c0_24, %c0_25], %33 {strides = array<i32>} : memref<16x128xf32, #tpu.memory_space<vmem>>, vector<16x128xf32>,
      %cst_26 = arith.constant 0.000000e+00 : f32
      %35 = vector.broadcast %cst_26 : f32 to vector<16x128xf32>
      %c0_27 = arith.constant 0 : index
      %c0_28 = arith.constant 0 : index
      %36 = vector.load %arg7[%c0_27, %c0_28] : memref<16x128xf32, #tpu.memory_space<vmem>>, vector<16x128xf32>
      tpu.vector_store %arg7[%c0_27, %c0_28], %35 {strides = array<i32>} : memref<16x128xf32, #tpu.memory_space<vmem>>, vector<16x128xf32>,
    } else {
    }
    %c0 = arith.constant 0 : index
    %c0_1 = arith.constant 0 : index
    %c0_2 = arith.constant 0 : index
    %3 = vector.load %arg2[%c0, %c0_1, %c0_2] : memref<1x16x196xbf16, #tpu.memory_space<vmem>>, vector<1x16x196xbf16>
    %4 = vector.shape_cast %3 : vector<1x16x196xbf16> to vector<16x196xbf16>
    %c0_3 = arith.constant 0 : index
    %c0_4 = arith.constant 0 : index
    %5 = vector.load %arg3[%c0_3, %c0_4] : memref<196x128xbf16, #tpu.memory_space<vmem>>, vector<196x128xbf16>
    %cst = arith.constant dense<0.000000e+00> : vector<16x128xf32>
    %6 = tpu.matmul %4, %5, %cst {dimension_numbers = #tpu.dot_dimension_numbers<[1], [0], [0], [1], [0, 0, 1, 1], [], []>} : vector<16x196xbf16>, vector<196x128xbf16>, vector<16x128xf32> -> vector<16x128xf32>
    %c0_5 = arith.constant 0 : index
    %c0_6 = arith.constant 0 : index
    %7 = vector.load %arg4[%c0_5, %c0_6] : memref<1x128xf32, #tpu.memory_space<vmem>>, vector<1x128xf32>
    %8 = vector.broadcast %7 : vector<1x128xf32> to vector<16x128xf32>
    %9 = arith.mulf %6, %8 : vector<16x128xf32>
    %c0_7 = arith.constant 0 : index
    %c0_8 = arith.constant 0 : index
    %10 = vector.load %arg5[%c0_7, %c0_8] : memref<1x128xf32, #tpu.memory_space<vmem>>, vector<1x128xf32>
    %11 = vector.broadcast %10 : vector<1x128xf32> to vector<16x128xf32>
    %12 = arith.addf %9, %11 : vector<16x128xf32>
    %c0_9 = arith.constant 0 : index
    %c0_10 = arith.constant 0 : index
    %13 = vector.load %arg8[%c0_9, %c0_10] : memref<16x128xf32, #tpu.memory_space<vmem>>, vector<16x128xf32>
    %14 = arith.addf %13, %12 : vector<16x128xf32>
    %cst_11 = arith.constant 1.000000e+00 : f32
    %15 = vector.broadcast %cst_11 : f32 to vector<16x128xf32>
    %16 = arith.cmpf oge, %14, %15 : vector<16x128xf32>
    %17 = arith.extui %16 : vector<16x128xi1> to vector<16x128xi32>
    %18 = arith.sitofp %17 : vector<16x128xi32> to vector<16x128xf32>
    %cst_12 = arith.constant 1.000000e+00 : f32
    %19 = vector.broadcast %cst_12 : f32 to vector<16x128xf32>
    %20 = arith.subf %19, %18 : vector<16x128xf32>
    %21 = arith.mulf %14, %20 : vector<16x128xf32>
    %c0_13 = arith.constant 0 : index
    %c0_14 = arith.constant 0 : index
    %22 = vector.load %arg8[%c0_13, %c0_14] : memref<16x128xf32, #tpu.memory_space<vmem>>, vector<16x128xf32>
    tpu.vector_store %arg8[%c0_13, %c0_14], %21 {strides = array<i32>} : memref<16x128xf32, #tpu.memory_space<vmem>>, vector<16x128xf32>,
    %23 = arith.truncf %18 : vector<16x128xf32> to vector<16x128xbf16>
    %c0_15 = arith.constant 0 : index
    %c0_16 = arith.constant 0 : index
    %c0_17 = arith.constant 0 : index
    %24 = vector.load %arg6[%c0_15, %c0_16, %c0_17] : memref<1x16x128xbf16, #tpu.memory_space<vmem>>, vector<1x16x128xbf16>
    %25 = vector.shape_cast %24 : vector<1x16x128xbf16> to vector<16x128xbf16>
    %26 = vector.shape_cast %23 : vector<16x128xbf16> to vector<1x16x128xbf16>
    tpu.vector_store %arg6[%c0_15, %c0_16, %c0_17], %26 {strides = array<i32>} : memref<1x16x128xbf16, #tpu.memory_space<vmem>>, vector<1x16x128xbf16>,
    %c0_18 = arith.constant 0 : index
    %c0_19 = arith.constant 0 : index
    %27 = vector.load %arg7[%c0_18, %c0_19] : memref<16x128xf32, #tpu.memory_space<vmem>>, vector<16x128xf32>
    %28 = arith.addf %27, %18 : vector<16x128xf32>
    %c0_20 = arith.constant 0 : index
    %c0_21 = arith.constant 0 : index
    %29 = vector.load %arg7[%c0_20, %c0_21] : memref<16x128xf32, #tpu.memory_space<vmem>>, vector<16x128xf32>
    tpu.vector_store %arg7[%c0_20, %c0_21], %28 {strides = array<i32>} : memref<16x128xf32, #tpu.memory_space<vmem>>, vector<16x128xf32>,
    %c3_i32 = arith.constant 3 : i32
    %30 = arith.cmpi eq, %arg1, %c3_i32 : i32
    %31 = arith.extui %30 : i1 to i32
    %c0_i32_22 = arith.constant 0 : i32
    %32 = arith.cmpi ne, %31, %c0_i32_22 : i32
    scf.if %32 {
      %c0_23 = arith.constant 0 : index
      %c0_24 = arith.constant 0 : index
      %33 = vector.load %arg7[%c0_23, %c0_24] : memref<16x128xf32, #tpu.memory_space<vmem>>, vector<16x128xf32>
      %cst_25 = arith.constant 2.500000e-01 : f32
      %34 = vector.broadcast %cst_25 : f32 to vector<16x128xf32>
      %35 = arith.mulf %33, %34 : vector<16x128xf32>
      %c0_26 = arith.constant 0 : index
      %c0_27 = arith.constant 0 : index
      %36 = vector.load %arg7[%c0_26, %c0_27] : memref<16x128xf32, #tpu.memory_space<vmem>>, vector<16x128xf32>
      tpu.vector_store %arg7[%c0_26, %c0_27], %35 {strides = array<i32>} : memref<16x128xf32, #tpu.memory_space<vmem>>, vector<16x128xf32>,
    } else {
    }
    return
  }
  func.func @transform_0(%arg0: i32, %arg1: i32) -> (i32, i32, i32) {
    %c0_i32 = arith.constant 0 : i32
    %c0_i32_0 = arith.constant 0 : i32
    return %arg1, %arg0, %c0_i32 : i32, i32, i32
  }
  func.func @transform_1(%arg0: i32, %arg1: i32) -> (i32, i32) {
    %c0_i32 = arith.constant 0 : i32
    %c0_i32_0 = arith.constant 0 : i32
    %c0_i32_1 = arith.constant 0 : i32
    return %c0_i32, %c0_i32_0 : i32, i32
  }
  func.func @transform_2(%arg0: i32, %arg1: i32) -> (i32, i32) {
    %c0_i32 = arith.constant 0 : i32
    %c0_i32_0 = arith.constant 0 : i32
    %c0_i32_1 = arith.constant 0 : i32
    return %c0_i32, %c0_i32_0 : i32, i32
  }
  func.func @transform_3(%arg0: i32, %arg1: i32) -> (i32, i32) {
    %c0_i32 = arith.constant 0 : i32
    %c0_i32_0 = arith.constant 0 : i32
    %c0_i32_1 = arith.constant 0 : i32
    return %c0_i32, %c0_i32_0 : i32, i32
  }
  func.func @transform_4(%arg0: i32, %arg1: i32) -> (i32, i32, i32) {
    %c0_i32 = arith.constant 0 : i32
    %c0_i32_0 = arith.constant 0 : i32
    return %arg1, %arg0, %c0_i32 : i32, i32, i32
  }
  func.func @transform_5(%arg0: i32, %arg1: i32) -> (i32, i32) {
    %c0_i32 = arith.constant 0 : i32
    %c0_i32_0 = arith.constant 0 : i32
    return %arg0, %c0_i32 : i32, i32
  }
}

module attributes {stable_mosaic.version = 11 : i64} {
  func.func @kernel(%arg0: i32, %arg1: i32, %arg2: memref<1x16x128xbf16, #tpu.memory_space<vmem>>, %arg3: memref<128x128xbf16, #tpu.memory_space<vmem>>, %arg4: memref<1x128xf32, #tpu.memory_space<vmem>>, %arg5: memref<1x128xf32, #tpu.memory_space<vmem>>, %arg6: memref<1x16x128xbf16, #tpu.memory_space<vmem>>, %arg7: memref<16x128xf32, #tpu.memory_space<vmem>>, %arg8: memref<16x128xf32, #tpu.memory_space<vmem>>) attributes {dimension_semantics = [#tpu.dimension_semantics<parallel>, #tpu.dimension_semantics<arbitrary>], iteration_bounds = array<i64: 1, 4>, scalar_prefetch = 0 : i64, scratch_operands = 1 : i64, tpu.core_type = #tpu.core_type<tc>, window_params = [{transform_indices = @transform_0, window_bounds = array<i64: 1, 16, 128>}, {pipeline_mode = #tpu.pipeline_mode<synchronous>, transform_indices = @transform_1, window_bounds = array<i64: 128, 128>}, {pipeline_mode = #tpu.pipeline_mode<synchronous>, transform_indices = @transform_2, window_bounds = array<i64: 1, 128>}, {pipeline_mode = #tpu.pipeline_mode<synchronous>, transform_indices = @transform_3, window_bounds = array<i64: 1, 128>}, {transform_indices = @transform_4, window_bounds = array<i64: 1, 16, 128>}, {transform_indices = @transform_5, window_bounds = array<i64: 16, 128>}]} {
    %c0_i32 = arith.constant 0 : i32
    %0 = arith.cmpi eq, %arg1, %c0_i32 : i32
    %1 = arith.extui %0 : i1 to i32
    %c0_i32_0 = arith.constant 0 : i32
    %2 = arith.cmpi ne, %1, %c0_i32_0 : i32
    scf.if %2 {
      %cst_23 = arith.constant 0.000000e+00 : f32
      %33 = vector.broadcast %cst_23 : f32 to vector<16x128xf32>
      %c0_24 = arith.constant 0 : index
      %c0_25 = arith.constant 0 : index
      %34 = vector.load %arg8[%c0_24, %c0_25] : memref<16x128xf32, #tpu.memory_space<vmem>>, vector<16x128xf32>
      tpu.vector_store %arg8[%c0_24, %c0_25], %33 {strides = array<i32>} : memref<16x128xf32, #tpu.memory_space<vmem>>, vector<16x128xf32>,
      %cst_26 = arith.constant 0.000000e+00 : f32
      %35 = vector.broadcast %cst_26 : f32 to vector<16x128xf32>
      %c0_27 = arith.constant 0 : index
      %c0_28 = arith.constant 0 : index
      %36 = vector.load %arg7[%c0_27, %c0_28] : memref<16x128xf32, #tpu.memory_space<vmem>>, vector<16x128xf32>
      tpu.vector_store %arg7[%c0_27, %c0_28], %35 {strides = array<i32>} : memref<16x128xf32, #tpu.memory_space<vmem>>, vector<16x128xf32>,
    } else {
    }
    %c0 = arith.constant 0 : index
    %c0_1 = arith.constant 0 : index
    %c0_2 = arith.constant 0 : index
    %3 = vector.load %arg2[%c0, %c0_1, %c0_2] : memref<1x16x128xbf16, #tpu.memory_space<vmem>>, vector<1x16x128xbf16>
    %4 = vector.shape_cast %3 : vector<1x16x128xbf16> to vector<16x128xbf16>
    %c0_3 = arith.constant 0 : index
    %c0_4 = arith.constant 0 : index
    %5 = vector.load %arg3[%c0_3, %c0_4] : memref<128x128xbf16, #tpu.memory_space<vmem>>, vector<128x128xbf16>
    %cst = arith.constant dense<0.000000e+00> : vector<16x128xf32>
    %6 = tpu.matmul %4, %5, %cst {dimension_numbers = #tpu.dot_dimension_numbers<[1], [0], [0], [1], [0, 0, 1, 1], [], []>} : vector<16x128xbf16>, vector<128x128xbf16>, vector<16x128xf32> -> vector<16x128xf32>
    %c0_5 = arith.constant 0 : index
    %c0_6 = arith.constant 0 : index
    %7 = vector.load %arg4[%c0_5, %c0_6] : memref<1x128xf32, #tpu.memory_space<vmem>>, vector<1x128xf32>
    %8 = vector.broadcast %7 : vector<1x128xf32> to vector<16x128xf32>
    %9 = arith.mulf %6, %8 : vector<16x128xf32>
    %c0_7 = arith.constant 0 : index
    %c0_8 = arith.constant 0 : index
    %10 = vector.load %arg5[%c0_7, %c0_8] : memref<1x128xf32, #tpu.memory_space<vmem>>, vector<1x128xf32>
    %11 = vector.broadcast %10 : vector<1x128xf32> to vector<16x128xf32>
    %12 = arith.addf %9, %11 : vector<16x128xf32>
    %c0_9 = arith.constant 0 : index
    %c0_10 = arith.constant 0 : index
    %13 = vector.load %arg8[%c0_9, %c0_10] : memref<16x128xf32, #tpu.memory_space<vmem>>, vector<16x128xf32>
    %14 = arith.addf %13, %12 : vector<16x128xf32>
    %cst_11 = arith.constant 1.000000e+00 : f32
    %15 = vector.broadcast %cst_11 : f32 to vector<16x128xf32>
    %16 = arith.cmpf oge, %14, %15 : vector<16x128xf32>
    %17 = arith.extui %16 : vector<16x128xi1> to vector<16x128xi32>
    %18 = arith.sitofp %17 : vector<16x128xi32> to vector<16x128xf32>
    %cst_12 = arith.constant 1.000000e+00 : f32
    %19 = vector.broadcast %cst_12 : f32 to vector<16x128xf32>
    %20 = arith.subf %19, %18 : vector<16x128xf32>
    %21 = arith.mulf %14, %20 : vector<16x128xf32>
    %c0_13 = arith.constant 0 : index
    %c0_14 = arith.constant 0 : index
    %22 = vector.load %arg8[%c0_13, %c0_14] : memref<16x128xf32, #tpu.memory_space<vmem>>, vector<16x128xf32>
    tpu.vector_store %arg8[%c0_13, %c0_14], %21 {strides = array<i32>} : memref<16x128xf32, #tpu.memory_space<vmem>>, vector<16x128xf32>,
    %23 = arith.truncf %18 : vector<16x128xf32> to vector<16x128xbf16>
    %c0_15 = arith.constant 0 : index
    %c0_16 = arith.constant 0 : index
    %c0_17 = arith.constant 0 : index
    %24 = vector.load %arg6[%c0_15, %c0_16, %c0_17] : memref<1x16x128xbf16, #tpu.memory_space<vmem>>, vector<1x16x128xbf16>
    %25 = vector.shape_cast %24 : vector<1x16x128xbf16> to vector<16x128xbf16>
    %26 = vector.shape_cast %23 : vector<16x128xbf16> to vector<1x16x128xbf16>
    tpu.vector_store %arg6[%c0_15, %c0_16, %c0_17], %26 {strides = array<i32>} : memref<1x16x128xbf16, #tpu.memory_space<vmem>>, vector<1x16x128xbf16>,
    %c0_18 = arith.constant 0 : index
    %c0_19 = arith.constant 0 : index
    %27 = vector.load %arg7[%c0_18, %c0_19] : memref<16x128xf32, #tpu.memory_space<vmem>>, vector<16x128xf32>
    %28 = arith.addf %27, %18 : vector<16x128xf32>
    %c0_20 = arith.constant 0 : index
    %c0_21 = arith.constant 0 : index
    %29 = vector.load %arg7[%c0_20, %c0_21] : memref<16x128xf32, #tpu.memory_space<vmem>>, vector<16x128xf32>
    tpu.vector_store %arg7[%c0_20, %c0_21], %28 {strides = array<i32>} : memref<16x128xf32, #tpu.memory_space<vmem>>, vector<16x128xf32>,
    %c3_i32 = arith.constant 3 : i32
    %30 = arith.cmpi eq, %arg1, %c3_i32 : i32
    %31 = arith.extui %30 : i1 to i32
    %c0_i32_22 = arith.constant 0 : i32
    %32 = arith.cmpi ne, %31, %c0_i32_22 : i32
    scf.if %32 {
      %c0_23 = arith.constant 0 : index
      %c0_24 = arith.constant 0 : index
      %33 = vector.load %arg7[%c0_23, %c0_24] : memref<16x128xf32, #tpu.memory_space<vmem>>, vector<16x128xf32>
      %cst_25 = arith.constant 2.500000e-01 : f32
      %34 = vector.broadcast %cst_25 : f32 to vector<16x128xf32>
      %35 = arith.mulf %33, %34 : vector<16x128xf32>
      %c0_26 = arith.constant 0 : index
      %c0_27 = arith.constant 0 : index
      %36 = vector.load %arg7[%c0_26, %c0_27] : memref<16x128xf32, #tpu.memory_space<vmem>>, vector<16x128xf32>
      tpu.vector_store %arg7[%c0_26, %c0_27], %35 {strides = array<i32>} : memref<16x128xf32, #tpu.memory_space<vmem>>, vector<16x128xf32>,
    } else {
    }
    return
  }
  func.func @transform_0(%arg0: i32, %arg1: i32) -> (i32, i32, i32) {
    %c0_i32 = arith.constant 0 : i32
    %c0_i32_0 = arith.constant 0 : i32
    return %arg1, %arg0, %c0_i32 : i32, i32, i32
  }
  func.func @transform_1(%arg0: i32, %arg1: i32) -> (i32, i32) {
    %c0_i32 = arith.constant 0 : i32
    %c0_i32_0 = arith.constant 0 : i32
    %c0_i32_1 = arith.constant 0 : i32
    return %c0_i32, %c0_i32_0 : i32, i32
  }
  func.func @transform_2(%arg0: i32, %arg1: i32) -> (i32, i32) {
    %c0_i32 = arith.constant 0 : i32
    %c0_i32_0 = arith.constant 0 : i32
    %c0_i32_1 = arith.constant 0 : i32
    return %c0_i32, %c0_i32_0 : i32, i32
  }
  func.func @transform_3(%arg0: i32, %arg1: i32) -> (i32, i32) {
    %c0_i32 = arith.constant 0 : i32
    %c0_i32_0 = arith.constant 0 : i32
    %c0_i32_1 = arith.constant 0 : i32
    return %c0_i32, %c0_i32_0 : i32, i32
  }
  func.func @transform_4(%arg0: i32, %arg1: i32) -> (i32, i32, i32) {
    %c0_i32 = arith.constant 0 : i32
    %c0_i32_0 = arith.constant 0 : i32
    return %arg1, %arg0, %c0_i32 : i32, i32, i32
  }
  func.func @transform_5(%arg0: i32, %arg1: i32) -> (i32, i32) {
    %c0_i32 = arith.constant 0 : i32
    %c0_i32_0 = arith.constant 0 : i32
    return %arg0, %c0_i32 : i32, i32
  }
}

</mosaic_0001>

<bundles_post_ra>
// kernel: csnn_forward.4
= control target key start
LH: loop header
LB: loop body
LE: loop exit
PB: predicated region body
PF: predicated region fallthrough
CT: control target
= control target key end

     0   :  { %11 = vsyncpa [#allocation5], 0  ;;  %s7437_s0 = inlined_call_operand.vmem [shape: bf16[1568,9], index: 0, kind: input, shape index: {}]   ;;  %s7438_s1 = inlined_call_operand.vmem [shape: bf16[9,4], index: 1, kind: input, shape index: {}]   ;;  %s7439_s2 = inlined_call_operand.vmem [shape: f32[1,4], index: 2, kind: input, shape index: {}]   ;;  %s7440_s3 = inlined_call_operand.vmem [shape: f32[1,4], index: 3, kind: input, shape index: {}]   ;;  %s7441_s4 = inlined_call_operand.vmem [shape: bf16[4,1568,4], index: 4, kind: output, shape index: {0}]   ;;  %s7442_s5 = inlined_call_operand.hbm [shape: f32[1568,4], index: 5, kind: output, shape index: {1}]  }
   0x1   :  { %13 = vsyncpa [#allocation5 + $0x1], 0  ;;  %s4723_s18 = smov 0   ;;  %s4725_s19 = smov 0  }
   0x2   :  { %s4727_s20 = smov 0   ;;  %s4729_s21 = smov 0  }
   0x3   :  { %s4731_s22 = smov 0   ;;  %s4733_s23 = smov 0  }
   0x4   :  { %s4735_s24 = smov 0   ;;  %s4737_s25 = smov 0  }
   0x5 LB: > { %7566 = sst [smem:[#allocation7_spill]] %s4680_s24  ;;  %s3805_s26 = sadd.s32 4294967295, %s4684_s25   ;;  %s4684_s25 = sphi %s4737_s25, %s19_s25   ;;  %s4680_s24 = sphi %s4735_s24, %s7760_s24   ;;  %s4676_s23 = sphi %s4733_s23, %s7765_s23   ;;  %s4672_s22 = sphi %s4731_s22, %s7758_s22   ;;  %s4668_s21 = sphi %s4729_s21, %s7764_s21   ;;  %s4664_s20 = sphi %s4727_s20, %s7763_s20   ;;  %s4660_s19 = sphi %s4725_s19, %s7762_s19   ;;  %s4656_s18 = sphi %s4723_s18, %s7761_s18  }
   0x6   : > { %s3806_s27 = sadd.s32 4294967294, %s4684_s25   ;;  %s28_s28 = sadd.s32 1, %s4676_s23 }
   0x7   : > { %p29_p0 = scmp.ge.s32.totalorder %s28_s28, 4  ;;  %s31_s29 = sadd.s32 1, %s4680_s24 }
   0x8   : > { %p165_p1 = scmp.ne.s32.totalorder %s4664_s20, %s4660_s19  ;;  %p166_p2 = scmp.eq.s32.totalorder %s3805_s26, 7 }
   0x9   : > { %s7767_s28 = smov (%p29_p0, %s28_s28), 0  ;;  %s7769_s29 = smov (!%p29_p0, %s31_s29), %s4680_s24 }
   0xa   : > { %7567 = sst [smem:[#allocation8_spill]] %s7767_s28  ;;  %p4772_p3 = por %p166_p2, %p165_p1 }
   0xb   : > { %p171_p4 = scmp.ne.s32.totalorder %s4660_s19, %s4656_s18  ;;  %p33_p5 = scmp.ge.s32.totalorder %s7769_s29, 2 }
   0xc   : > { %p172_p6 = scmp.eq.s32.totalorder %s3806_s27, 7  ;;  %p3809_p7 = scmp.ge.s32.totalorder %s4684_s25, 1 }
   0xd   : > { %p208_p8 = scmp.lt.s32.totalorder %s4684_s25, 9  ;;  %s7771_s29 = smov (%p33_p5, %s7769_s29), 0 }
   0xe   : > { %7569 = sst [smem:[#allocation9_spill]] %s7771_s29  ;;  %p4782_p9 = por %p172_p6, %p171_p4 }
   0xf   : > { %p209_p10 = pnand %p3809_p7, %p208_p8  ;;  %s152_s7 = ssub.s32 %s4680_s24, %s7771_s29 }
  0x10   : > { %s155_s8 = sadd.s32 1, %s4664_s20  ;;  %p153_p11 = scmp.eq.s32.totalorder %s152_s7, 0 }
  0x11   : > { %212 = sbr.rel (%p209_p10) target bundleno = 751 (0x2ef), region = 36 }
  0x12   : > { %s4790_s9 = scalar_select %p153_p11, %s4664_s20, %s155_s8  }
  0x16   : > { %s242_s10 = sand.u32 1, %s4660_s19   ;;  %s245_s11 = smul.u32 98, %s4672_s22 }
  0x17   : > { %s4463_s12 = smul.u32 784, %s242_s10  ;;  %p252_p12 = scmp.lt.s32.totalorder %s4668_s21, 3 }
  0x18   : > { %p246_p13 = scmp.lt.s32.totalorder %s245_s11, 195  ;;  %p3812_p0 = scmp.ne.s32.totalorder %s4668_s21, 0 }
  0x19   : > { %s253_s13 = scalar_select %p252_p12, %s4668_s21, 3 }
  0x1a   : > { %s7773_s11 = smov (!%p246_p13, %s245_s11), 195  ;;  %s4808_s24 = scalar_lea.vmem [#allocation4], %s4463_s12 }
  0x1b   : > { %s3810_s14 = sshll.u32 %s7773_s11, 2  ;;  %s4464_s26 = smul.u32 196, %s253_s13 }
  0x1c   : > { %s4801_s17 = scalar_lea.vmem %s7437_s0, %s3810_s14  ;;  %266 = sbr.rel (%p3812_p0) target bundleno = 435 (0x1b3), region = 40 }
  0x1d   : > { %s257_s27 = sadd.s32 %s4464_s26, %s7773_s11 }
  0x1e   : > { %s3811_s7 = sshll.u32 %s257_s27, 2 }
  0x1f   : > { %s4806_s28 = scalar_lea.vmem %s7441_s4, %s3811_s7 }
  0x21   : > { %vm962_vm0 = vcmask 1043456   ;;  %v4686_v0 = vmov 0.0   ;;  %v4542_v1 = vld [vmem:[%s7438_s1] sm:$0x1f]   ;;  %vm963_vm1 = vcmask 1044480   ;;  %v4687_v2 = vmov 65535  }
  0x22   : > { %4263 = vmatprep.subr.bf16.mxu0 %v4686_v0  ;;  %4461 = vmatprep.subr.bf16.mxu1 %v4686_v0  ;;  %v964_v3 = vsel %vm962_vm0, 4294967295, %v4687_v2  ;;  %vm4688_vm2 = vmmov 0   ;;  %v4543_v6 = vld [vmem:[%s4801_s17] sm:$0xff]   ;;  %v4544_v7 = vld [vmem:[%s4801_s17 + $0xc8] sm:$0xff]   ;;  %vm814_vm3 = vcmask 72704   ;;  %v4546_v9 = vld [vmem:[%s4801_s17 + $0xd0] sm:$0xff]  }
  0x23   : > { %4265 = vmatprep.mubr.msk.bf16.mxu0 %vm4688_vm2, %v4686_v0  ;;  %4365 = vmatprep.mubr.msk.bf16.mxu1 %vm4688_vm2, %v4686_v0  ;;  %v965_v4 = vsel %vm963_vm1, %v964_v3, 0  ;;  %v4545_v8 = vld [vmem:[%s4801_s17 + $0x8] sm:$0xff]   ;;  %v4547_v10 = vld [vmem:[%s4801_s17 + $0x10] sm:$0xff]   ;;  %v4548_v11 = vld [vmem:[%s4801_s17 + $0xd8] sm:$0xff]   ;;  %vm267_vm4 = vcmask 31744  }
  0x24   : > { %v967_v5 = vand.u32 %v4542_v1, %v965_v4  ;;  %v4549_v12 = vld [vmem:[%s4801_s17 + $0x18] sm:$0xff]   ;;  %v4550_v13 = vld [vmem:[%s4801_s17 + $0xe0] sm:$0xff]   ;;  %v4552_v15 = vld [vmem:[%s4801_s17 + $0xe8] sm:$0xff]   ;;  %268 = vst.msk [vmem:[#allocation2] sm:$0xff] %vm267_vm4, %v4686_v0 }
  0x25   : > { %v4551_v14 = vld [vmem:[%s4801_s17 + $0x20] sm:$0xff]   ;;  %v4553_v16 = vld [vmem:[%s4801_s17 + $0x28] sm:$0xff]   ;;  %v4554_v17 = vld [vmem:[%s4801_s17 + $0xf0] sm:$0xff]   ;;  %269 = vst.msk [vmem:[#allocation2 + $0x8] sm:$0xff] %vm267_vm4, %v4686_v0 }
  0x26   : > { %4264 = vmatpush3.bf16.msra.mxu0 %v967_v5  ;;  %4462 = vmatpush3.bf16.msra.mxu1 %v967_v5  ;;  %v4555_v18 = vld [vmem:[%s4801_s17 + $0x30] sm:$0xff]   ;;  %v4556_v19 = vld [vmem:[%s4801_s17 + $0xf8] sm:$0xff]   ;;  %v4558_v21 = vld [vmem:[%s4801_s17 + $0x100] sm:$0xff]   ;;  %270 = vst.msk [vmem:[#allocation2 + $0x10] sm:$0xff] %vm267_vm4, %v4686_v0 }
  0x27   : > { %v4557_v20 = vld [vmem:[%s4801_s17 + $0x38] sm:$0xff]   ;;  %271 = vst.msk [vmem:[#allocation2 + $0x18] sm:$0xff] %vm267_vm4, %v4686_v0  ;;  %272 = vst.msk [vmem:[#allocation2 + $0x20] sm:$0xff] %vm267_vm4, %v4686_v0  ;;  %v4559_v22 = vld [vmem:[%s4801_s17 + $0x40] sm:$0xff]  }
  0x28   : > { %273 = vst.msk [vmem:[#allocation2 + $0x28] sm:$0xff] %vm267_vm4, %v4686_v0  ;;  %274 = vst.msk [vmem:[#allocation2 + $0x30] sm:$0xff] %vm267_vm4, %v4686_v0  ;;  %v4560_v23 = vld [vmem:[%s4801_s17 + $0x108] sm:$0xff]   ;;  %v4562_v25 = vld [vmem:[%s4801_s17 + $0x110] sm:$0xff]  }
  0x29   : > { %4266 = vmatmul.mubr.msk.bf16.vlgmr.msra.gmra.mxu0 %vm814_vm3, %v4543_v6  ;;  %4366 = vmatmul.mubr.msk.bf16.vlgmr.msra.gmra.mxu1 %vm814_vm3, %v4544_v7  ;;  %275 = vst.msk [vmem:[#allocation2 + $0x38] sm:$0xff] %vm267_vm4, %v4686_v0  ;;  %276 = vst.msk [vmem:[#allocation2 + $0x40] sm:$0xff] %vm267_vm4, %v4686_v0  ;;  %v4561_v24 = vld [vmem:[%s4801_s17 + $0x48] sm:$0xff]   ;;  %v4563_v26 = vld [vmem:[%s4801_s17 + $0x50] sm:$0xff]  }
  0x2a   : > { %4269 = vmatprep.mubr.msk.bf16.mxu0 %vm4688_vm2, %v4686_v0  ;;  %4369 = vmatprep.mubr.msk.bf16.mxu1 %vm4688_vm2, %v4686_v0  ;;  %277 = vst.msk [vmem:[#allocation2 + $0x48] sm:$0xff] %vm267_vm4, %v4686_v0  ;;  %278 = vst.msk [vmem:[#allocation2 + $0x50] sm:$0xff] %vm267_vm4, %v4686_v0  ;;  %v4564_v27 = vld [vmem:[%s4801_s17 + $0x118] sm:$0xff]   ;;  %v4566_v29 = vld [vmem:[%s4801_s17 + $0x120] sm:$0xff]  }
  0x2b   : > { %279 = vst.msk [vmem:[#allocation2 + $0x58] sm:$0xff] %vm267_vm4, %v4686_v0  ;;  %280 = vst.msk [vmem:[#allocation2 + $0x60] sm:$0xff] %vm267_vm4, %v4686_v0  ;;  %v4565_v28 = vld [vmem:[%s4801_s17 + $0x58] sm:$0xff]   ;;  %v4567_v30 = vld [vmem:[%s4801_s17 + $0x60] sm:$0xff]  }
  0x2c   : > { %281 = vst.msk [vmem:[#allocation2 + $0x68] sm:$0xff] %vm267_vm4, %v4686_v0  ;;  %282 = vst.msk [vmem:[#allocation2 + $0x70] sm:$0xff] %vm267_vm4, %v4686_v0  ;;  %v4568_v31 = vld [vmem:[%s4801_s17 + $0x128] sm:$0xff]   ;;  %v4570_v33 = vld [vmem:[%s4801_s17 + $0x130] sm:$0xff]  }
  0x2d   : > { %283 = vst.msk [vmem:[#allocation2 + $0x78] sm:$0xff] %vm267_vm4, %v4686_v0  ;;  %284 = vst.msk [vmem:[#allocation2 + $0x80] sm:$0xff] %vm267_vm4, %v4686_v0  ;;  %v4569_v32 = vld [vmem:[%s4801_s17 + $0x68] sm:$0xff]   ;;  %v4571_v34 = vld [vmem:[%s4801_s17 + $0x70] sm:$0xff]  }
  0x2e   : > { %285 = vst.msk [vmem:[#allocation2 + $0x88] sm:$0xff] %vm267_vm4, %v4686_v0  ;;  %286 = vst.msk [vmem:[#allocation2 + $0x90] sm:$0xff] %vm267_vm4, %v4686_v0  ;;  %v4572_v35 = vld [vmem:[%s4801_s17 + $0x138] sm:$0xff]   ;;  %v4574_v37 = vld [vmem:[%s4801_s17 + $0x140] sm:$0xff]  }
  0x2f   : > { %287 = vst.msk [vmem:[#allocation2 + $0x98] sm:$0xff] %vm267_vm4, %v4686_v0  ;;  %288 = vst.msk [vmem:[#allocation2 + $0xa0] sm:$0xff] %vm267_vm4, %v4686_v0  ;;  %v4573_v36 = vld [vmem:[%s4801_s17 + $0x78] sm:$0xff]   ;;  %v4575_v38 = vld [vmem:[%s4801_s17 + $0x80] sm:$0xff]  }
  0x30   : > { %289 = vst.msk [vmem:[#allocation2 + $0xa8] sm:$0xff] %vm267_vm4, %v4686_v0  ;;  %290 = vst.msk [vmem:[#allocation2 + $0xb0] sm:$0xff] %vm267_vm4, %v4686_v0  ;;  %v4576_v39 = vld [vmem:[%s4801_s17 + $0x148] sm:$0xff]   ;;  %v4578_v41 = vld [vmem:[%s4801_s17 + $0x150] sm:$0xff]  }
  0x31   : > { %4270 = vmatmul.mubr.msk.bf16.gmra.mxu0 %vm814_vm3, %v4545_v8  ;;  %4370 = vmatmul.mubr.msk.bf16.gmra.mxu1 %vm814_vm3, %v4546_v9  ;;  %291 = vst.msk [vmem:[#allocation2 + $0xb8] sm:$0xff] %vm267_vm4, %v4686_v0  ;;  %292 = vst.msk [vmem:[#allocation2 + $0xc0] sm:$0xff] %vm267_vm4, %v4686_v0  ;;  %v4577_v40 = vld [vmem:[%s4801_s17 + $0x88] sm:$0xff]   ;;  %v4579_v42 = vld [vmem:[%s4801_s17 + $0x90] sm:$0xff]  }
  0x32   : > { %4273 = vmatprep.mubr.msk.bf16.mxu0 %vm4688_vm2, %v4686_v0  ;;  %4373 = vmatprep.mubr.msk.bf16.mxu1 %vm4688_vm2, %v4686_v0  ;;  %293 = vst.msk [vmem:[#allocation2 + $0xc8] sm:$0xff] %vm267_vm4, %v4686_v0  ;;  %294 = vst.msk [vmem:[#allocation2 + $0xd0] sm:$0xff] %vm267_vm4, %v4686_v0  ;;  %v4580_v43 = vld [vmem:[%s4801_s17 + $0x158] sm:$0xff]   ;;  %v4582_v45 = vld [vmem:[%s4801_s17 + $0x160] sm:$0xff]  }
  0x33   : > { %295 = vst.msk [vmem:[#allocation2 + $0xd8] sm:$0xff] %vm267_vm4, %v4686_v0  ;;  %296 = vst.msk [vmem:[#allocation2 + $0xe0] sm:$0xff] %vm267_vm4, %v4686_v0  ;;  %v4581_v44 = vld [vmem:[%s4801_s17 + $0x98] sm:$0xff]   ;;  %v4583_v46 = vld [vmem:[%s4801_s17 + $0xa0] sm:$0xff]  }
  0x34   : > { %297 = vst.msk [vmem:[#allocation2 + $0xe8] sm:$0xff] %vm267_vm4, %v4686_v0  ;;  %298 = vst.msk [vmem:[#allocation2 + $0xf0] sm:$0xff] %vm267_vm4, %v4686_v0  ;;  %v4584_v47 = vld [vmem:[%s4801_s17 + $0x168] sm:$0xff]   ;;  %v4586_v49 = vld [vmem:[%s4801_s17 + $0x170] sm:$0xff]  }
  0x35   : > { %299 = vst.msk [vmem:[#allocation2 + $0xf8] sm:$0xff] %vm267_vm4, %v4686_v0  ;;  %300 = vst.msk [vmem:[#allocation2 + $0x100] sm:$0xff] %vm267_vm4, %v4686_v0  ;;  %v4585_v48 = vld [vmem:[%s4801_s17 + $0xa8] sm:$0xff]   ;;  %v4587_v50 = vld [vmem:[%s4801_s17 + $0xb0] sm:$0xff]  }
  0x36   : > { %301 = vst.msk [vmem:[#allocation2 + $0x108] sm:$0xff] %vm267_vm4, %v4686_v0  ;;  %302 = vst.msk [vmem:[#allocation2 + $0x110] sm:$0xff] %vm267_vm4, %v4686_v0  ;;  %v4588_v51 = vld [vmem:[%s4801_s17 + $0x178] sm:$0xff]   ;;  %v4590_v53 = vld [vmem:[%s4801_s17 + $0x180] sm:$0xff]  }
  0x37   : > { %303 = vst.msk [vmem:[#allocation2 + $0x118] sm:$0xff] %vm267_vm4, %v4686_v0  ;;  %304 = vst.msk [vmem:[#allocation2 + $0x120] sm:$0xff] %vm267_vm4, %v4686_v0  ;;  %v4589_v52 = vld [vmem:[%s4801_s17 + $0xb8] sm:$0xff]   ;;  %v4591_v54 = vld [vmem:[%s4801_s17 + $0xc0] sm:$0xff]  }
  0x38   : > { %305 = vst.msk [vmem:[#allocation2 + $0x128] sm:$0xff] %vm267_vm4, %v4686_v0  ;;  %306 = vst.msk [vmem:[#allocation2 + $0x130] sm:$0xff] %vm267_vm4, %v4686_v0  ;;  %v5504_v55 = vld [vmem:[%s7439_s2] ss:$0 sm:$0xff] }
  0x39   : > { %4274 = vmatmul.mubr.msk.bf16.gmra.mxu0 %vm814_vm3, %v4547_v10  ;;  %4374 = vmatmul.mubr.msk.bf16.gmra.mxu1 %vm814_vm3, %v4548_v11  ;;  %307 = vst.msk [vmem:[#allocation2 + $0x138] sm:$0xff] %vm267_vm4, %v4686_v0  ;;  %308 = vst.msk [vmem:[#allocation2 + $0x140] sm:$0xff] %vm267_vm4, %v4686_v0  ;;  %v5509_v57 = vld [vmem:[%s7440_s3] ss:$0 sm:$0xff] }
  0x3a   : > { %4277 = vmatprep.mubr.msk.bf16.mxu0 %vm4688_vm2, %v4686_v0  ;;  %4377 = vmatprep.mubr.msk.bf16.mxu1 %vm4688_vm2, %v4686_v0  ;;  %309 = vst.msk [vmem:[#allocation2 + $0x148] sm:$0xff] %vm267_vm4, %v4686_v0  ;;  %310 = vst.msk [vmem:[#allocation2 + $0x150] sm:$0xff] %vm267_vm4, %v4686_v0 }
  0x3b   : > { %311 = vst.msk [vmem:[#allocation2 + $0x158] sm:$0xff] %vm267_vm4, %v4686_v0  ;;  %312 = vst.msk [vmem:[#allocation2 + $0x160] sm:$0xff] %vm267_vm4, %v4686_v0 }
  0x3c   : > { %313 = vst.msk [vmem:[#allocation2 + $0x168] sm:$0xff] %vm267_vm4, %v4686_v0  ;;  %314 = vst.msk [vmem:[#allocation2 + $0x170] sm:$0xff] %vm267_vm4, %v4686_v0 }
  0x3d   : > { %315 = vst.msk [vmem:[#allocation2 + $0x178] sm:$0xff] %vm267_vm4, %v4686_v0  ;;  %316 = vst.msk [vmem:[#allocation2 + $0x180] sm:$0xff] %vm267_vm4, %v4686_v0 }
  0x3e   : > { %317 = vst.msk [vmem:[#allocation2 + $0x188] sm:$0xff] %vm267_vm4, %v4686_v0  ;;  %318 = vst.msk [vmem:[#allocation2 + $0x190] sm:$0xff] %vm267_vm4, %v4686_v0 }
  0x3f   : > { %319 = vst.msk [vmem:[#allocation2 + $0x198] sm:$0xff] %vm267_vm4, %v4686_v0  ;;  %320 = vst.msk [vmem:[#allocation2 + $0x1a0] sm:$0xff] %vm267_vm4, %v4686_v0 }
  0x40   : > { %321 = vst.msk [vmem:[#allocation2 + $0x1a8] sm:$0xff] %vm267_vm4, %v4686_v0  ;;  %322 = vst.msk [vmem:[#allocation2 + $0x1b0] sm:$0xff] %vm267_vm4, %v4686_v0 }
  0x41   : > { %4278 = vmatmul.mubr.msk.bf16.gmra.mxu0 %vm814_vm3, %v4549_v12  ;;  %4378 = vmatmul.mubr.msk.bf16.gmra.mxu1 %vm814_vm3, %v4550_v13  ;;  %323 = vst.msk [vmem:[#allocation2 + $0x1b8] sm:$0xff] %vm267_vm4, %v4686_v0  ;;  %324 = vst.msk [vmem:[#allocation2 + $0x1c0] sm:$0xff] %vm267_vm4, %v4686_v0 }
  0x42   : > { %4281 = vmatprep.mubr.msk.bf16.mxu0 %vm4688_vm2, %v4686_v0  ;;  %4381 = vmatprep.mubr.msk.bf16.mxu1 %vm4688_vm2, %v4686_v0  ;;  %325 = vst.msk [vmem:[#allocation2 + $0x1c8] sm:$0xff] %vm267_vm4, %v4686_v0  ;;  %326 = vst.msk [vmem:[#allocation2 + $0x1d0] sm:$0xff] %vm267_vm4, %v4686_v0 }
  0x43   : > { %327 = vst.msk [vmem:[#allocation2 + $0x1d8] sm:$0xff] %vm267_vm4, %v4686_v0  ;;  %328 = vst.msk [vmem:[#allocation2 + $0x1e0] sm:$0xff] %vm267_vm4, %v4686_v0 }
  0x44   : > { %329 = vst.msk [vmem:[#allocation2 + $0x1e8] sm:$0xff] %vm267_vm4, %v4686_v0  ;;  %330 = vst.msk [vmem:[#allocation2 + $0x1f0] sm:$0xff] %vm267_vm4, %v4686_v0 }
  0x45   : > { %331 = vst.msk [vmem:[#allocation2 + $0x1f8] sm:$0xff] %vm267_vm4, %v4686_v0  ;;  %332 = vst.msk [vmem:[#allocation2 + $0x200] sm:$0xff] %vm267_vm4, %v4686_v0 }
  0x46   : > { %333 = vst.msk [vmem:[#allocation2 + $0x208] sm:$0xff] %vm267_vm4, %v4686_v0  ;;  %334 = vst.msk [vmem:[#allocation2 + $0x210] sm:$0xff] %vm267_vm4, %v4686_v0 }
  0x47   : > { %335 = vst.msk [vmem:[#allocation2 + $0x218] sm:$0xff] %vm267_vm4, %v4686_v0  ;;  %336 = vst.msk [vmem:[#allocation2 + $0x220] sm:$0xff] %vm267_vm4, %v4686_v0 }
  0x48   : > { %337 = vst.msk [vmem:[#allocation2 + $0x228] sm:$0xff] %vm267_vm4, %v4686_v0  ;;  %338 = vst.msk [vmem:[#allocation2 + $0x230] sm:$0xff] %vm267_vm4, %v4686_v0 }
  0x49   : > { %4282 = vmatmul.mubr.msk.bf16.gmra.mxu0 %vm814_vm3, %v4551_v14  ;;  %4382 = vmatmul.mubr.msk.bf16.gmra.mxu1 %vm814_vm3, %v4552_v15  ;;  %339 = vst.msk [vmem:[#allocation2 + $0x238] sm:$0xff] %vm267_vm4, %v4686_v0  ;;  %340 = vst.msk [vmem:[#allocation2 + $0x240] sm:$0xff] %vm267_vm4, %v4686_v0 }
  0x4a   : > { %4285 = vmatprep.mubr.msk.bf16.mxu0 %vm4688_vm2, %v4686_v0  ;;  %4385 = vmatprep.mubr.msk.bf16.mxu1 %vm4688_vm2, %v4686_v0  ;;  %341 = vst.msk [vmem:[#allocation2 + $0x248] sm:$0xff] %vm267_vm4, %v4686_v0  ;;  %342 = vst.msk [vmem:[#allocation2 + $0x250] sm:$0xff] %vm267_vm4, %v4686_v0 }
  0x4b   : > { %343 = vst.msk [vmem:[#allocation2 + $0x258] sm:$0xff] %vm267_vm4, %v4686_v0  ;;  %344 = vst.msk [vmem:[#allocation2 + $0x260] sm:$0xff] %vm267_vm4, %v4686_v0 }
  0x4c   : > { %345 = vst.msk [vmem:[#allocation2 + $0x268] sm:$0xff] %vm267_vm4, %v4686_v0  ;;  %346 = vst.msk [vmem:[#allocation2 + $0x270] sm:$0xff] %vm267_vm4, %v4686_v0 }
  0x4d   : > { %347 = vst.msk [vmem:[#allocation2 + $0x278] sm:$0xff] %vm267_vm4, %v4686_v0  ;;  %348 = vst.msk [vmem:[#allocation2 + $0x280] sm:$0xff] %vm267_vm4, %v4686_v0 }
  0x4e   : > { %349 = vst.msk [vmem:[#allocation2 + $0x288] sm:$0xff] %vm267_vm4, %v4686_v0  ;;  %350 = vst.msk [vmem:[#allocation2 + $0x290] sm:$0xff] %vm267_vm4, %v4686_v0 }
  0x4f   : > { %351 = vst.msk [vmem:[#allocation2 + $0x298] sm:$0xff] %vm267_vm4, %v4686_v0  ;;  %352 = vst.msk [vmem:[#allocation2 + $0x2a0] sm:$0xff] %vm267_vm4, %v4686_v0 }
  0x50   : > { %353 = vst.msk [vmem:[#allocation2 + $0x2a8] sm:$0xff] %vm267_vm4, %v4686_v0  ;;  %354 = vst.msk [vmem:[#allocation2 + $0x2b0] sm:$0xff] %vm267_vm4, %v4686_v0 }
  0x51   : > { %4286 = vmatmul.mubr.msk.bf16.gmra.mxu0 %vm814_vm3, %v4553_v16  ;;  %4386 = vmatmul.mubr.msk.bf16.gmra.mxu1 %vm814_vm3, %v4554_v17  ;;  %355 = vst.msk [vmem:[#allocation2 + $0x2b8] sm:$0xff] %vm267_vm4, %v4686_v0  ;;  %356 = vst.msk [vmem:[#allocation2 + $0x2c0] sm:$0xff] %vm267_vm4, %v4686_v0 }
  0x52   : > { %4289 = vmatprep.mubr.msk.bf16.mxu0 %vm4688_vm2, %v4686_v0  ;;  %4389 = vmatprep.mubr.msk.bf16.mxu1 %vm4688_vm2, %v4686_v0  ;;  %357 = vst.msk [vmem:[#allocation2 + $0x2c8] sm:$0xff] %vm267_vm4, %v4686_v0  ;;  %358 = vst.msk [vmem:[#allocation2 + $0x2d0] sm:$0xff] %vm267_vm4, %v4686_v0 }
  0x53   : > { %359 = vst.msk [vmem:[#allocation2 + $0x2d8] sm:$0xff] %vm267_vm4, %v4686_v0  ;;  %360 = vst.msk [vmem:[#allocation2 + $0x2e0] sm:$0xff] %vm267_vm4, %v4686_v0 }
  0x54   : > { %361 = vst.msk [vmem:[#allocation2 + $0x2e8] sm:$0xff] %vm267_vm4, %v4686_v0  ;;  %362 = vst.msk [vmem:[#allocation2 + $0x2f0] sm:$0xff] %vm267_vm4, %v4686_v0 }
  0x55   : > { %363 = vst.msk [vmem:[#allocation2 + $0x2f8] sm:$0xff] %vm267_vm4, %v4686_v0  ;;  %364 = vst.msk [vmem:[#allocation2 + $0x300] sm:$0xff] %vm267_vm4, %v4686_v0 }
  0x56   : > { %365 = vst.msk [vmem:[#allocation2 + $0x308] sm:$0xff] %vm267_vm4, %v4686_v0  ;;  %366 = vst.msk [vmem:[%s4808_s24] sm:$0xff] %vm267_vm4, %v4686_v0 }
  0x57   : > { %367 = vst.msk [vmem:[%s4808_s24 + $0x8] sm:$0xff] %vm267_vm4, %v4686_v0  ;;  %368 = vst.msk [vmem:[%s4808_s24 + $0x10] sm:$0xff] %vm267_vm4, %v4686_v0 }
  0x58   : > { %369 = vst.msk [vmem:[%s4808_s24 + $0x18] sm:$0xff] %vm267_vm4, %v4686_v0  ;;  %370 = vst.msk [vmem:[%s4808_s24 + $0x20] sm:$0xff] %vm267_vm4, %v4686_v0 }
  0x59   : > { %4290 = vmatmul.mubr.msk.bf16.gmra.mxu0 %vm814_vm3, %v4555_v18  ;;  %4390 = vmatmul.mubr.msk.bf16.gmra.mxu1 %vm814_vm3, %v4556_v19  ;;  %371 = vst.msk [vmem:[%s4808_s24 + $0x28] sm:$0xff] %vm267_vm4, %v4686_v0  ;;  %372 = vst.msk [vmem:[%s4808_s24 + $0x30] sm:$0xff] %vm267_vm4, %v4686_v0 }
  0x5a   : > { %4293 = vmatprep.mubr.msk.bf16.mxu0 %vm4688_vm2, %v4686_v0  ;;  %4393 = vmatprep.mubr.msk.bf16.mxu1 %vm4688_vm2, %v4686_v0  ;;  %373 = vst.msk [vmem:[%s4808_s24 + $0x38] sm:$0xff] %vm267_vm4, %v4686_v0  ;;  %374 = vst.msk [vmem:[%s4808_s24 + $0x40] sm:$0xff] %vm267_vm4, %v4686_v0 }
  0x5b   : > { %375 = vst.msk [vmem:[%s4808_s24 + $0x48] sm:$0xff] %vm267_vm4, %v4686_v0  ;;  %376 = vst.msk [vmem:[%s4808_s24 + $0x50] sm:$0xff] %vm267_vm4, %v4686_v0 }
  0x5c   : > { %377 = vst.msk [vmem:[%s4808_s24 + $0x58] sm:$0xff] %vm267_vm4, %v4686_v0  ;;  %378 = vst.msk [vmem:[%s4808_s24 + $0x60] sm:$0xff] %vm267_vm4, %v4686_v0 }
  0x5d   : > { %379 = vst.msk [vmem:[%s4808_s24 + $0x68] sm:$0xff] %vm267_vm4, %v4686_v0  ;;  %380 = vst.msk [vmem:[%s4808_s24 + $0x70] sm:$0xff] %vm267_vm4, %v4686_v0 }
  0x5e   : > { %381 = vst.msk [vmem:[%s4808_s24 + $0x78] sm:$0xff] %vm267_vm4, %v4686_v0  ;;  %382 = vst.msk [vmem:[%s4808_s24 + $0x80] sm:$0xff] %vm267_vm4, %v4686_v0 }
  0x5f   : > { %383 = vst.msk [vmem:[%s4808_s24 + $0x88] sm:$0xff] %vm267_vm4, %v4686_v0  ;;  %384 = vst.msk [vmem:[%s4808_s24 + $0x90] sm:$0xff] %vm267_vm4, %v4686_v0 }
  0x60   : > { %385 = vst.msk [vmem:[%s4808_s24 + $0x98] sm:$0xff] %vm267_vm4, %v4686_v0  ;;  %386 = vst.msk [vmem:[%s4808_s24 + $0xa0] sm:$0xff] %vm267_vm4, %v4686_v0 }
  0x61   : > { %4294 = vmatmul.mubr.msk.bf16.gmra.mxu0 %vm814_vm3, %v4557_v20  ;;  %4394 = vmatmul.mubr.msk.bf16.gmra.mxu1 %vm814_vm3, %v4558_v21  ;;  %387 = vst.msk [vmem:[%s4808_s24 + $0xa8] sm:$0xff] %vm267_vm4, %v4686_v0  ;;  %388 = vst.msk [vmem:[%s4808_s24 + $0xb0] sm:$0xff] %vm267_vm4, %v4686_v0 }
  0x62   : > { %4297 = vmatprep.mubr.msk.bf16.mxu0 %vm4688_vm2, %v4686_v0  ;;  %4397 = vmatprep.mubr.msk.bf16.mxu1 %vm4688_vm2, %v4686_v0  ;;  %389 = vst.msk [vmem:[%s4808_s24 + $0xb8] sm:$0xff] %vm267_vm4, %v4686_v0  ;;  %390 = vst.msk [vmem:[%s4808_s24 + $0xc0] sm:$0xff] %vm267_vm4, %v4686_v0 }
  0x63   : > { %391 = vst.msk [vmem:[%s4808_s24 + $0xc8] sm:$0xff] %vm267_vm4, %v4686_v0  ;;  %392 = vst.msk [vmem:[%s4808_s24 + $0xd0] sm:$0xff] %vm267_vm4, %v4686_v0 }
  0x64   : > { %393 = vst.msk [vmem:[%s4808_s24 + $0xd8] sm:$0xff] %vm267_vm4, %v4686_v0  ;;  %394 = vst.msk [vmem:[%s4808_s24 + $0xe0] sm:$0xff] %vm267_vm4, %v4686_v0 }
  0x65   : > { %395 = vst.msk [vmem:[%s4808_s24 + $0xe8] sm:$0xff] %vm267_vm4, %v4686_v0  ;;  %396 = vst.msk [vmem:[%s4808_s24 + $0xf0] sm:$0xff] %vm267_vm4, %v4686_v0 }
  0x66   : > { %397 = vst.msk [vmem:[%s4808_s24 + $0xf8] sm:$0xff] %vm267_vm4, %v4686_v0  ;;  %398 = vst.msk [vmem:[%s4808_s24 + $0x100] sm:$0xff] %vm267_vm4, %v4686_v0 }
  0x67   : > { %399 = vst.msk [vmem:[%s4808_s24 + $0x108] sm:$0xff] %vm267_vm4, %v4686_v0  ;;  %400 = vst.msk [vmem:[%s4808_s24 + $0x110] sm:$0xff] %vm267_vm4, %v4686_v0 }
  0x68   : > { %401 = vst.msk [vmem:[%s4808_s24 + $0x118] sm:$0xff] %vm267_vm4, %v4686_v0  ;;  %402 = vst.msk [vmem:[%s4808_s24 + $0x120] sm:$0xff] %vm267_vm4, %v4686_v0 }
  0x69   : > { %403 = vst.msk [vmem:[%s4808_s24 + $0x128] sm:$0xff] %vm267_vm4, %v4686_v0  ;;  %404 = vst.msk [vmem:[%s4808_s24 + $0x130] sm:$0xff] %vm267_vm4, %v4686_v0  ;;  %4298 = vmatmul.mubr.msk.bf16.gmra.mxu0 %vm814_vm3, %v4559_v22  ;;  %4398 = vmatmul.mubr.msk.bf16.gmra.mxu1 %vm814_vm3, %v4560_v23 }
  0x6a   : > { %405 = vst.msk [vmem:[%s4808_s24 + $0x138] sm:$0xff] %vm267_vm4, %v4686_v0  ;;  %406 = vst.msk [vmem:[%s4808_s24 + $0x140] sm:$0xff] %vm267_vm4, %v4686_v0  ;;  %4301 = vmatprep.mubr.msk.bf16.mxu0 %vm4688_vm2, %v4686_v0  ;;  %4401 = vmatprep.mubr.msk.bf16.mxu1 %vm4688_vm2, %v4686_v0 }
  0x6b   : > { %407 = vst.msk [vmem:[%s4808_s24 + $0x148] sm:$0xff] %vm267_vm4, %v4686_v0  ;;  %408 = vst.msk [vmem:[%s4808_s24 + $0x150] sm:$0xff] %vm267_vm4, %v4686_v0 }
  0x6c   : > { %409 = vst.msk [vmem:[%s4808_s24 + $0x158] sm:$0xff] %vm267_vm4, %v4686_v0  ;;  %410 = vst.msk [vmem:[%s4808_s24 + $0x160] sm:$0xff] %vm267_vm4, %v4686_v0 }
  0x6d   : > { %411 = vst.msk [vmem:[%s4808_s24 + $0x168] sm:$0xff] %vm267_vm4, %v4686_v0  ;;  %412 = vst.msk [vmem:[%s4808_s24 + $0x170] sm:$0xff] %vm267_vm4, %v4686_v0 }
  0x6e   : > { %413 = vst.msk [vmem:[%s4808_s24 + $0x178] sm:$0xff] %vm267_vm4, %v4686_v0  ;;  %414 = vst.msk [vmem:[%s4808_s24 + $0x180] sm:$0xff] %vm267_vm4, %v4686_v0 }
  0x6f   : > { %415 = vst.msk [vmem:[%s4808_s24 + $0x188] sm:$0xff] %vm267_vm4, %v4686_v0  ;;  %416 = vst.msk [vmem:[%s4808_s24 + $0x190] sm:$0xff] %vm267_vm4, %v4686_v0 }
  0x70   : > { %417 = vst.msk [vmem:[%s4808_s24 + $0x198] sm:$0xff] %vm267_vm4, %v4686_v0  ;;  %418 = vst.msk [vmem:[%s4808_s24 + $0x1a0] sm:$0xff] %vm267_vm4, %v4686_v0 }
  0x71   : > { %419 = vst.msk [vmem:[%s4808_s24 + $0x1a8] sm:$0xff] %vm267_vm4, %v4686_v0  ;;  %420 = vst.msk [vmem:[%s4808_s24 + $0x1b0] sm:$0xff] %vm267_vm4, %v4686_v0  ;;  %4302 = vmatmul.mubr.msk.bf16.gmra.mxu0 %vm814_vm3, %v4561_v24  ;;  %4402 = vmatmul.mubr.msk.bf16.gmra.mxu1 %vm814_vm3, %v4562_v25 }
  0x72   : > { %421 = vst.msk [vmem:[%s4808_s24 + $0x1b8] sm:$0xff] %vm267_vm4, %v4686_v0  ;;  %422 = vst.msk [vmem:[%s4808_s24 + $0x1c0] sm:$0xff] %vm267_vm4, %v4686_v0  ;;  %4305 = vmatprep.mubr.msk.bf16.mxu0 %vm4688_vm2, %v4686_v0  ;;  %4405 = vmatprep.mubr.msk.bf16.mxu1 %vm4688_vm2, %v4686_v0 }
  0x73   : > { %423 = vst.msk [vmem:[%s4808_s24 + $0x1c8] sm:$0xff] %vm267_vm4, %v4686_v0  ;;  %424 = vst.msk [vmem:[%s4808_s24 + $0x1d0] sm:$0xff] %vm267_vm4, %v4686_v0 }
  0x74   : > { %425 = vst.msk [vmem:[%s4808_s24 + $0x1d8] sm:$0xff] %vm267_vm4, %v4686_v0  ;;  %426 = vst.msk [vmem:[%s4808_s24 + $0x1e0] sm:$0xff] %vm267_vm4, %v4686_v0 }
  0x75   : > { %427 = vst.msk [vmem:[%s4808_s24 + $0x1e8] sm:$0xff] %vm267_vm4, %v4686_v0  ;;  %428 = vst.msk [vmem:[%s4808_s24 + $0x1f0] sm:$0xff] %vm267_vm4, %v4686_v0 }
  0x76   : > { %429 = vst.msk [vmem:[%s4808_s24 + $0x1f8] sm:$0xff] %vm267_vm4, %v4686_v0  ;;  %430 = vst.msk [vmem:[%s4808_s24 + $0x200] sm:$0xff] %vm267_vm4, %v4686_v0 }
  0x77   : > { %431 = vst.msk [vmem:[%s4808_s24 + $0x208] sm:$0xff] %vm267_vm4, %v4686_v0  ;;  %432 = vst.msk [vmem:[%s4808_s24 + $0x210] sm:$0xff] %vm267_vm4, %v4686_v0 }
  0x78   : > { %433 = vst.msk [vmem:[%s4808_s24 + $0x218] sm:$0xff] %vm267_vm4, %v4686_v0  ;;  %434 = vst.msk [vmem:[%s4808_s24 + $0x220] sm:$0xff] %vm267_vm4, %v4686_v0 }
  0x79   : > { %435 = vst.msk [vmem:[%s4808_s24 + $0x228] sm:$0xff] %vm267_vm4, %v4686_v0  ;;  %436 = vst.msk [vmem:[%s4808_s24 + $0x230] sm:$0xff] %vm267_vm4, %v4686_v0  ;;  %4306 = vmatmul.mubr.msk.bf16.gmra.mxu0 %vm814_vm3, %v4563_v26  ;;  %4406 = vmatmul.mubr.msk.bf16.gmra.mxu1 %vm814_vm3, %v4564_v27 }
  0x7a   : > { %437 = vst.msk [vmem:[%s4808_s24 + $0x238] sm:$0xff] %vm267_vm4, %v4686_v0  ;;  %438 = vst.msk [vmem:[%s4808_s24 + $0x240] sm:$0xff] %vm267_vm4, %v4686_v0  ;;  %4309 = vmatprep.mubr.msk.bf16.mxu0 %vm4688_vm2, %v4686_v0  ;;  %4409 = vmatprep.mubr.msk.bf16.mxu1 %vm4688_vm2, %v4686_v0 }
  0x7b   : > { %439 = vst.msk [vmem:[%s4808_s24 + $0x248] sm:$0xff] %vm267_vm4, %v4686_v0  ;;  %440 = vst.msk [vmem:[%s4808_s24 + $0x250] sm:$0xff] %vm267_vm4, %v4686_v0 }
  0x7c   : > { %441 = vst.msk [vmem:[%s4808_s24 + $0x258] sm:$0xff] %vm267_vm4, %v4686_v0  ;;  %442 = vst.msk [vmem:[%s4808_s24 + $0x260] sm:$0xff] %vm267_vm4, %v4686_v0 }
  0x7d   : > { %443 = vst.msk [vmem:[%s4808_s24 + $0x268] sm:$0xff] %vm267_vm4, %v4686_v0  ;;  %444 = vst.msk [vmem:[%s4808_s24 + $0x270] sm:$0xff] %vm267_vm4, %v4686_v0 }
  0x7e   : > { %445 = vst.msk [vmem:[%s4808_s24 + $0x278] sm:$0xff] %vm267_vm4, %v4686_v0  ;;  %446 = vst.msk [vmem:[%s4808_s24 + $0x280] sm:$0xff] %vm267_vm4, %v4686_v0 }
  0x7f   : > { %447 = vst.msk [vmem:[%s4808_s24 + $0x288] sm:$0xff] %vm267_vm4, %v4686_v0  ;;  %448 = vst.msk [vmem:[%s4808_s24 + $0x290] sm:$0xff] %vm267_vm4, %v4686_v0 }
  0x80   : > { %449 = vst.msk [vmem:[%s4808_s24 + $0x298] sm:$0xff] %vm267_vm4, %v4686_v0  ;;  %450 = vst.msk [vmem:[%s4808_s24 + $0x2a0] sm:$0xff] %vm267_vm4, %v4686_v0 }
  0x81   : > { %451 = vst.msk [vmem:[%s4808_s24 + $0x2a8] sm:$0xff] %vm267_vm4, %v4686_v0  ;;  %452 = vst.msk [vmem:[%s4808_s24 + $0x2b0] sm:$0xff] %vm267_vm4, %v4686_v0  ;;  %4310 = vmatmul.mubr.msk.bf16.gmra.mxu0 %vm814_vm3, %v4565_v28  ;;  %4410 = vmatmul.mubr.msk.bf16.gmra.mxu1 %vm814_vm3, %v4566_v29 }
  0x82   : > { %453 = vst.msk [vmem:[%s4808_s24 + $0x2b8] sm:$0xff] %vm267_vm4, %v4686_v0  ;;  %454 = vst.msk [vmem:[%s4808_s24 + $0x2c0] sm:$0xff] %vm267_vm4, %v4686_v0  ;;  %4313 = vmatprep.mubr.msk.bf16.mxu0 %vm4688_vm2, %v4686_v0  ;;  %4413 = vmatprep.mubr.msk.bf16.mxu1 %vm4688_vm2, %v4686_v0 }
  0x83   : > { %455 = vst.msk [vmem:[%s4808_s24 + $0x2c8] sm:$0xff] %vm267_vm4, %v4686_v0  ;;  %456 = vst.msk [vmem:[%s4808_s24 + $0x2d0] sm:$0xff] %vm267_vm4, %v4686_v0 }
  0x84   : > { %457 = vst.msk [vmem:[%s4808_s24 + $0x2d8] sm:$0xff] %vm267_vm4, %v4686_v0  ;;  %458 = vst.msk [vmem:[%s4808_s24 + $0x2e0] sm:$0xff] %vm267_vm4, %v4686_v0 }
  0x85   : > { %459 = vst.msk [vmem:[%s4808_s24 + $0x2e8] sm:$0xff] %vm267_vm4, %v4686_v0  ;;  %460 = vst.msk [vmem:[%s4808_s24 + $0x2f0] sm:$0xff] %vm267_vm4, %v4686_v0 }
  0x86   : > { %461 = vst.msk [vmem:[%s4808_s24 + $0x2f8] sm:$0xff] %vm267_vm4, %v4686_v0  ;;  %462 = vst.msk [vmem:[%s4808_s24 + $0x300] sm:$0xff] %vm267_vm4, %v4686_v0 }
  0x87   : > { %463 = vst.msk [vmem:[%s4808_s24 + $0x308] sm:$0xff] %vm267_vm4, %v4686_v0 }
  0x89   : > { %4314 = vmatmul.mubr.msk.bf16.gmra.mxu0 %vm814_vm3, %v4567_v30  ;;  %4414 = vmatmul.mubr.msk.bf16.gmra.mxu1 %vm814_vm3, %v4568_v31 }
  0x8a   : > { %4317 = vmatprep.mubr.msk.bf16.mxu0 %vm4688_vm2, %v4686_v0  ;;  %4417 = vmatprep.mubr.msk.bf16.mxu1 %vm4688_vm2, %v4686_v0 }
  0x91   : > { %4318 = vmatmul.mubr.msk.bf16.gmra.mxu0 %vm814_vm3, %v4569_v32  ;;  %4418 = vmatmul.mubr.msk.bf16.gmra.mxu1 %vm814_vm3, %v4570_v33 }
  0x92   : > { %4321 = vmatprep.mubr.msk.bf16.mxu0 %vm4688_vm2, %v4686_v0  ;;  %4421 = vmatprep.mubr.msk.bf16.mxu1 %vm4688_vm2, %v4686_v0 }
  0x99   : > { %4322 = vmatmul.mubr.msk.bf16.gmra.mxu0 %vm814_vm3, %v4571_v34  ;;  %4422 = vmatmul.mubr.msk.bf16.gmra.mxu1 %vm814_vm3, %v4572_v35 }
  0x9a   : > { %4325 = vmatprep.mubr.msk.bf16.mxu0 %vm4688_vm2, %v4686_v0  ;;  %4425 = vmatprep.mubr.msk.bf16.mxu1 %vm4688_vm2, %v4686_v0 }
  0xa1   : > { %4326 = vmatmul.mubr.msk.bf16.gmra.mxu0 %vm814_vm3, %v4573_v36  ;;  %4426 = vmatmul.mubr.msk.bf16.gmra.mxu1 %vm814_vm3, %v4574_v37 }
  0xa2   : > { %4329 = vmatprep.mubr.msk.bf16.mxu0 %vm4688_vm2, %v4686_v0  ;;  %4429 = vmatprep.mubr.msk.bf16.mxu1 %vm4688_vm2, %v4686_v0 }
  0xa9   : > { %4330 = vmatmul.mubr.msk.bf16.gmra.mxu0 %vm814_vm3, %v4575_v38  ;;  %4430 = vmatmul.mubr.msk.bf16.gmra.mxu1 %vm814_vm3, %v4576_v39 }
  0xaa   : > { %4333 = vmatprep.mubr.msk.bf16.mxu0 %vm4688_vm2, %v4686_v0  ;;  %4433 = vmatprep.mubr.msk.bf16.mxu1 %vm4688_vm2, %v4686_v0 }
  0xb1   : > { %4334 = vmatmul.mubr.msk.bf16.gmra.mxu0 %vm814_vm3, %v4577_v40  ;;  %4434 = vmatmul.mubr.msk.bf16.gmra.mxu1 %vm814_vm3, %v4578_v41 }
  0xb2   : > { %4337 = vmatprep.mubr.msk.bf16.mxu0 %vm4688_vm2, %v4686_v0  ;;  %4437 = vmatprep.mubr.msk.bf16.mxu1 %vm4688_vm2, %v4686_v0 }
  0xb9   : > { %4338 = vmatmul.mubr.msk.bf16.gmra.mxu0 %vm814_vm3, %v4579_v42  ;;  %4438 = vmatmul.mubr.msk.bf16.gmra.mxu1 %vm814_vm3, %v4580_v43 }
  0xba   : > { %4341 = vmatprep.mubr.msk.bf16.mxu0 %vm4688_vm2, %v4686_v0  ;;  %4441 = vmatprep.mubr.msk.bf16.mxu1 %vm4688_vm2, %v4686_v0 }
  0xc1   : > { %4342 = vmatmul.mubr.msk.bf16.gmra.mxu0 %vm814_vm3, %v4581_v44  ;;  %4442 = vmatmul.mubr.msk.bf16.gmra.mxu1 %vm814_vm3, %v4582_v45 }
  0xc2   : > { %4345 = vmatprep.mubr.msk.bf16.mxu0 %vm4688_vm2, %v4686_v0  ;;  %4445 = vmatprep.mubr.msk.bf16.mxu1 %vm4688_vm2, %v4686_v0 }
  0xc9   : > { %4346 = vmatmul.mubr.msk.bf16.gmra.mxu0 %vm814_vm3, %v4583_v46  ;;  %4446 = vmatmul.mubr.msk.bf16.gmra.mxu1 %vm814_vm3, %v4584_v47 }
  0xca   : > { %4349 = vmatprep.mubr.msk.bf16.mxu0 %vm4688_vm2, %v4686_v0  ;;  %4449 = vmatprep.mubr.msk.bf16.mxu1 %vm4688_vm2, %v4686_v0 }
  0xd1   : > { %4350 = vmatmul.mubr.msk.bf16.gmra.mxu0 %vm814_vm3, %v4585_v48  ;;  %4450 = vmatmul.mubr.msk.bf16.gmra.mxu1 %vm814_vm3, %v4586_v49 }
  0xd2   : > { %4353 = vmatprep.mubr.msk.bf16.mxu0 %vm4688_vm2, %v4686_v0  ;;  %4453 = vmatprep.mubr.msk.bf16.mxu1 %vm4688_vm2, %v4686_v0 }
  0xd9   : > { %4354 = vmatmul.mubr.msk.bf16.gmra.mxu0 %vm814_vm3, %v4587_v50  ;;  %4454 = vmatmul.mubr.msk.bf16.gmra.mxu1 %vm814_vm3, %v4588_v51 }
  0xda   : > { %4357 = vmatprep.mubr.msk.bf16.mxu0 %vm4688_vm2, %v4686_v0  ;;  %4457 = vmatprep.mubr.msk.bf16.mxu1 %vm4688_vm2, %v4686_v0 }
  0xe1   : > { %4358 = vmatmul.mubr.msk.bf16.gmra.mxu0 %vm814_vm3, %v4589_v52  ;;  %4458 = vmatmul.mubr.msk.bf16.gmra.mxu1 %vm814_vm3, %v4590_v53 }
  0xe2   : > { %4361 = vmatprep.mubr.msk.bf16.mxu0 %vm4688_vm2, %v4686_v0 }
  0xe9   : > { %v1003_v56 = vpop.f32.mrf.mxu0  ;;  %4362 = vmatmul.mubr.msk.bf16.gmra.mxu0 %vm814_vm3, %v4591_v54  ;;  %v1203_v58 = vpop.f32.mrf.mxu1 }
  0xea   : > { %v1401_v59 = vmul.f32 %v5504_v55, %v1003_v56  ;;  %v1451_v60 = vmul.f32 %v5504_v55, %v1203_v58 }
  0xeb   : > { %v4267_v61 = vpop.f32.mrf.mxu0  ;;  %v4367_v62 = vpop.f32.mrf.mxu1 }
  0xec   : > { %v1506_v63 = vadd.f32 %v5509_v57, %v1401_v59  ;;  %v1556_v0 = vadd.f32 %v5509_v57, %v1451_v60 }
  0xed   : > { %v1006_v1 = vpop.f32.mrf.mxu0  ;;  %v1206_v2 = vpop.f32.mrf.mxu1 }
  0xee   : > { %1604 = vst.msk [vmem:[#allocation3] sm:$0xff] %vm267_vm4, %v1506_v63  ;;  %1654 = vst.msk [vmem:[#allocation3 + $0x190] sm:$0xff] %vm267_vm4, %v1556_v0  ;;  %v1402_v3 = vmul.f32 %v5504_v55, %v1006_v1  ;;  %v1452_v4 = vmul.f32 %v5504_v55, %v1206_v2 }
  0xef   : > { %v4268_v5 = vpop.f32.mrf.mxu0  ;;  %v4368_v6 = vpop.f32.mrf.mxu1 }
  0xf0   : > { %v1507_v7 = vadd.f32 %v5509_v57, %v1402_v3  ;;  %v1557_v8 = vadd.f32 %v5509_v57, %v1452_v4 }
  0xf1   : > { %v1011_v9 = vpop.f32.mrf.mxu0  ;;  %v1211_v10 = vpop.f32.mrf.mxu1 }
  0xf2   : > { %1605 = vst.msk [vmem:[#allocation3 + $0x8] sm:$0xff] %vm267_vm4, %v1507_v7  ;;  %1655 = vst.msk [vmem:[#allocation3 + $0x198] sm:$0xff] %vm267_vm4, %v1557_v8  ;;  %v1403_v11 = vmul.f32 %v5504_v55, %v1011_v9  ;;  %v1453_v12 = vmul.f32 %v5504_v55, %v1211_v10 }
  0xf3   : > { %v4271_v13 = vpop.f32.mrf.mxu0  ;;  %v4371_v14 = vpop.f32.mrf.mxu1 }
  0xf4   : > { %v1508_v15 = vadd.f32 %v5509_v57, %v1403_v11  ;;  %v1558_v16 = vadd.f32 %v5509_v57, %v1453_v12 }
  0xf5   : > { %v1014_v17 = vpop.f32.mrf.mxu0  ;;  %v1214_v18 = vpop.f32.mrf.mxu1 }
  0xf6   : > { %1606 = vst.msk [vmem:[#allocation3 + $0x10] sm:$0xff] %vm267_vm4, %v1508_v15  ;;  %1656 = vst.msk [vmem:[#allocation3 + $0x1a0] sm:$0xff] %vm267_vm4, %v1558_v16  ;;  %v1404_v19 = vmul.f32 %v5504_v55, %v1014_v17  ;;  %v1454_v20 = vmul.f32 %v5504_v55, %v1214_v18 }
  0xf7   : > { %v4272_v21 = vpop.f32.mrf.mxu0  ;;  %v4372_v22 = vpop.f32.mrf.mxu1 }
  0xf8   : > { %v1509_v23 = vadd.f32 %v5509_v57, %v1404_v19  ;;  %v1559_v24 = vadd.f32 %v5509_v57, %v1454_v20 }
  0xf9   : > { %v1019_v25 = vpop.f32.mrf.mxu0  ;;  %v1219_v26 = vpop.f32.mrf.mxu1 }
  0xfa   : > { %1607 = vst.msk [vmem:[#allocation3 + $0x18] sm:$0xff] %vm267_vm4, %v1509_v23  ;;  %1657 = vst.msk [vmem:[#allocation3 + $0x1a8] sm:$0xff] %vm267_vm4, %v1559_v24  ;;  %v1405_v27 = vmul.f32 %v5504_v55, %v1019_v25  ;;  %v1455_v28 = vmul.f32 %v5504_v55, %v1219_v26 }
  0xfb   : > { %v4275_v29 = vpop.f32.mrf.mxu0  ;;  %v4375_v30 = vpop.f32.mrf.mxu1 }
  0xfc   : > { %v1510_v31 = vadd.f32 %v5509_v57, %v1405_v27  ;;  %v1560_v32 = vadd.f32 %v5509_v57, %v1455_v28 }
  0xfd   : > { %v1022_v33 = vpop.f32.mrf.mxu0  ;;  %v1222_v34 = vpop.f32.mrf.mxu1 }
  0xfe   : > { %1608 = vst.msk [vmem:[#allocation3 + $0x20] sm:$0xff] %vm267_vm4, %v1510_v31  ;;  %1658 = vst.msk [vmem:[#allocation3 + $0x1b0] sm:$0xff] %vm267_vm4, %v1560_v32  ;;  %v1406_v35 = vmul.f32 %v5504_v55, %v1022_v33  ;;  %v1456_v36 = vmul.f32 %v5504_v55, %v1222_v34 }
  0xff   : > { %v4276_v37 = vpop.f32.mrf.mxu0  ;;  %v4376_v38 = vpop.f32.mrf.mxu1 }
 0x100   : > { %v1511_v39 = vadd.f32 %v5509_v57, %v1406_v35  ;;  %v1561_v40 = vadd.f32 %v5509_v57, %v1456_v36 }
 0x101   : > { %v1027_v41 = vpop.f32.mrf.mxu0  ;;  %v1227_v42 = vpop.f32.mrf.mxu1 }
 0x102   : > { %1609 = vst.msk [vmem:[#allocation3 + $0x28] sm:$0xff] %vm267_vm4, %v1511_v39  ;;  %1659 = vst.msk [vmem:[#allocation3 + $0x1b8] sm:$0xff] %vm267_vm4, %v1561_v40  ;;  %v1407_v43 = vmul.f32 %v5504_v55, %v1027_v41  ;;  %v1457_v44 = vmul.f32 %v5504_v55, %v1227_v42 }
 0x103   : > { %v4279_v45 = vpop.f32.mrf.mxu0  ;;  %v4379_v46 = vpop.f32.mrf.mxu1 }
 0x104   : > { %v1512_v47 = vadd.f32 %v5509_v57, %v1407_v43  ;;  %v1562_v48 = vadd.f32 %v5509_v57, %v1457_v44 }
 0x105   : > { %v1030_v49 = vpop.f32.mrf.mxu0  ;;  %v1230_v50 = vpop.f32.mrf.mxu1 }
 0x106   : > { %1610 = vst.msk [vmem:[#allocation3 + $0x30] sm:$0xff] %vm267_vm4, %v1512_v47  ;;  %1660 = vst.msk [vmem:[#allocation3 + $0x1c0] sm:$0xff] %vm267_vm4, %v1562_v48  ;;  %v1408_v51 = vmul.f32 %v5504_v55, %v1030_v49  ;;  %v1458_v52 = vmul.f32 %v5504_v55, %v1230_v50 }
 0x107   : > { %v4280_v53 = vpop.f32.mrf.mxu0  ;;  %v4380_v54 = vpop.f32.mrf.mxu1 }
 0x108   : > { %v1513_v56 = vadd.f32 %v5509_v57, %v1408_v51  ;;  %v1563_v58 = vadd.f32 %v5509_v57, %v1458_v52 }
 0x109   : > { %v1035_v59 = vpop.f32.mrf.mxu0  ;;  %v1235_v60 = vpop.f32.mrf.mxu1 }
 0x10a   : > { %1611 = vst.msk [vmem:[#allocation3 + $0x38] sm:$0xff] %vm267_vm4, %v1513_v56  ;;  %1661 = vst.msk [vmem:[#allocation3 + $0x1c8] sm:$0xff] %vm267_vm4, %v1563_v58  ;;  %v1409_v61 = vmul.f32 %v5504_v55, %v1035_v59  ;;  %v1459_v62 = vmul.f32 %v5504_v55, %v1235_v60 }
 0x10b   : > { %v4283_v63 = vpop.f32.mrf.mxu0  ;;  %v4383_v0 = vpop.f32.mrf.mxu1 }
 0x10c   : > { %v1514_v1 = vadd.f32 %v5509_v57, %v1409_v61  ;;  %v1564_v2 = vadd.f32 %v5509_v57, %v1459_v62 }
 0x10d   : > { %v1038_v3 = vpop.f32.mrf.mxu0  ;;  %v1238_v4 = vpop.f32.mrf.mxu1 }
 0x10e   : > { %1612 = vst.msk [vmem:[#allocation3 + $0x40] sm:$0xff] %vm267_vm4, %v1514_v1  ;;  %1662 = vst.msk [vmem:[#allocation3 + $0x1d0] sm:$0xff] %vm267_vm4, %v1564_v2  ;;  %v1410_v5 = vmul.f32 %v5504_v55, %v1038_v3  ;;  %v1460_v6 = vmul.f32 %v5504_v55, %v1238_v4 }
 0x10f   : > { %v4284_v7 = vpop.f32.mrf.mxu0  ;;  %v4384_v8 = vpop.f32.mrf.mxu1 }
 0x110   : > { %v1515_v9 = vadd.f32 %v5509_v57, %v1410_v5  ;;  %v1565_v10 = vadd.f32 %v5509_v57, %v1460_v6 }
 0x111   : > { %v1043_v11 = vpop.f32.mrf.mxu0  ;;  %v1243_v12 = vpop.f32.mrf.mxu1 }
 0x112   : > { %1613 = vst.msk [vmem:[#allocation3 + $0x48] sm:$0xff] %vm267_vm4, %v1515_v9  ;;  %1663 = vst.msk [vmem:[#allocation3 + $0x1d8] sm:$0xff] %vm267_vm4, %v1565_v10  ;;  %v1411_v13 = vmul.f32 %v5504_v55, %v1043_v11  ;;  %v1461_v14 = vmul.f32 %v5504_v55, %v1243_v12 }
 0x113   : > { %v4287_v15 = vpop.f32.mrf.mxu0  ;;  %v4387_v16 = vpop.f32.mrf.mxu1 }
 0x114   : > { %v1516_v17 = vadd.f32 %v5509_v57, %v1411_v13  ;;  %v1566_v18 = vadd.f32 %v5509_v57, %v1461_v14 }
 0x115   : > { %v1046_v19 = vpop.f32.mrf.mxu0  ;;  %v1246_v20 = vpop.f32.mrf.mxu1 }
 0x116   : > { %1614 = vst.msk [vmem:[#allocation3 + $0x50] sm:$0xff] %vm267_vm4, %v1516_v17  ;;  %1664 = vst.msk [vmem:[#allocation3 + $0x1e0] sm:$0xff] %vm267_vm4, %v1566_v18  ;;  %v1412_v21 = vmul.f32 %v5504_v55, %v1046_v19  ;;  %v1462_v22 = vmul.f32 %v5504_v55, %v1246_v20 }
 0x117   : > { %v4288_v23 = vpop.f32.mrf.mxu0  ;;  %v4388_v24 = vpop.f32.mrf.mxu1 }
 0x118   : > { %v1517_v25 = vadd.f32 %v5509_v57, %v1412_v21  ;;  %v1567_v26 = vadd.f32 %v5509_v57, %v1462_v22 }
 0x119   : > { %v1051_v27 = vpop.f32.mrf.mxu0  ;;  %v1251_v28 = vpop.f32.mrf.mxu1 }
 0x11a   : > { %1615 = vst.msk [vmem:[#allocation3 + $0x58] sm:$0xff] %vm267_vm4, %v1517_v25  ;;  %1665 = vst.msk [vmem:[#allocation3 + $0x1e8] sm:$0xff] %vm267_vm4, %v1567_v26  ;;  %v1413_v29 = vmul.f32 %v5504_v55, %v1051_v27  ;;  %v1463_v30 = vmul.f32 %v5504_v55, %v1251_v28 }
 0x11b   : > { %v4291_v31 = vpop.f32.mrf.mxu0  ;;  %v4391_v32 = vpop.f32.mrf.mxu1 }
 0x11c   : > { %v1518_v33 = vadd.f32 %v5509_v57, %v1413_v29  ;;  %v1568_v34 = vadd.f32 %v5509_v57, %v1463_v30 }
 0x11d   : > { %v1054_v35 = vpop.f32.mrf.mxu0  ;;  %v1254_v36 = vpop.f32.mrf.mxu1 }
 0x11e   : > { %1616 = vst.msk [vmem:[#allocation3 + $0x60] sm:$0xff] %vm267_vm4, %v1518_v33  ;;  %1666 = vst.msk [vmem:[#allocation3 + $0x1f0] sm:$0xff] %vm267_vm4, %v1568_v34  ;;  %v1414_v37 = vmul.f32 %v5504_v55, %v1054_v35  ;;  %v1464_v38 = vmul.f32 %v5504_v55, %v1254_v36 }
 0x11f   : > { %v4292_v39 = vpop.f32.mrf.mxu0  ;;  %v4392_v40 = vpop.f32.mrf.mxu1 }
 0x120   : > { %v1519_v41 = vadd.f32 %v5509_v57, %v1414_v37  ;;  %v1569_v42 = vadd.f32 %v5509_v57, %v1464_v38 }
 0x121   : > { %v1059_v43 = vpop.f32.mrf.mxu0  ;;  %v1259_v44 = vpop.f32.mrf.mxu1 }
 0x122   : > { %1617 = vst.msk [vmem:[#allocation3 + $0x68] sm:$0xff] %vm267_vm4, %v1519_v41  ;;  %1667 = vst.msk [vmem:[#allocation3 + $0x1f8] sm:$0xff] %vm267_vm4, %v1569_v42  ;;  %v1415_v45 = vmul.f32 %v5504_v55, %v1059_v43  ;;  %v1465_v46 = vmul.f32 %v5504_v55, %v1259_v44 }
 0x123   : > { %v4295_v47 = vpop.f32.mrf.mxu0  ;;  %v4395_v48 = vpop.f32.mrf.mxu1 }
 0x124   : > { %v1520_v49 = vadd.f32 %v5509_v57, %v1415_v45  ;;  %v1570_v50 = vadd.f32 %v5509_v57, %v1465_v46 }
 0x125   : > { %v1062_v51 = vpop.f32.mrf.mxu0  ;;  %v1262_v52 = vpop.f32.mrf.mxu1 }
 0x126   : > { %1618 = vst.msk [vmem:[#allocation3 + $0x70] sm:$0xff] %vm267_vm4, %v1520_v49  ;;  %1668 = vst.msk [vmem:[#allocation3 + $0x200] sm:$0xff] %vm267_vm4, %v1570_v50  ;;  %v1416_v53 = vmul.f32 %v5504_v55, %v1062_v51  ;;  %v1466_v54 = vmul.f32 %v5504_v55, %v1262_v52 }
 0x127   : > { %v4296_v56 = vpop.f32.mrf.mxu0  ;;  %v4396_v58 = vpop.f32.mrf.mxu1 }
 0x128   : > { %v1521_v59 = vadd.f32 %v5509_v57, %v1416_v53  ;;  %v1571_v60 = vadd.f32 %v5509_v57, %v1466_v54 }
 0x129   : > { %v1067_v61 = vpop.f32.mrf.mxu0  ;;  %v1267_v62 = vpop.f32.mrf.mxu1 }
 0x12a   : > { %1619 = vst.msk [vmem:[#allocation3 + $0x78] sm:$0xff] %vm267_vm4, %v1521_v59  ;;  %1669 = vst.msk [vmem:[#allocation3 + $0x208] sm:$0xff] %vm267_vm4, %v1571_v60  ;;  %v1417_v63 = vmul.f32 %v5504_v55, %v1067_v61  ;;  %v1467_v0 = vmul.f32 %v5504_v55, %v1267_v62 }
 0x12b   : > { %v4299_v1 = vpop.f32.mrf.mxu0  ;;  %v4399_v2 = vpop.f32.mrf.mxu1 }
 0x12c   : > { %v1522_v3 = vadd.f32 %v5509_v57, %v1417_v63  ;;  %v1572_v4 = vadd.f32 %v5509_v57, %v1467_v0 }
 0x12d   : > { %v1070_v5 = vpop.f32.mrf.mxu0  ;;  %v1270_v6 = vpop.f32.mrf.mxu1 }
 0x12e   : > { %1620 = vst.msk [vmem:[#allocation3 + $0x80] sm:$0xff] %vm267_vm4, %v1522_v3  ;;  %1670 = vst.msk [vmem:[#allocation3 + $0x210] sm:$0xff] %vm267_vm4, %v1572_v4  ;;  %v1418_v7 = vmul.f32 %v5504_v55, %v1070_v5  ;;  %v1468_v8 = vmul.f32 %v5504_v55, %v1270_v6 }
 0x12f   : > { %v4300_v9 = vpop.f32.mrf.mxu0  ;;  %v4400_v10 = vpop.f32.mrf.mxu1 }
 0x130   : > { %v1523_v11 = vadd.f32 %v5509_v57, %v1418_v7  ;;  %v1573_v12 = vadd.f32 %v5509_v57, %v1468_v8 }
 0x131   : > { %v1075_v13 = vpop.f32.mrf.mxu0  ;;  %v1275_v14 = vpop.f32.mrf.mxu1 }
 0x132   : > { %1621 = vst.msk [vmem:[#allocation3 + $0x88] sm:$0xff] %vm267_vm4, %v1523_v11  ;;  %1671 = vst.msk [vmem:[#allocation3 + $0x218] sm:$0xff] %vm267_vm4, %v1573_v12  ;;  %v1419_v15 = vmul.f32 %v5504_v55, %v1075_v13  ;;  %v1469_v16 = vmul.f32 %v5504_v55, %v1275_v14 }
 0x133   : > { %v4303_v17 = vpop.f32.mrf.mxu0  ;;  %v4403_v18 = vpop.f32.mrf.mxu1 }
 0x134   : > { %v1524_v19 = vadd.f32 %v5509_v57, %v1419_v15  ;;  %v1574_v20 = vadd.f32 %v5509_v57, %v1469_v16 }
 0x135   : > { %v1078_v21 = vpop.f32.mrf.mxu0  ;;  %v1278_v22 = vpop.f32.mrf.mxu1 }
 0x136   : > { %1622 = vst.msk [vmem:[#allocation3 + $0x90] sm:$0xff] %vm267_vm4, %v1524_v19  ;;  %1672 = vst.msk [vmem:[#allocation3 + $0x220] sm:$0xff] %vm267_vm4, %v1574_v20  ;;  %v1420_v23 = vmul.f32 %v5504_v55, %v1078_v21  ;;  %v1470_v24 = vmul.f32 %v5504_v55, %v1278_v22 }
 0x137   : > { %v4304_v25 = vpop.f32.mrf.mxu0  ;;  %v4404_v26 = vpop.f32.mrf.mxu1 }
 0x138   : > { %v1525_v27 = vadd.f32 %v5509_v57, %v1420_v23  ;;  %v1575_v28 = vadd.f32 %v5509_v57, %v1470_v24 }
 0x139   : > { %v1083_v29 = vpop.f32.mrf.mxu0  ;;  %v1283_v30 = vpop.f32.mrf.mxu1 }
 0x13a   : > { %1623 = vst.msk [vmem:[#allocation3 + $0x98] sm:$0xff] %vm267_vm4, %v1525_v27  ;;  %1673 = vst.msk [vmem:[#allocation3 + $0x228] sm:$0xff] %vm267_vm4, %v1575_v28  ;;  %v1421_v31 = vmul.f32 %v5504_v55, %v1083_v29  ;;  %v1471_v32 = vmul.f32 %v5504_v55, %v1283_v30 }
 0x13b   : > { %v4307_v33 = vpop.f32.mrf.mxu0  ;;  %v4407_v34 = vpop.f32.mrf.mxu1 }
 0x13c   : > { %v1526_v35 = vadd.f32 %v5509_v57, %v1421_v31  ;;  %v1576_v36 = vadd.f32 %v5509_v57, %v1471_v32 }
 0x13d   : > { %v1086_v37 = vpop.f32.mrf.mxu0  ;;  %v1286_v38 = vpop.f32.mrf.mxu1 }
 0x13e   : > { %1624 = vst.msk [vmem:[#allocation3 + $0xa0] sm:$0xff] %vm267_vm4, %v1526_v35  ;;  %1674 = vst.msk [vmem:[#allocation3 + $0x230] sm:$0xff] %vm267_vm4, %v1576_v36  ;;  %v1422_v39 = vmul.f32 %v5504_v55, %v1086_v37  ;;  %v1472_v40 = vmul.f32 %v5504_v55, %v1286_v38 }
 0x13f   : > { %v4308_v41 = vpop.f32.mrf.mxu0  ;;  %v4408_v42 = vpop.f32.mrf.mxu1 }
 0x140   : > { %v1527_v43 = vadd.f32 %v5509_v57, %v1422_v39  ;;  %v1577_v44 = vadd.f32 %v5509_v57, %v1472_v40 }
 0x141   : > { %v1091_v45 = vpop.f32.mrf.mxu0  ;;  %v1291_v46 = vpop.f32.mrf.mxu1 }
 0x142   : > { %1625 = vst.msk [vmem:[#allocation3 + $0xa8] sm:$0xff] %vm267_vm4, %v1527_v43  ;;  %1675 = vst.msk [vmem:[#allocation3 + $0x238] sm:$0xff] %vm267_vm4, %v1577_v44  ;;  %v1423_v47 = vmul.f32 %v5504_v55, %v1091_v45  ;;  %v1473_v48 = vmul.f32 %v5504_v55, %v1291_v46 }
 0x143   : > { %v4311_v49 = vpop.f32.mrf.mxu0  ;;  %v4411_v50 = vpop.f32.mrf.mxu1 }
 0x144   : > { %v1528_v51 = vadd.f32 %v5509_v57, %v1423_v47  ;;  %v1578_v52 = vadd.f32 %v5509_v57, %v1473_v48 }
 0x145   : > { %v1094_v53 = vpop.f32.mrf.mxu0  ;;  %v1294_v54 = vpop.f32.mrf.mxu1 }
 0x146   : > { %1626 = vst.msk [vmem:[#allocation3 + $0xb0] sm:$0xff] %vm267_vm4, %v1528_v51  ;;  %1676 = vst.msk [vmem:[#allocation3 + $0x240] sm:$0xff] %vm267_vm4, %v1578_v52  ;;  %v1424_v56 = vmul.f32 %v5504_v55, %v1094_v53  ;;  %v1474_v58 = vmul.f32 %v5504_v55, %v1294_v54 }
 0x147   : > { %v4312_v59 = vpop.f32.mrf.mxu0  ;;  %v4412_v60 = vpop.f32.mrf.mxu1 }
 0x148   : > { %v1529_v61 = vadd.f32 %v5509_v57, %v1424_v56  ;;  %v1579_v62 = vadd.f32 %v5509_v57, %v1474_v58 }
 0x149   : > { %v1099_v63 = vpop.f32.mrf.mxu0  ;;  %v1299_v0 = vpop.f32.mrf.mxu1 }
 0x14a   : > { %1627 = vst.msk [vmem:[#allocation3 + $0xb8] sm:$0xff] %vm267_vm4, %v1529_v61  ;;  %1677 = vst.msk [vmem:[#allocation3 + $0x248] sm:$0xff] %vm267_vm4, %v1579_v62  ;;  %v1425_v1 = vmul.f32 %v5504_v55, %v1099_v63  ;;  %v1475_v2 = vmul.f32 %v5504_v55, %v1299_v0 }
 0x14b   : > { %v4315_v3 = vpop.f32.mrf.mxu0  ;;  %v4415_v4 = vpop.f32.mrf.mxu1 }
 0x14c   : > { %v1530_v5 = vadd.f32 %v5509_v57, %v1425_v1  ;;  %v1580_v6 = vadd.f32 %v5509_v57, %v1475_v2 }
 0x14d   : > { %v1102_v7 = vpop.f32.mrf.mxu0  ;;  %v1302_v8 = vpop.f32.mrf.mxu1 }
 0x14e   : > { %1628 = vst.msk [vmem:[#allocation3 + $0xc0] sm:$0xff] %vm267_vm4, %v1530_v5  ;;  %1678 = vst.msk [vmem:[#allocation3 + $0x250] sm:$0xff] %vm267_vm4, %v1580_v6  ;;  %v1426_v9 = vmul.f32 %v5504_v55, %v1102_v7  ;;  %v1476_v10 = vmul.f32 %v5504_v55, %v1302_v8 }
 0x14f   : > { %v4316_v11 = vpop.f32.mrf.mxu0  ;;  %v4416_v12 = vpop.f32.mrf.mxu1 }
 0x150   : > { %v1531_v13 = vadd.f32 %v5509_v57, %v1426_v9  ;;  %v1581_v14 = vadd.f32 %v5509_v57, %v1476_v10 }
 0x151   : > { %v1107_v15 = vpop.f32.mrf.mxu0  ;;  %v1307_v16 = vpop.f32.mrf.mxu1 }
 0x152   : > { %1629 = vst.msk [vmem:[#allocation3 + $0xc8] sm:$0xff] %vm267_vm4, %v1531_v13  ;;  %1679 = vst.msk [vmem:[#allocation3 + $0x258] sm:$0xff] %vm267_vm4, %v1581_v14  ;;  %v1427_v17 = vmul.f32 %v5504_v55, %v1107_v15  ;;  %v1477_v18 = vmul.f32 %v5504_v55, %v1307_v16 }
 0x153   : > { %v4319_v19 = vpop.f32.mrf.mxu0  ;;  %v4419_v20 = vpop.f32.mrf.mxu1 }
 0x154   : > { %v1532_v21 = vadd.f32 %v5509_v57, %v1427_v17  ;;  %v1582_v22 = vadd.f32 %v5509_v57, %v1477_v18 }
 0x155   : > { %v1110_v23 = vpop.f32.mrf.mxu0  ;;  %v1310_v24 = vpop.f32.mrf.mxu1 }
 0x156   : > { %1630 = vst.msk [vmem:[#allocation3 + $0xd0] sm:$0xff] %vm267_vm4, %v1532_v21  ;;  %1680 = vst.msk [vmem:[#allocation3 + $0x260] sm:$0xff] %vm267_vm4, %v1582_v22  ;;  %v1428_v25 = vmul.f32 %v5504_v55, %v1110_v23  ;;  %v1478_v26 = vmul.f32 %v5504_v55, %v1310_v24 }
 0x157   : > { %v4320_v27 = vpop.f32.mrf.mxu0  ;;  %v4420_v28 = vpop.f32.mrf.mxu1 }
 0x158   : > { %v1533_v29 = vadd.f32 %v5509_v57, %v1428_v25  ;;  %v1583_v30 = vadd.f32 %v5509_v57, %v1478_v26 }
 0x159   : > { %v1115_v31 = vpop.f32.mrf.mxu0  ;;  %v1315_v32 = vpop.f32.mrf.mxu1 }
 0x15a   : > { %1631 = vst.msk [vmem:[#allocation3 + $0xd8] sm:$0xff] %vm267_vm4, %v1533_v29  ;;  %1681 = vst.msk [vmem:[#allocation3 + $0x268] sm:$0xff] %vm267_vm4, %v1583_v30  ;;  %v1429_v33 = vmul.f32 %v5504_v55, %v1115_v31  ;;  %v1479_v34 = vmul.f32 %v5504_v55, %v1315_v32 }
 0x15b   : > { %v4323_v35 = vpop.f32.mrf.mxu0  ;;  %v4423_v36 = vpop.f32.mrf.mxu1 }
 0x15c   : > { %v1534_v37 = vadd.f32 %v5509_v57, %v1429_v33  ;;  %v1584_v38 = vadd.f32 %v5509_v57, %v1479_v34 }
 0x15d   : > { %v1118_v39 = vpop.f32.mrf.mxu0  ;;  %v1318_v40 = vpop.f32.mrf.mxu1 }
 0x15e   : > { %1632 = vst.msk [vmem:[#allocation3 + $0xe0] sm:$0xff] %vm267_vm4, %v1534_v37  ;;  %1682 = vst.msk [vmem:[#allocation3 + $0x270] sm:$0xff] %vm267_vm4, %v1584_v38  ;;  %v1430_v41 = vmul.f32 %v5504_v55, %v1118_v39  ;;  %v1480_v42 = vmul.f32 %v5504_v55, %v1318_v40 }
 0x15f   : > { %v4324_v43 = vpop.f32.mrf.mxu0  ;;  %v4424_v44 = vpop.f32.mrf.mxu1 }
 0x160   : > { %v1535_v45 = vadd.f32 %v5509_v57, %v1430_v41  ;;  %v1585_v46 = vadd.f32 %v5509_v57, %v1480_v42 }
 0x161   : > { %v1123_v47 = vpop.f32.mrf.mxu0  ;;  %v1323_v48 = vpop.f32.mrf.mxu1 }
 0x162   : > { %1633 = vst.msk [vmem:[#allocation3 + $0xe8] sm:$0xff] %vm267_vm4, %v1535_v45  ;;  %1683 = vst.msk [vmem:[#allocation3 + $0x278] sm:$0xff] %vm267_vm4, %v1585_v46  ;;  %v1431_v49 = vmul.f32 %v5504_v55, %v1123_v47  ;;  %v1481_v50 = vmul.f32 %v5504_v55, %v1323_v48 }
 0x163   : > { %v4327_v51 = vpop.f32.mrf.mxu0  ;;  %v4427_v52 = vpop.f32.mrf.mxu1 }
 0x164   : > { %v1536_v53 = vadd.f32 %v5509_v57, %v1431_v49  ;;  %v1586_v54 = vadd.f32 %v5509_v57, %v1481_v50 }
 0x165   : > { %v1126_v56 = vpop.f32.mrf.mxu0  ;;  %v1326_v58 = vpop.f32.mrf.mxu1 }
 0x166   : > { %1634 = vst.msk [vmem:[#allocation3 + $0xf0] sm:$0xff] %vm267_vm4, %v1536_v53  ;;  %1684 = vst.msk [vmem:[#allocation3 + $0x280] sm:$0xff] %vm267_vm4, %v1586_v54  ;;  %v1432_v59 = vmul.f32 %v5504_v55, %v1126_v56  ;;  %v1482_v60 = vmul.f32 %v5504_v55, %v1326_v58 }
 0x167   : > { %v4328_v61 = vpop.f32.mrf.mxu0  ;;  %v4428_v62 = vpop.f32.mrf.mxu1 }
 0x168   : > { %v1537_v63 = vadd.f32 %v5509_v57, %v1432_v59  ;;  %v1587_v0 = vadd.f32 %v5509_v57, %v1482_v60 }
 0x169   : > { %v1131_v1 = vpop.f32.mrf.mxu0  ;;  %v1331_v2 = vpop.f32.mrf.mxu1 }
 0x16a   : > { %1635 = vst.msk [vmem:[#allocation3 + $0xf8] sm:$0xff] %vm267_vm4, %v1537_v63  ;;  %1685 = vst.msk [vmem:[#allocation3 + $0x288] sm:$0xff] %vm267_vm4, %v1587_v0  ;;  %v1433_v3 = vmul.f32 %v5504_v55, %v1131_v1  ;;  %v1483_v4 = vmul.f32 %v5504_v55, %v1331_v2 }
 0x16b   : > { %v4331_v5 = vpop.f32.mrf.mxu0  ;;  %v4431_v6 = vpop.f32.mrf.mxu1 }
 0x16c   : > { %v1538_v7 = vadd.f32 %v5509_v57, %v1433_v3  ;;  %v1588_v8 = vadd.f32 %v5509_v57, %v1483_v4 }
 0x16d   : > { %v1134_v9 = vpop.f32.mrf.mxu0  ;;  %v1334_v10 = vpop.f32.mrf.mxu1 }
 0x16e   : > { %1636 = vst.msk [vmem:[#allocation3 + $0x100] sm:$0xff] %vm267_vm4, %v1538_v7  ;;  %1686 = vst.msk [vmem:[#allocation3 + $0x290] sm:$0xff] %vm267_vm4, %v1588_v8  ;;  %v1434_v11 = vmul.f32 %v5504_v55, %v1134_v9  ;;  %v1484_v12 = vmul.f32 %v5504_v55, %v1334_v10 }
 0x16f   : > { %v4332_v13 = vpop.f32.mrf.mxu0  ;;  %v4432_v14 = vpop.f32.mrf.mxu1 }
 0x170   : > { %v1539_v15 = vadd.f32 %v5509_v57, %v1434_v11  ;;  %v1589_v16 = vadd.f32 %v5509_v57, %v1484_v12 }
 0x171   : > { %v1139_v17 = vpop.f32.mrf.mxu0  ;;  %v1339_v18 = vpop.f32.mrf.mxu1 }
 0x172   : > { %1637 = vst.msk [vmem:[#allocation3 + $0x108] sm:$0xff] %vm267_vm4, %v1539_v15  ;;  %1687 = vst.msk [vmem:[#allocation3 + $0x298] sm:$0xff] %vm267_vm4, %v1589_v16  ;;  %v1435_v19 = vmul.f32 %v5504_v55, %v1139_v17  ;;  %v1485_v20 = vmul.f32 %v5504_v55, %v1339_v18 }
 0x173   : > { %v4335_v21 = vpop.f32.mrf.mxu0  ;;  %v4435_v22 = vpop.f32.mrf.mxu1 }
 0x174   : > { %v1540_v23 = vadd.f32 %v5509_v57, %v1435_v19  ;;  %v1590_v24 = vadd.f32 %v5509_v57, %v1485_v20 }
 0x175   : > { %v1142_v25 = vpop.f32.mrf.mxu0  ;;  %v1342_v26 = vpop.f32.mrf.mxu1 }
 0x176   : > { %1638 = vst.msk [vmem:[#allocation3 + $0x110] sm:$0xff] %vm267_vm4, %v1540_v23  ;;  %1688 = vst.msk [vmem:[#allocation3 + $0x2a0] sm:$0xff] %vm267_vm4, %v1590_v24  ;;  %v1436_v27 = vmul.f32 %v5504_v55, %v1142_v25  ;;  %v1486_v28 = vmul.f32 %v5504_v55, %v1342_v26 }
 0x177   : > { %v4336_v29 = vpop.f32.mrf.mxu0  ;;  %v4436_v30 = vpop.f32.mrf.mxu1 }
 0x178   : > { %v1541_v31 = vadd.f32 %v5509_v57, %v1436_v27  ;;  %v1591_v32 = vadd.f32 %v5509_v57, %v1486_v28 }
 0x179   : > { %v1147_v33 = vpop.f32.mrf.mxu0  ;;  %v1347_v34 = vpop.f32.mrf.mxu1 }
 0x17a   : > { %1639 = vst.msk [vmem:[#allocation3 + $0x118] sm:$0xff] %vm267_vm4, %v1541_v31  ;;  %1689 = vst.msk [vmem:[#allocation3 + $0x2a8] sm:$0xff] %vm267_vm4, %v1591_v32  ;;  %v1437_v35 = vmul.f32 %v5504_v55, %v1147_v33  ;;  %v1487_v36 = vmul.f32 %v5504_v55, %v1347_v34 }
 0x17b   : > { %v4339_v37 = vpop.f32.mrf.mxu0  ;;  %v4439_v38 = vpop.f32.mrf.mxu1 }
 0x17c   : > { %v1542_v39 = vadd.f32 %v5509_v57, %v1437_v35  ;;  %v1592_v40 = vadd.f32 %v5509_v57, %v1487_v36 }
 0x17d   : > { %v1150_v41 = vpop.f32.mrf.mxu0  ;;  %v1350_v42 = vpop.f32.mrf.mxu1 }
 0x17e   : > { %1640 = vst.msk [vmem:[#allocation3 + $0x120] sm:$0xff] %vm267_vm4, %v1542_v39  ;;  %1690 = vst.msk [vmem:[#allocation3 + $0x2b0] sm:$0xff] %vm267_vm4, %v1592_v40  ;;  %v1438_v43 = vmul.f32 %v5504_v55, %v1150_v41  ;;  %v1488_v44 = vmul.f32 %v5504_v55, %v1350_v42 }
 0x17f   : > { %v4340_v45 = vpop.f32.mrf.mxu0  ;;  %v4440_v46 = vpop.f32.mrf.mxu1 }
 0x180   : > { %v1543_v47 = vadd.f32 %v5509_v57, %v1438_v43  ;;  %v1593_v48 = vadd.f32 %v5509_v57, %v1488_v44 }
 0x181   : > { %v1155_v49 = vpop.f32.mrf.mxu0  ;;  %v1355_v50 = vpop.f32.mrf.mxu1 }
 0x182   : > { %1641 = vst.msk [vmem:[#allocation3 + $0x128] sm:$0xff] %vm267_vm4, %v1543_v47  ;;  %1691 = vst.msk [vmem:[#allocation3 + $0x2b8] sm:$0xff] %vm267_vm4, %v1593_v48  ;;  %v1439_v51 = vmul.f32 %v5504_v55, %v1155_v49  ;;  %v1489_v52 = vmul.f32 %v5504_v55, %v1355_v50 }
 0x183   : > { %v4343_v53 = vpop.f32.mrf.mxu0  ;;  %v4443_v54 = vpop.f32.mrf.mxu1 }
 0x184   : > { %v1544_v56 = vadd.f32 %v5509_v57, %v1439_v51  ;;  %v1594_v58 = vadd.f32 %v5509_v57, %v1489_v52 }
 0x185   : > { %v1158_v59 = vpop.f32.mrf.mxu0  ;;  %v1358_v60 = vpop.f32.mrf.mxu1 }
 0x186   : > { %1642 = vst.msk [vmem:[#allocation3 + $0x130] sm:$0xff] %vm267_vm4, %v1544_v56  ;;  %1692 = vst.msk [vmem:[#allocation3 + $0x2c0] sm:$0xff] %vm267_vm4, %v1594_v58  ;;  %v1440_v61 = vmul.f32 %v5504_v55, %v1158_v59  ;;  %v1490_v62 = vmul.f32 %v5504_v55, %v1358_v60 }
 0x187   : > { %v4344_v63 = vpop.f32.mrf.mxu0  ;;  %v4444_v0 = vpop.f32.mrf.mxu1 }
 0x188   : > { %v1545_v1 = vadd.f32 %v5509_v57, %v1440_v61  ;;  %v1595_v2 = vadd.f32 %v5509_v57, %v1490_v62 }
 0x189   : > { %v1163_v3 = vpop.f32.mrf.mxu0  ;;  %v1363_v4 = vpop.f32.mrf.mxu1 }
 0x18a   : > { %1643 = vst.msk [vmem:[#allocation3 + $0x138] sm:$0xff] %vm267_vm4, %v1545_v1  ;;  %1693 = vst.msk [vmem:[#allocation3 + $0x2c8] sm:$0xff] %vm267_vm4, %v1595_v2  ;;  %v1441_v5 = vmul.f32 %v5504_v55, %v1163_v3  ;;  %v1491_v6 = vmul.f32 %v5504_v55, %v1363_v4 }
 0x18b   : > { %v4347_v7 = vpop.f32.mrf.mxu0  ;;  %v4447_v8 = vpop.f32.mrf.mxu1 }
 0x18c   : > { %v1546_v9 = vadd.f32 %v5509_v57, %v1441_v5  ;;  %v1596_v10 = vadd.f32 %v5509_v57, %v1491_v6 }
 0x18d   : > { %v1166_v11 = vpop.f32.mrf.mxu0  ;;  %v1366_v12 = vpop.f32.mrf.mxu1 }
 0x18e   : > { %1644 = vst.msk [vmem:[#allocation3 + $0x140] sm:$0xff] %vm267_vm4, %v1546_v9  ;;  %1694 = vst.msk [vmem:[#allocation3 + $0x2d0] sm:$0xff] %vm267_vm4, %v1596_v10  ;;  %v1442_v13 = vmul.f32 %v5504_v55, %v1166_v11  ;;  %v1492_v14 = vmul.f32 %v5504_v55, %v1366_v12 }
 0x18f   : > { %v4348_v15 = vpop.f32.mrf.mxu0  ;;  %v4448_v16 = vpop.f32.mrf.mxu1 }
 0x190   : > { %v1547_v17 = vadd.f32 %v5509_v57, %v1442_v13  ;;  %v1597_v18 = vadd.f32 %v5509_v57, %v1492_v14 }
 0x191   : > { %v1171_v19 = vpop.f32.mrf.mxu0  ;;  %v1371_v20 = vpop.f32.mrf.mxu1 }
 0x192   : > { %1645 = vst.msk [vmem:[#allocation3 + $0x148] sm:$0xff] %vm267_vm4, %v1547_v17  ;;  %1695 = vst.msk [vmem:[#allocation3 + $0x2d8] sm:$0xff] %vm267_vm4, %v1597_v18  ;;  %v1443_v21 = vmul.f32 %v5504_v55, %v1171_v19  ;;  %v1493_v22 = vmul.f32 %v5504_v55, %v1371_v20 }
 0x193   : > { %v4351_v23 = vpop.f32.mrf.mxu0  ;;  %v4451_v24 = vpop.f32.mrf.mxu1 }
 0x194   : > { %v1548_v25 = vadd.f32 %v5509_v57, %v1443_v21  ;;  %v1598_v26 = vadd.f32 %v5509_v57, %v1493_v22 }
 0x195   : > { %v1174_v27 = vpop.f32.mrf.mxu0  ;;  %v1374_v28 = vpop.f32.mrf.mxu1 }
 0x196   : > { %1646 = vst.msk [vmem:[#allocation3 + $0x150] sm:$0xff] %vm267_vm4, %v1548_v25  ;;  %1696 = vst.msk [vmem:[#allocation3 + $0x2e0] sm:$0xff] %vm267_vm4, %v1598_v26  ;;  %v1444_v29 = vmul.f32 %v5504_v55, %v1174_v27  ;;  %v1494_v30 = vmul.f32 %v5504_v55, %v1374_v28 }
 0x197   : > { %v4352_v31 = vpop.f32.mrf.mxu0  ;;  %v4452_v32 = vpop.f32.mrf.mxu1 }
 0x198   : > { %v1549_v33 = vadd.f32 %v5509_v57, %v1444_v29  ;;  %v1599_v34 = vadd.f32 %v5509_v57, %v1494_v30 }
 0x199   : > { %v1179_v35 = vpop.f32.mrf.mxu0  ;;  %v1379_v36 = vpop.f32.mrf.mxu1 }
 0x19a   : > { %1647 = vst.msk [vmem:[#allocation3 + $0x158] sm:$0xff] %vm267_vm4, %v1549_v33  ;;  %1697 = vst.msk [vmem:[#allocation3 + $0x2e8] sm:$0xff] %vm267_vm4, %v1599_v34  ;;  %v1445_v37 = vmul.f32 %v5504_v55, %v1179_v35  ;;  %v1495_v38 = vmul.f32 %v5504_v55, %v1379_v36 }
 0x19b   : > { %v4355_v39 = vpop.f32.mrf.mxu0  ;;  %v4455_v40 = vpop.f32.mrf.mxu1 }
 0x19c   : > { %v1550_v41 = vadd.f32 %v5509_v57, %v1445_v37  ;;  %v1600_v42 = vadd.f32 %v5509_v57, %v1495_v38 }
 0x19d   : > { %v1182_v43 = vpop.f32.mrf.mxu0  ;;  %v1382_v44 = vpop.f32.mrf.mxu1 }
 0x19e   : > { %1648 = vst.msk [vmem:[#allocation3 + $0x160] sm:$0xff] %vm267_vm4, %v1550_v41  ;;  %1698 = vst.msk [vmem:[#allocation3 + $0x2f0] sm:$0xff] %vm267_vm4, %v1600_v42  ;;  %v1446_v45 = vmul.f32 %v5504_v55, %v1182_v43  ;;  %v1496_v46 = vmul.f32 %v5504_v55, %v1382_v44 }
 0x19f   : > { %v4356_v47 = vpop.f32.mrf.mxu0  ;;  %v4456_v48 = vpop.f32.mrf.mxu1 }
 0x1a0   : > { %v1551_v49 = vadd.f32 %v5509_v57, %v1446_v45  ;;  %v1601_v50 = vadd.f32 %v5509_v57, %v1496_v46 }
 0x1a1   : > { %v1187_v51 = vpop.f32.mrf.mxu0  ;;  %v1387_v52 = vpop.f32.mrf.mxu1 }
 0x1a2   : > { %1649 = vst.msk [vmem:[#allocation3 + $0x168] sm:$0xff] %vm267_vm4, %v1551_v49  ;;  %1699 = vst.msk [vmem:[#allocation3 + $0x2f8] sm:$0xff] %vm267_vm4, %v1601_v50  ;;  %v1447_v53 = vmul.f32 %v5504_v55, %v1187_v51  ;;  %v1497_v54 = vmul.f32 %v5504_v55, %v1387_v52 }
 0x1a3   : > { %v4359_v56 = vpop.f32.mrf.mxu0  ;;  %v4459_v58 = vpop.f32.mrf.mxu1 }
 0x1a4   : > { %v1552_v59 = vadd.f32 %v5509_v57, %v1447_v53  ;;  %v1602_v60 = vadd.f32 %v5509_v57, %v1497_v54 }
 0x1a5   : > { %v1190_v61 = vpop.f32.mrf.mxu0  ;;  %v1390_v62 = vpop.f32.mrf.mxu1 }
 0x1a6   : > { %1650 = vst.msk [vmem:[#allocation3 + $0x170] sm:$0xff] %vm267_vm4, %v1552_v59  ;;  %1700 = vst.msk [vmem:[#allocation3 + $0x300] sm:$0xff] %vm267_vm4, %v1602_v60  ;;  %v1448_v63 = vmul.f32 %v5504_v55, %v1190_v61  ;;  %v1498_v0 = vmul.f32 %v5504_v55, %v1390_v62 }
 0x1a7   : > { %v4360_v1 = vpop.f32.mrf.mxu0  ;;  %v4460_v2 = vpop.f32.mrf.mxu1 }
 0x1a8   : > { %v1553_v3 = vadd.f32 %v5509_v57, %v1448_v63  ;;  %v1603_v4 = vadd.f32 %v5509_v57, %v1498_v0 }
 0x1a9   : > { %v1195_v5 = vpop.f32.mrf.mxu0 }
 0x1aa   : > { %1651 = vst.msk [vmem:[#allocation3 + $0x178] sm:$0xff] %vm267_vm4, %v1553_v3  ;;  %1701 = vst.msk [vmem:[#allocation3 + $0x308] sm:$0xff] %vm267_vm4, %v1603_v4  ;;  %v1449_v6 = vmul.f32 %v5504_v55, %v1195_v5 }
 0x1ab   : > { %v4363_v7 = vpop.f32.mrf.mxu0 }
 0x1ac   : > { %v1554_v8 = vadd.f32 %v5509_v57, %v1449_v6 }
 0x1ad   : > { %v1198_v9 = vpop.f32.mrf.mxu0 }
 0x1ae   : > { %1652 = vst.msk [vmem:[#allocation3 + $0x180] sm:$0xff] %vm267_vm4, %v1554_v8  ;;  %v1450_v10 = vmul.f32 %v5504_v55, %v1198_v9 }
 0x1af   : > { %v4364_v11 = vpop.f32.mrf.mxu0 }
 0x1b0   : > { %v1555_v12 = vadd.f32 %v5509_v57, %v1450_v10 }
 0x1b2   : > { %1653 = vst.msk [vmem:[#allocation3 + $0x188] sm:$0xff] %vm267_vm4, %v1555_v12 }
 0x1b3 PF: > { %v1702_v13 = vld [vmem:[#allocation3] sm:$0xff]  ;;  %v1800_v14 = vld [vmem:[#allocation2] sm:$0xff]  ;;  %v1703_v15 = vld [vmem:[#allocation3 + $0x8] sm:$0xff]  ;;  %vm2486_vm6 = vcmask 31744   ;;  %v4689_v26 = vmov 0.0   ;;  %p4110_p1 = scmp.ne.s32.totalorder %s4668_s21, 3 }
 0x1b4   : > { %v1898_v16 = vadd.f32 %v1800_v14, %v1702_v13  ;;  %v1801_v17 = vld [vmem:[#allocation2 + $0x8] sm:$0xff]  ;;  %v1704_v18 = vld [vmem:[#allocation3 + $0x10] sm:$0xff]  ;;  %v1802_v19 = vld [vmem:[#allocation2 + $0x10] sm:$0xff] }
 0x1b5   : > { %v1899_v20 = vadd.f32 %v1801_v17, %v1703_v15  ;;  %v1900_v21 = vadd.f32 %v1802_v19, %v1704_v18  ;;  %v1705_v22 = vld [vmem:[#allocation3 + $0x18] sm:$0xff]  ;;  %v1803_v23 = vld [vmem:[#allocation2 + $0x18] sm:$0xff]  ;;  %v1706_v24 = vld [vmem:[#allocation3 + $0x20] sm:$0xff] }
 0x1b6   : > { %vm1996_vm5 = vcmp.ge.f32.partialorder %v1898_v16, 1.0  ;;  %v1901_v55 = vadd.f32 %v1803_v23, %v1705_v22  ;;  %v1804_v25 = vld [vmem:[#allocation2 + $0x20] sm:$0xff]  ;;  %v1707_v57 = vld [vmem:[#allocation3 + $0x28] sm:$0xff]  ;;  %v1805_v29 = vld [vmem:[#allocation2 + $0x28] sm:$0xff] }
 0x1b7   : > { %v5807_v27 = vsel %vm1996_vm5, 1.0, %v4689_v26  ;;  %vm1997_vm7 = vcmp.ge.f32.partialorder %v1899_v20, 1.0  ;;  %vm1998_vm8 = vcmp.ge.f32.partialorder %v1900_v21, 1.0  ;;  %v1902_v28 = vadd.f32 %v1804_v25, %v1706_v24  ;;  %v1708_v30 = vld [vmem:[#allocation3 + $0x30] sm:$0xff]  ;;  %v1806_v31 = vld [vmem:[#allocation2 + $0x30] sm:$0xff]  ;;  %v1709_v35 = vld [vmem:[#allocation3 + $0x38] sm:$0xff] }
 0x1b8   : > { %v2290_v32 = vsub.f32 1.0, %v5807_v27  ;;  %v5811_v33 = vsel %vm1997_vm7, 1.0, %v4689_v26  ;;  %v5814_v34 = vsel %vm1998_vm8, 1.0, %v4689_v26  ;;  %vm1999_vm9 = vcmp.ge.f32.partialorder %v1901_v55, 1.0  ;;  %v1807_v36 = vld [vmem:[#allocation2 + $0x38] sm:$0xff]  ;;  %v1710_v40 = vld [vmem:[#allocation3 + $0x40] sm:$0xff] }
 0x1b9   : > { %v2291_v37 = vsub.f32 1.0, %v5811_v33  ;;  %v2292_v38 = vsub.f32 1.0, %v5814_v34  ;;  %v5819_v39 = vsel %vm1999_vm9, 1.0, %v4689_v26  ;;  %vm2000_vm10 = vcmp.ge.f32.partialorder %v1902_v28, 1.0  ;;  %v1808_v41 = vld [vmem:[#allocation2 + $0x40] sm:$0xff]  ;;  %v1711_v46 = vld [vmem:[#allocation3 + $0x48] sm:$0xff] }
 0x1ba   : > { %v2388_v42 = vmul.f32 %v2290_v32, %v1898_v16  ;;  %v2293_v43 = vsub.f32 1.0, %v5819_v39  ;;  %v5823_v44 = vsel %vm2000_vm10, 1.0, %v4689_v26  ;;  %v1903_v45 = vadd.f32 %v1805_v29, %v1707_v57  ;;  %v1809_v47 = vld [vmem:[#allocation2 + $0x48] sm:$0xff]  ;;  %v1712_v56 = vld [vmem:[#allocation3 + $0x50] sm:$0xff]  ;;  %v1810_v61 = vld [vmem:[#allocation2 + $0x50] sm:$0xff] }
 0x1bb   : > { %v2389_v48 = vmul.f32 %v2291_v37, %v1899_v20  ;;  %v2390_v49 = vmul.f32 %v2292_v38, %v1900_v21  ;;  %v2294_v50 = vsub.f32 1.0, %v5823_v44  ;;  %v1904_v51 = vadd.f32 %v1806_v31, %v1708_v30  ;;  %v1713_v62 = vld [vmem:[#allocation3 + $0x58] sm:$0xff]  ;;  %v1811_v63 = vld [vmem:[#allocation2 + $0x58] sm:$0xff]  ;;  %v1714_v2 = vld [vmem:[#allocation3 + $0x60] sm:$0xff] }
 0x1bc   : > { %2487 = vst.msk [vmem:[#allocation2] sm:$0xff] %vm2486_vm6, %v2388_v42  ;;  %v2391_v52 = vmul.f32 %v2293_v43, %v1901_v55  ;;  %vm2001_vm11 = vcmp.ge.f32.partialorder %v1903_v45, 1.0  ;;  %v1905_v53 = vadd.f32 %v1807_v36, %v1709_v35  ;;  %v1906_v54 = vadd.f32 %v1808_v41, %v1710_v40  ;;  %v1812_v3 = vld [vmem:[#allocation2 + $0x60] sm:$0xff]  ;;  %v1715_v7 = vld [vmem:[#allocation3 + $0x68] sm:$0xff]  ;;  %v1813_v8 = vld [vmem:[#allocation2 + $0x68] sm:$0xff] }
 0x1bd   : > { %2488 = vst.msk [vmem:[#allocation2 + $0x8] sm:$0xff] %vm2486_vm6, %v2389_v48  ;;  %2489 = vst.msk [vmem:[#allocation2 + $0x10] sm:$0xff] %vm2486_vm6, %v2390_v49  ;;  %v2392_v58 = vmul.f32 %v2294_v50, %v1902_v28  ;;  %v5830_v59 = vsel %vm2001_vm11, 1.0, %v4689_v26  ;;  %vm2002_vm12 = vcmp.ge.f32.partialorder %v1904_v51, 1.0  ;;  %v1907_v60 = vadd.f32 %v1809_v47, %v1711_v46  ;;  %v1716_v13 = vld [vmem:[#allocation3 + $0x70] sm:$0xff]  ;;  %v1814_v14 = vld [vmem:[#allocation2 + $0x70] sm:$0xff] }
 0x1be   : > { %2490 = vst.msk [vmem:[#allocation2 + $0x18] sm:$0xff] %vm2486_vm6, %v2391_v52  ;;  %v2295_v0 = vsub.f32 1.0, %v5830_v59  ;;  %v5835_v1 = vsel %vm2002_vm12, 1.0, %v4689_v26  ;;  %vm2003_vm13 = vcmp.ge.f32.partialorder %v1905_v53, 1.0  ;;  %vm2004_vm14 = vcmp.ge.f32.partialorder %v1906_v54, 1.0  ;;  %v1717_v55 = vld [vmem:[#allocation3 + $0x78] sm:$0xff] }
 0x1bf   : > { %2491 = vst.msk [vmem:[#allocation2 + $0x20] sm:$0xff] %vm2486_vm6, %v2392_v58  ;;  %v2296_v4 = vsub.f32 1.0, %v5835_v1  ;;  %v5840_v5 = vsel %vm2003_vm13, 1.0, %v4689_v26  ;;  %v5843_v6 = vsel %vm2004_vm14, 1.0, %v4689_v26  ;;  %vm2005_vm15 = vcmp.ge.f32.partialorder %v1907_v60, 1.0  ;;  %v1815_v25 = vld [vmem:[#allocation2 + $0x78] sm:$0xff] }
 0x1c0   : > { %v2393_v9 = vmul.f32 %v2295_v0, %v1903_v45  ;;  %v2297_v10 = vsub.f32 1.0, %v5840_v5  ;;  %v2298_v11 = vsub.f32 1.0, %v5843_v6  ;;  %v5848_v12 = vsel %vm2005_vm15, 1.0, %v4689_v26  ;;  %v1718_v29 = vld [vmem:[#allocation3 + $0x80] sm:$0xff]  ;;  %v1816_v30 = vld [vmem:[#allocation2 + $0x80] sm:$0xff]  ;;  %v1719_v37 = vld [vmem:[#allocation3 + $0x88] sm:$0xff] }
 0x1c1   : > { %v2394_v15 = vmul.f32 %v2296_v4, %v1904_v51  ;;  %v2299_v16 = vsub.f32 1.0, %v5848_v12  ;;  %v1908_v17 = vadd.f32 %v1810_v61, %v1712_v56  ;;  %v1909_v18 = vadd.f32 %v1811_v63, %v1713_v62  ;;  %v1817_v42 = vld [vmem:[#allocation2 + $0x88] sm:$0xff]  ;;  %v1720_v43 = vld [vmem:[#allocation3 + $0x90] sm:$0xff]  ;;  %v1818_v45 = vld [vmem:[#allocation2 + $0x90] sm:$0xff] }
 0x1c2   : > { %2492 = vst.msk [vmem:[#allocation2 + $0x28] sm:$0xff] %vm2486_vm6, %v2393_v9  ;;  %v2395_v19 = vmul.f32 %v2297_v10, %v1905_v53  ;;  %v2396_v20 = vmul.f32 %v2298_v11, %v1906_v54  ;;  %v1910_v21 = vadd.f32 %v1812_v3, %v1714_v2  ;;  %v1911_v22 = vadd.f32 %v1813_v8, %v1715_v7  ;;  %v1721_v50 = vld [vmem:[#allocation3 + $0x98] sm:$0xff]  ;;  %v1819_v51 = vld [vmem:[#allocation2 + $0x98] sm:$0xff]  ;;  %v1722_v56 = vld [vmem:[#allocation3 + $0xa0] sm:$0xff] }
 0x1c3   : > { %2493 = vst.msk [vmem:[#allocation2 + $0x30] sm:$0xff] %vm2486_vm6, %v2394_v15  ;;  %v2397_v23 = vmul.f32 %v2299_v16, %v1907_v60  ;;  %vm2006_vm0 = vcmp.ge.f32.partialorder %v1908_v17, 1.0  ;;  %vm2007_vm1 = vcmp.ge.f32.partialorder %v1909_v18, 1.0  ;;  %v1912_v24 = vadd.f32 %v1814_v14, %v1716_v13  ;;  %v1820_v58 = vld [vmem:[#allocation2 + $0xa0] sm:$0xff]  ;;  %v1723_v4 = vld [vmem:[#allocation3 + $0xa8] sm:$0xff]  ;;  %v1821_v9 = vld [vmem:[#allocation2 + $0xa8] sm:$0xff] }
 0x1c4   : > { %2494 = vst.msk [vmem:[#allocation2 + $0x38] sm:$0xff] %vm2486_vm6, %v2395_v19  ;;  %2495 = vst.msk [vmem:[#allocation2 + $0x40] sm:$0xff] %vm2486_vm6, %v2396_v20  ;;  %v5856_v57 = vsel %vm2006_vm0, 1.0, %v4689_v26  ;;  %v5859_v28 = vsel %vm2007_vm1, 1.0, %v4689_v26  ;;  %vm2008_vm2 = vcmp.ge.f32.partialorder %v1910_v21, 1.0  ;;  %vm2009_vm3 = vcmp.ge.f32.partialorder %v1911_v22, 1.0 }
 0x1c5   : > { %2496 = vst.msk [vmem:[#allocation2 + $0x48] sm:$0xff] %vm2486_vm6, %v2397_v23  ;;  %v2300_v31 = vsub.f32 1.0, %v5856_v57  ;;  %v2301_v32 = vsub.f32 1.0, %v5859_v28  ;;  %v5865_v35 = vsel %vm2008_vm2, 1.0, %v4689_v26  ;;  %v5868_v36 = vsel %vm2009_vm3, 1.0, %v4689_v26  ;;  %v1724_v10 = vld [vmem:[#allocation3 + $0xb0] sm:$0xff] }
 0x1c6   : > { %v2302_v38 = vsub.f32 1.0, %v5865_v35  ;;  %v2303_v40 = vsub.f32 1.0, %v5868_v36  ;;  %vm2010_vm4 = vcmp.ge.f32.partialorder %v1912_v24, 1.0  ;;  %v1913_v41 = vadd.f32 %v1815_v25, %v1717_v55  ;;  %v1822_v11 = vld [vmem:[#allocation2 + $0xb0] sm:$0xff]  ;;  %v1725_v16 = vld [vmem:[#allocation3 + $0xb8] sm:$0xff]  ;;  %v1824_v25 = vld [vmem:[#allocation2 + $0xc0] sm:$0xff] }
 0x1c7   : > { %v2398_v46 = vmul.f32 %v2300_v31, %v1908_v17  ;;  %v2399_v47 = vmul.f32 %v2301_v32, %v1909_v18  ;;  %v5873_v48 = vsel %vm2010_vm4, 1.0, %v4689_v26  ;;  %v1914_v49 = vadd.f32 %v1816_v30, %v1718_v29  ;;  %v1823_v17 = vld [vmem:[#allocation2 + $0xb8] sm:$0xff]  ;;  %v1726_v55 = vld [vmem:[#allocation3 + $0xc0] sm:$0xff] }
 0x1c8   : > { %v2400_v52 = vmul.f32 %v2302_v38, %v1910_v21  ;;  %v2401_v53 = vmul.f32 %v2303_v40, %v1911_v22  ;;  %v2304_v54 = vsub.f32 1.0, %v5873_v48  ;;  %vm2011_vm5 = vcmp.ge.f32.partialorder %v1913_v41, 1.0 }
 0x1c9   : > { %2497 = vst.msk [vmem:[#allocation2 + $0x50] sm:$0xff] %vm2486_vm6, %v2398_v46  ;;  %2498 = vst.msk [vmem:[#allocation2 + $0x58] sm:$0xff] %vm2486_vm6, %v2399_v47  ;;  %v5879_v60 = vsel %vm2011_vm5, 1.0, %v4689_v26  ;;  %vm2012_vm7 = vcmp.ge.f32.partialorder %v1914_v49, 1.0  ;;  %v1915_v61 = vadd.f32 %v1817_v42, %v1719_v37  ;;  %v1916_v62 = vadd.f32 %v1818_v45, %v1720_v43  ;;  %v1727_v37 = vld [vmem:[#allocation3 + $0xc8] sm:$0xff]  ;;  %v1728_v42 = vld [vmem:[#allocation3 + $0xd0] sm:$0xff] }
 0x1ca   : > { %2499 = vst.msk [vmem:[#allocation2 + $0x60] sm:$0xff] %vm2486_vm6, %v2400_v52  ;;  %2500 = vst.msk [vmem:[#allocation2 + $0x68] sm:$0xff] %vm2486_vm6, %v2401_v53  ;;  %v2402_v63 = vmul.f32 %v2304_v54, %v1912_v24  ;;  %v2305_v0 = vsub.f32 1.0, %v5879_v60  ;;  %v5885_v2 = vsel %vm2012_vm7, 1.0, %v4689_v26  ;;  %v1917_v3 = vadd.f32 %v1819_v51, %v1721_v50  ;;  %v1826_v43 = vld [vmem:[#allocation2 + $0xd0] sm:$0xff]  ;;  %v1827_v50 = vld [vmem:[#allocation2 + $0xd8] sm:$0xff] }
 0x1cb   : > { %v2306_v7 = vsub.f32 1.0, %v5885_v2  ;;  %vm2013_vm8 = vcmp.ge.f32.partialorder %v1915_v61, 1.0  ;;  %vm2014_vm9 = vcmp.ge.f32.partialorder %v1916_v62, 1.0  ;;  %v1918_v8 = vadd.f32 %v1820_v58, %v1722_v56 }
 0x1cc   : > { %2501 = vst.msk [vmem:[#allocation2 + $0x70] sm:$0xff] %vm2486_vm6, %v2402_v63  ;;  %v2403_v13 = vmul.f32 %v2305_v0, %v1913_v41  ;;  %v5890_v14 = vsel %vm2013_vm8, 1.0, %v4689_v26  ;;  %v5893_v15 = vsel %vm2014_vm9, 1.0, %v4689_v26  ;;  %vm2015_vm10 = vcmp.ge.f32.partialorder %v1917_v3, 1.0  ;;  %v1825_v41 = vld [vmem:[#allocation2 + $0xc8] sm:$0xff]  ;;  %v1828_v63 = vld [vmem:[#allocation2 + $0xe0] sm:$0xff] }
 0x1cd   : > { %v2404_v18 = vmul.f32 %v2306_v7, %v1914_v49  ;;  %v2307_v19 = vsub.f32 1.0, %v5890_v14  ;;  %v2308_v20 = vsub.f32 1.0, %v5893_v15  ;;  %v5898_v21 = vsel %vm2015_vm10, 1.0, %v4689_v26  ;;  %v1729_v49 = vld [vmem:[#allocation3 + $0xd8] sm:$0xff] }
 0x1ce   : > { %2502 = vst.msk [vmem:[#allocation2 + $0x78] sm:$0xff] %vm2486_vm6, %v2403_v13  ;;  %v2309_v22 = vsub.f32 1.0, %v5898_v21  ;;  %vm2016_vm11 = vcmp.ge.f32.partialorder %v1918_v8, 1.0  ;;  %v1919_v23 = vadd.f32 %v1821_v9, %v1723_v4  ;;  %v1920_v24 = vadd.f32 %v1822_v11, %v1724_v10  ;;  %v1829_v11 = vld [vmem:[#allocation2 + $0xe8] sm:$0xff]  ;;  %v1732_v13 = vld [vmem:[#allocation3 + $0xf0] sm:$0xff] }
 0x1cf   : > { %2503 = vst.msk [vmem:[#allocation2 + $0x80] sm:$0xff] %vm2486_vm6, %v2404_v18  ;;  %v2405_v29 = vmul.f32 %v2307_v19, %v1915_v61  ;;  %v2406_v30 = vmul.f32 %v2308_v20, %v1916_v62  ;;  %v5904_v31 = vsel %vm2016_vm11, 1.0, %v4689_v26  ;;  %v1921_v32 = vadd.f32 %v1823_v17, %v1725_v16  ;;  %v1730_v62 = vld [vmem:[#allocation3 + $0xe0] sm:$0xff]  ;;  %v1733_v20 = vld [vmem:[#allocation3 + $0xf8] sm:$0xff] }
 0x1d0   : > { %v2407_v38 = vmul.f32 %v2309_v22, %v1917_v3  ;;  %v2310_v40 = vsub.f32 1.0, %v5904_v31  ;;  %vm2017_vm12 = vcmp.ge.f32.partialorder %v1919_v23, 1.0  ;;  %vm2018_vm13 = vcmp.ge.f32.partialorder %v1920_v24, 1.0  ;;  %v1830_v16 = vld [vmem:[#allocation2 + $0xf0] sm:$0xff]  ;;  %v1831_v22 = vld [vmem:[#allocation2 + $0xf8] sm:$0xff] }
 0x1d1   : > { %2504 = vst.msk [vmem:[#allocation2 + $0x88] sm:$0xff] %vm2486_vm6, %v2405_v29  ;;  %2505 = vst.msk [vmem:[#allocation2 + $0x90] sm:$0xff] %vm2486_vm6, %v2406_v30  ;;  %v5910_v45 = vsel %vm2017_vm12, 1.0, %v4689_v26  ;;  %v5913_v46 = vsel %vm2018_vm13, 1.0, %v4689_v26  ;;  %vm2019_vm14 = vcmp.ge.f32.partialorder %v1921_v32, 1.0  ;;  %v1922_v47 = vadd.f32 %v1824_v25, %v1726_v55 }
 0x1d2   : > { %2506 = vst.msk [vmem:[#allocation2 + $0x98] sm:$0xff] %vm2486_vm6, %v2407_v38  ;;  %v2408_v51 = vmul.f32 %v2310_v40, %v1918_v8  ;;  %v2311_v52 = vsub.f32 1.0, %v5910_v45  ;;  %v2312_v53 = vsub.f32 1.0, %v5913_v46  ;;  %v5919_v54 = vsel %vm2019_vm14, 1.0, %v4689_v26  ;;  %v1731_v8 = vld [vmem:[#allocation3 + $0xe8] sm:$0xff]  ;;  %v1832_v38 = vld [vmem:[#allocation2 + $0x100] sm:$0xff] }
 0x1d3   : > { %v2313_v56 = vsub.f32 1.0, %v5919_v54  ;;  %vm2020_vm15 = vcmp.ge.f32.partialorder %v1922_v47, 1.0  ;;  %v1923_v58 = vadd.f32 %v1825_v41, %v1727_v37  ;;  %v1924_v61 = vadd.f32 %v1826_v43, %v1728_v42  ;;  %v1734_v37 = vld [vmem:[#allocation3 + $0x100] sm:$0xff] }
 0x1d4   : > { %2507 = vst.msk [vmem:[#allocation2 + $0xa0] sm:$0xff] %vm2486_vm6, %v2408_v51  ;;  %v2409_v0 = vmul.f32 %v2311_v52, %v1919_v23  ;;  %v2410_v3 = vmul.f32 %v2312_v53, %v1920_v24  ;;  %v5924_v4 = vsel %vm2020_vm15, 1.0, %v4689_v26  ;;  %v1925_v7 = vadd.f32 %v1827_v50, %v1729_v49  ;;  %v1833_v51 = vld [vmem:[#allocation2 + $0x108] sm:$0xff]  ;;  %v1736_v52 = vld [vmem:[#allocation3 + $0x110] sm:$0xff]  ;;  %v1834_v53 = vld [vmem:[#allocation2 + $0x110] sm:$0xff] }
 0x1d5   : > { %v2411_v9 = vmul.f32 %v2313_v56, %v1921_v32  ;;  %v2314_v10 = vsub.f32 1.0, %v5924_v4  ;;  %vm2021_vm0 = vcmp.ge.f32.partialorder %v1923_v58, 1.0  ;;  %vm2022_vm1 = vcmp.ge.f32.partialorder %v1924_v61, 1.0 }
 0x1d6   : > { %2508 = vst.msk [vmem:[#allocation2 + $0xa8] sm:$0xff] %vm2486_vm6, %v2409_v0  ;;  %2509 = vst.msk [vmem:[#allocation2 + $0xb0] sm:$0xff] %vm2486_vm6, %v2410_v3  ;;  %v5930_v17 = vsel %vm2021_vm0, 1.0, %v4689_v26  ;;  %v5933_v18 = vsel %vm2022_vm1, 1.0, %v4689_v26  ;;  %vm2023_vm2 = vcmp.ge.f32.partialorder %v1925_v7, 1.0  ;;  %v1926_v19 = vadd.f32 %v1828_v63, %v1730_v62  ;;  %v1737_v62 = vld [vmem:[#allocation3 + $0x118] sm:$0xff] }
 0x1d7   : > { %2510 = vst.msk [vmem:[#allocation2 + $0xb8] sm:$0xff] %vm2486_vm6, %v2411_v9  ;;  %v2412_v23 = vmul.f32 %v2314_v10, %v1922_v47  ;;  %v2315_v24 = vsub.f32 1.0, %v5930_v17  ;;  %v2316_v55 = vsub.f32 1.0, %v5933_v18  ;;  %v5939_v25 = vsel %vm2023_vm2, 1.0, %v4689_v26  ;;  %v1735_v47 = vld [vmem:[#allocation3 + $0x108] sm:$0xff] }
 0x1d8   : > { %v2317_v29 = vsub.f32 1.0, %v5939_v25  ;;  %vm2024_vm3 = vcmp.ge.f32.partialorder %v1926_v19, 1.0  ;;  %v1927_v30 = vadd.f32 %v1829_v11, %v1731_v8  ;;  %v1928_v32 = vadd.f32 %v1830_v16, %v1732_v13  ;;  %v1835_v63 = vld [vmem:[#allocation2 + $0x118] sm:$0xff]  ;;  %v1738_v13 = vld [vmem:[#allocation3 + $0x120] sm:$0xff]  ;;  %v1836_v16 = vld [vmem:[#allocation2 + $0x120] sm:$0xff] }
 0x1d9   : > { %2511 = vst.msk [vmem:[#allocation2 + $0xc0] sm:$0xff] %vm2486_vm6, %v2412_v23  ;;  %v2413_v40 = vmul.f32 %v2315_v24, %v1923_v58  ;;  %v2414_v41 = vmul.f32 %v2316_v55, %v1924_v61  ;;  %v5944_v42 = vsel %vm2024_vm3, 1.0, %v4689_v26  ;;  %v1929_v43 = vadd.f32 %v1831_v22, %v1733_v20  ;;  %v1739_v24 = vld [vmem:[#allocation3 + $0x128] sm:$0xff] }
 0x1da   : > { %v2415_v49 = vmul.f32 %v2317_v29, %v1925_v7  ;;  %v2318_v50 = vsub.f32 1.0, %v5944_v42  ;;  %vm2025_vm4 = vcmp.ge.f32.partialorder %v1927_v30, 1.0  ;;  %vm2026_vm5 = vcmp.ge.f32.partialorder %v1928_v32, 1.0 }
 0x1db   : > { %2512 = vst.msk [vmem:[#allocation2 + $0xc8] sm:$0xff] %vm2486_vm6, %v2413_v40  ;;  %2513 = vst.msk [vmem:[#allocation2 + $0xd0] sm:$0xff] %vm2486_vm6, %v2414_v41  ;;  %v5950_v56 = vsel %vm2025_vm4, 1.0, %v4689_v26  ;;  %v5953_v58 = vsel %vm2026_vm5, 1.0, %v4689_v26  ;;  %vm2027_vm7 = vcmp.ge.f32.partialorder %v1929_v43, 1.0  ;;  %v1930_v61 = vadd.f32 %v1832_v38, %v1734_v37  ;;  %v1837_v37 = vld [vmem:[#allocation2 + $0x128] sm:$0xff] }
 0x1dc   : > { %2514 = vst.msk [vmem:[#allocation2 + $0xd8] sm:$0xff] %vm2486_vm6, %v2415_v49  ;;  %v2416_v0 = vmul.f32 %v2318_v50, %v1926_v19  ;;  %v2319_v3 = vsub.f32 1.0, %v5950_v56  ;;  %v2320_v7 = vsub.f32 1.0, %v5953_v58  ;;  %v5959_v8 = vsel %vm2027_vm7, 1.0, %v4689_v26  ;;  %v1740_v38 = vld [vmem:[#allocation3 + $0x130] sm:$0xff]  ;;  %v1838_v40 = vld [vmem:[#allocation2 + $0x130] sm:$0xff] }
 0x1dd   : > { %v2321_v9 = vsub.f32 1.0, %v5959_v8  ;;  %vm2028_vm8 = vcmp.ge.f32.partialorder %v1930_v61, 1.0  ;;  %v1931_v10 = vadd.f32 %v1833_v51, %v1735_v47  ;;  %v1932_v11 = vadd.f32 %v1834_v53, %v1736_v52  ;;  %v1839_v47 = vld [vmem:[#allocation2 + $0x138] sm:$0xff] }
 0x1de   : > { %2515 = vst.msk [vmem:[#allocation2 + $0xe0] sm:$0xff] %vm2486_vm6, %v2416_v0  ;;  %v2417_v20 = vmul.f32 %v2319_v3, %v1927_v30  ;;  %v2418_v22 = vmul.f32 %v2320_v7, %v1928_v32  ;;  %v5964_v19 = vsel %vm2028_vm8, 1.0, %v4689_v26  ;;  %v1933_v23 = vadd.f32 %v1835_v63, %v1737_v62  ;;  %v1742_v0 = vld [vmem:[#allocation3 + $0x140] sm:$0xff]  ;;  %v1840_v3 = vld [vmem:[#allocation2 + $0x140] sm:$0xff] }
 0x1df   : > { %7571 = vst [vmem:[#allocation10_spill] sm:$0xff] %v5964_v19  ;;  %v2419_v55 = vmul.f32 %v2321_v9, %v1929_v43  ;;  %v2322_v29 = vsub.f32 1.0, %v5964_v19  ;;  %vm2029_vm9 = vcmp.ge.f32.partialorder %v1931_v10, 1.0  ;;  %vm2030_vm10 = vcmp.ge.f32.partialorder %v1932_v11, 1.0  ;;  %v1741_v43 = vld [vmem:[#allocation3 + $0x138] sm:$0xff] }
 0x1e0   : > { %2516 = vst.msk [vmem:[#allocation2 + $0xe8] sm:$0xff] %vm2486_vm6, %v2417_v20  ;;  %2517 = vst.msk [vmem:[#allocation2 + $0xf0] sm:$0xff] %vm2486_vm6, %v2418_v22  ;;  %v5970_v30 = vsel %vm2029_vm9, 1.0, %v4689_v26  ;;  %v5973_v32 = vsel %vm2030_vm10, 1.0, %v4689_v26  ;;  %vm2031_vm11 = vcmp.ge.f32.partialorder %v1933_v23, 1.0  ;;  %v1934_v41 = vadd.f32 %v1836_v16, %v1738_v13  ;;  %v1743_v16 = vld [vmem:[#allocation3 + $0x148] sm:$0xff] }
 0x1e1   : > { %7572 = vst [vmem:[#allocation11_spill] sm:$0xff] %v5970_v30  ;;  %7573 = vst [vmem:[#allocation12_spill] sm:$0xff] %v5973_v32  ;;  %v2420_v49 = vmul.f32 %v2322_v29, %v1930_v61  ;;  %v2323_v50 = vsub.f32 1.0, %v5970_v30  ;;  %v2324_v51 = vsub.f32 1.0, %v5973_v32  ;;  %v5979_v52 = vsel %vm2031_vm11, 1.0, %v4689_v26  ;;  %v1744_v29 = vld [vmem:[#allocation3 + $0x150] sm:$0xff] }
 0x1e2   : > { %2518 = vst.msk [vmem:[#allocation2 + $0xf8] sm:$0xff] %vm2486_vm6, %v2419_v55  ;;  %7574 = vst [vmem:[#allocation13_spill] sm:$0xff] %v5979_v52  ;;  %v2325_v53 = vsub.f32 1.0, %v5979_v52  ;;  %vm2032_vm12 = vcmp.ge.f32.partialorder %v1934_v41, 1.0  ;;  %v1935_v62 = vadd.f32 %v1837_v37, %v1739_v24  ;;  %v1936_v63 = vadd.f32 %v1838_v40, %v1740_v38  ;;  %v1841_v55 = vld [vmem:[#allocation2 + $0x148] sm:$0xff]  ;;  %v1842_v24 = vld [vmem:[#allocation2 + $0x150] sm:$0xff] }
 0x1e3   : > { %2519 = vst.msk [vmem:[#allocation2 + $0x100] sm:$0xff] %vm2486_vm6, %v2420_v49  ;;  %v2421_v7 = vmul.f32 %v2323_v50, %v1931_v10  ;;  %v2422_v9 = vmul.f32 %v2324_v51, %v1932_v11  ;;  %v5984_v61 = vsel %vm2032_vm12, 1.0, %v4689_v26  ;;  %v1937_v13 = vadd.f32 %v1839_v47, %v1741_v43  ;;  %v1843_v38 = vld [vmem:[#allocation2 + $0x158] sm:$0xff] }
 0x1e4   : > { %7575 = vst [vmem:[#allocation14_spill] sm:$0xff] %v5984_v61  ;;  %v2423_v20 = vmul.f32 %v2325_v53, %v1933_v23  ;;  %v2326_v22 = vsub.f32 1.0, %v5984_v61  ;;  %vm2033_vm13 = vcmp.ge.f32.partialorder %v1935_v62, 1.0  ;;  %vm2034_vm14 = vcmp.ge.f32.partialorder %v1936_v63, 1.0  ;;  %v1745_v23 = vld [vmem:[#allocation3 + $0x158] sm:$0xff]  ;;  %v1748_v61 = vld [vmem:[#allocation3 + $0x170] sm:$0xff] }
 0x1e5   : > { %2520 = vst.msk [vmem:[#allocation2 + $0x108] sm:$0xff] %vm2486_vm6, %v2421_v7  ;;  %2521 = vst.msk [vmem:[#allocation2 + $0x110] sm:$0xff] %vm2486_vm6, %v2422_v9  ;;  %v5990_v10 = vsel %vm2033_vm13, 1.0, %v4689_v26  ;;  %v5993_v11 = vsel %vm2034_vm14, 1.0, %v4689_v26  ;;  %vm2035_vm15 = vcmp.ge.f32.partialorder %v1937_v13, 1.0  ;;  %v1938_v37 = vadd.f32 %v1840_v3, %v1742_v0  ;;  %v1746_v7 = vld [vmem:[#allocation3 + $0x160] sm:$0xff] }
 0x1e6   : > { %7576 = vst [vmem:[#allocation15_spill] sm:$0xff] %v5990_v10  ;;  %7577 = vst [vmem:[#allocation16_spill] sm:$0xff] %v5993_v11  ;;  %v2424_v40 = vmul.f32 %v2326_v22, %v1934_v41  ;;  %v2327_v43 = vsub.f32 1.0, %v5990_v10  ;;  %v2328_v47 = vsub.f32 1.0, %v5993_v11  ;;  %v5999_v49 = vsel %vm2035_vm15, 1.0, %v4689_v26  ;;  %v1844_v9 = vld [vmem:[#allocation2 + $0x160] sm:$0xff] }
 0x1e7   : > { %2522 = vst.msk [vmem:[#allocation2 + $0x118] sm:$0xff] %vm2486_vm6, %v2423_v20  ;;  %7578 = vst [vmem:[#allocation17_spill] sm:$0xff] %v5999_v49  ;;  %v2329_v50 = vsub.f32 1.0, %v5999_v49  ;;  %vm2036_vm0 = vcmp.ge.f32.partialorder %v1938_v37, 1.0  ;;  %v1939_v51 = vadd.f32 %v1841_v55, %v1743_v16  ;;  %v1940_v53 = vadd.f32 %v1842_v24, %v1744_v29  ;;  %v1747_v22 = vld [vmem:[#allocation3 + $0x168] sm:$0xff]  ;;  %v1845_v49 = vld [vmem:[#allocation2 + $0x168] sm:$0xff] }
 0x1e8   : > { %2523 = vst.msk [vmem:[#allocation2 + $0x120] sm:$0xff] %vm2486_vm6, %v2424_v40  ;;  %v2425_v0 = vmul.f32 %v2327_v43, %v1935_v62  ;;  %v2426_v3 = vmul.f32 %v2328_v47, %v1936_v63  ;;  %v6004_v41 = vsel %vm2036_vm0, 1.0, %v4689_v26  ;;  %v1941_v20 = vadd.f32 %v1843_v38, %v1745_v23  ;;  %v1846_v16 = vld [vmem:[#allocation2 + $0x170] sm:$0xff]  ;;  %v1847_v29 = vld [vmem:[#allocation2 + $0x178] sm:$0xff] }
 0x1e9   : > { %7579 = vst [vmem:[#allocation18_spill] sm:$0xff] %v6004_v41  ;;  %v2427_v11 = vmul.f32 %v2329_v50, %v1937_v13  ;;  %v2330_v10 = vsub.f32 1.0, %v6004_v41  ;;  %vm2037_vm1 = vcmp.ge.f32.partialorder %v1939_v51, 1.0  ;;  %vm2038_vm2 = vcmp.ge.f32.partialorder %v1940_v53, 1.0  ;;  %v1749_v13 = vld [vmem:[#allocation3 + $0x178] sm:$0xff]  ;;  %v1752_v41 = vld [vmem:[#allocation3 + $0x190] sm:$0xff] }
 0x1ea   : > { %2524 = vst.msk [vmem:[#allocation2 + $0x128] sm:$0xff] %vm2486_vm6, %v2425_v0  ;;  %2525 = vst.msk [vmem:[#allocation2 + $0x130] sm:$0xff] %vm2486_vm6, %v2426_v3  ;;  %v6010_v62 = vsel %vm2037_vm1, 1.0, %v4689_v26  ;;  %v6013_v63 = vsel %vm2038_vm2, 1.0, %v4689_v26  ;;  %vm2039_vm3 = vcmp.ge.f32.partialorder %v1941_v20, 1.0  ;;  %v1942_v55 = vadd.f32 %v1844_v9, %v1746_v7  ;;  %v1750_v0 = vld [vmem:[#allocation3 + $0x180] sm:$0xff] }
 0x1eb   : > { %7580 = vst [vmem:[#allocation19_spill] sm:$0xff] %v6010_v62  ;;  %7581 = vst [vmem:[#allocation20_spill] sm:$0xff] %v6013_v63  ;;  %v2428_v24 = vmul.f32 %v2330_v10, %v1938_v37  ;;  %v2331_v23 = vsub.f32 1.0, %v6010_v62  ;;  %v2332_v38 = vsub.f32 1.0, %v6013_v63  ;;  %v6019_v40 = vsel %vm2039_vm3, 1.0, %v4689_v26  ;;  %v1848_v3 = vld [vmem:[#allocation2 + $0x180] sm:$0xff] }
 0x1ec   : > { %2526 = vst.msk [vmem:[#allocation2 + $0x138] sm:$0xff] %vm2486_vm6, %v2427_v11  ;;  %7582 = vst [vmem:[#allocation21_spill] sm:$0xff] %v6019_v40  ;;  %v2333_v43 = vsub.f32 1.0, %v6019_v40  ;;  %vm2040_vm4 = vcmp.ge.f32.partialorder %v1942_v55, 1.0  ;;  %v1943_v47 = vadd.f32 %v1845_v49, %v1747_v22  ;;  %v1944_v50 = vadd.f32 %v1846_v16, %v1748_v61  ;;  %v1751_v37 = vld [vmem:[#allocation3 + $0x188] sm:$0xff]  ;;  %v1849_v40 = vld [vmem:[#allocation2 + $0x188] sm:$0xff] }
 0x1ed   : > { %2527 = vst.msk [vmem:[#allocation2 + $0x140] sm:$0xff] %vm2486_vm6, %v2428_v24  ;;  %v2429_v7 = vmul.f32 %v2331_v23, %v1939_v51  ;;  %v2430_v9 = vmul.f32 %v2332_v38, %v1940_v53  ;;  %v6024_v10 = vsel %vm2040_vm4, 1.0, %v4689_v26  ;;  %v1945_v11 = vadd.f32 %v1847_v29, %v1749_v13  ;;  %v1850_v49 = vld [vmem:[#allocation2 + $0x190] sm:$0xff]  ;;  %v1851_v22 = vld [vmem:[#allocation2 + $0x198] sm:$0xff] }
 0x1ee   : > { %7583 = vst [vmem:[#allocation22_spill] sm:$0xff] %v6024_v10  ;;  %v2431_v63 = vmul.f32 %v2333_v43, %v1941_v20  ;;  %v2334_v62 = vsub.f32 1.0, %v6024_v10  ;;  %vm2041_vm5 = vcmp.ge.f32.partialorder %v1943_v47, 1.0  ;;  %vm2042_vm7 = vcmp.ge.f32.partialorder %v1944_v50, 1.0  ;;  %v1753_v20 = vld [vmem:[#allocation3 + $0x198] sm:$0xff]  ;;  %v1756_v10 = vld [vmem:[#allocation3 + $0x1b0] sm:$0xff] }
 0x1ef   : > { %2528 = vst.msk [vmem:[#allocation2 + $0x148] sm:$0xff] %vm2486_vm6, %v2429_v7  ;;  %2529 = vst.msk [vmem:[#allocation2 + $0x150] sm:$0xff] %vm2486_vm6, %v2430_v9  ;;  %v6030_v61 = vsel %vm2041_vm5, 1.0, %v4689_v26  ;;  %v6033_v51 = vsel %vm2042_vm7, 1.0, %v4689_v26  ;;  %vm2043_vm8 = vcmp.ge.f32.partialorder %v1945_v11, 1.0  ;;  %v1946_v53 = vadd.f32 %v1848_v3, %v1750_v0  ;;  %v1754_v7 = vld [vmem:[#allocation3 + $0x1a0] sm:$0xff] }
 0x1f0   : > { %7584 = vst [vmem:[#allocation23_spill] sm:$0xff] %v6030_v61  ;;  %7585 = vst [vmem:[#allocation24_spill] sm:$0xff] %v6033_v51  ;;  %v2432_v16 = vmul.f32 %v2334_v62, %v1942_v55  ;;  %v2335_v13 = vsub.f32 1.0, %v6030_v61  ;;  %v2336_v29 = vsub.f32 1.0, %v6033_v51  ;;  %v6039_v24 = vsel %vm2043_vm8, 1.0, %v4689_v26  ;;  %v1852_v9 = vld [vmem:[#allocation2 + $0x1a0] sm:$0xff] }
 0x1f1   : > { %2530 = vst.msk [vmem:[#allocation2 + $0x158] sm:$0xff] %vm2486_vm6, %v2431_v63  ;;  %7586 = vst [vmem:[#allocation25_spill] sm:$0xff] %v6039_v24  ;;  %v2337_v23 = vsub.f32 1.0, %v6039_v24  ;;  %vm2044_vm9 = vcmp.ge.f32.partialorder %v1946_v53, 1.0  ;;  %v1947_v38 = vadd.f32 %v1849_v40, %v1751_v37  ;;  %v1948_v43 = vadd.f32 %v1850_v49, %v1752_v41  ;;  %v1755_v55 = vld [vmem:[#allocation3 + $0x1a8] sm:$0xff]  ;;  %v1853_v24 = vld [vmem:[#allocation2 + $0x1a8] sm:$0xff] }
 0x1f2   : > { %2531 = vst.msk [vmem:[#allocation2 + $0x160] sm:$0xff] %vm2486_vm6, %v2432_v16  ;;  %v2433_v0 = vmul.f32 %v2335_v13, %v1943_v47  ;;  %v2434_v3 = vmul.f32 %v2336_v29, %v1944_v50  ;;  %v6044_v62 = vsel %vm2044_vm9, 1.0, %v4689_v26  ;;  %v1949_v63 = vadd.f32 %v1851_v22, %v1753_v20  ;;  %v1854_v40 = vld [vmem:[#allocation2 + $0x1b0] sm:$0xff]  ;;  %v1855_v37 = vld [vmem:[#allocation2 + $0x1b8] sm:$0xff] }
 0x1f3   : > { %7587 = vst [vmem:[#allocation26_spill] sm:$0xff] %v6044_v62  ;;  %v2435_v51 = vmul.f32 %v2337_v23, %v1945_v11  ;;  %v2338_v61 = vsub.f32 1.0, %v6044_v62  ;;  %vm2045_vm10 = vcmp.ge.f32.partialorder %v1947_v38, 1.0  ;;  %vm2046_vm11 = vcmp.ge.f32.partialorder %v1948_v43, 1.0  ;;  %v1757_v11 = vld [vmem:[#allocation3 + $0x1b8] sm:$0xff]  ;;  %v1760_v62 = vld [vmem:[#allocation3 + $0x1d0] sm:$0xff] }
 0x1f4   : > { %2532 = vst.msk [vmem:[#allocation2 + $0x168] sm:$0xff] %vm2486_vm6, %v2433_v0  ;;  %2533 = vst.msk [vmem:[#allocation2 + $0x170] sm:$0xff] %vm2486_vm6, %v2434_v3  ;;  %v6050_v41 = vsel %vm2045_vm10, 1.0, %v4689_v26  ;;  %v6053_v47 = vsel %vm2046_vm11, 1.0, %v4689_v26  ;;  %vm2047_vm12 = vcmp.ge.f32.partialorder %v1949_v63, 1.0  ;;  %v1950_v50 = vadd.f32 %v1852_v9, %v1754_v7  ;;  %v1758_v0 = vld [vmem:[#allocation3 + $0x1c0] sm:$0xff] }
 0x1f5   : > { %7588 = vst [vmem:[#allocation27_spill] sm:$0xff] %v6050_v41  ;;  %7589 = vst [vmem:[#allocation28_spill] sm:$0xff] %v6053_v47  ;;  %v2436_v49 = vmul.f32 %v2338_v61, %v1946_v53  ;;  %v2339_v20 = vsub.f32 1.0, %v6050_v41  ;;  %v2340_v22 = vsub.f32 1.0, %v6053_v47  ;;  %v6059_v16 = vsel %vm2047_vm12, 1.0, %v4689_v26  ;;  %v1856_v3 = vld [vmem:[#allocation2 + $0x1c0] sm:$0xff] }
 0x1f6   : > { %2534 = vst.msk [vmem:[#allocation2 + $0x178] sm:$0xff] %vm2486_vm6, %v2435_v51  ;;  %7590 = vst [vmem:[#allocation29_spill] sm:$0xff] %v6059_v16  ;;  %v2341_v13 = vsub.f32 1.0, %v6059_v16  ;;  %vm2048_vm13 = vcmp.ge.f32.partialorder %v1950_v50, 1.0  ;;  %v1951_v29 = vadd.f32 %v1853_v24, %v1755_v55  ;;  %v1952_v23 = vadd.f32 %v1854_v40, %v1756_v10  ;;  %v1759_v53 = vld [vmem:[#allocation3 + $0x1c8] sm:$0xff]  ;;  %v1857_v16 = vld [vmem:[#allocation2 + $0x1c8] sm:$0xff] }
 0x1f7   : > { %2535 = vst.msk [vmem:[#allocation2 + $0x180] sm:$0xff] %vm2486_vm6, %v2436_v49  ;;  %v2437_v7 = vmul.f32 %v2339_v20, %v1947_v38  ;;  %v2438_v9 = vmul.f32 %v2340_v22, %v1948_v43  ;;  %v6064_v61 = vsel %vm2048_vm13, 1.0, %v4689_v26  ;;  %v1953_v51 = vadd.f32 %v1855_v37, %v1757_v11  ;;  %v1858_v24 = vld [vmem:[#allocation2 + $0x1d0] sm:$0xff]  ;;  %v1859_v55 = vld [vmem:[#allocation2 + $0x1d8] sm:$0xff] }
 0x1f8   : > { %7591 = vst [vmem:[#allocation30_spill] sm:$0xff] %v6064_v61  ;;  %v2439_v47 = vmul.f32 %v2341_v13, %v1949_v63  ;;  %v2342_v41 = vsub.f32 1.0, %v6064_v61  ;;  %vm2049_vm14 = vcmp.ge.f32.partialorder %v1951_v29, 1.0  ;;  %vm2050_vm15 = vcmp.ge.f32.partialorder %v1952_v23, 1.0  ;;  %v1761_v63 = vld [vmem:[#allocation3 + $0x1d8] sm:$0xff]  ;;  %v1764_v61 = vld [vmem:[#allocation3 + $0x1f0] sm:$0xff] }
 0x1f9   : > { %2536 = vst.msk [vmem:[#allocation2 + $0x188] sm:$0xff] %vm2486_vm6, %v2437_v7  ;;  %2537 = vst.msk [vmem:[#allocation2 + $0x190] sm:$0xff] %vm2486_vm6, %v2438_v9  ;;  %v6070_v10 = vsel %vm2049_vm14, 1.0, %v4689_v26  ;;  %v6073_v38 = vsel %vm2050_vm15, 1.0, %v4689_v26  ;;  %vm2051_vm0 = vcmp.ge.f32.partialorder %v1953_v51, 1.0  ;;  %v1954_v43 = vadd.f32 %v1856_v3, %v1758_v0  ;;  %v1762_v7 = vld [vmem:[#allocation3 + $0x1e0] sm:$0xff] }
 0x1fa   : > { %7592 = vst [vmem:[#allocation31_spill] sm:$0xff] %v6070_v10  ;;  %7593 = vst [vmem:[#allocation32_spill] sm:$0xff] %v6073_v38  ;;  %v2440_v40 = vmul.f32 %v2342_v41, %v1950_v50  ;;  %v2343_v11 = vsub.f32 1.0, %v6070_v10  ;;  %v2344_v37 = vsub.f32 1.0, %v6073_v38  ;;  %v6079_v49 = vsel %vm2051_vm0, 1.0, %v4689_v26  ;;  %v1860_v9 = vld [vmem:[#allocation2 + $0x1e0] sm:$0xff] }
 0x1fb   : > { %2538 = vst.msk [vmem:[#allocation2 + $0x198] sm:$0xff] %vm2486_vm6, %v2439_v47  ;;  %7594 = vst [vmem:[#allocation33_spill] sm:$0xff] %v6079_v49  ;;  %v2345_v20 = vsub.f32 1.0, %v6079_v49  ;;  %vm2052_vm1 = vcmp.ge.f32.partialorder %v1954_v43, 1.0  ;;  %v1955_v22 = vadd.f32 %v1857_v16, %v1759_v53  ;;  %v1956_v13 = vadd.f32 %v1858_v24, %v1760_v62  ;;  %v1763_v50 = vld [vmem:[#allocation3 + $0x1e8] sm:$0xff]  ;;  %v1861_v49 = vld [vmem:[#allocation2 + $0x1e8] sm:$0xff] }
 0x1fc   : > { %2539 = vst.msk [vmem:[#allocation2 + $0x1a0] sm:$0xff] %vm2486_vm6, %v2440_v40  ;;  %v2441_v0 = vmul.f32 %v2343_v11, %v1951_v29  ;;  %v2442_v3 = vmul.f32 %v2344_v37, %v1952_v23  ;;  %v6084_v41 = vsel %vm2052_vm1, 1.0, %v4689_v26  ;;  %v1957_v47 = vadd.f32 %v1859_v55, %v1761_v63  ;;  %v1862_v16 = vld [vmem:[#allocation2 + $0x1f0] sm:$0xff]  ;;  %v1863_v53 = vld [vmem:[#allocation2 + $0x1f8] sm:$0xff] }
 0x1fd   : > { %7595 = vst [vmem:[#allocation34_spill] sm:$0xff] %v6084_v41  ;;  %v2443_v38 = vmul.f32 %v2345_v20, %v1953_v51  ;;  %v2346_v10 = vsub.f32 1.0, %v6084_v41  ;;  %vm2053_vm2 = vcmp.ge.f32.partialorder %v1955_v22, 1.0  ;;  %vm2054_vm3 = vcmp.ge.f32.partialorder %v1956_v13, 1.0  ;;  %v1765_v51 = vld [vmem:[#allocation3 + $0x1f8] sm:$0xff]  ;;  %v1768_v41 = vld [vmem:[#allocation3 + $0x210] sm:$0xff] }
 0x1fe   : > { %2540 = vst.msk [vmem:[#allocation2 + $0x1a8] sm:$0xff] %vm2486_vm6, %v2441_v0  ;;  %2541 = vst.msk [vmem:[#allocation2 + $0x1b0] sm:$0xff] %vm2486_vm6, %v2442_v3  ;;  %v6090_v62 = vsel %vm2053_vm2, 1.0, %v4689_v26  ;;  %v6093_v29 = vsel %vm2054_vm3, 1.0, %v4689_v26  ;;  %vm2055_vm4 = vcmp.ge.f32.partialorder %v1957_v47, 1.0  ;;  %v1958_v23 = vadd.f32 %v1860_v9, %v1762_v7  ;;  %v1766_v0 = vld [vmem:[#allocation3 + $0x200] sm:$0xff] }
 0x1ff   : > { %7596 = vst [vmem:[#allocation35_spill] sm:$0xff] %v6090_v62  ;;  %7597 = vst [vmem:[#allocation36_spill] sm:$0xff] %v6093_v29  ;;  %v2444_v24 = vmul.f32 %v2346_v10, %v1954_v43  ;;  %v2347_v63 = vsub.f32 1.0, %v6090_v62  ;;  %v2348_v55 = vsub.f32 1.0, %v6093_v29  ;;  %v6099_v40 = vsel %vm2055_vm4, 1.0, %v4689_v26  ;;  %v1864_v3 = vld [vmem:[#allocation2 + $0x200] sm:$0xff] }
 0x200   : > { %2542 = vst.msk [vmem:[#allocation2 + $0x1b8] sm:$0xff] %vm2486_vm6, %v2443_v38  ;;  %7598 = vst [vmem:[#allocation37_spill] sm:$0xff] %v6099_v40  ;;  %v2349_v11 = vsub.f32 1.0, %v6099_v40  ;;  %vm2056_vm5 = vcmp.ge.f32.partialorder %v1958_v23, 1.0  ;;  %v1959_v37 = vadd.f32 %v1861_v49, %v1763_v50  ;;  %v1960_v20 = vadd.f32 %v1862_v16, %v1764_v61  ;;  %v1767_v43 = vld [vmem:[#allocation3 + $0x208] sm:$0xff]  ;;  %v1865_v40 = vld [vmem:[#allocation2 + $0x208] sm:$0xff] }
 0x201   : > { %2543 = vst.msk [vmem:[#allocation2 + $0x1c0] sm:$0xff] %vm2486_vm6, %v2444_v24  ;;  %v2445_v7 = vmul.f32 %v2347_v63, %v1955_v22  ;;  %v2446_v9 = vmul.f32 %v2348_v55, %v1956_v13  ;;  %v6104_v10 = vsel %vm2056_vm5, 1.0, %v4689_v26  ;;  %v1961_v38 = vadd.f32 %v1863_v53, %v1765_v51  ;;  %v1866_v49 = vld [vmem:[#allocation2 + $0x210] sm:$0xff]  ;;  %v1867_v50 = vld [vmem:[#allocation2 + $0x218] sm:$0xff] }
 0x202   : > { %7599 = vst [vmem:[#allocation38_spill] sm:$0xff] %v6104_v10  ;;  %v2447_v29 = vmul.f32 %v2349_v11, %v1957_v47  ;;  %v2350_v62 = vsub.f32 1.0, %v6104_v10  ;;  %vm2057_vm7 = vcmp.ge.f32.partialorder %v1959_v37, 1.0  ;;  %vm2058_vm8 = vcmp.ge.f32.partialorder %v1960_v20, 1.0  ;;  %v1769_v47 = vld [vmem:[#allocation3 + $0x218] sm:$0xff]  ;;  %v1772_v10 = vld [vmem:[#allocation3 + $0x230] sm:$0xff] }
 0x203   : > { %2544 = vst.msk [vmem:[#allocation2 + $0x1c8] sm:$0xff] %vm2486_vm6, %v2445_v7  ;;  %2545 = vst.msk [vmem:[#allocation2 + $0x1d0] sm:$0xff] %vm2486_vm6, %v2446_v9  ;;  %v6110_v61 = vsel %vm2057_vm7, 1.0, %v4689_v26  ;;  %v6113_v22 = vsel %vm2058_vm8, 1.0, %v4689_v26  ;;  %vm2059_vm9 = vcmp.ge.f32.partialorder %v1961_v38, 1.0  ;;  %v1962_v13 = vadd.f32 %v1864_v3, %v1766_v0  ;;  %v1770_v7 = vld [vmem:[#allocation3 + $0x220] sm:$0xff] }
 0x204   : > { %7600 = vst [vmem:[#allocation39_spill] sm:$0xff] %v6110_v61  ;;  %7601 = vst [vmem:[#allocation40_spill] sm:$0xff] %v6113_v22  ;;  %v2448_v16 = vmul.f32 %v2350_v62, %v1958_v23  ;;  %v2351_v51 = vsub.f32 1.0, %v6110_v61  ;;  %v2352_v53 = vsub.f32 1.0, %v6113_v22  ;;  %v6119_v24 = vsel %vm2059_vm9, 1.0, %v4689_v26  ;;  %v1868_v9 = vld [vmem:[#allocation2 + $0x220] sm:$0xff] }
 0x205   : > { %2546 = vst.msk [vmem:[#allocation2 + $0x1d8] sm:$0xff] %vm2486_vm6, %v2447_v29  ;;  %7602 = vst [vmem:[#allocation41_spill] sm:$0xff] %v6119_v24  ;;  %v2353_v63 = vsub.f32 1.0, %v6119_v24  ;;  %vm2060_vm10 = vcmp.ge.f32.partialorder %v1962_v13, 1.0  ;;  %v1963_v55 = vadd.f32 %v1865_v40, %v1767_v43  ;;  %v1964_v11 = vadd.f32 %v1866_v49, %v1768_v41  ;;  %v1771_v23 = vld [vmem:[#allocation3 + $0x228] sm:$0xff]  ;;  %v1869_v24 = vld [vmem:[#allocation2 + $0x228] sm:$0xff] }
 0x206   : > { %2547 = vst.msk [vmem:[#allocation2 + $0x1e0] sm:$0xff] %vm2486_vm6, %v2448_v16  ;;  %v2449_v0 = vmul.f32 %v2351_v51, %v1959_v37  ;;  %v2450_v3 = vmul.f32 %v2352_v53, %v1960_v20  ;;  %v6124_v62 = vsel %vm2060_vm10, 1.0, %v4689_v26  ;;  %v1965_v29 = vadd.f32 %v1867_v50, %v1769_v47  ;;  %v1870_v40 = vld [vmem:[#allocation2 + $0x230] sm:$0xff]  ;;  %v1871_v43 = vld [vmem:[#allocation2 + $0x238] sm:$0xff] }
 0x207   : > { %7603 = vst [vmem:[#allocation42_spill] sm:$0xff] %v6124_v62  ;;  %v2451_v22 = vmul.f32 %v2353_v63, %v1961_v38  ;;  %v2354_v61 = vsub.f32 1.0, %v6124_v62  ;;  %vm2061_vm11 = vcmp.ge.f32.partialorder %v1963_v55, 1.0  ;;  %vm2062_vm12 = vcmp.ge.f32.partialorder %v1964_v11, 1.0  ;;  %v1773_v38 = vld [vmem:[#allocation3 + $0x238] sm:$0xff]  ;;  %v1776_v62 = vld [vmem:[#allocation3 + $0x250] sm:$0xff] }
 0x208   : > { %2548 = vst.msk [vmem:[#allocation2 + $0x1e8] sm:$0xff] %vm2486_vm6, %v2449_v0  ;;  %2549 = vst.msk [vmem:[#allocation2 + $0x1f0] sm:$0xff] %vm2486_vm6, %v2450_v3  ;;  %v6130_v41 = vsel %vm2061_vm11, 1.0, %v4689_v26  ;;  %v6133_v37 = vsel %vm2062_vm12, 1.0, %v4689_v26  ;;  %vm2063_vm13 = vcmp.ge.f32.partialorder %v1965_v29, 1.0  ;;  %v1966_v20 = vadd.f32 %v1868_v9, %v1770_v7  ;;  %v1774_v0 = vld [vmem:[#allocation3 + $0x240] sm:$0xff] }
 0x209   : > { %7604 = vst [vmem:[#allocation43_spill] sm:$0xff] %v6130_v41  ;;  %7605 = vst [vmem:[#allocation44_spill] sm:$0xff] %v6133_v37  ;;  %v2452_v49 = vmul.f32 %v2354_v61, %v1962_v13  ;;  %v2355_v47 = vsub.f32 1.0, %v6130_v41  ;;  %v2356_v50 = vsub.f32 1.0, %v6133_v37  ;;  %v6139_v16 = vsel %vm2063_vm13, 1.0, %v4689_v26  ;;  %v1872_v3 = vld [vmem:[#allocation2 + $0x240] sm:$0xff] }
 0x20a   : > { %2550 = vst.msk [vmem:[#allocation2 + $0x1f8] sm:$0xff] %vm2486_vm6, %v2451_v22  ;;  %7606 = vst [vmem:[#allocation45_spill] sm:$0xff] %v6139_v16  ;;  %v2357_v51 = vsub.f32 1.0, %v6139_v16  ;;  %vm2064_vm14 = vcmp.ge.f32.partialorder %v1966_v20, 1.0  ;;  %v1967_v53 = vadd.f32 %v1869_v24, %v1771_v23  ;;  %v1968_v63 = vadd.f32 %v1870_v40, %v1772_v10  ;;  %v1775_v13 = vld [vmem:[#allocation3 + $0x248] sm:$0xff]  ;;  %v1873_v16 = vld [vmem:[#allocation2 + $0x248] sm:$0xff] }
 0x20b   : > { %2551 = vst.msk [vmem:[#allocation2 + $0x200] sm:$0xff] %vm2486_vm6, %v2452_v49  ;;  %v2453_v7 = vmul.f32 %v2355_v47, %v1963_v55  ;;  %v2454_v9 = vmul.f32 %v2356_v50, %v1964_v11  ;;  %v6144_v61 = vsel %vm2064_vm14, 1.0, %v4689_v26  ;;  %v1969_v22 = vadd.f32 %v1871_v43, %v1773_v38  ;;  %v1874_v24 = vld [vmem:[#allocation2 + $0x250] sm:$0xff]  ;;  %v1875_v23 = vld [vmem:[#allocation2 + $0x258] sm:$0xff] }
 0x20c   : > { %7607 = vst [vmem:[#allocation46_spill] sm:$0xff] %v6144_v61  ;;  %v2455_v37 = vmul.f32 %v2357_v51, %v1965_v29  ;;  %v2358_v41 = vsub.f32 1.0, %v6144_v61  ;;  %vm2065_vm15 = vcmp.ge.f32.partialorder %v1967_v53, 1.0  ;;  %vm2066_vm0 = vcmp.ge.f32.partialorder %v1968_v63, 1.0  ;;  %v1777_v29 = vld [vmem:[#allocation3 + $0x258] sm:$0xff]  ;;  %v1780_v61 = vld [vmem:[#allocation3 + $0x270] sm:$0xff] }
 0x20d   : > { %2552 = vst.msk [vmem:[#allocation2 + $0x208] sm:$0xff] %vm2486_vm6, %v2453_v7  ;;  %2553 = vst.msk [vmem:[#allocation2 + $0x210] sm:$0xff] %vm2486_vm6, %v2454_v9  ;;  %v6150_v10 = vsel %vm2065_vm15, 1.0, %v4689_v26  ;;  %v6153_v55 = vsel %vm2066_vm0, 1.0, %v4689_v26  ;;  %vm2067_vm1 = vcmp.ge.f32.partialorder %v1969_v22, 1.0  ;;  %v1970_v11 = vadd.f32 %v1872_v3, %v1774_v0  ;;  %v1778_v7 = vld [vmem:[#allocation3 + $0x260] sm:$0xff] }
 0x20e   : > { %7608 = vst [vmem:[#allocation47_spill] sm:$0xff] %v6150_v10  ;;  %7609 = vst [vmem:[#allocation48_spill] sm:$0xff] %v6153_v55  ;;  %v2456_v40 = vmul.f32 %v2358_v41, %v1966_v20  ;;  %v2359_v38 = vsub.f32 1.0, %v6150_v10  ;;  %v2360_v43 = vsub.f32 1.0, %v6153_v55  ;;  %v6159_v49 = vsel %vm2067_vm1, 1.0, %v4689_v26  ;;  %v1876_v9 = vld [vmem:[#allocation2 + $0x260] sm:$0xff] }
 0x20f   : > { %2554 = vst.msk [vmem:[#allocation2 + $0x218] sm:$0xff] %vm2486_vm6, %v2455_v37  ;;  %7610 = vst [vmem:[#allocation49_spill] sm:$0xff] %v6159_v49  ;;  %v2361_v47 = vsub.f32 1.0, %v6159_v49  ;;  %vm2068_vm2 = vcmp.ge.f32.partialorder %v1970_v11, 1.0  ;;  %v1971_v50 = vadd.f32 %v1873_v16, %v1775_v13  ;;  %v1972_v51 = vadd.f32 %v1874_v24, %v1776_v62  ;;  %v1779_v20 = vld [vmem:[#allocation3 + $0x268] sm:$0xff]  ;;  %v1877_v49 = vld [vmem:[#allocation2 + $0x268] sm:$0xff] }
 0x210   : > { %2555 = vst.msk [vmem:[#allocation2 + $0x220] sm:$0xff] %vm2486_vm6, %v2456_v40  ;;  %v2457_v0 = vmul.f32 %v2359_v38, %v1967_v53  ;;  %v2458_v3 = vmul.f32 %v2360_v43, %v1968_v63  ;;  %v6164_v41 = vsel %vm2068_vm2, 1.0, %v4689_v26  ;;  %v1973_v37 = vadd.f32 %v1875_v23, %v1777_v29  ;;  %v1878_v16 = vld [vmem:[#allocation2 + $0x270] sm:$0xff]  ;;  %v1879_v13 = vld [vmem:[#allocation2 + $0x278] sm:$0xff] }
 0x211   : > { %7611 = vst [vmem:[#allocation50_spill] sm:$0xff] %v6164_v41  ;;  %v2459_v55 = vmul.f32 %v2361_v47, %v1969_v22  ;;  %v2362_v10 = vsub.f32 1.0, %v6164_v41  ;;  %vm2069_vm3 = vcmp.ge.f32.partialorder %v1971_v50, 1.0  ;;  %vm2070_vm4 = vcmp.ge.f32.partialorder %v1972_v51, 1.0  ;;  %v1781_v22 = vld [vmem:[#allocation3 + $0x278] sm:$0xff]  ;;  %v1784_v41 = vld [vmem:[#allocation3 + $0x290] sm:$0xff] }
 0x212   : > { %2556 = vst.msk [vmem:[#allocation2 + $0x228] sm:$0xff] %vm2486_vm6, %v2457_v0  ;;  %2557 = vst.msk [vmem:[#allocation2 + $0x230] sm:$0xff] %vm2486_vm6, %v2458_v3  ;;  %v6170_v62 = vsel %vm2069_vm3, 1.0, %v4689_v26  ;;  %v6173_v53 = vsel %vm2070_vm4, 1.0, %v4689_v26  ;;  %vm2071_vm5 = vcmp.ge.f32.partialorder %v1973_v37, 1.0  ;;  %v1974_v63 = vadd.f32 %v1876_v9, %v1778_v7  ;;  %v1782_v0 = vld [vmem:[#allocation3 + $0x280] sm:$0xff] }
 0x213   : > { %7612 = vst [vmem:[#allocation51_spill] sm:$0xff] %v6170_v62  ;;  %7613 = vst [vmem:[#allocation52_spill] sm:$0xff] %v6173_v53  ;;  %v2460_v24 = vmul.f32 %v2362_v10, %v1970_v11  ;;  %v2363_v29 = vsub.f32 1.0, %v6170_v62  ;;  %v2364_v23 = vsub.f32 1.0, %v6173_v53  ;;  %v6179_v40 = vsel %vm2071_vm5, 1.0, %v4689_v26  ;;  %v1880_v3 = vld [vmem:[#allocation2 + $0x280] sm:$0xff] }
 0x214   : > { %2558 = vst.msk [vmem:[#allocation2 + $0x238] sm:$0xff] %vm2486_vm6, %v2459_v55  ;;  %7614 = vst [vmem:[#allocation53_spill] sm:$0xff] %v6179_v40  ;;  %v2365_v38 = vsub.f32 1.0, %v6179_v40  ;;  %vm2072_vm7 = vcmp.ge.f32.partialorder %v1974_v63, 1.0  ;;  %v1975_v43 = vadd.f32 %v1877_v49, %v1779_v20  ;;  %v1976_v47 = vadd.f32 %v1878_v16, %v1780_v61  ;;  %v1783_v11 = vld [vmem:[#allocation3 + $0x288] sm:$0xff]  ;;  %v1881_v40 = vld [vmem:[#allocation2 + $0x288] sm:$0xff] }
 0x215   : > { %2559 = vst.msk [vmem:[#allocation2 + $0x240] sm:$0xff] %vm2486_vm6, %v2460_v24  ;;  %v2461_v7 = vmul.f32 %v2363_v29, %v1971_v50  ;;  %v2462_v9 = vmul.f32 %v2364_v23, %v1972_v51  ;;  %v6184_v10 = vsel %vm2072_vm7, 1.0, %v4689_v26  ;;  %v1977_v55 = vadd.f32 %v1879_v13, %v1781_v22  ;;  %v1882_v49 = vld [vmem:[#allocation2 + $0x290] sm:$0xff]  ;;  %v1883_v20 = vld [vmem:[#allocation2 + $0x298] sm:$0xff] }
 0x216   : > { %7615 = vst [vmem:[#allocation54_spill] sm:$0xff] %v6184_v10  ;;  %v2463_v53 = vmul.f32 %v2365_v38, %v1973_v37  ;;  %v2366_v62 = vsub.f32 1.0, %v6184_v10  ;;  %vm2073_vm8 = vcmp.ge.f32.partialorder %v1975_v43, 1.0  ;;  %vm2074_vm9 = vcmp.ge.f32.partialorder %v1976_v47, 1.0  ;;  %v1785_v37 = vld [vmem:[#allocation3 + $0x298] sm:$0xff]  ;;  %v1788_v10 = vld [vmem:[#allocation3 + $0x2b0] sm:$0xff] }
 0x217   : > { %2560 = vst.msk [vmem:[#allocation2 + $0x248] sm:$0xff] %vm2486_vm6, %v2461_v7  ;;  %2561 = vst.msk [vmem:[#allocation2 + $0x250] sm:$0xff] %vm2486_vm6, %v2462_v9  ;;  %v6190_v61 = vsel %vm2073_vm8, 1.0, %v4689_v26  ;;  %v6193_v50 = vsel %vm2074_vm9, 1.0, %v4689_v26  ;;  %vm2075_vm10 = vcmp.ge.f32.partialorder %v1977_v55, 1.0  ;;  %v1978_v51 = vadd.f32 %v1880_v3, %v1782_v0  ;;  %v1786_v7 = vld [vmem:[#allocation3 + $0x2a0] sm:$0xff] }
 0x218   : > { %7616 = vst [vmem:[#allocation55_spill] sm:$0xff] %v6190_v61  ;;  %7617 = vst [vmem:[#allocation56_spill] sm:$0xff] %v6193_v50  ;;  %v2464_v16 = vmul.f32 %v2366_v62, %v1974_v63  ;;  %v2367_v22 = vsub.f32 1.0, %v6190_v61  ;;  %v2368_v13 = vsub.f32 1.0, %v6193_v50  ;;  %v6199_v24 = vsel %vm2075_vm10, 1.0, %v4689_v26  ;;  %v1884_v9 = vld [vmem:[#allocation2 + $0x2a0] sm:$0xff] }
 0x219   : > { %2562 = vst.msk [vmem:[#allocation2 + $0x258] sm:$0xff] %vm2486_vm6, %v2463_v53  ;;  %7618 = vst [vmem:[#allocation57_spill] sm:$0xff] %v6199_v24  ;;  %v2369_v29 = vsub.f32 1.0, %v6199_v24  ;;  %vm2076_vm11 = vcmp.ge.f32.partialorder %v1978_v51, 1.0  ;;  %v1979_v23 = vadd.f32 %v1881_v40, %v1783_v11  ;;  %v1980_v38 = vadd.f32 %v1882_v49, %v1784_v41  ;;  %v1787_v63 = vld [vmem:[#allocation3 + $0x2a8] sm:$0xff]  ;;  %v1885_v24 = vld [vmem:[#allocation2 + $0x2a8] sm:$0xff] }
 0x21a   : > { %2563 = vst.msk [vmem:[#allocation2 + $0x260] sm:$0xff] %vm2486_vm6, %v2464_v16  ;;  %v2465_v0 = vmul.f32 %v2367_v22, %v1975_v43  ;;  %v2466_v3 = vmul.f32 %v2368_v13, %v1976_v47  ;;  %v6204_v62 = vsel %vm2076_vm11, 1.0, %v4689_v26  ;;  %v1981_v53 = vadd.f32 %v1883_v20, %v1785_v37  ;;  %v1886_v40 = vld [vmem:[#allocation2 + $0x2b0] sm:$0xff]  ;;  %v1887_v11 = vld [vmem:[#allocation2 + $0x2b8] sm:$0xff] }
 0x21b   : > { %7619 = vst [vmem:[#allocation58_spill] sm:$0xff] %v6204_v62  ;;  %v2467_v50 = vmul.f32 %v2369_v29, %v1977_v55  ;;  %v2370_v61 = vsub.f32 1.0, %v6204_v62  ;;  %vm2077_vm12 = vcmp.ge.f32.partialorder %v1979_v23, 1.0  ;;  %vm2078_vm13 = vcmp.ge.f32.partialorder %v1980_v38, 1.0  ;;  %v1789_v55 = vld [vmem:[#allocation3 + $0x2b8] sm:$0xff]  ;;  %v1792_v62 = vld [vmem:[#allocation3 + $0x2d0] sm:$0xff] }
 0x21c   : > { %2564 = vst.msk [vmem:[#allocation2 + $0x268] sm:$0xff] %vm2486_vm6, %v2465_v0  ;;  %2565 = vst.msk [vmem:[#allocation2 + $0x270] sm:$0xff] %vm2486_vm6, %v2466_v3  ;;  %v6210_v41 = vsel %vm2077_vm12, 1.0, %v4689_v26  ;;  %v6213_v43 = vsel %vm2078_vm13, 1.0, %v4689_v26  ;;  %vm2079_vm14 = vcmp.ge.f32.partialorder %v1981_v53, 1.0  ;;  %v1982_v47 = vadd.f32 %v1884_v9, %v1786_v7  ;;  %v1790_v0 = vld [vmem:[#allocation3 + $0x2c0] sm:$0xff] }
 0x21d   : > { %7620 = vst [vmem:[#allocation59_spill] sm:$0xff] %v6210_v41  ;;  %7621 = vst [vmem:[#allocation60_spill] sm:$0xff] %v6213_v43  ;;  %v2468_v49 = vmul.f32 %v2370_v61, %v1978_v51  ;;  %v2371_v37 = vsub.f32 1.0, %v6210_v41  ;;  %v2372_v20 = vsub.f32 1.0, %v6213_v43  ;;  %v6219_v16 = vsel %vm2079_vm14, 1.0, %v4689_v26  ;;  %v1888_v3 = vld [vmem:[#allocation2 + $0x2c0] sm:$0xff] }
 0x21e   : > { %2566 = vst.msk [vmem:[#allocation2 + $0x278] sm:$0xff] %vm2486_vm6, %v2467_v50  ;;  %7622 = vst [vmem:[#allocation61_spill] sm:$0xff] %v6219_v16  ;;  %v2373_v22 = vsub.f32 1.0, %v6219_v16  ;;  %vm2080_vm15 = vcmp.ge.f32.partialorder %v1982_v47, 1.0  ;;  %v1983_v13 = vadd.f32 %v1885_v24, %v1787_v63  ;;  %v1984_v29 = vadd.f32 %v1886_v40, %v1788_v10  ;;  %v1791_v51 = vld [vmem:[#allocation3 + $0x2c8] sm:$0xff]  ;;  %v1889_v16 = vld [vmem:[#allocation2 + $0x2c8] sm:$0xff] }
 0x21f   : > { %2567 = vst.msk [vmem:[#allocation2 + $0x280] sm:$0xff] %vm2486_vm6, %v2468_v49  ;;  %v2469_v7 = vmul.f32 %v2371_v37, %v1979_v23  ;;  %v2470_v9 = vmul.f32 %v2372_v20, %v1980_v38  ;;  %v6224_v61 = vsel %vm2080_vm15, 1.0, %v4689_v26  ;;  %v1985_v50 = vadd.f32 %v1887_v11, %v1789_v55  ;;  %v1890_v24 = vld [vmem:[#allocation2 + $0x2d0] sm:$0xff]  ;;  %v1891_v63 = vld [vmem:[#allocation2 + $0x2d8] sm:$0xff] }
 0x220   : > { %7623 = vst [vmem:[#allocation62_spill] sm:$0xff] %v6224_v61  ;;  %v2471_v43 = vmul.f32 %v2373_v22, %v1981_v53  ;;  %v2374_v41 = vsub.f32 1.0, %v6224_v61  ;;  %vm2081_vm0 = vcmp.ge.f32.partialorder %v1983_v13, 1.0  ;;  %vm2082_vm1 = vcmp.ge.f32.partialorder %v1984_v29, 1.0  ;;  %v1793_v53 = vld [vmem:[#allocation3 + $0x2d8] sm:$0xff] }
 0x221   : > { %2568 = vst.msk [vmem:[#allocation2 + $0x288] sm:$0xff] %vm2486_vm6, %v2469_v7  ;;  %2569 = vst.msk [vmem:[#allocation2 + $0x290] sm:$0xff] %vm2486_vm6, %v2470_v9  ;;  %v6230_v10 = vsel %vm2081_vm0, 1.0, %v4689_v26  ;;  %v6233_v23 = vsel %vm2082_vm1, 1.0, %v4689_v26  ;;  %vm2083_vm2 = vcmp.ge.f32.partialorder %v1985_v50, 1.0  ;;  %v1986_v38 = vadd.f32 %v1888_v3, %v1790_v0  ;;  %v1794_v7 = vld [vmem:[#allocation3 + $0x2e0] sm:$0xff] }
 0x222   : > { %7624 = vst [vmem:[#allocation63_spill] sm:$0xff] %v6230_v10  ;;  %7625 = vst [vmem:[#allocation64_spill] sm:$0xff] %v6233_v23  ;;  %v2472_v40 = vmul.f32 %v2374_v41, %v1982_v47  ;;  %v2375_v55 = vsub.f32 1.0, %v6230_v10  ;;  %v2376_v11 = vsub.f32 1.0, %v6233_v23  ;;  %v6239_v49 = vsel %vm2083_vm2, 1.0, %v4689_v26  ;;  %v1892_v9 = vld [vmem:[#allocation2 + $0x2e0] sm:$0xff] }
 0x223   : > { %2570 = vst.msk [vmem:[#allocation2 + $0x298] sm:$0xff] %vm2486_vm6, %v2471_v43  ;;  %7626 = vst [vmem:[#allocation65_spill] sm:$0xff] %v6239_v49  ;;  %v2377_v37 = vsub.f32 1.0, %v6239_v49  ;;  %vm2084_vm3 = vcmp.ge.f32.partialorder %v1986_v38, 1.0  ;;  %v1987_v20 = vadd.f32 %v1889_v16, %v1791_v51  ;;  %v1988_v22 = vadd.f32 %v1890_v24, %v1792_v62  ;;  %v1795_v47 = vld [vmem:[#allocation3 + $0x2e8] sm:$0xff]  ;;  %v1893_v49 = vld [vmem:[#allocation2 + $0x2e8] sm:$0xff] }
 0x224   : > { %2571 = vst.msk [vmem:[#allocation2 + $0x2a0] sm:$0xff] %vm2486_vm6, %v2472_v40  ;;  %v2473_v0 = vmul.f32 %v2375_v55, %v1983_v13  ;;  %v2474_v3 = vmul.f32 %v2376_v11, %v1984_v29  ;;  %v6244_v41 = vsel %vm2084_vm3, 1.0, %v4689_v26  ;;  %v1989_v43 = vadd.f32 %v1891_v63, %v1793_v53  ;;  %v1796_v16 = vld [vmem:[#allocation3 + $0x2f0] sm:$0xff]  ;;  %v1894_v62 = vld [vmem:[#allocation2 + $0x2f0] sm:$0xff]  ;;  %v1895_v24 = vld [vmem:[#allocation2 + $0x2f8] sm:$0xff] }
 0x225   : > { %7627 = vst [vmem:[#allocation66_spill] sm:$0xff] %v6244_v41  ;;  %vm2977_vm4 = vcmask 27648   ;;  %v2475_v23 = vmul.f32 %v2377_v37, %v1985_v50  ;;  %v2378_v10 = vsub.f32 1.0, %v6244_v41  ;;  %vm2085_vm5 = vcmp.ge.f32.partialorder %v1987_v20, 1.0  ;;  %v1797_v50 = vld [vmem:[#allocation3 + $0x2f8] sm:$0xff]  ;;  %v1896_v41 = vld [vmem:[#allocation2 + $0x300] sm:$0xff] }
 0x226   : > { %vm2086_vm7 = vcmp.ge.f32.partialorder %v1988_v22, 1.0  ;;  %2572 = vst.msk [vmem:[#allocation2 + $0x2a8] sm:$0xff] %vm2486_vm6, %v2473_v0  ;;  %2573 = vst.msk [vmem:[#allocation2 + $0x2b0] sm:$0xff] %vm2486_vm6, %v2474_v3  ;;  %v6250_v13 = vsel %vm2085_vm5, 1.0, %v4689_v26  ;;  %vm2087_vm8 = vcmp.ge.f32.partialorder %v1989_v43, 1.0  ;;  %v1990_v51 = vadd.f32 %v1892_v9, %v1794_v7  ;;  %v1798_v3 = vld [vmem:[#allocation3 + $0x300] sm:$0xff] }
 0x227   : > { %7628 = vst [vmem:[#allocation67_spill] sm:$0xff] %v6250_v13  ;;  %v6253_v29 = vsel %vm2086_vm7, 1.0, %v4689_v26  ;;  %2574 = vst.msk [vmem:[#allocation2 + $0x2b8] sm:$0xff] %vm2486_vm6, %v2475_v23  ;;  %v2476_v53 = vmul.f32 %v2378_v10, %v1986_v38  ;;  %v2379_v63 = vsub.f32 1.0, %v6250_v13  ;;  %v6259_v55 = vsel %vm2087_vm8, 1.0, %v4689_v26  ;;  %v1799_v13 = vld [vmem:[#allocation3 + $0x308] sm:$0xff] }
 0x228   : > { %7629 = vst [vmem:[#allocation68_spill] sm:$0xff] %v6253_v29  ;;  %v2380_v40 = vsub.f32 1.0, %v6253_v29  ;;  %7630 = vst [vmem:[#allocation69_spill] sm:$0xff] %v6259_v55  ;;  %v2381_v11 = vsub.f32 1.0, %v6259_v55  ;;  %vm2088_vm9 = vcmp.ge.f32.partialorder %v1990_v51, 1.0  ;;  %v1991_v37 = vadd.f32 %v1893_v49, %v1795_v47  ;;  %v1897_v55 = vld [vmem:[#allocation2 + $0x308] sm:$0xff] }
 0x229   : > { %v1992_v0 = vadd.f32 %v1894_v62, %v1796_v16  ;;  %2575 = vst.msk [vmem:[#allocation2 + $0x2c0] sm:$0xff] %vm2486_vm6, %v2476_v53  ;;  %v2477_v7 = vmul.f32 %v2379_v63, %v1987_v20  ;;  %v6264_v10 = vsel %vm2088_vm9, 1.0, %v4689_v26  ;;  %v1993_v23 = vadd.f32 %v1895_v24, %v1797_v50 }
 0x22a   : > { %v2478_v9 = vmul.f32 %v2380_v40, %v1988_v22  ;;  %7631 = vst [vmem:[#allocation70_spill] sm:$0xff] %v6264_v10  ;;  %v2479_v38 = vmul.f32 %v2381_v11, %v1989_v43  ;;  %v2382_v29 = vsub.f32 1.0, %v6264_v10  ;;  %vm2089_vm10 = vcmp.ge.f32.partialorder %v1991_v37, 1.0 }
 0x22b   : > { %vm2090_vm11 = vcmp.ge.f32.partialorder %v1992_v0, 1.0  ;;  %2576 = vst.msk [vmem:[#allocation2 + $0x2c8] sm:$0xff] %vm2486_vm6, %v2477_v7  ;;  %v6270_v49 = vsel %vm2089_vm10, 1.0, %v4689_v26  ;;  %vm2091_vm12 = vcmp.ge.f32.partialorder %v1993_v23, 1.0  ;;  %v1994_v22 = vadd.f32 %v1896_v41, %v1798_v3 }
 0x22c   : > { %2577 = vst.msk [vmem:[#allocation2 + $0x2d0] sm:$0xff] %vm2486_vm6, %v2478_v9  ;;  %7632 = vst [vmem:[#allocation71_spill] sm:$0xff] %v6270_v49  ;;  %v6273_v20 = vsel %vm2090_vm11, 1.0, %v4689_v26  ;;  %v2480_v43 = vmul.f32 %v2382_v29, %v1990_v51  ;;  %v2383_v47 = vsub.f32 1.0, %v6270_v49  ;;  %v6279_v62 = vsel %vm2091_vm12, 1.0, %v4689_v26 }
 0x22d   : > { %7633 = vst [vmem:[#allocation72_spill] sm:$0xff] %v6273_v20  ;;  %2578 = vst.msk [vmem:[#allocation2 + $0x2d8] sm:$0xff] %vm2486_vm6, %v2479_v38  ;;  %v2384_v16 = vsub.f32 1.0, %v6273_v20  ;;  %v2385_v50 = vsub.f32 1.0, %v6279_v62  ;;  %vm2092_vm13 = vcmp.ge.f32.partialorder %v1994_v22, 1.0  ;;  %v1995_v24 = vadd.f32 %v1897_v55, %v1799_v13 }
 0x22e   : > { %7634 = vst [vmem:[#allocation73_spill] sm:$0xff] %v6279_v62  ;;  %v4114_v53 = vpack.c.bf16 %v5807_v27, %v5807_v27  ;;  %2579 = vst.msk [vmem:[#allocation2 + $0x2e0] sm:$0xff] %vm2486_vm6, %v2480_v43  ;;  %v2481_v41 = vmul.f32 %v2383_v47, %v1991_v37  ;;  %v6286_v51 = vsel %vm2092_vm13, 1.0, %v4689_v26  ;;  %v4115_v63 = vpack.c.bf16 %v5811_v33, %v5811_v33 }
 0x22f   : > { %v2482_v29 = vmul.f32 %v2384_v16, %v1992_v0  ;;  %7635 = vst [vmem:[#allocation74_spill] sm:$0xff] %v6286_v51  ;;  %v2483_v40 = vmul.f32 %v2385_v50, %v1993_v23  ;;  %v2386_v11 = vsub.f32 1.0, %v6286_v51  ;;  %vm2093_vm14 = vcmp.ge.f32.partialorder %v1995_v24, 1.0 }
 0x230   : > { %2978 = vst.msk [vmem:[%s4806_s28] sm:$0xf] %vm2977_vm4, %v4114_v53  ;;  %v4116_v13 = vpack.c.bf16 %v5814_v34, %v5814_v34  ;;  %v6298_v55 = vsel %vm2093_vm14, 1.0, %v4689_v26  ;;  %2979 = vst.msk [vmem:[%s4806_s28 + $0x4] sm:$0xf] %vm2977_vm4, %v4115_v63  ;;  %v4117_v37 = vpack.c.bf16 %v5819_v39, %v5819_v39  ;;  %v4118_v0 = vpack.c.bf16 %v5823_v44, %v5823_v44 }
 0x231   : > { %2580 = vst.msk [vmem:[#allocation2 + $0x2e8] sm:$0xff] %vm2486_vm6, %v2481_v41  ;;  %2581 = vst.msk [vmem:[#allocation2 + $0x2f0] sm:$0xff] %vm2486_vm6, %v2482_v29  ;;  %v4119_v3 = vpack.c.bf16 %v5830_v59, %v5830_v59  ;;  %v2484_v7 = vmul.f32 %v2386_v11, %v1994_v22  ;;  %v2387_v9 = vsub.f32 1.0, %v6298_v55  ;;  %v4120_v26 = vpack.c.bf16 %v5835_v1, %v5835_v1 }
 0x232   : > { %7636 = vst [vmem:[#allocation75_spill] sm:$0xff] %v6298_v55  ;;  %2582 = vst.msk [vmem:[#allocation2 + $0x2f8] sm:$0xff] %vm2486_vm6, %v2483_v40  ;;  %v4121_v23 = vpack.c.bf16 %v5840_v5, %v5840_v5  ;;  %v4122_v38 = vpack.c.bf16 %v5843_v6, %v5843_v6  ;;  %v4123_v22 = vpack.c.bf16 %v5848_v12, %v5848_v12 }
 0x233   : > { %2980 = vst.msk [vmem:[%s4806_s28 + $0x8] sm:$0xf] %vm2977_vm4, %v4116_v13  ;;  %2981 = vst.msk [vmem:[%s4806_s28 + $0xc] sm:$0xf] %vm2977_vm4, %v4117_v37  ;;  %v4124_v43 = vpack.c.bf16 %v5856_v57, %v5856_v57  ;;  %v4125_v47 = vpack.c.bf16 %v5859_v28, %v5859_v28  ;;  %v2485_v16 = vmul.f32 %v2387_v9, %v1995_v24 }
 0x234   : > { %2982 = vst.msk [vmem:[%s4806_s28 + $0x10] sm:$0xf] %vm2977_vm4, %v4118_v0  ;;  %2983 = vst.msk [vmem:[%s4806_s28 + $0x14] sm:$0xf] %vm2977_vm4, %v4119_v3  ;;  %v4126_v50 = vpack.c.bf16 %v5865_v35, %v5865_v35  ;;  %v4127_v53 = vpack.c.bf16 %v5868_v36, %v5868_v36  ;;  %v4128_v41 = vpack.c.bf16 %v5873_v48, %v5873_v48 }
 0x235   : > { %2583 = vst.msk [vmem:[#allocation2 + $0x300] sm:$0xff] %vm2486_vm6, %v2484_v7  ;;  %v4129_v24 = vpack.c.bf16 %v5879_v60, %v5879_v60  ;;  %v4130_v29 = vpack.c.bf16 %v5885_v2, %v5885_v2  ;;  %v4131_v63 = vpack.c.bf16 %v5890_v14, %v5890_v14  ;;  %v4132_v40 = vpack.c.bf16 %v5893_v15, %v5893_v15 }
 0x236   : > { %2984 = vst.msk [vmem:[%s4806_s28 + $0x18] sm:$0xf] %vm2977_vm4, %v4120_v26  ;;  %2985 = vst.msk [vmem:[%s4806_s28 + $0x1c] sm:$0xf] %vm2977_vm4, %v4121_v23  ;;  %v4133_v11 = vpack.c.bf16 %v5898_v21, %v5898_v21  ;;  %v4134_v13 = vpack.c.bf16 %v5904_v31, %v5904_v31  ;;  %v4135_v37 = vpack.c.bf16 %v5910_v45, %v5910_v45 }
 0x237   : > { %2986 = vst.msk [vmem:[%s4806_s28 + $0x20] sm:$0xf] %vm2977_vm4, %v4122_v38  ;;  %2987 = vst.msk [vmem:[%s4806_s28 + $0x24] sm:$0xf] %vm2977_vm4, %v4123_v22  ;;  %v4136_v0 = vpack.c.bf16 %v5913_v46, %v5913_v46  ;;  %v4137_v3 = vpack.c.bf16 %v5919_v54, %v5919_v54  ;;  %v4138_v7 = vpack.c.bf16 %v5924_v4, %v5924_v4 }
 0x238   : > { %2988 = vst.msk [vmem:[%s4806_s28 + $0x28] sm:$0xf] %vm2977_vm4, %v4124_v43  ;;  %2989 = vst.msk [vmem:[%s4806_s28 + $0x2c] sm:$0xf] %vm2977_vm4, %v4125_v47  ;;  %v4139_v9 = vpack.c.bf16 %v5930_v17, %v5930_v17  ;;  %v4140_v26 = vpack.c.bf16 %v5933_v18, %v5933_v18  ;;  %v4141_v23 = vpack.c.bf16 %v5939_v25, %v5939_v25 }
 0x239   : > { %2584 = vst.msk [vmem:[#allocation2 + $0x308] sm:$0xff] %vm2486_vm6, %v2485_v16  ;;  %v4142_v38 = vpack.c.bf16 %v5944_v42, %v5944_v42  ;;  %v4143_v22 = vpack.c.bf16 %v5950_v56, %v5950_v56  ;;  %v4144_v43 = vpack.c.bf16 %v5953_v58, %v5953_v58  ;;  %v4145_v47 = vpack.c.bf16 %v5959_v8, %v5959_v8 }
 0x23a   : > { %2990 = vst.msk [vmem:[%s4806_s28 + $0x30] sm:$0xf] %vm2977_vm4, %v4126_v50  ;;  %2991 = vst.msk [vmem:[%s4806_s28 + $0x34] sm:$0xf] %vm2977_vm4, %v4127_v53  ;;  %v4146_v16 = vpack.c.bf16 %v5964_v19, %v5964_v19  ;;  %v4147_v50 = vpack.c.bf16 %v5970_v30, %v5970_v30  ;;  %v4148_v53 = vpack.c.bf16 %v5973_v32, %v5973_v32  ;;  %v7690_v32 = vld [vmem:[#allocation68_spill] sm:$0xff] }
 0x23b   : > { %2992 = vst.msk [vmem:[%s4806_s28 + $0x38] sm:$0xf] %vm2977_vm4, %v4128_v41  ;;  %2993 = vst.msk [vmem:[%s4806_s28 + $0x3c] sm:$0xf] %vm2977_vm4, %v4129_v24  ;;  %v4149_v41 = vpack.c.bf16 %v5979_v52, %v5979_v52  ;;  %v7637_v24 = vld [vmem:[#allocation14_spill] sm:$0xff]  ;;  %v4207_v30 = vpack.c.bf16 %v6270_v49, %v6270_v49  ;;  %v4210_v49 = vpack.c.bf16 %v6286_v51, %v6286_v51 }
 0x23c   : > { %2994 = vst.msk [vmem:[%s4806_s28 + $0x40] sm:$0xf] %vm2977_vm4, %v4130_v29  ;;  %2995 = vst.msk [vmem:[%s4806_s28 + $0x44] sm:$0xf] %vm2977_vm4, %v4131_v63  ;;  %v4150_v29 = vpack.c.bf16 %v7637_v24, %v7637_v24  ;;  %v7638_v63 = vld [vmem:[#allocation15_spill] sm:$0xff]  ;;  %v3096_v19 = vld [vmem:[%s4808_s24 + $0xa0] sm:$0xff] }
 0x23d   : > { %2996 = vst.msk [vmem:[%s4806_s28 + $0x48] sm:$0xf] %vm2977_vm4, %v4132_v40  ;;  %2997 = vst.msk [vmem:[%s4806_s28 + $0x4c] sm:$0xf] %vm2977_vm4, %v4133_v11  ;;  %v4151_v40 = vpack.c.bf16 %v7638_v63, %v7638_v63  ;;  %v7639_v11 = vld [vmem:[#allocation16_spill] sm:$0xff]  ;;  %v7689_v24 = vld [vmem:[#allocation67_spill] sm:$0xff] }
 0x23e   : > { %2998 = vst.msk [vmem:[%s4806_s28 + $0x50] sm:$0xf] %vm2977_vm4, %v4134_v13  ;;  %2999 = vst.msk [vmem:[%s4806_s28 + $0x54] sm:$0xf] %vm2977_vm4, %v4135_v37  ;;  %v4152_v13 = vpack.c.bf16 %v7639_v11, %v7639_v11  ;;  %v7640_v37 = vld [vmem:[#allocation17_spill] sm:$0xff]  ;;  %v7686_v11 = vld [vmem:[#allocation64_spill] sm:$0xff]  ;;  %v4203_v52 = vpack.c.bf16 %v7689_v24, %v7689_v24 }
 0x23f   : > { %3000 = vst.msk [vmem:[%s4806_s28 + $0x58] sm:$0xf] %vm2977_vm4, %v4136_v0  ;;  %3001 = vst.msk [vmem:[%s4806_s28 + $0x5c] sm:$0xf] %vm2977_vm4, %v4137_v3  ;;  %v4153_v0 = vpack.c.bf16 %v7640_v37, %v7640_v37  ;;  %v7641_v3 = vld [vmem:[#allocation18_spill] sm:$0xff]  ;;  %v7691_v24 = vld [vmem:[#allocation69_spill] sm:$0xff] }
 0x240   : > { %3002 = vst.msk [vmem:[%s4806_s28 + $0x60] sm:$0xf] %vm2977_vm4, %v4138_v7  ;;  %3003 = vst.msk [vmem:[%s4806_s28 + $0x64] sm:$0xf] %vm2977_vm4, %v4139_v9  ;;  %v4154_v7 = vpack.c.bf16 %v7641_v3, %v7641_v3  ;;  %v7642_v9 = vld [vmem:[#allocation19_spill] sm:$0xff] }
 0x241   : > { %3004 = vst.msk [vmem:[%s4806_s28 + $0x68] sm:$0xf] %vm2977_vm4, %v4140_v26  ;;  %3005 = vst.msk [vmem:[%s4806_s28 + $0x6c] sm:$0xf] %vm2977_vm4, %v4141_v23  ;;  %v4155_v26 = vpack.c.bf16 %v7642_v9, %v7642_v9  ;;  %v7643_v23 = vld [vmem:[#allocation20_spill] sm:$0xff]  ;;  %v7685_v3 = vld [vmem:[#allocation63_spill] sm:$0xff] }
 0x242   : > { %3006 = vst.msk [vmem:[%s4806_s28 + $0x70] sm:$0xf] %vm2977_vm4, %v4142_v38  ;;  %3007 = vst.msk [vmem:[%s4806_s28 + $0x74] sm:$0xf] %vm2977_vm4, %v4143_v22  ;;  %v4156_v38 = vpack.c.bf16 %v7643_v23, %v7643_v23  ;;  %v7644_v22 = vld [vmem:[#allocation21_spill] sm:$0xff]  ;;  %v7683_v9 = vld [vmem:[#allocation60_spill] sm:$0xff]  ;;  %v4199_v37 = vpack.c.bf16 %v7685_v3, %v7685_v3 }
 0x243   : > { %3008 = vst.msk [vmem:[%s4806_s28 + $0x78] sm:$0xf] %vm2977_vm4, %v4144_v43  ;;  %3009 = vst.msk [vmem:[%s4806_s28 + $0x7c] sm:$0xf] %vm2977_vm4, %v4145_v47  ;;  %v4157_v43 = vpack.c.bf16 %v7644_v22, %v7644_v22  ;;  %v7645_v47 = vld [vmem:[#allocation22_spill] sm:$0xff]  ;;  %v7687_v3 = vld [vmem:[#allocation65_spill] sm:$0xff] }
 0x244   : > { %3010 = vst.msk [vmem:[%s4806_s28 + $0x80] sm:$0xf] %vm2977_vm4, %v4146_v16  ;;  %3011 = vst.msk [vmem:[%s4806_s28 + $0x84] sm:$0xf] %vm2977_vm4, %v4147_v50  ;;  %v4158_v16 = vpack.c.bf16 %v7645_v47, %v7645_v47  ;;  %v7646_v50 = vld [vmem:[#allocation23_spill] sm:$0xff] }
 0x245   : > { %3012 = vst.msk [vmem:[%s4806_s28 + $0x88] sm:$0xf] %vm2977_vm4, %v4148_v53  ;;  %3013 = vst.msk [vmem:[%s4806_s28 + $0x8c] sm:$0xf] %vm2977_vm4, %v4149_v41  ;;  %v4159_v53 = vpack.c.bf16 %v7646_v50, %v7646_v50  ;;  %v7647_v41 = vld [vmem:[#allocation24_spill] sm:$0xff]  ;;  %v7650_v47 = vld [vmem:[#allocation27_spill] sm:$0xff] }
 0x246   : > { %3014 = vst.msk [vmem:[%s4806_s28 + $0x90] sm:$0xf] %vm2977_vm4, %v4150_v29  ;;  %3015 = vst.msk [vmem:[%s4806_s28 + $0x94] sm:$0xf] %vm2977_vm4, %v4151_v40  ;;  %v4160_v23 = vpack.c.bf16 %v7647_v41, %v7647_v41  ;;  %v7648_v29 = vld [vmem:[#allocation25_spill] sm:$0xff]  ;;  %v4163_v41 = vpack.c.bf16 %v7650_v47, %v7650_v47 }
 0x247   : > { %3016 = vst.msk [vmem:[%s4806_s28 + $0x98] sm:$0xf] %vm2977_vm4, %v4152_v13  ;;  %3017 = vst.msk [vmem:[%s4806_s28 + $0x9c] sm:$0xf] %vm2977_vm4, %v4153_v0  ;;  %v4161_v40 = vpack.c.bf16 %v7648_v29, %v7648_v29  ;;  %v7649_v13 = vld [vmem:[#allocation26_spill] sm:$0xff]  ;;  %v7651_v0 = vld [vmem:[#allocation28_spill] sm:$0xff] }
 0x248   : > { %3018 = vst.msk [vmem:[%s4806_s28 + $0xa0] sm:$0xf] %vm2977_vm4, %v4154_v7  ;;  %3019 = vst.msk [vmem:[%s4806_s28 + $0xa4] sm:$0xf] %vm2977_vm4, %v4155_v26  ;;  %v4162_v50 = vpack.c.bf16 %v7649_v13, %v7649_v13  ;;  %v4164_v22 = vpack.c.bf16 %v7651_v0, %v7651_v0  ;;  %v7652_v7 = vld [vmem:[#allocation29_spill] sm:$0xff]  ;;  %v7654_v13 = vld [vmem:[#allocation31_spill] sm:$0xff] }
 0x249   : > { %3020 = vst.msk [vmem:[%s4806_s28 + $0xa8] sm:$0xf] %vm2977_vm4, %v4156_v38  ;;  %3021 = vst.msk [vmem:[%s4806_s28 + $0xac] sm:$0xf] %vm2977_vm4, %v4157_v43  ;;  %v4165_v26 = vpack.c.bf16 %v7652_v7, %v7652_v7  ;;  %v7653_v38 = vld [vmem:[#allocation30_spill] sm:$0xff]  ;;  %v4167_v0 = vpack.c.bf16 %v7654_v13, %v7654_v13  ;;  %v7655_v43 = vld [vmem:[#allocation32_spill] sm:$0xff] }
 0x24a   : > { %3022 = vst.msk [vmem:[%s4806_s28 + $0xb0] sm:$0xf] %vm2977_vm4, %v4158_v16  ;;  %3023 = vst.msk [vmem:[%s4806_s28 + $0xb4] sm:$0xf] %vm2977_vm4, %v4159_v53  ;;  %v4166_v47 = vpack.c.bf16 %v7653_v38, %v7653_v38  ;;  %v4168_v29 = vpack.c.bf16 %v7655_v43, %v7655_v43  ;;  %v7657_v53 = vld [vmem:[#allocation34_spill] sm:$0xff]  ;;  %v7658_v38 = vld [vmem:[#allocation35_spill] sm:$0xff] }
 0x24b   : > { %3024 = vst.msk [vmem:[%s4806_s28 + $0xb8] sm:$0xf] %vm2977_vm4, %v4160_v23  ;;  %3025 = vst.msk [vmem:[%s4806_s28 + $0xbc] sm:$0xf] %vm2977_vm4, %v4161_v40  ;;  %v7656_v23 = vld [vmem:[#allocation33_spill] sm:$0xff]  ;;  %v4170_v13 = vpack.c.bf16 %v7657_v53, %v7657_v53  ;;  %v4171_v43 = vpack.c.bf16 %v7658_v38, %v7658_v38  ;;  %v7659_v40 = vld [vmem:[#allocation36_spill] sm:$0xff] }
 0x24c   : > { %3026 = vst.msk [vmem:[%s4806_s28 + $0xc0] sm:$0xf] %vm2977_vm4, %v4162_v50  ;;  %3027 = vst.msk [vmem:[%s4806_s28 + $0xc4] sm:$0xf] %vm2977_vm4, %v4163_v41  ;;  %v4169_v16 = vpack.c.bf16 %v7656_v23, %v7656_v23  ;;  %v4172_v7 = vpack.c.bf16 %v7659_v40, %v7659_v40  ;;  %v7661_v41 = vld [vmem:[#allocation38_spill] sm:$0xff]  ;;  %v7662_v53 = vld [vmem:[#allocation39_spill] sm:$0xff] }
 0x24d   : > { %3028 = vst.msk [vmem:[%s4806_s28 + $0xc8] sm:$0xf] %vm2977_vm4, %v4164_v22  ;;  %3029 = vst.msk [vmem:[%s4806_s28 + $0xcc] sm:$0xf] %vm2977_vm4, %v4165_v26  ;;  %v7660_v22 = vld [vmem:[#allocation37_spill] sm:$0xff]  ;;  %v4174_v38 = vpack.c.bf16 %v7661_v41, %v7661_v41  ;;  %v4175_v40 = vpack.c.bf16 %v7662_v53, %v7662_v53  ;;  %v7663_v26 = vld [vmem:[#allocation40_spill] sm:$0xff] }
 0x24e   : > { %3030 = vst.msk [vmem:[%s4806_s28 + $0xd0] sm:$0xf] %vm2977_vm4, %v4166_v47  ;;  %3031 = vst.msk [vmem:[%s4806_s28 + $0xd4] sm:$0xf] %vm2977_vm4, %v4167_v0  ;;  %v4173_v50 = vpack.c.bf16 %v7660_v22, %v7660_v22  ;;  %v4176_v23 = vpack.c.bf16 %v7663_v26, %v7663_v26  ;;  %v7664_v47 = vld [vmem:[#allocation41_spill] sm:$0xff]  ;;  %v7665_v0 = vld [vmem:[#allocation42_spill] sm:$0xff] }
 0x24f   : > { %3032 = vst.msk [vmem:[%s4806_s28 + $0xd8] sm:$0xf] %vm2977_vm4, %v4168_v29  ;;  %3033 = vst.msk [vmem:[%s4806_s28 + $0xdc] sm:$0xf] %vm2977_vm4, %v4169_v16  ;;  %v4177_v29 = vpack.c.bf16 %v7664_v47, %v7664_v47  ;;  %v4178_v53 = vpack.c.bf16 %v7665_v0, %v7665_v0  ;;  %v7666_v41 = vld [vmem:[#allocation43_spill] sm:$0xff]  ;;  %v7667_v16 = vld [vmem:[#allocation44_spill] sm:$0xff] }
 0x250   : > { %3034 = vst.msk [vmem:[%s4806_s28 + $0xe0] sm:$0xf] %vm2977_vm4, %v4170_v13  ;;  %3035 = vst.msk [vmem:[%s4806_s28 + $0xe4] sm:$0xf] %vm2977_vm4, %v4171_v43  ;;  %v4179_v26 = vpack.c.bf16 %v7666_v41, %v7666_v41  ;;  %v4180_v22 = vpack.c.bf16 %v7667_v16, %v7667_v16  ;;  %v7668_v13 = vld [vmem:[#allocation45_spill] sm:$0xff]  ;;  %v7669_v43 = vld [vmem:[#allocation46_spill] sm:$0xff] }
 0x251   : > { %3036 = vst.msk [vmem:[%s4806_s28 + $0xe8] sm:$0xf] %vm2977_vm4, %v4172_v7  ;;  %3037 = vst.msk [vmem:[%s4806_s28 + $0xec] sm:$0xf] %vm2977_vm4, %v4173_v50  ;;  %v4181_v7 = vpack.c.bf16 %v7668_v13, %v7668_v13  ;;  %v4182_v41 = vpack.c.bf16 %v7669_v43, %v7669_v43  ;;  %v7670_v0 = vld [vmem:[#allocation47_spill] sm:$0xff]  ;;  %v7671_v50 = vld [vmem:[#allocation48_spill] sm:$0xff] }
 0x252   : > { %3038 = vst.msk [vmem:[%s4806_s28 + $0xf0] sm:$0xf] %vm2977_vm4, %v4174_v38  ;;  %3039 = vst.msk [vmem:[%s4806_s28 + $0xf4] sm:$0xf] %vm2977_vm4, %v4175_v40  ;;  %v4183_v16 = vpack.c.bf16 %v7670_v0, %v7670_v0  ;;  %v4184_v47 = vpack.c.bf16 %v7671_v50, %v7671_v50  ;;  %v7672_v38 = vld [vmem:[#allocation49_spill] sm:$0xff]  ;;  %v7673_v40 = vld [vmem:[#allocation50_spill] sm:$0xff] }
 0x253   : > { %3040 = vst.msk [vmem:[%s4806_s28 + $0xf8] sm:$0xf] %vm2977_vm4, %v4176_v23  ;;  %3041 = vst.msk [vmem:[%s4806_s28 + $0xfc] sm:$0xf] %vm2977_vm4, %v4177_v29  ;;  %v4185_v23 = vpack.c.bf16 %v7672_v38, %v7672_v38  ;;  %v4186_v0 = vpack.c.bf16 %v7673_v40, %v7673_v40  ;;  %v7674_v50 = vld [vmem:[#allocation51_spill] sm:$0xff]  ;;  %v7675_v43 = vld [vmem:[#allocation52_spill] sm:$0xff] }
 0x254   : > { %3042 = vst.msk [vmem:[%s4806_s28 + $0x100] sm:$0xf] %vm2977_vm4, %v4178_v53  ;;  %3043 = vst.msk [vmem:[%s4806_s28 + $0x104] sm:$0xf] %vm2977_vm4, %v4179_v26  ;;  %v4187_v29 = vpack.c.bf16 %v7674_v50, %v7674_v50  ;;  %v4188_v53 = vpack.c.bf16 %v7675_v43, %v7675_v43  ;;  %v7677_v40 = vld [vmem:[#allocation54_spill] sm:$0xff]  ;;  %v7678_v38 = vld [vmem:[#allocation55_spill] sm:$0xff] }
 0x255   : > { %3044 = vst.msk [vmem:[%s4806_s28 + $0x108] sm:$0xf] %vm2977_vm4, %v4180_v22  ;;  %3045 = vst.msk [vmem:[%s4806_s28 + $0x10c] sm:$0xf] %vm2977_vm4, %v4181_v7  ;;  %v7676_v22 = vld [vmem:[#allocation53_spill] sm:$0xff]  ;;  %v4190_v50 = vpack.c.bf16 %v7677_v40, %v7677_v40  ;;  %v4191_v7 = vpack.c.bf16 %v7678_v38, %v7678_v38  ;;  %v7679_v43 = vld [vmem:[#allocation56_spill] sm:$0xff] }
 0x256   : > { %3046 = vst.msk [vmem:[%s4806_s28 + $0x110] sm:$0xf] %vm2977_vm4, %v4182_v41  ;;  %3047 = vst.msk [vmem:[%s4806_s28 + $0x114] sm:$0xf] %vm2977_vm4, %v4183_v16  ;;  %v4189_v26 = vpack.c.bf16 %v7676_v22, %v7676_v22  ;;  %v4192_v41 = vpack.c.bf16 %v7679_v43, %v7679_v43  ;;  %v3076_v16 = vld [vmem:[%s4808_s24] sm:$0xff]  ;;  %v7682_v13 = vld [vmem:[#allocation59_spill] sm:$0xff] }
 0x257   : > { %3048 = vst.msk [vmem:[%s4806_s28 + $0x118] sm:$0xf] %vm2977_vm4, %v4184_v47  ;;  %3049 = vst.msk [vmem:[%s4806_s28 + $0x11c] sm:$0xf] %vm2977_vm4, %v4185_v23  ;;  %v7680_v47 = vld [vmem:[#allocation57_spill] sm:$0xff]  ;;  %v7681_v22 = vld [vmem:[#allocation58_spill] sm:$0xff]  ;;  %v4195_v43 = vpack.c.bf16 %v7682_v13, %v7682_v13  ;;  %v4196_v23 = vpack.c.bf16 %v7683_v9, %v7683_v9 }
 0x258   : > { %3050 = vst.msk [vmem:[%s4806_s28 + $0x120] sm:$0xf] %vm2977_vm4, %v4186_v0  ;;  %3051 = vst.msk [vmem:[%s4806_s28 + $0x124] sm:$0xf] %vm2977_vm4, %v4187_v29  ;;  %v4193_v40 = vpack.c.bf16 %v7680_v47, %v7680_v47  ;;  %v4194_v38 = vpack.c.bf16 %v7681_v22, %v7681_v22  ;;  %v3077_v0 = vld [vmem:[%s4808_s24 + $0x8] sm:$0xff]  ;;  %v3078_v29 = vld [vmem:[%s4808_s24 + $0x10] sm:$0xff]  ;;  %v4198_v22 = vpack.c.bf16 %v6224_v61, %v6224_v61 }
 0x259   : > { %3052 = vst.msk [vmem:[%s4806_s28 + $0x128] sm:$0xf] %vm2977_vm4, %v4188_v53  ;;  %v3079_v53 = vld [vmem:[%s4808_s24 + $0x18] sm:$0xff]  ;;  %v3080_v47 = vld [vmem:[%s4808_s24 + $0x20] sm:$0xff]  ;;  %3053 = vst.msk [vmem:[%s4806_s28 + $0x12c] sm:$0xf] %vm2977_vm4, %v4189_v26  ;;  %v4200_v26 = vpack.c.bf16 %v7686_v11, %v7686_v11  ;;  %v4201_v11 = vpack.c.bf16 %v7687_v3, %v7687_v3 }
 0x25a   : > { %3054 = vst.msk [vmem:[%s4806_s28 + $0x130] sm:$0xf] %vm2977_vm4, %v4190_v50  ;;  %3055 = vst.msk [vmem:[%s4806_s28 + $0x134] sm:$0xf] %vm2977_vm4, %v4191_v7  ;;  %v7684_v13 = vld [vmem:[#allocation61_spill] sm:$0xff]  ;;  %v3082_v7 = vld [vmem:[%s4808_s24 + $0x30] sm:$0xff]  ;;  %v3178_v51 = vadd.f32 %v5823_v44, %v3080_v47 }
 0x25b   : > { %3056 = vst.msk [vmem:[%s4806_s28 + $0x138] sm:$0xf] %vm2977_vm4, %v4192_v41  ;;  %v4197_v9 = vpack.c.bf16 %v7684_v13, %v7684_v13  ;;  %v3081_v50 = vld [vmem:[%s4808_s24 + $0x28] sm:$0xff]  ;;  %v3083_v41 = vld [vmem:[%s4808_s24 + $0x38] sm:$0xff]  ;;  %v3084_v13 = vld [vmem:[%s4808_s24 + $0x40] sm:$0xff] }
 0x25c   : > { %3057 = vst.msk [vmem:[%s4806_s28 + $0x13c] sm:$0xf] %vm2977_vm4, %v4193_v40  ;;  %3058 = vst.msk [vmem:[%s4806_s28 + $0x140] sm:$0xf] %vm2977_vm4, %v4194_v38  ;;  %v7688_v61 = vld [vmem:[#allocation66_spill] sm:$0xff]  ;;  %v4204_v40 = vpack.c.bf16 %v7690_v32, %v7690_v32  ;;  %v3085_v38 = vld [vmem:[%s4808_s24 + $0x48] sm:$0xff]  ;;  %v4205_v32 = vpack.c.bf16 %v7691_v24, %v7691_v24  ;;  %v3182_v44 = vadd.f32 %v5843_v6, %v3084_v13 }
 0x25d   : > { %3059 = vst.msk [vmem:[%s4806_s28 + $0x144] sm:$0xf] %vm2977_vm4, %v4195_v43  ;;  %3060 = vst.msk [vmem:[%s4806_s28 + $0x148] sm:$0xf] %vm2977_vm4, %v4196_v23  ;;  %v4202_v63 = vpack.c.bf16 %v7688_v61, %v7688_v61  ;;  %v3086_v43 = vld [vmem:[%s4808_s24 + $0x50] sm:$0xff]  ;;  %v3087_v23 = vld [vmem:[%s4808_s24 + $0x58] sm:$0xff]  ;;  %v4206_v61 = vpack.c.bf16 %v6264_v10, %v6264_v10  ;;  %v4211_v10 = vpack.c.bf16 %v6298_v55, %v6298_v55 }
 0x25e   : > { %v3088_v3 = vld [vmem:[%s4808_s24 + $0x60] sm:$0xff]  ;;  %3061 = vst.msk [vmem:[%s4806_s28 + $0x14c] sm:$0xf] %vm2977_vm4, %v4197_v9  ;;  %3062 = vst.msk [vmem:[%s4806_s28 + $0x150] sm:$0xf] %vm2977_vm4, %v4198_v22  ;;  %v4208_v9 = vpack.c.bf16 %v6273_v20, %v6273_v20  ;;  %v3089_v22 = vld [vmem:[%s4808_s24 + $0x68] sm:$0xff]  ;;  %v4209_v20 = vpack.c.bf16 %v6279_v62, %v6279_v62  ;;  %v3175_v55 = vadd.f32 %v5811_v33, %v3077_v0 }
 0x25f   : > { %3063 = vst.msk [vmem:[%s4806_s28 + $0x154] sm:$0xf] %vm2977_vm4, %v4199_v37  ;;  %3064 = vst.msk [vmem:[%s4806_s28 + $0x158] sm:$0xf] %vm2977_vm4, %v4200_v26  ;;  %v3090_v37 = vld [vmem:[%s4808_s24 + $0x70] sm:$0xff]  ;;  %v3091_v26 = vld [vmem:[%s4808_s24 + $0x78] sm:$0xff]  ;;  %v3179_v33 = vadd.f32 %v5830_v59, %v3081_v50  ;;  %v3183_v59 = vadd.f32 %v5848_v12, %v3085_v38  ;;  %v3186_v6 = vadd.f32 %v5865_v35, %v3088_v3 }
 0x260   : > { %v3092_v24 = vld [vmem:[%s4808_s24 + $0x80] sm:$0xff]  ;;  %3065 = vst.msk [vmem:[%s4806_s28 + $0x15c] sm:$0xf] %vm2977_vm4, %v4201_v11  ;;  %3066 = vst.msk [vmem:[%s4806_s28 + $0x160] sm:$0xf] %vm2977_vm4, %v4202_v63  ;;  %v3174_v11 = vadd.f32 %v5807_v27, %v3076_v16  ;;  %v3093_v63 = vld [vmem:[%s4808_s24 + $0x88] sm:$0xff]  ;;  %v3176_v27 = vadd.f32 %v5814_v34, %v3078_v29  ;;  %v3177_v16 = vadd.f32 %v5819_v39, %v3079_v53 }
 0x261   : > { %3067 = vst.msk [vmem:[%s4806_s28 + $0x164] sm:$0xf] %vm2977_vm4, %v4203_v52  ;;  %3068 = vst.msk [vmem:[%s4806_s28 + $0x168] sm:$0xf] %vm2977_vm4, %v4204_v40  ;;  %v3094_v52 = vld [vmem:[%s4808_s24 + $0x90] sm:$0xff]  ;;  %v3095_v40 = vld [vmem:[%s4808_s24 + $0x98] sm:$0xff]  ;;  %v3180_v34 = vadd.f32 %v5835_v1, %v3082_v7  ;;  %v3181_v39 = vadd.f32 %v5840_v5, %v3083_v41  ;;  %v3184_v1 = vadd.f32 %v5856_v57, %v3086_v43 }
 0x262   : > { %3069 = vst.msk [vmem:[%s4806_s28 + $0x16c] sm:$0xf] %vm2977_vm4, %v4205_v32  ;;  %3070 = vst.msk [vmem:[%s4806_s28 + $0x170] sm:$0xf] %vm2977_vm4, %v4206_v61  ;;  %v3097_v62 = vld [vmem:[%s4808_s24 + $0xa8] sm:$0xff]  ;;  %v3098_v32 = vld [vmem:[%s4808_s24 + $0xb0] sm:$0xff]  ;;  %v3185_v5 = vadd.f32 %v5859_v28, %v3087_v23  ;;  %v3187_v12 = vadd.f32 %v5868_v36, %v3089_v22  ;;  %v3188_v57 = vadd.f32 %v5873_v48, %v3090_v37 }
 0x263   : > { %3071 = vst.msk [vmem:[%s4806_s28 + $0x174] sm:$0xf] %vm2977_vm4, %v4207_v30  ;;  %3072 = vst.msk [vmem:[%s4806_s28 + $0x178] sm:$0xf] %vm2977_vm4, %v4208_v9  ;;  %v3099_v61 = vld [vmem:[%s4808_s24 + $0xb8] sm:$0xff]  ;;  %v3100_v30 = vld [vmem:[%s4808_s24 + $0xc0] sm:$0xff]  ;;  %v3189_v28 = vadd.f32 %v5879_v60, %v3091_v26  ;;  %v3190_v35 = vadd.f32 %v5885_v2, %v3092_v24  ;;  %v3191_v36 = vadd.f32 %v5890_v14, %v3093_v63 }
 0x264   : > { %3073 = vst.msk [vmem:[%s4806_s28 + $0x17c] sm:$0xf] %vm2977_vm4, %v4209_v20  ;;  %3074 = vst.msk [vmem:[%s4806_s28 + $0x180] sm:$0xf] %vm2977_vm4, %v4210_v49  ;;  %v3101_v47 = vld [vmem:[%s4808_s24 + $0xc8] sm:$0xff]  ;;  %v3102_v20 = vld [vmem:[%s4808_s24 + $0xd0] sm:$0xff]  ;;  %v3192_v48 = vadd.f32 %v5893_v15, %v3094_v52  ;;  %v3193_v60 = vadd.f32 %v5898_v21, %v3095_v40  ;;  %v3194_v2 = vadd.f32 %v5904_v31, %v3096_v19 }
 0x265   : > { %3075 = vst.msk [vmem:[%s4806_s28 + $0x184] sm:$0xf] %vm2977_vm4, %v4211_v10  ;;  %v3103_v49 = vld [vmem:[%s4808_s24 + $0xd8] sm:$0xff]  ;;  %v3104_v10 = vld [vmem:[%s4808_s24 + $0xe0] sm:$0xff]  ;;  %v3105_v13 = vld [vmem:[%s4808_s24 + $0xe8] sm:$0xff]  ;;  %v3195_v14 = vadd.f32 %v5910_v45, %v3097_v62  ;;  %v3196_v15 = vadd.f32 %v5913_v46, %v3098_v32  ;;  %v3197_v21 = vadd.f32 %v5919_v54, %v3099_v61  ;;  %v3198_v31 = vadd.f32 %v5924_v4, %v3100_v30 }
 0x266   : > { %3272 = vst.msk [vmem:[%s4808_s24] sm:$0xff] %vm2486_vm6, %v3174_v11  ;;  %3273 = vst.msk [vmem:[%s4808_s24 + $0x8] sm:$0xff] %vm2486_vm6, %v3175_v55  ;;  %v3106_v55 = vld [vmem:[%s4808_s24 + $0xf0] sm:$0xff]  ;;  %v3107_v0 = vld [vmem:[%s4808_s24 + $0xf8] sm:$0xff]  ;;  %v3199_v45 = vadd.f32 %v5930_v17, %v3101_v47  ;;  %v3200_v46 = vadd.f32 %v5933_v18, %v3102_v20  ;;  %v3201_v54 = vadd.f32 %v5939_v25, %v3103_v49 }
 0x267   : > { %3274 = vst.msk [vmem:[%s4808_s24 + $0x10] sm:$0xff] %vm2486_vm6, %v3176_v27  ;;  %3275 = vst.msk [vmem:[%s4808_s24 + $0x18] sm:$0xff] %vm2486_vm6, %v3177_v16  ;;  %v3108_v29 = vld [vmem:[%s4808_s24 + $0x100] sm:$0xff]  ;;  %v3110_v3 = vld [vmem:[%s4808_s24 + $0x110] sm:$0xff]  ;;  %v3202_v4 = vadd.f32 %v5944_v42, %v3104_v10  ;;  %v3203_v17 = vadd.f32 %v5950_v56, %v3105_v13  ;;  %v3204_v18 = vadd.f32 %v5953_v58, %v3106_v55 }
 0x268   : > { %3276 = vst.msk [vmem:[%s4808_s24 + $0x20] sm:$0xff] %vm2486_vm6, %v3178_v51  ;;  %3277 = vst.msk [vmem:[%s4808_s24 + $0x28] sm:$0xff] %vm2486_vm6, %v3179_v33  ;;  %v3109_v51 = vld [vmem:[%s4808_s24 + $0x108] sm:$0xff]  ;;  %v3111_v53 = vld [vmem:[%s4808_s24 + $0x118] sm:$0xff]  ;;  %v3205_v25 = vadd.f32 %v5959_v8, %v3107_v0 }
 0x269   : > { %3278 = vst.msk [vmem:[%s4808_s24 + $0x30] sm:$0xff] %vm2486_vm6, %v3180_v34  ;;  %3279 = vst.msk [vmem:[%s4808_s24 + $0x38] sm:$0xff] %vm2486_vm6, %v3181_v39  ;;  %v3112_v50 = vld [vmem:[%s4808_s24 + $0x120] sm:$0xff]  ;;  %v3113_v24 = vld [vmem:[%s4808_s24 + $0x128] sm:$0xff] }
 0x26a   : > { %3280 = vst.msk [vmem:[%s4808_s24 + $0x40] sm:$0xff] %vm2486_vm6, %v3182_v44  ;;  %3281 = vst.msk [vmem:[%s4808_s24 + $0x48] sm:$0xff] %vm2486_vm6, %v3183_v59  ;;  %v3114_v7 = vld [vmem:[%s4808_s24 + $0x130] sm:$0xff]  ;;  %v3115_v41 = vld [vmem:[%s4808_s24 + $0x138] sm:$0xff] }
 0x26b   : > { %3282 = vst.msk [vmem:[%s4808_s24 + $0x50] sm:$0xff] %vm2486_vm6, %v3184_v1  ;;  %3283 = vst.msk [vmem:[%s4808_s24 + $0x58] sm:$0xff] %vm2486_vm6, %v3185_v5  ;;  %v3116_v38 = vld [vmem:[%s4808_s24 + $0x140] sm:$0xff]  ;;  %v3117_v19 = vld [vmem:[%s4808_s24 + $0x148] sm:$0xff] }
 0x26c   : > { %3284 = vst.msk [vmem:[%s4808_s24 + $0x60] sm:$0xff] %vm2486_vm6, %v3186_v6  ;;  %3285 = vst.msk [vmem:[%s4808_s24 + $0x68] sm:$0xff] %vm2486_vm6, %v3187_v12  ;;  %v3118_v43 = vld [vmem:[%s4808_s24 + $0x150] sm:$0xff]  ;;  %v3119_v23 = vld [vmem:[%s4808_s24 + $0x158] sm:$0xff] }
 0x26d   : > { %3286 = vst.msk [vmem:[%s4808_s24 + $0x70] sm:$0xff] %vm2486_vm6, %v3188_v57  ;;  %3287 = vst.msk [vmem:[%s4808_s24 + $0x78] sm:$0xff] %vm2486_vm6, %v3189_v28  ;;  %v3120_v9 = vld [vmem:[%s4808_s24 + $0x160] sm:$0xff]  ;;  %v3121_v62 = vld [vmem:[%s4808_s24 + $0x168] sm:$0xff] }
 0x26e   : > { %3288 = vst.msk [vmem:[%s4808_s24 + $0x80] sm:$0xff] %vm2486_vm6, %v3190_v35  ;;  %3289 = vst.msk [vmem:[%s4808_s24 + $0x88] sm:$0xff] %vm2486_vm6, %v3191_v36  ;;  %v3122_v22 = vld [vmem:[%s4808_s24 + $0x170] sm:$0xff]  ;;  %v3123_v37 = vld [vmem:[%s4808_s24 + $0x178] sm:$0xff] }
 0x26f   : > { %3290 = vst.msk [vmem:[%s4808_s24 + $0x90] sm:$0xff] %vm2486_vm6, %v3192_v48  ;;  %3291 = vst.msk [vmem:[%s4808_s24 + $0x98] sm:$0xff] %vm2486_vm6, %v3193_v60  ;;  %v3124_v26 = vld [vmem:[%s4808_s24 + $0x180] sm:$0xff]  ;;  %v3125_v63 = vld [vmem:[%s4808_s24 + $0x188] sm:$0xff] }
 0x270   : > { %3292 = vst.msk [vmem:[%s4808_s24 + $0xa0] sm:$0xff] %vm2486_vm6, %v3194_v2  ;;  %3293 = vst.msk [vmem:[%s4808_s24 + $0xa8] sm:$0xff] %vm2486_vm6, %v3195_v14  ;;  %v7692_v42 = vld [vmem:[#allocation10_spill] sm:$0xff]  ;;  %v3127_v40 = vld [vmem:[%s4808_s24 + $0x198] sm:$0xff] }
 0x271   : > { %3294 = vst.msk [vmem:[%s4808_s24 + $0xb0] sm:$0xff] %vm2486_vm6, %v3196_v15  ;;  %3295 = vst.msk [vmem:[%s4808_s24 + $0xb8] sm:$0xff] %vm2486_vm6, %v3197_v21  ;;  %v3206_v11 = vadd.f32 %v7692_v42, %v3108_v29  ;;  %v3126_v52 = vld [vmem:[%s4808_s24 + $0x190] sm:$0xff]  ;;  %v3128_v27 = vld [vmem:[%s4808_s24 + $0x1a0] sm:$0xff] }
 0x272   : > { %3296 = vst.msk [vmem:[%s4808_s24 + $0xc0] sm:$0xff] %vm2486_vm6, %v3198_v31  ;;  %3297 = vst.msk [vmem:[%s4808_s24 + $0xc8] sm:$0xff] %vm2486_vm6, %v3199_v45  ;;  %v7693_v56 = vld [vmem:[#allocation11_spill] sm:$0xff]  ;;  %v7694_v8 = vld [vmem:[#allocation12_spill] sm:$0xff] }
 0x273   : > { %3298 = vst.msk [vmem:[%s4808_s24 + $0xd0] sm:$0xff] %vm2486_vm6, %v3200_v46  ;;  %3299 = vst.msk [vmem:[%s4808_s24 + $0xd8] sm:$0xff] %vm2486_vm6, %v3201_v54  ;;  %v3207_v58 = vadd.f32 %v7693_v56, %v3109_v51  ;;  %v3208_v16 = vadd.f32 %v7694_v8, %v3110_v3  ;;  %v7695_v32 = vld [vmem:[#allocation13_spill] sm:$0xff]  ;;  %v7696_v30 = vld [vmem:[#allocation14_spill] sm:$0xff] }
 0x274   : > { %3300 = vst.msk [vmem:[%s4808_s24 + $0xe0] sm:$0xff] %vm2486_vm6, %v3202_v4  ;;  %v3209_v61 = vadd.f32 %v7695_v32, %v3111_v53  ;;  %v3210_v33 = vadd.f32 %v7696_v30, %v3112_v50  ;;  %v3129_v34 = vld [vmem:[%s4808_s24 + $0x1a8] sm:$0xff]  ;;  %v3130_v39 = vld [vmem:[%s4808_s24 + $0x1b0] sm:$0xff]  ;;  %v3131_v44 = vld [vmem:[%s4808_s24 + $0x1b8] sm:$0xff] }
 0x275   : > { %v3132_v47 = vld [vmem:[%s4808_s24 + $0x1c0] sm:$0xff]  ;;  %3301 = vst.msk [vmem:[%s4808_s24 + $0xe8] sm:$0xff] %vm2486_vm6, %v3203_v17  ;;  %3302 = vst.msk [vmem:[%s4808_s24 + $0xf0] sm:$0xff] %vm2486_vm6, %v3204_v18  ;;  %v7697_v20 = vld [vmem:[#allocation15_spill] sm:$0xff] }
 0x276   : > { %3303 = vst.msk [vmem:[%s4808_s24 + $0xf8] sm:$0xff] %vm2486_vm6, %v3205_v25  ;;  %3304 = vst.msk [vmem:[%s4808_s24 + $0x100] sm:$0xff] %vm2486_vm6, %v3206_v11  ;;  %v3211_v49 = vadd.f32 %v7697_v20, %v3113_v24  ;;  %v7698_v10 = vld [vmem:[#allocation16_spill] sm:$0xff]  ;;  %v7699_v1 = vld [vmem:[#allocation17_spill] sm:$0xff] }
 0x277   : > { %v3212_v59 = vadd.f32 %v7698_v10, %v3114_v7  ;;  %v3213_v5 = vadd.f32 %v7699_v1, %v3115_v41  ;;  %v7700_v6 = vld [vmem:[#allocation18_spill] sm:$0xff]  ;;  %v3133_v55 = vld [vmem:[%s4808_s24 + $0x1c8] sm:$0xff]  ;;  %v3135_v29 = vld [vmem:[%s4808_s24 + $0x1d8] sm:$0xff]  ;;  %3305 = vst.msk [vmem:[%s4808_s24 + $0x108] sm:$0xff] %vm2486_vm6, %v3207_v58 }
 0x278   : > { %v3214_v13 = vadd.f32 %v7700_v6, %v3116_v38  ;;  %v3134_v0 = vld [vmem:[%s4808_s24 + $0x1d0] sm:$0xff]  ;;  %v3136_v12 = vld [vmem:[%s4808_s24 + $0x1e0] sm:$0xff]  ;;  %3306 = vst.msk [vmem:[%s4808_s24 + $0x110] sm:$0xff] %vm2486_vm6, %v3208_v16  ;;  %3307 = vst.msk [vmem:[%s4808_s24 + $0x118] sm:$0xff] %vm2486_vm6, %v3209_v61 }
 0x279   : > { %3308 = vst.msk [vmem:[%s4808_s24 + $0x120] sm:$0xff] %vm2486_vm6, %v3210_v33  ;;  %v7701_v57 = vld [vmem:[#allocation19_spill] sm:$0xff]  ;;  %v7702_v35 = vld [vmem:[#allocation20_spill] sm:$0xff]  ;;  %v7703_v3 = vld [vmem:[#allocation21_spill] sm:$0xff] }
 0x27a   : > { %v3215_v28 = vadd.f32 %v7701_v57, %v3117_v19  ;;  %v3216_v51 = vadd.f32 %v7702_v35, %v3118_v43  ;;  %v3217_v53 = vadd.f32 %v7703_v3, %v3119_v23  ;;  %v7704_v50 = vld [vmem:[#allocation22_spill] sm:$0xff]  ;;  %v3137_v48 = vld [vmem:[%s4808_s24 + $0x1e8] sm:$0xff]  ;;  %v3139_v2 = vld [vmem:[%s4808_s24 + $0x1f8] sm:$0xff]  ;;  %3309 = vst.msk [vmem:[%s4808_s24 + $0x128] sm:$0xff] %vm2486_vm6, %v3211_v49 }
 0x27b   : > { %v3218_v36 = vadd.f32 %v7704_v50, %v3120_v9  ;;  %v3138_v60 = vld [vmem:[%s4808_s24 + $0x1f0] sm:$0xff]  ;;  %v3140_v24 = vld [vmem:[%s4808_s24 + $0x200] sm:$0xff]  ;;  %3310 = vst.msk [vmem:[%s4808_s24 + $0x130] sm:$0xff] %vm2486_vm6, %v3212_v59  ;;  %3311 = vst.msk [vmem:[%s4808_s24 + $0x138] sm:$0xff] %vm2486_vm6, %v3213_v5 }
 0x27c   : > { %3312 = vst.msk [vmem:[%s4808_s24 + $0x140] sm:$0xff] %vm2486_vm6, %v3214_v13  ;;  %v7705_v7 = vld [vmem:[#allocation23_spill] sm:$0xff]  ;;  %v7706_v38 = vld [vmem:[#allocation24_spill] sm:$0xff]  ;;  %v7707_v15 = vld [vmem:[#allocation25_spill] sm:$0xff] }
 0x27d   : > { %v3219_v41 = vadd.f32 %v7705_v7, %v3121_v62  ;;  %v3220_v14 = vadd.f32 %v7706_v38, %v3122_v22  ;;  %v3221_v21 = vadd.f32 %v7707_v15, %v3123_v37  ;;  %v7708_v31 = vld [vmem:[#allocation26_spill] sm:$0xff]  ;;  %v3141_v43 = vld [vmem:[%s4808_s24 + $0x208] sm:$0xff]  ;;  %v3143_v9 = vld [vmem:[%s4808_s24 + $0x218] sm:$0xff]  ;;  %3313 = vst.msk [vmem:[%s4808_s24 + $0x148] sm:$0xff] %vm2486_vm6, %v3215_v28 }
 0x27e   : > { %v3222_v19 = vadd.f32 %v7708_v31, %v3124_v26  ;;  %v3142_v23 = vld [vmem:[%s4808_s24 + $0x210] sm:$0xff]  ;;  %v3144_v45 = vld [vmem:[%s4808_s24 + $0x220] sm:$0xff]  ;;  %3314 = vst.msk [vmem:[%s4808_s24 + $0x150] sm:$0xff] %vm2486_vm6, %v3216_v51  ;;  %3315 = vst.msk [vmem:[%s4808_s24 + $0x158] sm:$0xff] %vm2486_vm6, %v3217_v53 }
 0x27f   : > { %3316 = vst.msk [vmem:[%s4808_s24 + $0x160] sm:$0xff] %vm2486_vm6, %v3218_v36  ;;  %v7709_v46 = vld [vmem:[#allocation27_spill] sm:$0xff]  ;;  %v7710_v4 = vld [vmem:[#allocation28_spill] sm:$0xff]  ;;  %v7711_v22 = vld [vmem:[#allocation29_spill] sm:$0xff] }
 0x280   : > { %v3223_v54 = vadd.f32 %v7709_v46, %v3125_v63  ;;  %v3224_v62 = vadd.f32 %v7710_v4, %v3126_v52  ;;  %v3225_v37 = vadd.f32 %v7711_v22, %v3127_v40  ;;  %v7712_v26 = vld [vmem:[#allocation30_spill] sm:$0xff]  ;;  %v3145_v18 = vld [vmem:[%s4808_s24 + $0x228] sm:$0xff]  ;;  %v3147_v42 = vld [vmem:[%s4808_s24 + $0x238] sm:$0xff]  ;;  %3317 = vst.msk [vmem:[%s4808_s24 + $0x168] sm:$0xff] %vm2486_vm6, %v3219_v41 }
 0x281   : > { %v3226_v17 = vadd.f32 %v7712_v26, %v3128_v27  ;;  %v3146_v25 = vld [vmem:[%s4808_s24 + $0x230] sm:$0xff]  ;;  %v3148_v11 = vld [vmem:[%s4808_s24 + $0x240] sm:$0xff]  ;;  %3318 = vst.msk [vmem:[%s4808_s24 + $0x170] sm:$0xff] %vm2486_vm6, %v3220_v14  ;;  %3319 = vst.msk [vmem:[%s4808_s24 + $0x178] sm:$0xff] %vm2486_vm6, %v3221_v21 }
 0x282   : > { %3320 = vst.msk [vmem:[%s4808_s24 + $0x180] sm:$0xff] %vm2486_vm6, %v3222_v19  ;;  %v7713_v63 = vld [vmem:[#allocation31_spill] sm:$0xff]  ;;  %v7714_v40 = vld [vmem:[#allocation32_spill] sm:$0xff]  ;;  %v7715_v56 = vld [vmem:[#allocation33_spill] sm:$0xff] }
 0x283   : > { %v3227_v52 = vadd.f32 %v7713_v63, %v3129_v34  ;;  %v3228_v27 = vadd.f32 %v7714_v40, %v3130_v39  ;;  %v3229_v58 = vadd.f32 %v7715_v56, %v3131_v44  ;;  %v7716_v8 = vld [vmem:[#allocation34_spill] sm:$0xff]  ;;  %v3149_v32 = vld [vmem:[%s4808_s24 + $0x248] sm:$0xff]  ;;  %v3151_v30 = vld [vmem:[%s4808_s24 + $0x258] sm:$0xff]  ;;  %3321 = vst.msk [vmem:[%s4808_s24 + $0x188] sm:$0xff] %vm2486_vm6, %v3223_v54 }
 0x284   : > { %v3230_v16 = vadd.f32 %v7716_v8, %v3132_v47  ;;  %v3150_v61 = vld [vmem:[%s4808_s24 + $0x250] sm:$0xff]  ;;  %3322 = vst.msk [vmem:[%s4808_s24 + $0x190] sm:$0xff] %vm2486_vm6, %v3224_v62  ;;  %3323 = vst.msk [vmem:[%s4808_s24 + $0x198] sm:$0xff] %vm2486_vm6, %v3225_v37  ;;  %v7717_v33 = vld [vmem:[#allocation35_spill] sm:$0xff] }
 0x285   : > { %3324 = vst.msk [vmem:[%s4808_s24 + $0x1a0] sm:$0xff] %vm2486_vm6, %v3226_v17  ;;  %v3231_v34 = vadd.f32 %v7717_v33, %v3133_v55  ;;  %v7718_v39 = vld [vmem:[#allocation36_spill] sm:$0xff]  ;;  %v7719_v47 = vld [vmem:[#allocation37_spill] sm:$0xff]  ;;  %v7720_v49 = vld [vmem:[#allocation38_spill] sm:$0xff] }
 0x286   : > { %v3232_v44 = vadd.f32 %v7718_v39, %v3134_v0  ;;  %v3233_v20 = vadd.f32 %v7719_v47, %v3135_v29  ;;  %v3234_v10 = vadd.f32 %v7720_v49, %v3136_v12  ;;  %v3152_v59 = vld [vmem:[%s4808_s24 + $0x260] sm:$0xff]  ;;  %v3153_v1 = vld [vmem:[%s4808_s24 + $0x268] sm:$0xff]  ;;  %v3154_v5 = vld [vmem:[%s4808_s24 + $0x270] sm:$0xff]  ;;  %3325 = vst.msk [vmem:[%s4808_s24 + $0x1a8] sm:$0xff] %vm2486_vm6, %v3227_v52 }
 0x287   : > { %3326 = vst.msk [vmem:[%s4808_s24 + $0x1b0] sm:$0xff] %vm2486_vm6, %v3228_v27  ;;  %3327 = vst.msk [vmem:[%s4808_s24 + $0x1b8] sm:$0xff] %vm2486_vm6, %v3229_v58  ;;  %v7721_v6 = vld [vmem:[#allocation39_spill] sm:$0xff]  ;;  %v7722_v55 = vld [vmem:[#allocation40_spill] sm:$0xff] }
 0x288   : > { %3328 = vst.msk [vmem:[%s4808_s24 + $0x1c0] sm:$0xff] %vm2486_vm6, %v3230_v16  ;;  %v3235_v13 = vadd.f32 %v7721_v6, %v3137_v48  ;;  %v3236_v0 = vadd.f32 %v7722_v55, %v3138_v60  ;;  %v7723_v29 = vld [vmem:[#allocation41_spill] sm:$0xff]  ;;  %v7724_v57 = vld [vmem:[#allocation42_spill] sm:$0xff]  ;;  %3329 = vst.msk [vmem:[%s4808_s24 + $0x1c8] sm:$0xff] %vm2486_vm6, %v3231_v34 }
 0x289   : > { %v3237_v12 = vadd.f32 %v7723_v29, %v3139_v2  ;;  %v3238_v28 = vadd.f32 %v7724_v57, %v3140_v24  ;;  %v3155_v35 = vld [vmem:[%s4808_s24 + $0x278] sm:$0xff]  ;;  %v3156_v51 = vld [vmem:[%s4808_s24 + $0x280] sm:$0xff]  ;;  %v3157_v3 = vld [vmem:[%s4808_s24 + $0x288] sm:$0xff]  ;;  %3330 = vst.msk [vmem:[%s4808_s24 + $0x1d0] sm:$0xff] %vm2486_vm6, %v3232_v44 }
 0x28a   : > { %3331 = vst.msk [vmem:[%s4808_s24 + $0x1d8] sm:$0xff] %vm2486_vm6, %v3233_v20  ;;  %3332 = vst.msk [vmem:[%s4808_s24 + $0x1e0] sm:$0xff] %vm2486_vm6, %v3234_v10  ;;  %v7725_v53 = vld [vmem:[#allocation43_spill] sm:$0xff]  ;;  %v7726_v36 = vld [vmem:[#allocation44_spill] sm:$0xff] }
 0x28b   : > { %v3239_v50 = vadd.f32 %v7725_v53, %v3141_v43  ;;  %v3240_v48 = vadd.f32 %v7726_v36, %v3142_v23  ;;  %v7727_v60 = vld [vmem:[#allocation45_spill] sm:$0xff]  ;;  %v7728_v24 = vld [vmem:[#allocation46_spill] sm:$0xff]  ;;  %3333 = vst.msk [vmem:[%s4808_s24 + $0x1e8] sm:$0xff] %vm2486_vm6, %v3235_v13  ;;  %3334 = vst.msk [vmem:[%s4808_s24 + $0x1f0] sm:$0xff] %vm2486_vm6, %v3236_v0 }
 0x28c   : > { %v3241_v2 = vadd.f32 %v7727_v60, %v3143_v9  ;;  %v3242_v7 = vadd.f32 %v7728_v24, %v3144_v45  ;;  %v3158_v41 = vld [vmem:[%s4808_s24 + $0x290] sm:$0xff]  ;;  %v3159_v38 = vld [vmem:[%s4808_s24 + $0x298] sm:$0xff]  ;;  %v3160_v14 = vld [vmem:[%s4808_s24 + $0x2a0] sm:$0xff]  ;;  %3335 = vst.msk [vmem:[%s4808_s24 + $0x1f8] sm:$0xff] %vm2486_vm6, %v3237_v12 }
 0x28d   : > { %3336 = vst.msk [vmem:[%s4808_s24 + $0x200] sm:$0xff] %vm2486_vm6, %v3238_v28  ;;  %v7729_v15 = vld [vmem:[#allocation47_spill] sm:$0xff]  ;;  %v7730_v31 = vld [vmem:[#allocation48_spill] sm:$0xff]  ;;  %v7731_v43 = vld [vmem:[#allocation49_spill] sm:$0xff] }
 0x28e   : > { %v3243_v21 = vadd.f32 %v7729_v15, %v3145_v18  ;;  %v3244_v19 = vadd.f32 %v7730_v31, %v3146_v25  ;;  %v3245_v23 = vadd.f32 %v7731_v43, %v3147_v42  ;;  %v7732_v9 = vld [vmem:[#allocation50_spill] sm:$0xff]  ;;  %v3161_v46 = vld [vmem:[%s4808_s24 + $0x2a8] sm:$0xff]  ;;  %v3163_v4 = vld [vmem:[%s4808_s24 + $0x2b8] sm:$0xff]  ;;  %3337 = vst.msk [vmem:[%s4808_s24 + $0x208] sm:$0xff] %vm2486_vm6, %v3239_v50 }
 0x28f   : > { %v3246_v45 = vadd.f32 %v7732_v9, %v3148_v11  ;;  %v3162_v54 = vld [vmem:[%s4808_s24 + $0x2b0] sm:$0xff]  ;;  %3338 = vst.msk [vmem:[%s4808_s24 + $0x210] sm:$0xff] %vm2486_vm6, %v3240_v48  ;;  %3339 = vst.msk [vmem:[%s4808_s24 + $0x218] sm:$0xff] %vm2486_vm6, %v3241_v2  ;;  %v7733_v62 = vld [vmem:[#allocation51_spill] sm:$0xff] }
 0x290   : > { %3340 = vst.msk [vmem:[%s4808_s24 + $0x220] sm:$0xff] %vm2486_vm6, %v3242_v7  ;;  %v3247_v22 = vadd.f32 %v7733_v62, %v3149_v32  ;;  %v7734_v37 = vld [vmem:[#allocation52_spill] sm:$0xff]  ;;  %v7735_v17 = vld [vmem:[#allocation53_spill] sm:$0xff]  ;;  %v7736_v25 = vld [vmem:[#allocation54_spill] sm:$0xff] }
 0x291   : > { %v3248_v26 = vadd.f32 %v7734_v37, %v3150_v61  ;;  %v3249_v18 = vadd.f32 %v7735_v17, %v3151_v30  ;;  %v3250_v42 = vadd.f32 %v7736_v25, %v3152_v59  ;;  %v3164_v11 = vld [vmem:[%s4808_s24 + $0x2c0] sm:$0xff]  ;;  %v3165_v63 = vld [vmem:[%s4808_s24 + $0x2c8] sm:$0xff]  ;;  %v3166_v52 = vld [vmem:[%s4808_s24 + $0x2d0] sm:$0xff]  ;;  %3341 = vst.msk [vmem:[%s4808_s24 + $0x228] sm:$0xff] %vm2486_vm6, %v3243_v21 }
 0x292   : > { %3342 = vst.msk [vmem:[%s4808_s24 + $0x230] sm:$0xff] %vm2486_vm6, %v3244_v19  ;;  %3343 = vst.msk [vmem:[%s4808_s24 + $0x238] sm:$0xff] %vm2486_vm6, %v3245_v23  ;;  %v7737_v40 = vld [vmem:[#allocation55_spill] sm:$0xff]  ;;  %v7738_v56 = vld [vmem:[#allocation56_spill] sm:$0xff] }
 0x293   : > { %3344 = vst.msk [vmem:[%s4808_s24 + $0x240] sm:$0xff] %vm2486_vm6, %v3246_v45  ;;  %v3251_v27 = vadd.f32 %v7737_v40, %v3153_v1  ;;  %v3252_v58 = vadd.f32 %v7738_v56, %v3154_v5  ;;  %v7739_v8 = vld [vmem:[#allocation57_spill] sm:$0xff]  ;;  %v7740_v32 = vld [vmem:[#allocation58_spill] sm:$0xff]  ;;  %3345 = vst.msk [vmem:[%s4808_s24 + $0x248] sm:$0xff] %vm2486_vm6, %v3247_v22 }
 0x294   : > { %v3253_v16 = vadd.f32 %v7739_v8, %v3155_v35  ;;  %v3254_v61 = vadd.f32 %v7740_v32, %v3156_v51  ;;  %v3167_v30 = vld [vmem:[%s4808_s24 + $0x2d8] sm:$0xff]  ;;  %v3168_v33 = vld [vmem:[%s4808_s24 + $0x2e0] sm:$0xff]  ;;  %v3169_v34 = vld [vmem:[%s4808_s24 + $0x2e8] sm:$0xff]  ;;  %3346 = vst.msk [vmem:[%s4808_s24 + $0x250] sm:$0xff] %vm2486_vm6, %v3248_v26 }
 0x295   : > { %3347 = vst.msk [vmem:[%s4808_s24 + $0x258] sm:$0xff] %vm2486_vm6, %v3249_v18  ;;  %3348 = vst.msk [vmem:[%s4808_s24 + $0x260] sm:$0xff] %vm2486_vm6, %v3250_v42  ;;  %v7741_v39 = vld [vmem:[#allocation59_spill] sm:$0xff]  ;;  %v7742_v47 = vld [vmem:[#allocation60_spill] sm:$0xff] }
 0x296   : > { %v3255_v44 = vadd.f32 %v7741_v39, %v3157_v3  ;;  %v3256_v20 = vadd.f32 %v7742_v47, %v3158_v41  ;;  %v7743_v49 = vld [vmem:[#allocation61_spill] sm:$0xff]  ;;  %v7744_v59 = vld [vmem:[#allocation62_spill] sm:$0xff]  ;;  %3349 = vst.msk [vmem:[%s4808_s24 + $0x268] sm:$0xff] %vm2486_vm6, %v3251_v27  ;;  %3350 = vst.msk [vmem:[%s4808_s24 + $0x270] sm:$0xff] %vm2486_vm6, %v3252_v58 }
 0x297   : > { %v3257_v10 = vadd.f32 %v7743_v49, %v3159_v38  ;;  %v3258_v1 = vadd.f32 %v7744_v59, %v3160_v14  ;;  %v3170_v5 = vld [vmem:[%s4808_s24 + $0x2f0] sm:$0xff]  ;;  %v3171_v6 = vld [vmem:[%s4808_s24 + $0x2f8] sm:$0xff]  ;;  %v3172_v13 = vld [vmem:[%s4808_s24 + $0x300] sm:$0xff]  ;;  %3351 = vst.msk [vmem:[%s4808_s24 + $0x278] sm:$0xff] %vm2486_vm6, %v3253_v16 }
 0x298   : > { %3352 = vst.msk [vmem:[%s4808_s24 + $0x280] sm:$0xff] %vm2486_vm6, %v3254_v61  ;;  %v7745_v55 = vld [vmem:[#allocation63_spill] sm:$0xff]  ;;  %v7746_v29 = vld [vmem:[#allocation64_spill] sm:$0xff]  ;;  %v7747_v57 = vld [vmem:[#allocation65_spill] sm:$0xff] }
 0x299   : > { %v3259_v0 = vadd.f32 %v7745_v55, %v3161_v46  ;;  %v3260_v12 = vadd.f32 %v7746_v29, %v3162_v54  ;;  %v3261_v28 = vadd.f32 %v7747_v57, %v3163_v4  ;;  %v7748_v35 = vld [vmem:[#allocation66_spill] sm:$0xff]  ;;  %v3173_v3 = vld [vmem:[%s4808_s24 + $0x308] sm:$0xff]  ;;  %3353 = vst.msk [vmem:[%s4808_s24 + $0x288] sm:$0xff] %vm2486_vm6, %v3255_v44  ;;  %3354 = vst.msk [vmem:[%s4808_s24 + $0x290] sm:$0xff] %vm2486_vm6, %v3256_v20 }
 0x29a   : > { %v3262_v51 = vadd.f32 %v7748_v35, %v3164_v11  ;;  %3355 = vst.msk [vmem:[%s4808_s24 + $0x298] sm:$0xff] %vm2486_vm6, %v3257_v10  ;;  %3356 = vst.msk [vmem:[%s4808_s24 + $0x2a0] sm:$0xff] %vm2486_vm6, %v3258_v1  ;;  %v7749_v53 = vld [vmem:[#allocation67_spill] sm:$0xff]  ;;  %v7750_v36 = vld [vmem:[#allocation68_spill] sm:$0xff] }
 0x29b   : > { %v3263_v50 = vadd.f32 %v7749_v53, %v3165_v63  ;;  %v3264_v48 = vadd.f32 %v7750_v36, %v3166_v52  ;;  %v7751_v60 = vld [vmem:[#allocation69_spill] sm:$0xff]  ;;  %v7752_v24 = vld [vmem:[#allocation70_spill] sm:$0xff]  ;;  %3357 = vst.msk [vmem:[%s4808_s24 + $0x2a8] sm:$0xff] %vm2486_vm6, %v3259_v0  ;;  %3358 = vst.msk [vmem:[%s4808_s24 + $0x2b0] sm:$0xff] %vm2486_vm6, %v3260_v12 }
 0x29c   : > { %v3265_v2 = vadd.f32 %v7751_v60, %v3167_v30  ;;  %v3266_v7 = vadd.f32 %v7752_v24, %v3168_v33  ;;  %3359 = vst.msk [vmem:[%s4808_s24 + $0x2b8] sm:$0xff] %vm2486_vm6, %v3261_v28  ;;  %3360 = vst.msk [vmem:[%s4808_s24 + $0x2c0] sm:$0xff] %vm2486_vm6, %v3262_v51  ;;  %v7753_v41 = vld [vmem:[#allocation71_spill] sm:$0xff]  ;;  %v7754_v14 = vld [vmem:[#allocation72_spill] sm:$0xff] }
 0x29d   : > { %v3267_v38 = vadd.f32 %v7753_v41, %v3169_v34  ;;  %v3268_v15 = vadd.f32 %v7754_v14, %v3170_v5  ;;  %v7755_v21 = vld [vmem:[#allocation73_spill] sm:$0xff]  ;;  %v7756_v19 = vld [vmem:[#allocation74_spill] sm:$0xff]  ;;  %3361 = vst.msk [vmem:[%s4808_s24 + $0x2c8] sm:$0xff] %vm2486_vm6, %v3263_v50  ;;  %3362 = vst.msk [vmem:[%s4808_s24 + $0x2d0] sm:$0xff] %vm2486_vm6, %v3264_v48  ;;  %3373 = sbr.rel (%p4110_p1) target bundleno = 726 (0x2d6), region = 44 }
 0x29e   : > { %v3269_v31 = vadd.f32 %v7755_v21, %v3171_v6  ;;  %v3270_v43 = vadd.f32 %v7756_v19, %v3172_v13  ;;  %3363 = vst.msk [vmem:[%s4808_s24 + $0x2d8] sm:$0xff] %vm2486_vm6, %v3265_v2  ;;  %3364 = vst.msk [vmem:[%s4808_s24 + $0x2e0] sm:$0xff] %vm2486_vm6, %v3266_v7  ;;  %v7757_v23 = vld [vmem:[#allocation75_spill] sm:$0xff] }
 0x29f   : > { %v3271_v9 = vadd.f32 %v7757_v23, %v3173_v3  ;;  %3365 = vst.msk [vmem:[%s4808_s24 + $0x2e8] sm:$0xff] %vm2486_vm6, %v3267_v38  ;;  %3366 = vst.msk [vmem:[%s4808_s24 + $0x2f0] sm:$0xff] %vm2486_vm6, %v3268_v15 }
 0x2a0   : > { %3367 = vst.msk [vmem:[%s4808_s24 + $0x2f8] sm:$0xff] %vm2486_vm6, %v3269_v31  ;;  %3368 = vst.msk [vmem:[%s4808_s24 + $0x300] sm:$0xff] %vm2486_vm6, %v3270_v43 }
 0x2a1   : > { %3369 = vst.msk [vmem:[%s4808_s24 + $0x308] sm:$0xff] %vm2486_vm6, %v3271_v9 }
 0x2a2   : > { %v3374_v45 = vld [vmem:[%s4808_s24] sm:$0xff]  ;;  %v3375_v46 = vld [vmem:[%s4808_s24 + $0x8] sm:$0xff]  ;;  %v3376_v54 = vld [vmem:[%s4808_s24 + $0x10] sm:$0xff] }
 0x2a3   : > { %v3472_v4 = vmul.f32 0.25, %v3374_v45  ;;  %v3473_v62 = vmul.f32 0.25, %v3375_v46  ;;  %v3474_v22 = vmul.f32 0.25, %v3376_v54  ;;  %v3377_v37 = vld [vmem:[%s4808_s24 + $0x18] sm:$0xff]  ;;  %v3378_v26 = vld [vmem:[%s4808_s24 + $0x20] sm:$0xff]  ;;  %v3379_v17 = vld [vmem:[%s4808_s24 + $0x28] sm:$0xff] }
 0x2a4   : > { %v3475_v18 = vmul.f32 0.25, %v3377_v37  ;;  %v3476_v25 = vmul.f32 0.25, %v3378_v26  ;;  %v3477_v42 = vmul.f32 0.25, %v3379_v17  ;;  %v3380_v11 = vld [vmem:[%s4808_s24 + $0x30] sm:$0xff]  ;;  %v3381_v63 = vld [vmem:[%s4808_s24 + $0x38] sm:$0xff]  ;;  %v3382_v52 = vld [vmem:[%s4808_s24 + $0x40] sm:$0xff] }
 0x2a5   : > { %3570 = vst.msk [vmem:[%s4808_s24] sm:$0xff] %vm2486_vm6, %v3472_v4  ;;  %3571 = vst.msk [vmem:[%s4808_s24 + $0x8] sm:$0xff] %vm2486_vm6, %v3473_v62  ;;  %v3478_v40 = vmul.f32 0.25, %v3380_v11  ;;  %v3479_v27 = vmul.f32 0.25, %v3381_v63  ;;  %v3480_v56 = vmul.f32 0.25, %v3382_v52  ;;  %v3383_v58 = vld [vmem:[%s4808_s24 + $0x48] sm:$0xff] }
 0x2a6   : > { %3572 = vst.msk [vmem:[%s4808_s24 + $0x10] sm:$0xff] %vm2486_vm6, %v3474_v22  ;;  %v3384_v8 = vld [vmem:[%s4808_s24 + $0x50] sm:$0xff]  ;;  %v3385_v16 = vld [vmem:[%s4808_s24 + $0x58] sm:$0xff]  ;;  %3573 = vst.msk [vmem:[%s4808_s24 + $0x18] sm:$0xff] %vm2486_vm6, %v3475_v18  ;;  %v3481_v32 = vmul.f32 0.25, %v3383_v58 }
 0x2a7   : > { %3574 = vst.msk [vmem:[%s4808_s24 + $0x20] sm:$0xff] %vm2486_vm6, %v3476_v25  ;;  %3575 = vst.msk [vmem:[%s4808_s24 + $0x28] sm:$0xff] %vm2486_vm6, %v3477_v42  ;;  %v3482_v61 = vmul.f32 0.25, %v3384_v8  ;;  %v3483_v30 = vmul.f32 0.25, %v3385_v16  ;;  %v3386_v33 = vld [vmem:[%s4808_s24 + $0x60] sm:$0xff]  ;;  %v3387_v34 = vld [vmem:[%s4808_s24 + $0x68] sm:$0xff] }
 0x2a8   : > { %v3388_v39 = vld [vmem:[%s4808_s24 + $0x70] sm:$0xff]  ;;  %3576 = vst.msk [vmem:[%s4808_s24 + $0x30] sm:$0xff] %vm2486_vm6, %v3478_v40  ;;  %3577 = vst.msk [vmem:[%s4808_s24 + $0x38] sm:$0xff] %vm2486_vm6, %v3479_v27  ;;  %v3484_v44 = vmul.f32 0.25, %v3386_v33  ;;  %v3485_v47 = vmul.f32 0.25, %v3387_v34  ;;  %v3389_v49 = vld [vmem:[%s4808_s24 + $0x78] sm:$0xff] }
 0x2a9   : > { %3578 = vst.msk [vmem:[%s4808_s24 + $0x40] sm:$0xff] %vm2486_vm6, %v3480_v56  ;;  %v3486_v20 = vmul.f32 0.25, %v3388_v39  ;;  %v3390_v10 = vld [vmem:[%s4808_s24 + $0x80] sm:$0xff]  ;;  %v3391_v59 = vld [vmem:[%s4808_s24 + $0x88] sm:$0xff]  ;;  %3579 = vst.msk [vmem:[%s4808_s24 + $0x48] sm:$0xff] %vm2486_vm6, %v3481_v32  ;;  %v3487_v1 = vmul.f32 0.25, %v3389_v49 }
 0x2aa   : > { %3580 = vst.msk [vmem:[%s4808_s24 + $0x50] sm:$0xff] %vm2486_vm6, %v3482_v61  ;;  %3581 = vst.msk [vmem:[%s4808_s24 + $0x58] sm:$0xff] %vm2486_vm6, %v3483_v30  ;;  %v3488_v5 = vmul.f32 0.25, %v3390_v10  ;;  %v3489_v6 = vmul.f32 0.25, %v3391_v59  ;;  %v3392_v13 = vld [vmem:[%s4808_s24 + $0x90] sm:$0xff]  ;;  %v3393_v55 = vld [vmem:[%s4808_s24 + $0x98] sm:$0xff] }
 0x2ab   : > { %v3394_v0 = vld [vmem:[%s4808_s24 + $0xa0] sm:$0xff]  ;;  %3582 = vst.msk [vmem:[%s4808_s24 + $0x60] sm:$0xff] %vm2486_vm6, %v3484_v44  ;;  %3583 = vst.msk [vmem:[%s4808_s24 + $0x68] sm:$0xff] %vm2486_vm6, %v3485_v47  ;;  %v3490_v29 = vmul.f32 0.25, %v3392_v13  ;;  %v3491_v12 = vmul.f32 0.25, %v3393_v55  ;;  %v3395_v28 = vld [vmem:[%s4808_s24 + $0xa8] sm:$0xff] }
 0x2ac   : > { %3584 = vst.msk [vmem:[%s4808_s24 + $0x70] sm:$0xff] %vm2486_vm6, %v3486_v20  ;;  %v3492_v57 = vmul.f32 0.25, %v3394_v0  ;;  %v3396_v35 = vld [vmem:[%s4808_s24 + $0xb0] sm:$0xff]  ;;  %v3397_v51 = vld [vmem:[%s4808_s24 + $0xb8] sm:$0xff]  ;;  %3585 = vst.msk [vmem:[%s4808_s24 + $0x78] sm:$0xff] %vm2486_vm6, %v3487_v1  ;;  %v3493_v3 = vmul.f32 0.25, %v3395_v28 }
 0x2ad   : > { %3586 = vst.msk [vmem:[%s4808_s24 + $0x80] sm:$0xff] %vm2486_vm6, %v3488_v5  ;;  %3587 = vst.msk [vmem:[%s4808_s24 + $0x88] sm:$0xff] %vm2486_vm6, %v3489_v6  ;;  %v3494_v53 = vmul.f32 0.25, %v3396_v35  ;;  %v3495_v50 = vmul.f32 0.25, %v3397_v51  ;;  %v3398_v36 = vld [vmem:[%s4808_s24 + $0xc0] sm:$0xff]  ;;  %v3399_v48 = vld [vmem:[%s4808_s24 + $0xc8] sm:$0xff] }
 0x2ae   : > { %v3400_v60 = vld [vmem:[%s4808_s24 + $0xd0] sm:$0xff]  ;;  %3588 = vst.msk [vmem:[%s4808_s24 + $0x90] sm:$0xff] %vm2486_vm6, %v3490_v29  ;;  %3589 = vst.msk [vmem:[%s4808_s24 + $0x98] sm:$0xff] %vm2486_vm6, %v3491_v12  ;;  %v3496_v2 = vmul.f32 0.25, %v3398_v36  ;;  %v3497_v24 = vmul.f32 0.25, %v3399_v48  ;;  %v3401_v41 = vld [vmem:[%s4808_s24 + $0xd8] sm:$0xff] }
 0x2af   : > { %3590 = vst.msk [vmem:[%s4808_s24 + $0xa0] sm:$0xff] %vm2486_vm6, %v3492_v57  ;;  %v3498_v7 = vmul.f32 0.25, %v3400_v60  ;;  %v3402_v38 = vld [vmem:[%s4808_s24 + $0xe0] sm:$0xff]  ;;  %v3403_v14 = vld [vmem:[%s4808_s24 + $0xe8] sm:$0xff]  ;;  %3591 = vst.msk [vmem:[%s4808_s24 + $0xa8] sm:$0xff] %vm2486_vm6, %v3493_v3  ;;  %v3499_v15 = vmul.f32 0.25, %v3401_v41 }
 0x2b0   : > { %3592 = vst.msk [vmem:[%s4808_s24 + $0xb0] sm:$0xff] %vm2486_vm6, %v3494_v53  ;;  %3593 = vst.msk [vmem:[%s4808_s24 + $0xb8] sm:$0xff] %vm2486_vm6, %v3495_v50  ;;  %v3500_v21 = vmul.f32 0.25, %v3402_v38  ;;  %v3501_v31 = vmul.f32 0.25, %v3403_v14  ;;  %v3404_v19 = vld [vmem:[%s4808_s24 + $0xf0] sm:$0xff]  ;;  %v3405_v43 = vld [vmem:[%s4808_s24 + $0xf8] sm:$0xff] }
 0x2b1   : > { %v3406_v23 = vld [vmem:[%s4808_s24 + $0x100] sm:$0xff]  ;;  %3594 = vst.msk [vmem:[%s4808_s24 + $0xc0] sm:$0xff] %vm2486_vm6, %v3496_v2  ;;  %3595 = vst.msk [vmem:[%s4808_s24 + $0xc8] sm:$0xff] %vm2486_vm6, %v3497_v24  ;;  %v3502_v9 = vmul.f32 0.25, %v3404_v19  ;;  %v3503_v45 = vmul.f32 0.25, %v3405_v43  ;;  %v3407_v54 = vld [vmem:[%s4808_s24 + $0x108] sm:$0xff] }
 0x2b2   : > { %3596 = vst.msk [vmem:[%s4808_s24 + $0xd0] sm:$0xff] %vm2486_vm6, %v3498_v7  ;;  %v3504_v46 = vmul.f32 0.25, %v3406_v23  ;;  %v3408_v4 = vld [vmem:[%s4808_s24 + $0x110] sm:$0xff]  ;;  %v3409_v62 = vld [vmem:[%s4808_s24 + $0x118] sm:$0xff]  ;;  %3597 = vst.msk [vmem:[%s4808_s24 + $0xd8] sm:$0xff] %vm2486_vm6, %v3499_v15  ;;  %v3505_v22 = vmul.f32 0.25, %v3407_v54 }
 0x2b3   : > { %3598 = vst.msk [vmem:[%s4808_s24 + $0xe0] sm:$0xff] %vm2486_vm6, %v3500_v21  ;;  %3599 = vst.msk [vmem:[%s4808_s24 + $0xe8] sm:$0xff] %vm2486_vm6, %v3501_v31  ;;  %v3506_v37 = vmul.f32 0.25, %v3408_v4  ;;  %v3507_v26 = vmul.f32 0.25, %v3409_v62  ;;  %v3410_v17 = vld [vmem:[%s4808_s24 + $0x120] sm:$0xff]  ;;  %v3411_v18 = vld [vmem:[%s4808_s24 + $0x128] sm:$0xff] }
 0x2b4   : > { %v3412_v25 = vld [vmem:[%s4808_s24 + $0x130] sm:$0xff]  ;;  %3600 = vst.msk [vmem:[%s4808_s24 + $0xf0] sm:$0xff] %vm2486_vm6, %v3502_v9  ;;  %3601 = vst.msk [vmem:[%s4808_s24 + $0xf8] sm:$0xff] %vm2486_vm6, %v3503_v45  ;;  %v3508_v42 = vmul.f32 0.25, %v3410_v17  ;;  %v3509_v11 = vmul.f32 0.25, %v3411_v18  ;;  %v3413_v52 = vld [vmem:[%s4808_s24 + $0x138] sm:$0xff] }
 0x2b5   : > { %3602 = vst.msk [vmem:[%s4808_s24 + $0x100] sm:$0xff] %vm2486_vm6, %v3504_v46  ;;  %v3510_v63 = vmul.f32 0.25, %v3412_v25  ;;  %v3414_v40 = vld [vmem:[%s4808_s24 + $0x140] sm:$0xff]  ;;  %v3415_v27 = vld [vmem:[%s4808_s24 + $0x148] sm:$0xff]  ;;  %3603 = vst.msk [vmem:[%s4808_s24 + $0x108] sm:$0xff] %vm2486_vm6, %v3505_v22  ;;  %v3511_v56 = vmul.f32 0.25, %v3413_v52 }
 0x2b6   : > { %3604 = vst.msk [vmem:[%s4808_s24 + $0x110] sm:$0xff] %vm2486_vm6, %v3506_v37  ;;  %3605 = vst.msk [vmem:[%s4808_s24 + $0x118] sm:$0xff] %vm2486_vm6, %v3507_v26  ;;  %v3512_v58 = vmul.f32 0.25, %v3414_v40  ;;  %v3513_v8 = vmul.f32 0.25, %v3415_v27  ;;  %v3416_v16 = vld [vmem:[%s4808_s24 + $0x150] sm:$0xff]  ;;  %v3417_v32 = vld [vmem:[%s4808_s24 + $0x158] sm:$0xff] }
 0x2b7   : > { %v3418_v61 = vld [vmem:[%s4808_s24 + $0x160] sm:$0xff]  ;;  %3606 = vst.msk [vmem:[%s4808_s24 + $0x120] sm:$0xff] %vm2486_vm6, %v3508_v42  ;;  %3607 = vst.msk [vmem:[%s4808_s24 + $0x128] sm:$0xff] %vm2486_vm6, %v3509_v11  ;;  %v3514_v30 = vmul.f32 0.25, %v3416_v16  ;;  %v3515_v33 = vmul.f32 0.25, %v3417_v32  ;;  %v3419_v39 = vld [vmem:[%s4808_s24 + $0x168] sm:$0xff] }
 0x2b8   : > { %3608 = vst.msk [vmem:[%s4808_s24 + $0x130] sm:$0xff] %vm2486_vm6, %v3510_v63  ;;  %v3516_v34 = vmul.f32 0.25, %v3418_v61  ;;  %v3420_v44 = vld [vmem:[%s4808_s24 + $0x170] sm:$0xff]  ;;  %v3421_v47 = vld [vmem:[%s4808_s24 + $0x178] sm:$0xff]  ;;  %3609 = vst.msk [vmem:[%s4808_s24 + $0x138] sm:$0xff] %vm2486_vm6, %v3511_v56  ;;  %v3517_v20 = vmul.f32 0.25, %v3419_v39 }
 0x2b9   : > { %3610 = vst.msk [vmem:[%s4808_s24 + $0x140] sm:$0xff] %vm2486_vm6, %v3512_v58  ;;  %3611 = vst.msk [vmem:[%s4808_s24 + $0x148] sm:$0xff] %vm2486_vm6, %v3513_v8  ;;  %v3518_v49 = vmul.f32 0.25, %v3420_v44  ;;  %v3519_v10 = vmul.f32 0.25, %v3421_v47  ;;  %v3422_v59 = vld [vmem:[%s4808_s24 + $0x180] sm:$0xff]  ;;  %v3423_v1 = vld [vmem:[%s4808_s24 + $0x188] sm:$0xff] }
 0x2ba   : > { %v3424_v5 = vld [vmem:[%s4808_s24 + $0x190] sm:$0xff]  ;;  %3612 = vst.msk [vmem:[%s4808_s24 + $0x150] sm:$0xff] %vm2486_vm6, %v3514_v30  ;;  %3613 = vst.msk [vmem:[%s4808_s24 + $0x158] sm:$0xff] %vm2486_vm6, %v3515_v33  ;;  %v3520_v6 = vmul.f32 0.25, %v3422_v59  ;;  %v3521_v13 = vmul.f32 0.25, %v3423_v1  ;;  %v3425_v0 = vld [vmem:[%s4808_s24 + $0x198] sm:$0xff] }
 0x2bb   : > { %3614 = vst.msk [vmem:[%s4808_s24 + $0x160] sm:$0xff] %vm2486_vm6, %v3516_v34  ;;  %v3522_v55 = vmul.f32 0.25, %v3424_v5  ;;  %v3426_v29 = vld [vmem:[%s4808_s24 + $0x1a0] sm:$0xff]  ;;  %v3427_v12 = vld [vmem:[%s4808_s24 + $0x1a8] sm:$0xff]  ;;  %3615 = vst.msk [vmem:[%s4808_s24 + $0x168] sm:$0xff] %vm2486_vm6, %v3517_v20  ;;  %v3523_v57 = vmul.f32 0.25, %v3425_v0 }
 0x2bc   : > { %3616 = vst.msk [vmem:[%s4808_s24 + $0x170] sm:$0xff] %vm2486_vm6, %v3518_v49  ;;  %3617 = vst.msk [vmem:[%s4808_s24 + $0x178] sm:$0xff] %vm2486_vm6, %v3519_v10  ;;  %v3524_v28 = vmul.f32 0.25, %v3426_v29  ;;  %v3525_v35 = vmul.f32 0.25, %v3427_v12  ;;  %v3428_v51 = vld [vmem:[%s4808_s24 + $0x1b0] sm:$0xff]  ;;  %v3429_v3 = vld [vmem:[%s4808_s24 + $0x1b8] sm:$0xff] }
 0x2bd   : > { %v3430_v53 = vld [vmem:[%s4808_s24 + $0x1c0] sm:$0xff]  ;;  %3618 = vst.msk [vmem:[%s4808_s24 + $0x180] sm:$0xff] %vm2486_vm6, %v3520_v6  ;;  %3619 = vst.msk [vmem:[%s4808_s24 + $0x188] sm:$0xff] %vm2486_vm6, %v3521_v13  ;;  %v3526_v50 = vmul.f32 0.25, %v3428_v51  ;;  %v3527_v36 = vmul.f32 0.25, %v3429_v3  ;;  %v3431_v60 = vld [vmem:[%s4808_s24 + $0x1c8] sm:$0xff] }
 0x2be   : > { %3620 = vst.msk [vmem:[%s4808_s24 + $0x190] sm:$0xff] %vm2486_vm6, %v3522_v55  ;;  %v3528_v48 = vmul.f32 0.25, %v3430_v53  ;;  %v3432_v2 = vld [vmem:[%s4808_s24 + $0x1d0] sm:$0xff]  ;;  %v3433_v24 = vld [vmem:[%s4808_s24 + $0x1d8] sm:$0xff]  ;;  %3621 = vst.msk [vmem:[%s4808_s24 + $0x198] sm:$0xff] %vm2486_vm6, %v3523_v57  ;;  %v3529_v7 = vmul.f32 0.25, %v3431_v60 }
 0x2bf   : > { %3622 = vst.msk [vmem:[%s4808_s24 + $0x1a0] sm:$0xff] %vm2486_vm6, %v3524_v28  ;;  %3623 = vst.msk [vmem:[%s4808_s24 + $0x1a8] sm:$0xff] %vm2486_vm6, %v3525_v35  ;;  %v3530_v41 = vmul.f32 0.25, %v3432_v2  ;;  %v3531_v38 = vmul.f32 0.25, %v3433_v24  ;;  %v3434_v14 = vld [vmem:[%s4808_s24 + $0x1e0] sm:$0xff]  ;;  %v3435_v15 = vld [vmem:[%s4808_s24 + $0x1e8] sm:$0xff] }
 0x2c0   : > { %v3436_v21 = vld [vmem:[%s4808_s24 + $0x1f0] sm:$0xff]  ;;  %3624 = vst.msk [vmem:[%s4808_s24 + $0x1b0] sm:$0xff] %vm2486_vm6, %v3526_v50  ;;  %3625 = vst.msk [vmem:[%s4808_s24 + $0x1b8] sm:$0xff] %vm2486_vm6, %v3527_v36  ;;  %v3532_v31 = vmul.f32 0.25, %v3434_v14  ;;  %v3533_v19 = vmul.f32 0.25, %v3435_v15  ;;  %v3437_v23 = vld [vmem:[%s4808_s24 + $0x1f8] sm:$0xff] }
 0x2c1   : > { %3626 = vst.msk [vmem:[%s4808_s24 + $0x1c0] sm:$0xff] %vm2486_vm6, %v3528_v48  ;;  %v3534_v43 = vmul.f32 0.25, %v3436_v21  ;;  %v3438_v9 = vld [vmem:[%s4808_s24 + $0x200] sm:$0xff]  ;;  %v3439_v45 = vld [vmem:[%s4808_s24 + $0x208] sm:$0xff]  ;;  %3627 = vst.msk [vmem:[%s4808_s24 + $0x1c8] sm:$0xff] %vm2486_vm6, %v3529_v7  ;;  %v3535_v46 = vmul.f32 0.25, %v3437_v23 }
 0x2c2   : > { %3628 = vst.msk [vmem:[%s4808_s24 + $0x1d0] sm:$0xff] %vm2486_vm6, %v3530_v41  ;;  %3629 = vst.msk [vmem:[%s4808_s24 + $0x1d8] sm:$0xff] %vm2486_vm6, %v3531_v38  ;;  %v3536_v54 = vmul.f32 0.25, %v3438_v9  ;;  %v3537_v4 = vmul.f32 0.25, %v3439_v45  ;;  %v3440_v62 = vld [vmem:[%s4808_s24 + $0x210] sm:$0xff]  ;;  %v3441_v22 = vld [vmem:[%s4808_s24 + $0x218] sm:$0xff] }
 0x2c3   : > { %v3442_v37 = vld [vmem:[%s4808_s24 + $0x220] sm:$0xff]  ;;  %3630 = vst.msk [vmem:[%s4808_s24 + $0x1e0] sm:$0xff] %vm2486_vm6, %v3532_v31  ;;  %3631 = vst.msk [vmem:[%s4808_s24 + $0x1e8] sm:$0xff] %vm2486_vm6, %v3533_v19  ;;  %v3538_v26 = vmul.f32 0.25, %v3440_v62  ;;  %v3539_v17 = vmul.f32 0.25, %v3441_v22  ;;  %v3443_v25 = vld [vmem:[%s4808_s24 + $0x228] sm:$0xff] }
 0x2c4   : > { %3632 = vst.msk [vmem:[%s4808_s24 + $0x1f0] sm:$0xff] %vm2486_vm6, %v3534_v43  ;;  %v3540_v18 = vmul.f32 0.25, %v3442_v37  ;;  %v3444_v42 = vld [vmem:[%s4808_s24 + $0x230] sm:$0xff]  ;;  %v3445_v11 = vld [vmem:[%s4808_s24 + $0x238] sm:$0xff]  ;;  %3633 = vst.msk [vmem:[%s4808_s24 + $0x1f8] sm:$0xff] %vm2486_vm6, %v3535_v46  ;;  %v3541_v63 = vmul.f32 0.25, %v3443_v25 }
 0x2c5   : > { %3634 = vst.msk [vmem:[%s4808_s24 + $0x200] sm:$0xff] %vm2486_vm6, %v3536_v54  ;;  %3635 = vst.msk [vmem:[%s4808_s24 + $0x208] sm:$0xff] %vm2486_vm6, %v3537_v4  ;;  %v3542_v52 = vmul.f32 0.25, %v3444_v42  ;;  %v3543_v40 = vmul.f32 0.25, %v3445_v11  ;;  %v3446_v27 = vld [vmem:[%s4808_s24 + $0x240] sm:$0xff]  ;;  %v3447_v56 = vld [vmem:[%s4808_s24 + $0x248] sm:$0xff] }
 0x2c6   : > { %v3448_v58 = vld [vmem:[%s4808_s24 + $0x250] sm:$0xff]  ;;  %3636 = vst.msk [vmem:[%s4808_s24 + $0x210] sm:$0xff] %vm2486_vm6, %v3538_v26  ;;  %3637 = vst.msk [vmem:[%s4808_s24 + $0x218] sm:$0xff] %vm2486_vm6, %v3539_v17  ;;  %v3544_v8 = vmul.f32 0.25, %v3446_v27  ;;  %v3545_v16 = vmul.f32 0.25, %v3447_v56  ;;  %v3449_v61 = vld [vmem:[%s4808_s24 + $0x258] sm:$0xff] }
 0x2c7   : > { %3638 = vst.msk [vmem:[%s4808_s24 + $0x220] sm:$0xff] %vm2486_vm6, %v3540_v18  ;;  %v3546_v32 = vmul.f32 0.25, %v3448_v58  ;;  %v3450_v30 = vld [vmem:[%s4808_s24 + $0x260] sm:$0xff]  ;;  %v3451_v33 = vld [vmem:[%s4808_s24 + $0x268] sm:$0xff]  ;;  %3639 = vst.msk [vmem:[%s4808_s24 + $0x228] sm:$0xff] %vm2486_vm6, %v3541_v63  ;;  %v3547_v34 = vmul.f32 0.25, %v3449_v61 }
 0x2c8   : > { %3640 = vst.msk [vmem:[%s4808_s24 + $0x230] sm:$0xff] %vm2486_vm6, %v3542_v52  ;;  %3641 = vst.msk [vmem:[%s4808_s24 + $0x238] sm:$0xff] %vm2486_vm6, %v3543_v40  ;;  %v3548_v39 = vmul.f32 0.25, %v3450_v30  ;;  %v3549_v44 = vmul.f32 0.25, %v3451_v33  ;;  %v3452_v47 = vld [vmem:[%s4808_s24 + $0x270] sm:$0xff]  ;;  %v3453_v20 = vld [vmem:[%s4808_s24 + $0x278] sm:$0xff] }
 0x2c9   : > { %v3454_v49 = vld [vmem:[%s4808_s24 + $0x280] sm:$0xff]  ;;  %3642 = vst.msk [vmem:[%s4808_s24 + $0x240] sm:$0xff] %vm2486_vm6, %v3544_v8  ;;  %3643 = vst.msk [vmem:[%s4808_s24 + $0x248] sm:$0xff] %vm2486_vm6, %v3545_v16  ;;  %v3550_v10 = vmul.f32 0.25, %v3452_v47  ;;  %v3551_v59 = vmul.f32 0.25, %v3453_v20  ;;  %v3455_v5 = vld [vmem:[%s4808_s24 + $0x288] sm:$0xff] }
 0x2ca   : > { %3644 = vst.msk [vmem:[%s4808_s24 + $0x250] sm:$0xff] %vm2486_vm6, %v3546_v32  ;;  %v3552_v1 = vmul.f32 0.25, %v3454_v49  ;;  %v3456_v6 = vld [vmem:[%s4808_s24 + $0x290] sm:$0xff]  ;;  %v3457_v13 = vld [vmem:[%s4808_s24 + $0x298] sm:$0xff]  ;;  %3645 = vst.msk [vmem:[%s4808_s24 + $0x258] sm:$0xff] %vm2486_vm6, %v3547_v34  ;;  %v3553_v55 = vmul.f32 0.25, %v3455_v5 }
 0x2cb   : > { %3646 = vst.msk [vmem:[%s4808_s24 + $0x260] sm:$0xff] %vm2486_vm6, %v3548_v39  ;;  %3647 = vst.msk [vmem:[%s4808_s24 + $0x268] sm:$0xff] %vm2486_vm6, %v3549_v44  ;;  %v3554_v0 = vmul.f32 0.25, %v3456_v6  ;;  %v3555_v29 = vmul.f32 0.25, %v3457_v13  ;;  %v3458_v12 = vld [vmem:[%s4808_s24 + $0x2a0] sm:$0xff]  ;;  %v3459_v57 = vld [vmem:[%s4808_s24 + $0x2a8] sm:$0xff] }
 0x2cc   : > { %v3460_v28 = vld [vmem:[%s4808_s24 + $0x2b0] sm:$0xff]  ;;  %3648 = vst.msk [vmem:[%s4808_s24 + $0x270] sm:$0xff] %vm2486_vm6, %v3550_v10  ;;  %3649 = vst.msk [vmem:[%s4808_s24 + $0x278] sm:$0xff] %vm2486_vm6, %v3551_v59  ;;  %v3556_v35 = vmul.f32 0.25, %v3458_v12  ;;  %v3557_v51 = vmul.f32 0.25, %v3459_v57  ;;  %v3461_v53 = vld [vmem:[%s4808_s24 + $0x2b8] sm:$0xff] }
 0x2cd   : > { %3650 = vst.msk [vmem:[%s4808_s24 + $0x280] sm:$0xff] %vm2486_vm6, %v3552_v1  ;;  %v3558_v3 = vmul.f32 0.25, %v3460_v28  ;;  %v3462_v50 = vld [vmem:[%s4808_s24 + $0x2c0] sm:$0xff]  ;;  %v3463_v36 = vld [vmem:[%s4808_s24 + $0x2c8] sm:$0xff]  ;;  %3651 = vst.msk [vmem:[%s4808_s24 + $0x288] sm:$0xff] %vm2486_vm6, %v3553_v55  ;;  %v3559_v48 = vmul.f32 0.25, %v3461_v53 }
 0x2ce   : > { %3652 = vst.msk [vmem:[%s4808_s24 + $0x290] sm:$0xff] %vm2486_vm6, %v3554_v0  ;;  %3653 = vst.msk [vmem:[%s4808_s24 + $0x298] sm:$0xff] %vm2486_vm6, %v3555_v29  ;;  %v3560_v60 = vmul.f32 0.25, %v3462_v50  ;;  %v3561_v2 = vmul.f32 0.25, %v3463_v36  ;;  %v3464_v24 = vld [vmem:[%s4808_s24 + $0x2d0] sm:$0xff]  ;;  %v3465_v7 = vld [vmem:[%s4808_s24 + $0x2d8] sm:$0xff] }
 0x2cf   : > { %v3466_v41 = vld [vmem:[%s4808_s24 + $0x2e0] sm:$0xff]  ;;  %3654 = vst.msk [vmem:[%s4808_s24 + $0x2a0] sm:$0xff] %vm2486_vm6, %v3556_v35  ;;  %3655 = vst.msk [vmem:[%s4808_s24 + $0x2a8] sm:$0xff] %vm2486_vm6, %v3557_v51  ;;  %v3562_v38 = vmul.f32 0.25, %v3464_v24  ;;  %v3563_v14 = vmul.f32 0.25, %v3465_v7  ;;  %v3467_v21 = vld [vmem:[%s4808_s24 + $0x2e8] sm:$0xff] }
 0x2d0   : > { %3656 = vst.msk [vmem:[%s4808_s24 + $0x2b0] sm:$0xff] %vm2486_vm6, %v3558_v3  ;;  %v3564_v15 = vmul.f32 0.25, %v3466_v41  ;;  %v3468_v31 = vld [vmem:[%s4808_s24 + $0x2f0] sm:$0xff]  ;;  %v3469_v19 = vld [vmem:[%s4808_s24 + $0x2f8] sm:$0xff]  ;;  %3657 = vst.msk [vmem:[%s4808_s24 + $0x2b8] sm:$0xff] %vm2486_vm6, %v3559_v48  ;;  %v3565_v43 = vmul.f32 0.25, %v3467_v21 }
 0x2d1   : > { %3658 = vst.msk [vmem:[%s4808_s24 + $0x2c0] sm:$0xff] %vm2486_vm6, %v3560_v60  ;;  %3659 = vst.msk [vmem:[%s4808_s24 + $0x2c8] sm:$0xff] %vm2486_vm6, %v3561_v2  ;;  %v3566_v23 = vmul.f32 0.25, %v3468_v31  ;;  %v3567_v9 = vmul.f32 0.25, %v3469_v19  ;;  %v3470_v45 = vld [vmem:[%s4808_s24 + $0x300] sm:$0xff]  ;;  %v3471_v46 = vld [vmem:[%s4808_s24 + $0x308] sm:$0xff] }
 0x2d2   : > { %3660 = vst.msk [vmem:[%s4808_s24 + $0x2d0] sm:$0xff] %vm2486_vm6, %v3562_v38  ;;  %3661 = vst.msk [vmem:[%s4808_s24 + $0x2d8] sm:$0xff] %vm2486_vm6, %v3563_v14  ;;  %v3568_v54 = vmul.f32 0.25, %v3470_v45  ;;  %v3569_v4 = vmul.f32 0.25, %v3471_v46 }
 0x2d3   : > { %3662 = vst.msk [vmem:[%s4808_s24 + $0x2e0] sm:$0xff] %vm2486_vm6, %v3564_v15  ;;  %3663 = vst.msk [vmem:[%s4808_s24 + $0x2e8] sm:$0xff] %vm2486_vm6, %v3565_v43 }
 0x2d4   : > { %3664 = vst.msk [vmem:[%s4808_s24 + $0x2f0] sm:$0xff] %vm2486_vm6, %v3566_v23  ;;  %3665 = vst.msk [vmem:[%s4808_s24 + $0x2f8] sm:$0xff] %vm2486_vm6, %v3567_v9 }
 0x2d5   : > { %3666 = vst.msk [vmem:[%s4808_s24 + $0x300] sm:$0xff] %vm2486_vm6, %v3568_v54  ;;  %3667 = vst.msk [vmem:[%s4808_s24 + $0x308] sm:$0xff] %vm2486_vm6, %v3569_v4 }
 0x2d6 PF: > { %s4212_s21 = smul.u32 12544, %s4672_s22  ;;  %s3695_s28 = sshll.u32 %s4808_s24, 4  ;;  %s7382_s28 = int_to_ptr.vmem [resolvable:$true] %s3695_s28 }
 0x2d7   : > { %s7386_s27 = scalar_lea.sflag [#allocation5], %s242_s10  ;;  %s4592_s7 = scalar_lea.vmem %s7382_s28, 12544 }
 0x2d8   : > { %s7380_s26 = scalar_lea.hbm %s7442_s5, %s4212_s21  ;;  %p4593_p2 = scmp.ne.s32.totalorder %s7382_s28, %s4592_s7 }
 0x2d9   : > { %s4690_s22 = smov [#allocation4]  }
 0x2da   : > { %p4594_p4 = pnand %p4593_p2, %p4772_p3  ;;  %s4596_s24 = sshll.u32 %s4690_s22, 4  ;;  %s4597_s24 = int_to_ptr.vmem [resolvable:$false] %s4596_s24 }
 0x2db   : > { %s4598_s8 = scalar_lea.vmem %s4597_s24, 25088  ;;  %p4599_p6 = scmp.lt.s32.totalorder %s7382_s28, %s4597_s24 }
 0x2dc   : > { %p4595_p5 = pneg %p4594_p4  ;;  %p4600_p7 = scmp.lt.s32.totalorder %s4598_s8, %s4592_s7 }
 0x2de   : > { %p4601_p8 = por %p4600_p7, %p4599_p6 }
 0x2e0   : > { %p4602_p10 = pnand %p4601_p8, %p4595_p5 }
 0x2e2   : > { %4605 = shalt.err (!%p4602_p10)
}
 0x2e3   : > { %s4606_s10 = scalar_lea.hbm %s7380_s26, 12544  ;;  %s4610_s29 = scalar_lea.hbm %s7442_s5, 25088 }
 0x2e4   : > { %p4607_p11 = scmp.ne.s32.totalorder %s7380_s26, %s4606_s10  ;;  %p4611_p0 = scmp.lt.s32.totalorder %s7380_s26, %s7442_s5 }
 0x2e5   : > { %p4612_p1 = scmp.lt.s32.totalorder %s4610_s29, %s4606_s10 }
 0x2e6   : > { %p4608_p12 = pnand %p4607_p11, %p4772_p3 }
 0x2e7   : > { %p4613_p2 = por %p4612_p1, %p4611_p0 }
 0x2e8   : > { %p4609_p13 = pneg %p4608_p12 }
 0x2ea   : > { %p4614_p4 = pnand %p4613_p2, %p4609_p13 }
 0x2ec   : > { %4617 = shalt.err (!%p4614_p4)
}
 0x2ed   : > { %s4691_s15 = smov 128   ;;  %s4692_s21 = smov 8  }
 0x2ee   : > { %4465 = dma.vmem_to_hbm [thread:$0]  (%p4772_p3), %s7382_s28, 12544, %s7380_s26, %s7386_s27, %s4691_s15, %s4691_s15, %s4692_s21  }
 0x2ef PF: > { %p4471_p5 = scmp.ge.s32.totalorder %s4684_s25, 2  ;;  %s3722_s16 = sand.u32 1, %s4656_s18  }
 0x2f0   : > { %s3723_s17 = scalar_lea.sflag [#allocation5], %s3722_s16 }
 0x2f1   : > { %p4468_p6 = pnand %p4471_p5, %p4782_p9 }
 0x2f3   : > { %p4469_p7 = pneg %p4468_p6 }
 0x2f5   : > { %4651 = dma.done.wait (%p4469_p7), %s3723_s17, 12544  }
 0x2f6   : > { %4653 = vsyncadd (%p4469_p7), %s3723_s17, 4294954752  ;;  %s19_s25 = sadd.s32 1, %s4684_s25   ;;  %s7758_s22 = sld [smem:[#allocation7_spill]] }
 0x2f7   : > { %p16_p8 = scmp.ge.s32.totalorder %s19_s25, 10   ;;  %s7759_s30 = sld [smem:[#allocation8_spill]] }
 0x2f8   : > { %s7760_s24 = sld [smem:[#allocation9_spill]]  ;;  %s7761_s18 = smov %s4660_s19 }
 0x2f9   : > { %s7762_s19 = smov %s4664_s20  ;;  %s7763_s20 = smov %s4790_s9 }
 0x2fa   : > { %s7764_s21 = smov %s4676_s23  ;;  %18 = sbr.rel (!%p16_p8) target bundleno = 5 (0x5), region = 91 }
 0x2fd   : > { %s7765_s23 = smov %s7759_s30 }
 0x2ff   :  { %3728 = vsyncpa [#allocation5], 1 }
 0x300   :  { %3730 = vsyncpa [#allocation5 + $0x1], 1 }

// kernel: csnn_forward.5
= control target key start
LH: loop header
LB: loop body
LE: loop exit
PB: predicated region body
PF: predicated region fallthrough
CT: control target
= control target key end

     0   :  { %11 = vsyncpa [#allocation4], 0  ;;  %s2584_s18 = smov 0   ;;  %s2586_s19 = smov 0   ;;  %s3419_s0 = inlined_call_operand.vmem [shape: bf16[4,400,36], index: 0, kind: input, shape index: {}]   ;;  %s3420_s1 = inlined_call_operand.vmem [shape: bf16[36,4], index: 1, kind: input, shape index: {}]   ;;  %s3421_s2 = inlined_call_operand.vmem [shape: f32[1,4], index: 2, kind: input, shape index: {}]   ;;  %s3422_s3 = inlined_call_operand.vmem [shape: f32[1,4], index: 3, kind: input, shape index: {}]   ;;  %s3423_s4 = inlined_call_operand.vmem [shape: bf16[4,400,4], index: 4, kind: output, shape index: {0}]   ;;  %s3424_s5 = inlined_call_operand.hbm [shape: f32[400,4], index: 5, kind: output, shape index: {1}]  }
   0x1   :  { %s2588_s20 = smov 0  }
   0x2 LB: > { %s2071_s21 = sadd.s32 4294967295, %s2546_s20   ;;  %s26_s22 = sadd.s32 1, %s2542_s19  ;;  %s2546_s20 = sphi %s2588_s20, %s17_s20   ;;  %s2542_s19 = sphi %s2586_s19, %s3427_s19   ;;  %s2538_s18 = sphi %s2584_s18, %s3426_s18  }
   0x3   : > { %p27_p0 = scmp.ge.s32.totalorder %s26_s22, 4  ;;  %p2075_p1 = scmp.ge.s32.totalorder %s2546_s20, 1 }
   0x4   : > { %p212_p2 = scmp.lt.s32.totalorder %s2546_s20, 5 }
   0x5   : > { %s3429_s22 = smov (%p27_p0, %s26_s22), 0 }
   0x6   : > { %p213_p3 = pnand %p2075_p1, %p212_p2 }
   0x7   : > { %p249_p4 = scmp.lt.s32.totalorder (!%p213_p3), %s2538_s18, 3  ;;  %p2078_p5 = scmp.ne.s32.totalorder (!%p213_p3), %s2538_s18, 0 }
   0x8   : > { %216 = sbr.rel (%p213_p3) target bundleno = 447 (0x1bf), region = 36 }
   0xd   : > { %s250_s23 = scalar_select %p249_p4, %s2538_s18, 3 }
   0xe   : > { %273 = sbr.rel (%p2078_p5) target bundleno = 70 (0x46), region = 40 }
   0xf   : > { %s2429_s24 = smul.u32 200, %s250_s23 }
  0x11   : > { %s2610_s27 = scalar_lea.vmem %s3419_s0, %s2429_s24  ;;  %s2615_s30 = scalar_lea.vmem %s3423_s4, %s2429_s24 }
  0x13   : > { %vm274_vm0 = vcmask 31744   ;;  %v2548_v0 = vmov 0.0  }
  0x14   : > { %275 = vst.msk [vmem:[#allocation2] sm:$0xff] %vm274_vm0, %v2548_v0  ;;  %276 = vst.msk [vmem:[#allocation2 + $0x8] sm:$0xff] %vm274_vm0, %v2548_v0 }
  0x15   : > { %277 = vst.msk [vmem:[#allocation2 + $0x10] sm:$0xff] %vm274_vm0, %v2548_v0  ;;  %278 = vst.msk [vmem:[#allocation2 + $0x18] sm:$0xff] %vm274_vm0, %v2548_v0 }
  0x16   : > { %279 = vst.msk [vmem:[#allocation2 + $0x20] sm:$0xff] %vm274_vm0, %v2548_v0  ;;  %280 = vst.msk [vmem:[#allocation2 + $0x28] sm:$0xff] %vm274_vm0, %v2548_v0 }
  0x17   : > { %281 = vst.msk [vmem:[#allocation2 + $0x30] sm:$0xff] %vm274_vm0, %v2548_v0  ;;  %282 = vst.msk [vmem:[#allocation2 + $0x38] sm:$0xff] %vm274_vm0, %v2548_v0 }
  0x18   : > { %283 = vst.msk [vmem:[#allocation2 + $0x40] sm:$0xff] %vm274_vm0, %v2548_v0  ;;  %284 = vst.msk [vmem:[#allocation2 + $0x48] sm:$0xff] %vm274_vm0, %v2548_v0 }
  0x19   : > { %285 = vst.msk [vmem:[#allocation2 + $0x50] sm:$0xff] %vm274_vm0, %v2548_v0  ;;  %286 = vst.msk [vmem:[#allocation2 + $0x58] sm:$0xff] %vm274_vm0, %v2548_v0 }
  0x1a   : > { %287 = vst.msk [vmem:[#allocation2 + $0x60] sm:$0xff] %vm274_vm0, %v2548_v0  ;;  %288 = vst.msk [vmem:[#allocation2 + $0x68] sm:$0xff] %vm274_vm0, %v2548_v0 }
  0x1b   : > { %289 = vst.msk [vmem:[#allocation2 + $0x70] sm:$0xff] %vm274_vm0, %v2548_v0  ;;  %290 = vst.msk [vmem:[#allocation2 + $0x78] sm:$0xff] %vm274_vm0, %v2548_v0 }
  0x1c   : > { %291 = vst.msk [vmem:[#allocation2 + $0x80] sm:$0xff] %vm274_vm0, %v2548_v0  ;;  %292 = vst.msk [vmem:[#allocation2 + $0x88] sm:$0xff] %vm274_vm0, %v2548_v0 }
  0x1d   : > { %293 = vst.msk [vmem:[#allocation2 + $0x90] sm:$0xff] %vm274_vm0, %v2548_v0  ;;  %294 = vst.msk [vmem:[#allocation2 + $0x98] sm:$0xff] %vm274_vm0, %v2548_v0 }
  0x1e   : > { %295 = vst.msk [vmem:[#allocation2 + $0xa0] sm:$0xff] %vm274_vm0, %v2548_v0  ;;  %296 = vst.msk [vmem:[#allocation2 + $0xa8] sm:$0xff] %vm274_vm0, %v2548_v0 }
  0x1f   : > { %297 = vst.msk [vmem:[#allocation2 + $0xb0] sm:$0xff] %vm274_vm0, %v2548_v0  ;;  %298 = vst.msk [vmem:[#allocation2 + $0xb8] sm:$0xff] %vm274_vm0, %v2548_v0 }
  0x20   : > { %299 = vst.msk [vmem:[#allocation2 + $0xc0] sm:$0xff] %vm274_vm0, %v2548_v0  ;;  %300 = vst.msk [vmem:[#allocation2 + $0xc8] sm:$0xff] %vm274_vm0, %v2548_v0 }
  0x21   : > { %301 = vst.msk [vmem:[#allocation2 + $0xd0] sm:$0xff] %vm274_vm0, %v2548_v0  ;;  %302 = vst.msk [vmem:[#allocation2 + $0xd8] sm:$0xff] %vm274_vm0, %v2548_v0 }
  0x22   : > { %303 = vst.msk [vmem:[#allocation2 + $0xe0] sm:$0xff] %vm274_vm0, %v2548_v0  ;;  %304 = vst.msk [vmem:[#allocation2 + $0xe8] sm:$0xff] %vm274_vm0, %v2548_v0 }
  0x23   : > { %305 = vst.msk [vmem:[#allocation2 + $0xf0] sm:$0xff] %vm274_vm0, %v2548_v0  ;;  %306 = vst.msk [vmem:[#allocation2 + $0xf8] sm:$0xff] %vm274_vm0, %v2548_v0 }
  0x24   : > { %307 = vst.msk [vmem:[#allocation2 + $0x100] sm:$0xff] %vm274_vm0, %v2548_v0  ;;  %308 = vst.msk [vmem:[#allocation2 + $0x108] sm:$0xff] %vm274_vm0, %v2548_v0 }
  0x25   : > { %309 = vst.msk [vmem:[#allocation2 + $0x110] sm:$0xff] %vm274_vm0, %v2548_v0  ;;  %310 = vst.msk [vmem:[#allocation2 + $0x118] sm:$0xff] %vm274_vm0, %v2548_v0 }
  0x26   : > { %311 = vst.msk [vmem:[#allocation2 + $0x120] sm:$0xff] %vm274_vm0, %v2548_v0  ;;  %312 = vst.msk [vmem:[#allocation2 + $0x128] sm:$0xff] %vm274_vm0, %v2548_v0 }
  0x27   : > { %313 = vst.msk [vmem:[#allocation2 + $0x130] sm:$0xff] %vm274_vm0, %v2548_v0  ;;  %314 = vst.msk [vmem:[#allocation2 + $0x138] sm:$0xff] %vm274_vm0, %v2548_v0 }
  0x28   : > { %315 = vst.msk [vmem:[#allocation2 + $0x140] sm:$0xff] %vm274_vm0, %v2548_v0  ;;  %316 = vst.msk [vmem:[#allocation2 + $0x148] sm:$0xff] %vm274_vm0, %v2548_v0 }
  0x29   : > { %317 = vst.msk [vmem:[#allocation2 + $0x150] sm:$0xff] %vm274_vm0, %v2548_v0  ;;  %318 = vst.msk [vmem:[#allocation2 + $0x158] sm:$0xff] %vm274_vm0, %v2548_v0 }
  0x2a   : > { %319 = vst.msk [vmem:[#allocation2 + $0x160] sm:$0xff] %vm274_vm0, %v2548_v0  ;;  %320 = vst.msk [vmem:[#allocation2 + $0x168] sm:$0xff] %vm274_vm0, %v2548_v0 }
  0x2b   : > { %321 = vst.msk [vmem:[#allocation2 + $0x170] sm:$0xff] %vm274_vm0, %v2548_v0  ;;  %322 = vst.msk [vmem:[#allocation2 + $0x178] sm:$0xff] %vm274_vm0, %v2548_v0 }
  0x2c   : > { %323 = vst.msk [vmem:[#allocation2 + $0x180] sm:$0xff] %vm274_vm0, %v2548_v0  ;;  %324 = vst.msk [vmem:[#allocation2 + $0x188] sm:$0xff] %vm274_vm0, %v2548_v0 }
  0x2d   : > { %325 = vst.msk [vmem:[#allocation3] sm:$0xff] %vm274_vm0, %v2548_v0  ;;  %326 = vst.msk [vmem:[#allocation3 + $0x8] sm:$0xff] %vm274_vm0, %v2548_v0 }
  0x2e   : > { %327 = vst.msk [vmem:[#allocation3 + $0x10] sm:$0xff] %vm274_vm0, %v2548_v0  ;;  %328 = vst.msk [vmem:[#allocation3 + $0x18] sm:$0xff] %vm274_vm0, %v2548_v0 }
  0x2f   : > { %329 = vst.msk [vmem:[#allocation3 + $0x20] sm:$0xff] %vm274_vm0, %v2548_v0  ;;  %330 = vst.msk [vmem:[#allocation3 + $0x28] sm:$0xff] %vm274_vm0, %v2548_v0 }
  0x30   : > { %331 = vst.msk [vmem:[#allocation3 + $0x30] sm:$0xff] %vm274_vm0, %v2548_v0  ;;  %332 = vst.msk [vmem:[#allocation3 + $0x38] sm:$0xff] %vm274_vm0, %v2548_v0 }
  0x31   : > { %333 = vst.msk [vmem:[#allocation3 + $0x40] sm:$0xff] %vm274_vm0, %v2548_v0  ;;  %334 = vst.msk [vmem:[#allocation3 + $0x48] sm:$0xff] %vm274_vm0, %v2548_v0 }
  0x32   : > { %335 = vst.msk [vmem:[#allocation3 + $0x50] sm:$0xff] %vm274_vm0, %v2548_v0  ;;  %336 = vst.msk [vmem:[#allocation3 + $0x58] sm:$0xff] %vm274_vm0, %v2548_v0 }
  0x33   : > { %337 = vst.msk [vmem:[#allocation3 + $0x60] sm:$0xff] %vm274_vm0, %v2548_v0  ;;  %338 = vst.msk [vmem:[#allocation3 + $0x68] sm:$0xff] %vm274_vm0, %v2548_v0 }
  0x34   : > { %339 = vst.msk [vmem:[#allocation3 + $0x70] sm:$0xff] %vm274_vm0, %v2548_v0  ;;  %340 = vst.msk [vmem:[#allocation3 + $0x78] sm:$0xff] %vm274_vm0, %v2548_v0 }
  0x35   : > { %341 = vst.msk [vmem:[#allocation3 + $0x80] sm:$0xff] %vm274_vm0, %v2548_v0  ;;  %342 = vst.msk [vmem:[#allocation3 + $0x88] sm:$0xff] %vm274_vm0, %v2548_v0 }
  0x36   : > { %343 = vst.msk [vmem:[#allocation3 + $0x90] sm:$0xff] %vm274_vm0, %v2548_v0  ;;  %344 = vst.msk [vmem:[#allocation3 + $0x98] sm:$0xff] %vm274_vm0, %v2548_v0 }
  0x37   : > { %345 = vst.msk [vmem:[#allocation3 + $0xa0] sm:$0xff] %vm274_vm0, %v2548_v0  ;;  %346 = vst.msk [vmem:[#allocation3 + $0xa8] sm:$0xff] %vm274_vm0, %v2548_v0 }
  0x38   : > { %347 = vst.msk [vmem:[#allocation3 + $0xb0] sm:$0xff] %vm274_vm0, %v2548_v0  ;;  %348 = vst.msk [vmem:[#allocation3 + $0xb8] sm:$0xff] %vm274_vm0, %v2548_v0 }
  0x39   : > { %349 = vst.msk [vmem:[#allocation3 + $0xc0] sm:$0xff] %vm274_vm0, %v2548_v0  ;;  %350 = vst.msk [vmem:[#allocation3 + $0xc8] sm:$0xff] %vm274_vm0, %v2548_v0 }
  0x3a   : > { %351 = vst.msk [vmem:[#allocation3 + $0xd0] sm:$0xff] %vm274_vm0, %v2548_v0  ;;  %352 = vst.msk [vmem:[#allocation3 + $0xd8] sm:$0xff] %vm274_vm0, %v2548_v0 }
  0x3b   : > { %353 = vst.msk [vmem:[#allocation3 + $0xe0] sm:$0xff] %vm274_vm0, %v2548_v0  ;;  %354 = vst.msk [vmem:[#allocation3 + $0xe8] sm:$0xff] %vm274_vm0, %v2548_v0 }
  0x3c   : > { %355 = vst.msk [vmem:[#allocation3 + $0xf0] sm:$0xff] %vm274_vm0, %v2548_v0  ;;  %356 = vst.msk [vmem:[#allocation3 + $0xf8] sm:$0xff] %vm274_vm0, %v2548_v0 }
  0x3d   : > { %357 = vst.msk [vmem:[#allocation3 + $0x100] sm:$0xff] %vm274_vm0, %v2548_v0  ;;  %358 = vst.msk [vmem:[#allocation3 + $0x108] sm:$0xff] %vm274_vm0, %v2548_v0 }
  0x3e   : > { %359 = vst.msk [vmem:[#allocation3 + $0x110] sm:$0xff] %vm274_vm0, %v2548_v0  ;;  %360 = vst.msk [vmem:[#allocation3 + $0x118] sm:$0xff] %vm274_vm0, %v2548_v0 }
  0x3f   : > { %361 = vst.msk [vmem:[#allocation3 + $0x120] sm:$0xff] %vm274_vm0, %v2548_v0  ;;  %362 = vst.msk [vmem:[#allocation3 + $0x128] sm:$0xff] %vm274_vm0, %v2548_v0 }
  0x40   : > { %363 = vst.msk [vmem:[#allocation3 + $0x130] sm:$0xff] %vm274_vm0, %v2548_v0  ;;  %364 = vst.msk [vmem:[#allocation3 + $0x138] sm:$0xff] %vm274_vm0, %v2548_v0 }
  0x41   : > { %365 = vst.msk [vmem:[#allocation3 + $0x140] sm:$0xff] %vm274_vm0, %v2548_v0  ;;  %366 = vst.msk [vmem:[#allocation3 + $0x148] sm:$0xff] %vm274_vm0, %v2548_v0 }
  0x42   : > { %367 = vst.msk [vmem:[#allocation3 + $0x150] sm:$0xff] %vm274_vm0, %v2548_v0  ;;  %368 = vst.msk [vmem:[#allocation3 + $0x158] sm:$0xff] %vm274_vm0, %v2548_v0 }
  0x43   : > { %369 = vst.msk [vmem:[#allocation3 + $0x160] sm:$0xff] %vm274_vm0, %v2548_v0  ;;  %370 = vst.msk [vmem:[#allocation3 + $0x168] sm:$0xff] %vm274_vm0, %v2548_v0 }
  0x44   : > { %371 = vst.msk [vmem:[#allocation3 + $0x170] sm:$0xff] %vm274_vm0, %v2548_v0  ;;  %372 = vst.msk [vmem:[#allocation3 + $0x178] sm:$0xff] %vm274_vm0, %v2548_v0 }
  0x45   : > { %373 = vst.msk [vmem:[#allocation3 + $0x180] sm:$0xff] %vm274_vm0, %v2548_v0  ;;  %374 = vst.msk [vmem:[#allocation3 + $0x188] sm:$0xff] %vm274_vm0, %v2548_v0 }
  0x46 PF: > { %v2466_v1 = vld [vmem:[%s3420_s1 + $0x10] ss:$0 sps:$4 sm:$0x33]   ;;  %v2549_v2 = vmov 0.0   ;;  %vm646_vm1 = vcmask 1041408   ;;  %v2467_v4 = vld [vmem:[%s3420_s1 + $0x8] sm:$0xff]  }
  0x47   : > { %2317 = vmatprep.subr.bf16.mxu0 %v2549_v2  ;;  %2423 = vmatprep.subr.bf16.mxu1 %v2549_v2  ;;  %v648_v3 = vsel %vm646_vm1, %v2466_v1, 0  ;;  %vm2550_vm2 = vmmov 0   ;;  %v2468_v5 = vld [vmem:[%s3420_s1] sm:$0xff]   ;;  %v2470_v7 = vld [vmem:[%s2610_s27 + $0x68] sm:$0xff]   ;;  %vm570_vm3 = vcmask 293888   ;;  %v2472_v9 = vld [vmem:[%s2610_s27 + $0x70] sm:$0xff]  }
  0x48   : > { %2318 = vmatpush3.bf16.msra.mxu0 %v648_v3  ;;  %2426 = vmatpush3.bf16.msra.mxu1 %v648_v3  ;;  %v2469_v6 = vld [vmem:[%s2610_s27] sm:$0xff]   ;;  %v2471_v8 = vld [vmem:[%s2610_s27 + $0x8] sm:$0xff]   ;;  %v2473_v10 = vld [vmem:[%s2610_s27 + $0x10] sm:$0xff]   ;;  %vm1347_vm6 = vcmask 31744   ;;  %vm1598_vm7 = vcmask 27648   ;;  %p2234_p6 = scmp.ne.s32.totalorder %s2538_s18, 3 }
  0x49   : > { %2319 = vmatprep.subr.bf16.mxu0 %v2549_v2  ;;  %2424 = vmatprep.subr.bf16.mxu1 %v2549_v2  ;;  %v2474_v11 = vld [vmem:[%s2610_s27 + $0x78] sm:$0xff]   ;;  %v2476_v13 = vld [vmem:[%s2610_s27 + $0x80] sm:$0xff]   ;;  %v2478_v15 = vld [vmem:[%s2610_s27 + $0x88] sm:$0xff]  }
  0x4a   : > { %2323 = vmatprep.mubr.msk.bf16.mxu0 %vm2550_vm2, %v2549_v2  ;;  %2375 = vmatprep.mubr.msk.bf16.mxu1 %vm2550_vm2, %v2549_v2  ;;  %v2475_v12 = vld [vmem:[%s2610_s27 + $0x18] sm:$0xff]   ;;  %v2477_v14 = vld [vmem:[%s2610_s27 + $0x20] sm:$0xff]   ;;  %v2479_v16 = vld [vmem:[%s2610_s27 + $0x28] sm:$0xff]  }
  0x4b   : > { %v2480_v17 = vld [vmem:[%s2610_s27 + $0x90] sm:$0xff]   ;;  %v2482_v19 = vld [vmem:[%s2610_s27 + $0x98] sm:$0xff]   ;;  %v2484_v21 = vld [vmem:[%s2610_s27 + $0xa0] sm:$0xff]  }
  0x4c   : > { %2320 = vmatpush3.bf16.msra.mxu0 %v2467_v4  ;;  %2427 = vmatpush3.bf16.msra.mxu1 %v2467_v4  ;;  %v2481_v18 = vld [vmem:[%s2610_s27 + $0x30] sm:$0xff]   ;;  %v2483_v20 = vld [vmem:[%s2610_s27 + $0x38] sm:$0xff]   ;;  %v2485_v22 = vld [vmem:[%s2610_s27 + $0x40] sm:$0xff]  }
  0x4d   : > { %2321 = vmatprep.subr.bf16.mxu0 %v2549_v2  ;;  %2425 = vmatprep.subr.bf16.mxu1 %v2549_v2  ;;  %v2486_v23 = vld [vmem:[%s2610_s27 + $0xa8] sm:$0xff]   ;;  %v2488_v25 = vld [vmem:[%s2610_s27 + $0xb0] sm:$0xff]   ;;  %v2490_v27 = vld [vmem:[%s2610_s27 + $0xb8] sm:$0xff]  }
  0x4e   : > { %v2487_v24 = vld [vmem:[%s2610_s27 + $0x48] sm:$0xff]   ;;  %v2489_v26 = vld [vmem:[%s2610_s27 + $0x50] sm:$0xff]   ;;  %v2491_v28 = vld [vmem:[%s2610_s27 + $0x58] sm:$0xff]  }
  0x4f   : > { %v2492_v29 = vld [vmem:[%s2610_s27 + $0xc0] sm:$0xff]   ;;  %v1023_v38 = vld [vmem:[#allocation2 + $0xd0] sm:$0xff]  ;;  %v998_v54 = vld [vmem:[#allocation2 + $0x8] sm:$0xff] }
  0x50   : > { %2322 = vmatpush3.bf16.msra.mxu0 %v2468_v5  ;;  %2428 = vmatpush3.bf16.msra.mxu1 %v2468_v5  ;;  %v2493_v30 = vld [vmem:[%s2610_s27 + $0x60] sm:$0xff]   ;;  %v1649_v49 = vld [vmem:[#allocation3] sm:$0xff]  ;;  %v1024_v56 = vld [vmem:[#allocation2 + $0xd8] sm:$0xff] }
  0x51   : > { %v2936_v31 = vld [vmem:[%s3421_s2] ss:$0 sm:$0xff] }
  0x52   : > { %v2941_v33 = vld [vmem:[%s3422_s3] ss:$0 sm:$0xff] }
  0x53   : > { %2324 = vmatmul.mubr.msk.bf16.vlgmr.msra.gmra.mxu0 %vm570_vm3, %v2469_v6  ;;  %2376 = vmatmul.mubr.msk.bf16.vlgmr.msra.gmra.mxu1 %vm570_vm3, %v2470_v7  ;;  %v997_v37 = vld [vmem:[#allocation2] sm:$0xff] }
  0x54   : > { %2327 = vmatprep.mubr.msk.bf16.mxu0 %vm2550_vm2, %v2549_v2  ;;  %2379 = vmatprep.mubr.msk.bf16.mxu1 %vm2550_vm2, %v2549_v2  ;;  %v1675_v52 = vld [vmem:[#allocation3 + $0xd0] sm:$0xff] }
  0x5b   : > { %2328 = vmatmul.mubr.msk.bf16.gmra.mxu0 %vm570_vm3, %v2471_v8  ;;  %2380 = vmatmul.mubr.msk.bf16.gmra.mxu1 %vm570_vm3, %v2472_v9 }
  0x5c   : > { %2331 = vmatprep.mubr.msk.bf16.mxu0 %vm2550_vm2, %v2549_v2  ;;  %2383 = vmatprep.mubr.msk.bf16.mxu1 %vm2550_vm2, %v2549_v2 }
  0x63   : > { %2332 = vmatmul.mubr.msk.bf16.gmra.mxu0 %vm570_vm3, %v2473_v10  ;;  %2384 = vmatmul.mubr.msk.bf16.gmra.mxu1 %vm570_vm3, %v2474_v11  ;;  %v1650_v10 = vld [vmem:[#allocation3 + $0x8] sm:$0xff] }
  0x64   : > { %2335 = vmatprep.mubr.msk.bf16.mxu0 %vm2550_vm2, %v2549_v2  ;;  %2387 = vmatprep.mubr.msk.bf16.mxu1 %vm2550_vm2, %v2549_v2 }
  0x6b   : > { %2336 = vmatmul.mubr.msk.bf16.gmra.mxu0 %vm570_vm3, %v2475_v12  ;;  %2388 = vmatmul.mubr.msk.bf16.gmra.mxu1 %vm570_vm3, %v2476_v13  ;;  %v1676_v13 = vld [vmem:[#allocation3 + $0xd8] sm:$0xff] }
  0x6c   : > { %2339 = vmatprep.mubr.msk.bf16.mxu0 %vm2550_vm2, %v2549_v2  ;;  %2391 = vmatprep.mubr.msk.bf16.mxu1 %vm2550_vm2, %v2549_v2 }
  0x73   : > { %2340 = vmatmul.mubr.msk.bf16.gmra.mxu0 %vm570_vm3, %v2477_v14  ;;  %2392 = vmatmul.mubr.msk.bf16.gmra.mxu1 %vm570_vm3, %v2478_v15  ;;  %v999_v14 = vld [vmem:[#allocation2 + $0x10] sm:$0xff]  ;;  %v1025_v15 = vld [vmem:[#allocation2 + $0xe0] sm:$0xff] }
  0x74   : > { %2343 = vmatprep.mubr.msk.bf16.mxu0 %vm2550_vm2, %v2549_v2  ;;  %2395 = vmatprep.mubr.msk.bf16.mxu1 %vm2550_vm2, %v2549_v2 }
  0x7b   : > { %2344 = vmatmul.mubr.msk.bf16.gmra.mxu0 %vm570_vm3, %v2479_v16  ;;  %2396 = vmatmul.mubr.msk.bf16.gmra.mxu1 %vm570_vm3, %v2480_v17 }
  0x7c   : > { %2347 = vmatprep.mubr.msk.bf16.mxu0 %vm2550_vm2, %v2549_v2  ;;  %2399 = vmatprep.mubr.msk.bf16.mxu1 %vm2550_vm2, %v2549_v2 }
  0x83   : > { %2348 = vmatmul.mubr.msk.bf16.gmra.mxu0 %vm570_vm3, %v2481_v18  ;;  %2400 = vmatmul.mubr.msk.bf16.gmra.mxu1 %vm570_vm3, %v2482_v19 }
  0x84   : > { %2351 = vmatprep.mubr.msk.bf16.mxu0 %vm2550_vm2, %v2549_v2  ;;  %2403 = vmatprep.mubr.msk.bf16.mxu1 %vm2550_vm2, %v2549_v2 }
  0x8b   : > { %2352 = vmatmul.mubr.msk.bf16.gmra.mxu0 %vm570_vm3, %v2483_v20  ;;  %2404 = vmatmul.mubr.msk.bf16.gmra.mxu1 %vm570_vm3, %v2484_v21 }
  0x8c   : > { %2355 = vmatprep.mubr.msk.bf16.mxu0 %vm2550_vm2, %v2549_v2  ;;  %2407 = vmatprep.mubr.msk.bf16.mxu1 %vm2550_vm2, %v2549_v2 }
  0x93   : > { %2356 = vmatmul.mubr.msk.bf16.gmra.mxu0 %vm570_vm3, %v2485_v22  ;;  %2408 = vmatmul.mubr.msk.bf16.gmra.mxu1 %vm570_vm3, %v2486_v23 }
  0x94   : > { %2359 = vmatprep.mubr.msk.bf16.mxu0 %vm2550_vm2, %v2549_v2  ;;  %2411 = vmatprep.mubr.msk.bf16.mxu1 %vm2550_vm2, %v2549_v2 }
  0x9b   : > { %2360 = vmatmul.mubr.msk.bf16.gmra.mxu0 %vm570_vm3, %v2487_v24  ;;  %2412 = vmatmul.mubr.msk.bf16.gmra.mxu1 %vm570_vm3, %v2488_v25 }
  0x9c   : > { %2363 = vmatprep.mubr.msk.bf16.mxu0 %vm2550_vm2, %v2549_v2  ;;  %2415 = vmatprep.mubr.msk.bf16.mxu1 %vm2550_vm2, %v2549_v2 }
  0xa3   : > { %2364 = vmatmul.mubr.msk.bf16.gmra.mxu0 %vm570_vm3, %v2489_v26  ;;  %2416 = vmatmul.mubr.msk.bf16.gmra.mxu1 %vm570_vm3, %v2490_v27 }
  0xa4   : > { %2367 = vmatprep.mubr.msk.bf16.mxu0 %vm2550_vm2, %v2549_v2  ;;  %2419 = vmatprep.mubr.msk.bf16.mxu1 %vm2550_vm2, %v2549_v2 }
  0xab   : > { %2368 = vmatmul.mubr.msk.bf16.gmra.mxu0 %vm570_vm3, %v2491_v28  ;;  %2420 = vmatmul.mubr.msk.bf16.gmra.mxu1 %vm570_vm3, %v2492_v29 }
  0xac   : > { %2371 = vmatprep.mubr.msk.bf16.mxu0 %vm2550_vm2, %v2549_v2 }
  0xb3   : > { %2372 = vmatmul.mubr.msk.bf16.gmra.mxu0 %vm570_vm3, %v2493_v30 }
 0x113   : > { %v684_v32 = vpop.f32.mrf.mxu0  ;;  %v788_v34 = vpop.f32.mrf.mxu1 }
 0x114   : > { %v890_v35 = vmul.f32 %v2936_v31, %v684_v32  ;;  %v916_v36 = vmul.f32 %v2936_v31, %v788_v34 }
 0x115   : > { %v2325_v39 = vpop.f32.mrf.mxu0  ;;  %v2377_v40 = vpop.f32.mrf.mxu1 }
 0x116   : > { %v947_v41 = vadd.f32 %v2941_v33, %v890_v35  ;;  %v973_v42 = vadd.f32 %v2941_v33, %v916_v36  ;;  %v1651_v36 = vld [vmem:[#allocation3 + $0x10] sm:$0xff] }
 0x117   : > { %v687_v43 = vpop.f32.mrf.mxu0  ;;  %v791_v44 = vpop.f32.mrf.mxu1 }
 0x118   : > { %v1047_v45 = vadd.f32 %v997_v37, %v947_v41  ;;  %v1073_v46 = vadd.f32 %v1023_v38, %v973_v42  ;;  %v891_v47 = vmul.f32 %v2936_v31, %v687_v43  ;;  %v917_v48 = vmul.f32 %v2936_v31, %v791_v44  ;;  %v1677_v41 = vld [vmem:[#allocation3 + $0xe0] sm:$0xff]  ;;  %v1000_v42 = vld [vmem:[#allocation2 + $0x18] sm:$0xff]  ;;  %v1026_v43 = vld [vmem:[#allocation2 + $0xe8] sm:$0xff] }
 0x119   : > { %v2326_v50 = vpop.f32.mrf.mxu0  ;;  %v2378_v51 = vpop.f32.mrf.mxu1 }
 0x11a   : > { %vm1097_vm4 = vcmp.ge.f32.partialorder %v1047_v45, 1.0  ;;  %vm1123_vm5 = vcmp.ge.f32.partialorder %v1073_v46, 1.0  ;;  %v948_v53 = vadd.f32 %v2941_v33, %v891_v47  ;;  %v974_v55 = vadd.f32 %v2941_v33, %v917_v48 }
 0x11b   : > { %v2134_v57 = vsel %vm1097_vm4, 1.0, %v2549_v2  ;;  %v2160_v58 = vsel %vm1123_vm5, 1.0, %v2549_v2  ;;  %v692_v59 = vpop.f32.mrf.mxu0  ;;  %v796_v60 = vpop.f32.mrf.mxu1 }
 0x11c   : > { %v1247_v61 = vsub.f32 1.0, %v2134_v57  ;;  %v2239_v62 = vpack.c.bf16 %v2134_v57, %v2134_v57  ;;  %v1699_v63 = vadd.f32 %v2134_v57, %v1649_v49  ;;  %v1273_v0 = vsub.f32 1.0, %v2160_v58 }
 0x11d   : > { %v2265_v1 = vpack.c.bf16 %v2160_v58, %v2160_v58  ;;  %v1725_v3 = vadd.f32 %v2160_v58, %v1675_v52  ;;  %v1048_v4 = vadd.f32 %v998_v54, %v948_v53  ;;  %v1074_v5 = vadd.f32 %v1024_v56, %v974_v55  ;;  %v2329_v6 = vpop.f32.mrf.mxu0  ;;  %v2381_v7 = vpop.f32.mrf.mxu1 }
 0x11e   : > { %v1297_v8 = vmul.f32 %v1247_v61, %v1047_v45  ;;  %1599 = vst.msk [vmem:[%s2615_s30] sm:$0xf] %vm1598_vm7, %v2239_v62  ;;  %v1323_v9 = vmul.f32 %v1273_v0, %v1073_v46  ;;  %v892_v11 = vmul.f32 %v2936_v31, %v692_v59  ;;  %v918_v12 = vmul.f32 %v2936_v31, %v796_v60  ;;  %v1001_v60 = vld [vmem:[#allocation2 + $0x20] sm:$0xff]  ;;  %v1027_v61 = vld [vmem:[#allocation2 + $0xf0] sm:$0xff]  ;;  %v1678_v6 = vld [vmem:[#allocation3 + $0xe8] sm:$0xff] }
 0x11f   : > { %1749 = vst.msk [vmem:[#allocation3] sm:$0xff] %vm1347_vm6, %v1699_v63  ;;  %1775 = vst.msk [vmem:[#allocation3 + $0xd0] sm:$0xff] %vm1347_vm6, %v1725_v3  ;;  %vm1098_vm8 = vcmp.ge.f32.partialorder %v1048_v4, 1.0  ;;  %vm1124_vm9 = vcmp.ge.f32.partialorder %v1074_v5, 1.0  ;;  %v695_v16 = vpop.f32.mrf.mxu0  ;;  %v799_v17 = vpop.f32.mrf.mxu1  ;;  %v1652_v3 = vld [vmem:[#allocation3 + $0x18] sm:$0xff] }
 0x120   : > { %1625 = vst.msk [vmem:[%s2615_s30 + $0x68] sm:$0xf] %vm1598_vm7, %v2265_v1  ;;  %v2135_v18 = vsel %vm1098_vm8, 1.0, %v2549_v2  ;;  %v2161_v19 = vsel %vm1124_vm9, 1.0, %v2549_v2  ;;  %v949_v20 = vadd.f32 %v2941_v33, %v892_v11  ;;  %v975_v21 = vadd.f32 %v2941_v33, %v918_v12 }
 0x121   : > { %1348 = vst.msk [vmem:[#allocation2] sm:$0xff] %vm1347_vm6, %v1297_v8  ;;  %1374 = vst.msk [vmem:[#allocation2 + $0xd0] sm:$0xff] %vm1347_vm6, %v1323_v9  ;;  %v1248_v22 = vsub.f32 1.0, %v2135_v18  ;;  %v2240_v23 = vpack.c.bf16 %v2135_v18, %v2135_v18  ;;  %v1700_v24 = vadd.f32 %v2135_v18, %v1650_v10  ;;  %v1274_v25 = vsub.f32 1.0, %v2161_v19  ;;  %v2330_v26 = vpop.f32.mrf.mxu0  ;;  %v2382_v27 = vpop.f32.mrf.mxu1 }
 0x122   : > { %v2266_v28 = vpack.c.bf16 %v2161_v19, %v2161_v19  ;;  %v1726_v29 = vadd.f32 %v2161_v19, %v1676_v13  ;;  %v1049_v30 = vadd.f32 %v999_v14, %v949_v20  ;;  %v1075_v32 = vadd.f32 %v1025_v15, %v975_v21  ;;  %v1653_v19 = vld [vmem:[#allocation3 + $0x20] sm:$0xff] }
 0x123   : > { %v1298_v34 = vmul.f32 %v1248_v22, %v1048_v4  ;;  %1600 = vst.msk [vmem:[%s2615_s30 + $0x4] sm:$0xf] %vm1598_vm7, %v2240_v23  ;;  %v1324_v35 = vmul.f32 %v1274_v25, %v1074_v5  ;;  %v893_v37 = vmul.f32 %v2936_v31, %v695_v16  ;;  %v919_v38 = vmul.f32 %v2936_v31, %v799_v17  ;;  %v700_v39 = vpop.f32.mrf.mxu0  ;;  %v804_v40 = vpop.f32.mrf.mxu1 }
 0x124   : > { %1750 = vst.msk [vmem:[#allocation3 + $0x8] sm:$0xff] %vm1347_vm6, %v1700_v24  ;;  %1776 = vst.msk [vmem:[#allocation3 + $0xd8] sm:$0xff] %vm1347_vm6, %v1726_v29  ;;  %vm1099_vm10 = vcmp.ge.f32.partialorder %v1049_v30, 1.0  ;;  %vm1125_vm11 = vcmp.ge.f32.partialorder %v1075_v32, 1.0  ;;  %v894_v44 = vmul.f32 %v2936_v31, %v700_v39  ;;  %v920_v45 = vmul.f32 %v2936_v31, %v804_v40  ;;  %v1679_v24 = vld [vmem:[#allocation3 + $0xf0] sm:$0xff] }
 0x125   : > { %1626 = vst.msk [vmem:[%s2615_s30 + $0x6c] sm:$0xf] %vm1598_vm7, %v2266_v28  ;;  %v2136_v46 = vsel %vm1099_vm10, 1.0, %v2549_v2  ;;  %v2162_v47 = vsel %vm1125_vm11, 1.0, %v2549_v2  ;;  %v950_v48 = vadd.f32 %v2941_v33, %v893_v37  ;;  %v976_v49 = vadd.f32 %v2941_v33, %v919_v38  ;;  %v2333_v50 = vpop.f32.mrf.mxu0  ;;  %v2385_v51 = vpop.f32.mrf.mxu1  ;;  %v1002_v37 = vld [vmem:[#allocation2 + $0x28] sm:$0xff]  ;;  %v1028_v38 = vld [vmem:[#allocation2 + $0xf8] sm:$0xff] }
 0x126   : > { %1349 = vst.msk [vmem:[#allocation2 + $0x8] sm:$0xff] %vm1347_vm6, %v1298_v34  ;;  %1375 = vst.msk [vmem:[#allocation2 + $0xd8] sm:$0xff] %vm1347_vm6, %v1324_v35  ;;  %v1249_v52 = vsub.f32 1.0, %v2136_v46  ;;  %v2241_v53 = vpack.c.bf16 %v2136_v46, %v2136_v46  ;;  %v1701_v54 = vadd.f32 %v2136_v46, %v1651_v36  ;;  %v1275_v55 = vsub.f32 1.0, %v2162_v47  ;;  %v1003_v51 = vld [vmem:[#allocation2 + $0x30] sm:$0xff] }
 0x127   : > { %v2267_v56 = vpack.c.bf16 %v2162_v47, %v2162_v47  ;;  %v1727_v57 = vadd.f32 %v2162_v47, %v1677_v41  ;;  %v1050_v58 = vadd.f32 %v1000_v42, %v950_v48  ;;  %v1076_v59 = vadd.f32 %v1026_v43, %v976_v49  ;;  %v703_v62 = vpop.f32.mrf.mxu0  ;;  %v807_v63 = vpop.f32.mrf.mxu1 }
 0x128   : > { %v1299_v0 = vmul.f32 %v1249_v52, %v1049_v30  ;;  %1601 = vst.msk [vmem:[%s2615_s30 + $0x8] sm:$0xf] %vm1598_vm7, %v2241_v53  ;;  %v1325_v1 = vmul.f32 %v1275_v55, %v1075_v32  ;;  %v951_v4 = vadd.f32 %v2941_v33, %v894_v44  ;;  %v977_v5 = vadd.f32 %v2941_v33, %v920_v45  ;;  %v1029_v52 = vld [vmem:[#allocation2 + $0x100] sm:$0xff] }
 0x129   : > { %1751 = vst.msk [vmem:[#allocation3 + $0x10] sm:$0xff] %vm1347_vm6, %v1701_v54  ;;  %1777 = vst.msk [vmem:[#allocation3 + $0xe0] sm:$0xff] %vm1347_vm6, %v1727_v57  ;;  %vm1100_vm12 = vcmp.ge.f32.partialorder %v1050_v58, 1.0  ;;  %vm1126_vm13 = vcmp.ge.f32.partialorder %v1076_v59, 1.0  ;;  %v895_v7 = vmul.f32 %v2936_v31, %v703_v62  ;;  %v921_v8 = vmul.f32 %v2936_v31, %v807_v63  ;;  %v2334_v9 = vpop.f32.mrf.mxu0  ;;  %v2386_v10 = vpop.f32.mrf.mxu1  ;;  %v1654_v57 = vld [vmem:[#allocation3 + $0x28] sm:$0xff] }
 0x12a   : > { %1627 = vst.msk [vmem:[%s2615_s30 + $0x70] sm:$0xf] %vm1598_vm7, %v2267_v56  ;;  %v2137_v11 = vsel %vm1100_vm12, 1.0, %v2549_v2  ;;  %v2163_v12 = vsel %vm1126_vm13, 1.0, %v2549_v2  ;;  %v1051_v13 = vadd.f32 %v1001_v60, %v951_v4  ;;  %v1077_v14 = vadd.f32 %v1027_v61, %v977_v5  ;;  %v1680_v60 = vld [vmem:[#allocation3 + $0xf8] sm:$0xff]  ;;  %v1655_v10 = vld [vmem:[#allocation3 + $0x30] sm:$0xff] }
 0x12b   : > { %1350 = vst.msk [vmem:[#allocation2 + $0x10] sm:$0xff] %vm1347_vm6, %v1299_v0  ;;  %1376 = vst.msk [vmem:[#allocation2 + $0xe0] sm:$0xff] %vm1347_vm6, %v1325_v1  ;;  %v1250_v15 = vsub.f32 1.0, %v2137_v11  ;;  %v2242_v16 = vpack.c.bf16 %v2137_v11, %v2137_v11  ;;  %v1702_v17 = vadd.f32 %v2137_v11, %v1652_v3  ;;  %v1276_v18 = vsub.f32 1.0, %v2163_v12  ;;  %v708_v20 = vpop.f32.mrf.mxu0  ;;  %v812_v21 = vpop.f32.mrf.mxu1 }
 0x12c   : > { %v2268_v22 = vpack.c.bf16 %v2163_v12, %v2163_v12  ;;  %v1728_v23 = vadd.f32 %v2163_v12, %v1678_v6  ;;  %vm1101_vm14 = vcmp.ge.f32.partialorder %v1051_v13, 1.0  ;;  %vm1127_vm15 = vcmp.ge.f32.partialorder %v1077_v14, 1.0 }
 0x12d   : > { %v1300_v25 = vmul.f32 %v1250_v15, %v1050_v58  ;;  %1602 = vst.msk [vmem:[%s2615_s30 + $0xc] sm:$0xf] %vm1598_vm7, %v2242_v16  ;;  %v1326_v26 = vmul.f32 %v1276_v18, %v1076_v59  ;;  %v2138_v27 = vsel %vm1101_vm14, 1.0, %v2549_v2  ;;  %v2164_v28 = vsel %vm1127_vm15, 1.0, %v2549_v2  ;;  %v2337_v29 = vpop.f32.mrf.mxu0  ;;  %v2389_v30 = vpop.f32.mrf.mxu1  ;;  %v1681_v15 = vld [vmem:[#allocation3 + $0x100] sm:$0xff]  ;;  %v1004_v16 = vld [vmem:[#allocation2 + $0x38] sm:$0xff] }
 0x12e   : > { %1752 = vst.msk [vmem:[#allocation3 + $0x18] sm:$0xff] %vm1347_vm6, %v1702_v17  ;;  %1778 = vst.msk [vmem:[#allocation3 + $0xe8] sm:$0xff] %vm1347_vm6, %v1728_v23  ;;  %v1251_v32 = vsub.f32 1.0, %v2138_v27  ;;  %v2243_v34 = vpack.c.bf16 %v2138_v27, %v2138_v27  ;;  %v1703_v35 = vadd.f32 %v2138_v27, %v1653_v19  ;;  %v1277_v36 = vsub.f32 1.0, %v2164_v28  ;;  %v1030_v17 = vld [vmem:[#allocation2 + $0x108] sm:$0xff] }
 0x12f   : > { %1628 = vst.msk [vmem:[%s2615_s30 + $0x74] sm:$0xf] %vm1598_vm7, %v2268_v22  ;;  %v2269_v39 = vpack.c.bf16 %v2164_v28, %v2164_v28  ;;  %v1729_v40 = vadd.f32 %v2164_v28, %v1679_v24  ;;  %v952_v41 = vadd.f32 %v2941_v33, %v895_v7  ;;  %v978_v42 = vadd.f32 %v2941_v33, %v921_v8  ;;  %v711_v43 = vpop.f32.mrf.mxu0  ;;  %v815_v44 = vpop.f32.mrf.mxu1 }
 0x130   : > { %1351 = vst.msk [vmem:[#allocation2 + $0x18] sm:$0xff] %vm1347_vm6, %v1300_v25  ;;  %1377 = vst.msk [vmem:[#allocation2 + $0xe8] sm:$0xff] %vm1347_vm6, %v1326_v26  ;;  %v1301_v45 = vmul.f32 %v1251_v32, %v1051_v13  ;;  %v1327_v46 = vmul.f32 %v1277_v36, %v1077_v14  ;;  %v896_v47 = vmul.f32 %v2936_v31, %v708_v20 }
 0x131   : > { %1603 = vst.msk [vmem:[%s2615_s30 + $0x10] sm:$0xf] %vm1598_vm7, %v2243_v34  ;;  %v922_v48 = vmul.f32 %v2936_v31, %v812_v21  ;;  %1629 = vst.msk [vmem:[%s2615_s30 + $0x78] sm:$0xf] %vm1598_vm7, %v2269_v39  ;;  %v1052_v49 = vadd.f32 %v1002_v37, %v952_v41  ;;  %v1078_v50 = vadd.f32 %v1028_v38, %v978_v42  ;;  %v2338_v55 = vpop.f32.mrf.mxu0  ;;  %v2390_v56 = vpop.f32.mrf.mxu1  ;;  %v1656_v38 = vld [vmem:[#allocation3 + $0x38] sm:$0xff]  ;;  %v1682_v41 = vld [vmem:[#allocation3 + $0x108] sm:$0xff] }
 0x132   : > { %1753 = vst.msk [vmem:[#allocation3 + $0x20] sm:$0xff] %vm1347_vm6, %v1703_v35  ;;  %1779 = vst.msk [vmem:[#allocation3 + $0xf0] sm:$0xff] %vm1347_vm6, %v1729_v40  ;;  %v897_v53 = vmul.f32 %v2936_v31, %v711_v43  ;;  %v923_v54 = vmul.f32 %v2936_v31, %v815_v44  ;;  %v953_v58 = vadd.f32 %v2941_v33, %v896_v47  ;;  %v1005_v42 = vld [vmem:[#allocation2 + $0x40] sm:$0xff]  ;;  %v1031_v43 = vld [vmem:[#allocation2 + $0x110] sm:$0xff] }
 0x133   : > { %1352 = vst.msk [vmem:[#allocation2 + $0x20] sm:$0xff] %vm1347_vm6, %v1301_v45  ;;  %1378 = vst.msk [vmem:[#allocation2 + $0xf0] sm:$0xff] %vm1347_vm6, %v1327_v46  ;;  %v979_v59 = vadd.f32 %v2941_v33, %v922_v48  ;;  %vm1102_vm0 = vcmp.ge.f32.partialorder %v1052_v49, 1.0  ;;  %vm1128_vm1 = vcmp.ge.f32.partialorder %v1078_v50, 1.0  ;;  %v716_v63 = vpop.f32.mrf.mxu0  ;;  %v820_v0 = vpop.f32.mrf.mxu1 }
 0x134   : > { %v954_v61 = vadd.f32 %v2941_v33, %v897_v53  ;;  %v980_v62 = vadd.f32 %v2941_v33, %v923_v54  ;;  %v2139_v1 = vsel %vm1102_vm0, 1.0, %v2549_v2  ;;  %v2165_v3 = vsel %vm1128_vm1, 1.0, %v2549_v2 }
 0x135   : > { %v1053_v4 = vadd.f32 %v1003_v51, %v953_v58  ;;  %v1079_v5 = vadd.f32 %v1029_v52, %v979_v59  ;;  %v1252_v6 = vsub.f32 1.0, %v2139_v1  ;;  %v2244_v7 = vpack.c.bf16 %v2139_v1, %v2139_v1  ;;  %v2341_v11 = vpop.f32.mrf.mxu0  ;;  %v2393_v12 = vpop.f32.mrf.mxu1 }
 0x136   : > { %v1704_v8 = vadd.f32 %v2139_v1, %v1654_v57  ;;  %v1278_v9 = vsub.f32 1.0, %v2165_v3  ;;  %v2270_v13 = vpack.c.bf16 %v2165_v3, %v2165_v3  ;;  %v1730_v14 = vadd.f32 %v2165_v3, %v1680_v60  ;;  %v1657_v3 = vld [vmem:[#allocation3 + $0x40] sm:$0xff] }
 0x137   : > { %vm1103_vm2 = vcmp.ge.f32.partialorder %v1053_v4, 1.0  ;;  %vm1129_vm3 = vcmp.ge.f32.partialorder %v1079_v5, 1.0  ;;  %v1302_v18 = vmul.f32 %v1252_v6, %v1052_v49  ;;  %1604 = vst.msk [vmem:[%s2615_s30 + $0x14] sm:$0xf] %vm1598_vm7, %v2244_v7  ;;  %v719_v22 = vpop.f32.mrf.mxu0  ;;  %v823_v23 = vpop.f32.mrf.mxu1  ;;  %v1054_v30 = vadd.f32 %v1004_v16, %v954_v61 }
 0x138   : > { %1754 = vst.msk [vmem:[#allocation3 + $0x28] sm:$0xff] %vm1347_vm6, %v1704_v8  ;;  %v1328_v19 = vmul.f32 %v1278_v9, %v1078_v50  ;;  %v2140_v20 = vsel %vm1103_vm2, 1.0, %v2549_v2  ;;  %v2166_v21 = vsel %vm1129_vm3, 1.0, %v2549_v2  ;;  %1780 = vst.msk [vmem:[#allocation3 + $0xf8] sm:$0xff] %vm1347_vm6, %v1730_v14  ;;  %v1080_v32 = vadd.f32 %v1030_v17, %v980_v62  ;;  %v1006_v62 = vld [vmem:[#allocation2 + $0x48] sm:$0xff]  ;;  %v1683_v8 = vld [vmem:[#allocation3 + $0x110] sm:$0xff] }
 0x139   : > { %1630 = vst.msk [vmem:[%s2615_s30 + $0x7c] sm:$0xf] %vm1598_vm7, %v2270_v13  ;;  %v1253_v24 = vsub.f32 1.0, %v2140_v20  ;;  %v2245_v25 = vpack.c.bf16 %v2140_v20, %v2140_v20  ;;  %v1705_v26 = vadd.f32 %v2140_v20, %v1655_v10  ;;  %v1279_v27 = vsub.f32 1.0, %v2166_v21  ;;  %v2342_v34 = vpop.f32.mrf.mxu0  ;;  %v2394_v35 = vpop.f32.mrf.mxu1 }
 0x13a   : > { %1353 = vst.msk [vmem:[#allocation2 + $0x28] sm:$0xff] %vm1347_vm6, %v1302_v18  ;;  %1379 = vst.msk [vmem:[#allocation2 + $0xf8] sm:$0xff] %vm1347_vm6, %v1328_v19  ;;  %v2271_v28 = vpack.c.bf16 %v2166_v21, %v2166_v21  ;;  %v1731_v29 = vadd.f32 %v2166_v21, %v1681_v15  ;;  %v898_v39 = vmul.f32 %v2936_v31, %v716_v63  ;;  %vm1104_vm4 = vcmp.ge.f32.partialorder %v1054_v30, 1.0  ;;  %v1032_v63 = vld [vmem:[#allocation2 + $0x118] sm:$0xff] }
 0x13b   : > { %v1303_v36 = vmul.f32 %v1253_v24, %v1053_v4  ;;  %1605 = vst.msk [vmem:[%s2615_s30 + $0x18] sm:$0xf] %vm1598_vm7, %v2245_v25  ;;  %v1329_v37 = vmul.f32 %v1279_v27, %v1079_v5  ;;  %v924_v40 = vmul.f32 %v2936_v31, %v820_v0  ;;  %vm1130_vm5 = vcmp.ge.f32.partialorder %v1080_v32, 1.0  ;;  %v724_v46 = vpop.f32.mrf.mxu0  ;;  %v828_v47 = vpop.f32.mrf.mxu1  ;;  %v1658_v21 = vld [vmem:[#allocation3 + $0x48] sm:$0xff]  ;;  %v1684_v24 = vld [vmem:[#allocation3 + $0x118] sm:$0xff] }
 0x13c   : > { %1755 = vst.msk [vmem:[#allocation3 + $0x30] sm:$0xff] %vm1347_vm6, %v1705_v26  ;;  %1781 = vst.msk [vmem:[#allocation3 + $0x100] sm:$0xff] %vm1347_vm6, %v1731_v29  ;;  %v899_v44 = vmul.f32 %v2936_v31, %v719_v22  ;;  %v925_v45 = vmul.f32 %v2936_v31, %v823_v23  ;;  %v2141_v48 = vsel %vm1104_vm4, 1.0, %v2549_v2  ;;  %v2167_v49 = vsel %vm1130_vm5, 1.0, %v2549_v2 }
 0x13d   : > { %1631 = vst.msk [vmem:[%s2615_s30 + $0x80] sm:$0xf] %vm1598_vm7, %v2271_v28  ;;  %v955_v50 = vadd.f32 %v2941_v33, %v898_v39  ;;  %v981_v51 = vadd.f32 %v2941_v33, %v924_v40  ;;  %v1254_v52 = vsub.f32 1.0, %v2141_v48  ;;  %v2246_v53 = vpack.c.bf16 %v2141_v48, %v2141_v48  ;;  %v2345_v56 = vpop.f32.mrf.mxu0  ;;  %v2397_v57 = vpop.f32.mrf.mxu1 }
 0x13e   : > { %1354 = vst.msk [vmem:[#allocation2 + $0x30] sm:$0xff] %vm1347_vm6, %v1303_v36  ;;  %1380 = vst.msk [vmem:[#allocation2 + $0x100] sm:$0xff] %vm1347_vm6, %v1329_v37  ;;  %v1706_v54 = vadd.f32 %v2141_v48, %v1656_v38  ;;  %v1280_v55 = vsub.f32 1.0, %v2167_v49  ;;  %v2272_v58 = vpack.c.bf16 %v2167_v49, %v2167_v49  ;;  %v1732_v59 = vadd.f32 %v2167_v49, %v1682_v41  ;;  %v1007_v37 = vld [vmem:[#allocation2 + $0x50] sm:$0xff]  ;;  %v1033_v38 = vld [vmem:[#allocation2 + $0x120] sm:$0xff] }
 0x13f   : > { %v1055_v60 = vadd.f32 %v1005_v42, %v955_v50  ;;  %v1081_v61 = vadd.f32 %v1031_v43, %v981_v51  ;;  %v1304_v0 = vmul.f32 %v1254_v52, %v1054_v30  ;;  %1606 = vst.msk [vmem:[%s2615_s30 + $0x1c] sm:$0xf] %vm1598_vm7, %v2246_v53  ;;  %v956_v4 = vadd.f32 %v2941_v33, %v899_v44  ;;  %v727_v6 = vpop.f32.mrf.mxu0  ;;  %v831_v7 = vpop.f32.mrf.mxu1  ;;  %v1008_v53 = vld [vmem:[#allocation2 + $0x58] sm:$0xff]  ;;  %v1659_v57 = vld [vmem:[#allocation3 + $0x50] sm:$0xff] }
 0x140   : > { %1756 = vst.msk [vmem:[#allocation3 + $0x38] sm:$0xff] %vm1347_vm6, %v1706_v54  ;;  %v1330_v1 = vmul.f32 %v1280_v55, %v1080_v32  ;;  %v982_v5 = vadd.f32 %v2941_v33, %v925_v45  ;;  %1782 = vst.msk [vmem:[#allocation3 + $0x108] sm:$0xff] %vm1347_vm6, %v1732_v59  ;;  %v900_v9 = vmul.f32 %v2936_v31, %v724_v46  ;;  %v1034_v54 = vld [vmem:[#allocation2 + $0x128] sm:$0xff] }
 0x141   : > { %1632 = vst.msk [vmem:[%s2615_s30 + $0x84] sm:$0xf] %vm1598_vm7, %v2272_v58  ;;  %vm1105_vm8 = vcmp.ge.f32.partialorder %v1055_v60, 1.0  ;;  %vm1131_vm9 = vcmp.ge.f32.partialorder %v1081_v61, 1.0  ;;  %v926_v10 = vmul.f32 %v2936_v31, %v828_v47  ;;  %v1056_v13 = vadd.f32 %v1006_v62, %v956_v4  ;;  %v2346_v15 = vpop.f32.mrf.mxu0  ;;  %v2398_v16 = vpop.f32.mrf.mxu1 }
 0x142   : > { %1355 = vst.msk [vmem:[#allocation2 + $0x38] sm:$0xff] %vm1347_vm6, %v1304_v0  ;;  %1381 = vst.msk [vmem:[#allocation2 + $0x108] sm:$0xff] %vm1347_vm6, %v1330_v1  ;;  %v2142_v11 = vsel %vm1105_vm8, 1.0, %v2549_v2  ;;  %v2168_v12 = vsel %vm1131_vm9, 1.0, %v2549_v2  ;;  %v1082_v14 = vadd.f32 %v1032_v63, %v982_v5  ;;  %v957_v43 = vadd.f32 %v2941_v33, %v900_v9  ;;  %v1685_v0 = vld [vmem:[#allocation3 + $0x120] sm:$0xff] }
 0x143   : > { %v1255_v17 = vsub.f32 1.0, %v2142_v11  ;;  %v2247_v18 = vpack.c.bf16 %v2142_v11, %v2142_v11  ;;  %v1707_v19 = vadd.f32 %v2142_v11, %v1657_v3  ;;  %v1281_v20 = vsub.f32 1.0, %v2168_v12  ;;  %v732_v25 = vpop.f32.mrf.mxu0  ;;  %v836_v26 = vpop.f32.mrf.mxu1 }
 0x144   : > { %v2273_v22 = vpack.c.bf16 %v2168_v12, %v2168_v12  ;;  %v1733_v23 = vadd.f32 %v2168_v12, %v1683_v8  ;;  %vm1106_vm10 = vcmp.ge.f32.partialorder %v1056_v13, 1.0  ;;  %vm1132_vm11 = vcmp.ge.f32.partialorder %v1082_v14, 1.0 }
 0x145   : > { %v1305_v27 = vmul.f32 %v1255_v17, %v1055_v60  ;;  %1607 = vst.msk [vmem:[%s2615_s30 + $0x20] sm:$0xf] %vm1598_vm7, %v2247_v18  ;;  %v1331_v28 = vmul.f32 %v1281_v20, %v1081_v61  ;;  %v2143_v29 = vsel %vm1106_vm10, 1.0, %v2549_v2  ;;  %v2169_v30 = vsel %vm1132_vm11, 1.0, %v2549_v2  ;;  %v2349_v39 = vpop.f32.mrf.mxu0  ;;  %v2401_v40 = vpop.f32.mrf.mxu1  ;;  %v1686_v17 = vld [vmem:[#allocation3 + $0x128] sm:$0xff]  ;;  %v1009_v18 = vld [vmem:[#allocation2 + $0x60] sm:$0xff] }
 0x146   : > { %1757 = vst.msk [vmem:[#allocation3 + $0x40] sm:$0xff] %vm1347_vm6, %v1707_v19  ;;  %1783 = vst.msk [vmem:[#allocation3 + $0x110] sm:$0xff] %vm1347_vm6, %v1733_v23  ;;  %v1256_v32 = vsub.f32 1.0, %v2143_v29  ;;  %v2248_v34 = vpack.c.bf16 %v2143_v29, %v2143_v29  ;;  %v1708_v35 = vadd.f32 %v2143_v29, %v1658_v21  ;;  %v1282_v36 = vsub.f32 1.0, %v2169_v30  ;;  %v1035_v19 = vld [vmem:[#allocation2 + $0x130] sm:$0xff]  ;;  %v1036_v39 = vld [vmem:[#allocation2 + $0x138] sm:$0xff] }
 0x147   : > { %1633 = vst.msk [vmem:[%s2615_s30 + $0x88] sm:$0xf] %vm1598_vm7, %v2273_v22  ;;  %v2274_v41 = vpack.c.bf16 %v2169_v30, %v2169_v30  ;;  %v1734_v42 = vadd.f32 %v2169_v30, %v1684_v24  ;;  %v983_v44 = vadd.f32 %v2941_v33, %v926_v10  ;;  %v901_v47 = vmul.f32 %v2936_v31, %v727_v6  ;;  %v735_v49 = vpop.f32.mrf.mxu0  ;;  %v839_v50 = vpop.f32.mrf.mxu1 }
 0x148   : > { %1356 = vst.msk [vmem:[#allocation2 + $0x40] sm:$0xff] %vm1347_vm6, %v1305_v27  ;;  %1382 = vst.msk [vmem:[#allocation2 + $0x110] sm:$0xff] %vm1347_vm6, %v1331_v28  ;;  %v1306_v45 = vmul.f32 %v1256_v32, %v1056_v13  ;;  %v1332_v46 = vmul.f32 %v1282_v36, %v1082_v14  ;;  %v927_v48 = vmul.f32 %v2936_v31, %v831_v7  ;;  %v1660_v14 = vld [vmem:[#allocation3 + $0x58] sm:$0xff] }
 0x149   : > { %1608 = vst.msk [vmem:[%s2615_s30 + $0x24] sm:$0xf] %vm1598_vm7, %v2248_v34  ;;  %1634 = vst.msk [vmem:[%s2615_s30 + $0x8c] sm:$0xf] %vm1598_vm7, %v2274_v41  ;;  %v1057_v51 = vadd.f32 %v1007_v37, %v957_v43  ;;  %v1083_v52 = vadd.f32 %v1033_v38, %v983_v44  ;;  %v902_v55 = vmul.f32 %v2936_v31, %v732_v25  ;;  %v2350_v62 = vpop.f32.mrf.mxu0  ;;  %v2402_v63 = vpop.f32.mrf.mxu1  ;;  %v1010_v38 = vld [vmem:[#allocation2 + $0x68] sm:$0xff] }
 0x14a   : > { %1758 = vst.msk [vmem:[#allocation3 + $0x48] sm:$0xff] %vm1347_vm6, %v1708_v35  ;;  %1784 = vst.msk [vmem:[#allocation3 + $0x118] sm:$0xff] %vm1347_vm6, %v1734_v42  ;;  %v928_v56 = vmul.f32 %v2936_v31, %v836_v26  ;;  %v958_v58 = vadd.f32 %v2941_v33, %v901_v47  ;;  %v984_v59 = vadd.f32 %v2941_v33, %v927_v48  ;;  %v1661_v42 = vld [vmem:[#allocation3 + $0x60] sm:$0xff]  ;;  %v1687_v47 = vld [vmem:[#allocation3 + $0x130] sm:$0xff] }
 0x14b   : > { %1357 = vst.msk [vmem:[#allocation2 + $0x48] sm:$0xff] %vm1347_vm6, %v1306_v45  ;;  %1383 = vst.msk [vmem:[#allocation2 + $0x118] sm:$0xff] %vm1347_vm6, %v1332_v46  ;;  %v903_v60 = vmul.f32 %v2936_v31, %v735_v49  ;;  %v929_v61 = vmul.f32 %v2936_v31, %v839_v50  ;;  %vm1107_vm12 = vcmp.ge.f32.partialorder %v1057_v51, 1.0  ;;  %vm1133_vm13 = vcmp.ge.f32.partialorder %v1083_v52, 1.0  ;;  %v740_v8 = vpop.f32.mrf.mxu0  ;;  %v844_v9 = vpop.f32.mrf.mxu1  ;;  %v1688_v63 = vld [vmem:[#allocation3 + $0x138] sm:$0xff] }
 0x14c   : > { %v959_v1 = vadd.f32 %v2941_v33, %v902_v55  ;;  %v985_v3 = vadd.f32 %v2941_v33, %v928_v56  ;;  %v2144_v4 = vsel %vm1107_vm12, 1.0, %v2549_v2  ;;  %v2170_v5 = vsel %vm1133_vm13, 1.0, %v2549_v2 }
 0x14d   : > { %v1058_v6 = vadd.f32 %v1008_v53, %v958_v58  ;;  %v1084_v7 = vadd.f32 %v1034_v54, %v984_v59  ;;  %v1257_v10 = vsub.f32 1.0, %v2144_v4  ;;  %v2249_v11 = vpack.c.bf16 %v2144_v4, %v2144_v4  ;;  %v2353_v20 = vpop.f32.mrf.mxu0  ;;  %v2405_v21 = vpop.f32.mrf.mxu1 }
 0x14e   : > { %v1709_v12 = vadd.f32 %v2144_v4, %v1659_v57  ;;  %v1283_v13 = vsub.f32 1.0, %v2170_v5  ;;  %v2275_v15 = vpack.c.bf16 %v2170_v5, %v2170_v5  ;;  %v1735_v16 = vadd.f32 %v2170_v5, %v1685_v0 }
 0x14f   : > { %vm1108_vm14 = vcmp.ge.f32.partialorder %v1058_v6, 1.0  ;;  %vm1134_vm15 = vcmp.ge.f32.partialorder %v1084_v7, 1.0  ;;  %v1307_v22 = vmul.f32 %v1257_v10, %v1057_v51  ;;  %1609 = vst.msk [vmem:[%s2615_s30 + $0x28] sm:$0xf] %vm1598_vm7, %v2249_v11  ;;  %v3107_v30 = vpop.f32.mrf.mxu0  ;;  %v3109_v32 = vpop.f32.mrf.mxu1  ;;  %v1059_v36 = vadd.f32 %v1009_v18, %v959_v1  ;;  %v1011_v11 = vld [vmem:[#allocation2 + $0x70] sm:$0xff] }
 0x150   : > { %1759 = vst.msk [vmem:[#allocation3 + $0x50] sm:$0xff] %vm1347_vm6, %v1709_v12  ;;  %v1333_v23 = vmul.f32 %v1283_v13, %v1083_v52  ;;  %v2145_v24 = vsel %vm1108_vm14, 1.0, %v2549_v2  ;;  %v2171_v25 = vsel %vm1134_vm15, 1.0, %v2549_v2  ;;  %1785 = vst.msk [vmem:[#allocation3 + $0x120] sm:$0xff] %vm1347_vm6, %v1735_v16  ;;  %v1085_v37 = vadd.f32 %v1035_v19, %v985_v3  ;;  %v1037_v12 = vld [vmem:[#allocation2 + $0x140] sm:$0xff] }
 0x151   : > { %1635 = vst.msk [vmem:[%s2615_s30 + $0x90] sm:$0xf] %vm1598_vm7, %v2275_v15  ;;  %v1258_v26 = vsub.f32 1.0, %v2145_v24  ;;  %v2250_v27 = vpack.c.bf16 %v2145_v24, %v2145_v24  ;;  %v1710_v28 = vadd.f32 %v2145_v24, %v1660_v14  ;;  %v1284_v29 = vsub.f32 1.0, %v2171_v25  ;;  %v2354_v45 = vpop.f32.mrf.mxu0  ;;  %v2406_v46 = vpop.f32.mrf.mxu1 }
 0x152   : > { %1358 = vst.msk [vmem:[#allocation2 + $0x50] sm:$0xff] %vm1347_vm6, %v1307_v22  ;;  %1384 = vst.msk [vmem:[#allocation2 + $0x120] sm:$0xff] %vm1347_vm6, %v1333_v23  ;;  %v2276_v34 = vpack.c.bf16 %v2171_v25, %v2171_v25  ;;  %v1736_v35 = vadd.f32 %v2171_v25, %v1686_v17  ;;  %v960_v43 = vadd.f32 %v2941_v33, %v903_v60  ;;  %vm1109_vm0 = vcmp.ge.f32.partialorder %v1059_v36, 1.0  ;;  %v1662_v60 = vld [vmem:[#allocation3 + $0x68] sm:$0xff] }
 0x153   : > { %v1308_v40 = vmul.f32 %v1258_v26, %v1058_v6  ;;  %1610 = vst.msk [vmem:[%s2615_s30 + $0x2c] sm:$0xf] %vm1598_vm7, %v2250_v27  ;;  %v1334_v41 = vmul.f32 %v1284_v29, %v1084_v7  ;;  %v986_v44 = vadd.f32 %v2941_v33, %v929_v61  ;;  %vm1135_vm1 = vcmp.ge.f32.partialorder %v1085_v37, 1.0  ;;  %v748_v54 = vpop.f32.mrf.mxu0  ;;  %v852_v55 = vpop.f32.mrf.mxu1  ;;  %v1012_v27 = vld [vmem:[#allocation2 + $0x78] sm:$0xff] }
 0x154   : > { %1760 = vst.msk [vmem:[#allocation3 + $0x58] sm:$0xff] %vm1347_vm6, %v1710_v28  ;;  %1786 = vst.msk [vmem:[#allocation3 + $0x128] sm:$0xff] %vm1347_vm6, %v1736_v35  ;;  %v904_v48 = vmul.f32 %v2936_v31, %v740_v8  ;;  %v930_v49 = vmul.f32 %v2936_v31, %v844_v9  ;;  %v2146_v50 = vsel %vm1109_vm0, 1.0, %v2549_v2  ;;  %v2172_v51 = vsel %vm1135_vm1, 1.0, %v2549_v2  ;;  %v1038_v28 = vld [vmem:[#allocation2 + $0x148] sm:$0xff] }
 0x155   : > { %1636 = vst.msk [vmem:[%s2615_s30 + $0x94] sm:$0xf] %vm1598_vm7, %v2276_v34  ;;  %v1060_v52 = vadd.f32 %v1010_v38, %v960_v43  ;;  %v1086_v53 = vadd.f32 %v1036_v39, %v986_v44  ;;  %v1259_v56 = vsub.f32 1.0, %v2146_v50  ;;  %v2251_v57 = vpack.c.bf16 %v2146_v50, %v2146_v50  ;;  %v2357_v0 = vpop.f32.mrf.mxu0  ;;  %v2409_v1 = vpop.f32.mrf.mxu1 }
 0x156   : > { %1359 = vst.msk [vmem:[#allocation2 + $0x58] sm:$0xff] %vm1347_vm6, %v1308_v40  ;;  %1385 = vst.msk [vmem:[#allocation2 + $0x128] sm:$0xff] %vm1347_vm6, %v1334_v41  ;;  %v1711_v58 = vadd.f32 %v2146_v50, %v1661_v42  ;;  %v1285_v59 = vsub.f32 1.0, %v2172_v51  ;;  %v2277_v61 = vpack.c.bf16 %v2172_v51, %v2172_v51  ;;  %v1737_v62 = vadd.f32 %v2172_v51, %v1687_v47  ;;  %v1689_v40 = vld [vmem:[#allocation3 + $0x140] sm:$0xff] }
 0x157   : > { %vm1110_vm2 = vcmp.ge.f32.partialorder %v1060_v52, 1.0  ;;  %vm1136_vm3 = vcmp.ge.f32.partialorder %v1086_v53, 1.0  ;;  %v1309_v3 = vmul.f32 %v1259_v56, %v1059_v36  ;;  %1611 = vst.msk [vmem:[%s2615_s30 + $0x30] sm:$0xf] %vm1598_vm7, %v2251_v57  ;;  %v751_v13 = vpop.f32.mrf.mxu0  ;;  %v855_v14 = vpop.f32.mrf.mxu1  ;;  %v961_v17 = vadd.f32 %v2941_v33, %v904_v48  ;;  %v1039_v56 = vld [vmem:[#allocation2 + $0x150] sm:$0xff] }
 0x158   : > { %1761 = vst.msk [vmem:[#allocation3 + $0x60] sm:$0xff] %vm1347_vm6, %v1711_v58  ;;  %v1335_v4 = vmul.f32 %v1285_v59, %v1085_v37  ;;  %v2147_v5 = vsel %vm1110_vm2, 1.0, %v2549_v2  ;;  %v2173_v6 = vsel %vm1136_vm3, 1.0, %v2549_v2  ;;  %1787 = vst.msk [vmem:[#allocation3 + $0x130] sm:$0xff] %vm1347_vm6, %v1737_v62  ;;  %v987_v18 = vadd.f32 %v2941_v33, %v930_v49 }
 0x159   : > { %1637 = vst.msk [vmem:[%s2615_s30 + $0x98] sm:$0xf] %vm1598_vm7, %v2277_v61  ;;  %v1260_v7 = vsub.f32 1.0, %v2147_v5  ;;  %v2252_v8 = vpack.c.bf16 %v2147_v5, %v2147_v5  ;;  %v1712_v9 = vadd.f32 %v2147_v5, %v1662_v60  ;;  %v1286_v10 = vsub.f32 1.0, %v2173_v6  ;;  %v2358_v23 = vpop.f32.mrf.mxu0  ;;  %v2410_v24 = vpop.f32.mrf.mxu1 }
 0x15a   : > { %1360 = vst.msk [vmem:[#allocation2 + $0x60] sm:$0xff] %vm1347_vm6, %v1309_v3  ;;  %1386 = vst.msk [vmem:[#allocation2 + $0x130] sm:$0xff] %vm1347_vm6, %v1335_v4  ;;  %v2278_v15 = vpack.c.bf16 %v2173_v6, %v2173_v6  ;;  %v1738_v16 = vadd.f32 %v2173_v6, %v1688_v63  ;;  %v905_v21 = vmul.f32 %v2936_v31, %v3107_v30  ;;  %v1663_v30 = vld [vmem:[#allocation3 + $0x70] sm:$0xff] }
 0x15b   : > { %v1310_v19 = vmul.f32 %v1260_v7, %v1060_v52  ;;  %1612 = vst.msk [vmem:[%s2615_s30 + $0x34] sm:$0xf] %vm1598_vm7, %v2252_v8  ;;  %v1336_v20 = vmul.f32 %v1286_v10, %v1086_v53  ;;  %v931_v22 = vmul.f32 %v2936_v31, %v3109_v32  ;;  %v1061_v25 = vadd.f32 %v1011_v11, %v961_v17  ;;  %v3157_v38 = vpop.f32.mrf.mxu0  ;;  %v3159_v39 = vpop.f32.mrf.mxu1  ;;  %v1664_v52 = vld [vmem:[#allocation3 + $0x78] sm:$0xff]  ;;  %v1040_v11 = vld [vmem:[#allocation2 + $0x158] sm:$0xff] }
 0x15c   : > { %1762 = vst.msk [vmem:[#allocation3 + $0x68] sm:$0xff] %vm1347_vm6, %v1712_v9  ;;  %1788 = vst.msk [vmem:[#allocation3 + $0x138] sm:$0xff] %vm1347_vm6, %v1738_v16  ;;  %v1087_v26 = vadd.f32 %v1037_v12, %v987_v18  ;;  %v906_v29 = vmul.f32 %v2936_v31, %v748_v54  ;;  %v932_v34 = vmul.f32 %v2936_v31, %v852_v55  ;;  %v1013_v55 = vld [vmem:[#allocation2 + $0x80] sm:$0xff]  ;;  %v1014_v10 = vld [vmem:[#allocation2 + $0x88] sm:$0xff] }
 0x15d   : > { %1638 = vst.msk [vmem:[%s2615_s30 + $0x9c] sm:$0xf] %vm1598_vm7, %v2278_v15  ;;  %v962_v32 = vadd.f32 %v2941_v33, %v905_v21  ;;  %v988_v35 = vadd.f32 %v2941_v33, %v931_v22  ;;  %v907_v36 = vmul.f32 %v2936_v31, %v751_v13  ;;  %v933_v37 = vmul.f32 %v2936_v31, %v855_v14  ;;  %v2361_v47 = vpop.f32.mrf.mxu0  ;;  %v2413_v48 = vpop.f32.mrf.mxu1  ;;  %v1665_v14 = vld [vmem:[#allocation3 + $0x80] sm:$0xff]  ;;  %v3185_v15 = vld [vmem:[%s3422_s3] ss:$0 sm:$0xff] }
 0x15e   : > { %1361 = vst.msk [vmem:[#allocation2 + $0x68] sm:$0xff] %vm1347_vm6, %v1310_v19  ;;  %1387 = vst.msk [vmem:[#allocation2 + $0x138] sm:$0xff] %vm1347_vm6, %v1336_v20  ;;  %vm1111_vm4 = vcmp.ge.f32.partialorder %v1061_v25, 1.0  ;;  %vm1137_vm5 = vcmp.ge.f32.partialorder %v1087_v26, 1.0  ;;  %v963_v41 = vadd.f32 %v2941_v33, %v906_v29  ;;  %v989_v42 = vadd.f32 %v2941_v33, %v932_v34  ;;  %v1690_v33 = vld [vmem:[#allocation3 + $0x148] sm:$0xff]  ;;  %v1691_v20 = vld [vmem:[#allocation3 + $0x150] sm:$0xff] }
 0x15f   : > { %v2148_v43 = vsel %vm1111_vm4, 1.0, %v2549_v2  ;;  %v2174_v44 = vsel %vm1137_vm5, 1.0, %v2549_v2  ;;  %v1062_v45 = vadd.f32 %v1012_v27, %v962_v32  ;;  %v1088_v46 = vadd.f32 %v1038_v28, %v988_v35  ;;  %v3165_v57 = vpop.f32.mrf.mxu0  ;;  %v3167_v58 = vpop.f32.mrf.mxu1  ;;  %v3199_v21 = vld [vmem:[%s3421_s2] ss:$0 sm:$0xff] }
 0x160   : > { %v1261_v31 = vsub.f32 1.0, %v2148_v43  ;;  %v2253_v49 = vpack.c.bf16 %v2148_v43, %v2148_v43  ;;  %v1713_v50 = vadd.f32 %v2148_v43, %v1663_v30  ;;  %v1287_v51 = vsub.f32 1.0, %v2174_v44 }
 0x161   : > { %v2279_v53 = vpack.c.bf16 %v2174_v44, %v2174_v44  ;;  %v1739_v54 = vadd.f32 %v2174_v44, %v1689_v40  ;;  %vm1112_vm8 = vcmp.ge.f32.partialorder %v1062_v45, 1.0  ;;  %vm1138_vm9 = vcmp.ge.f32.partialorder %v1088_v46, 1.0  ;;  %v2362_v4 = vpop.f32.mrf.mxu0  ;;  %v2414_v5 = vpop.f32.mrf.mxu1 }
 0x162   : > { %v1311_v59 = vmul.f32 %v1261_v31, %v1061_v25  ;;  %1613 = vst.msk [vmem:[%s2615_s30 + $0x38] sm:$0xf] %vm1598_vm7, %v2253_v49  ;;  %v1337_v60 = vmul.f32 %v1287_v51, %v1087_v26  ;;  %v2149_v61 = vsel %vm1112_vm8, 1.0, %v2549_v2  ;;  %v2175_v62 = vsel %vm1138_vm9, 1.0, %v2549_v2  ;;  %v1015_v49 = vld [vmem:[#allocation2 + $0x90] sm:$0xff]  ;;  %v1042_v4 = vld [vmem:[#allocation2 + $0x168] sm:$0xff] }
 0x163   : > { %1763 = vst.msk [vmem:[#allocation3 + $0x70] sm:$0xff] %vm1347_vm6, %v1713_v50  ;;  %1789 = vst.msk [vmem:[#allocation3 + $0x140] sm:$0xff] %vm1347_vm6, %v1739_v54  ;;  %v1262_v63 = vsub.f32 1.0, %v2149_v61  ;;  %v2254_v0 = vpack.c.bf16 %v2149_v61, %v2149_v61  ;;  %v1714_v1 = vadd.f32 %v2149_v61, %v1664_v52  ;;  %v1288_v3 = vsub.f32 1.0, %v2175_v62  ;;  %v3189_v18 = vpop.f32.mrf.mxu0  ;;  %v3191_v19 = vpop.f32.mrf.mxu1  ;;  %v1041_v50 = vld [vmem:[#allocation2 + $0x160] sm:$0xff] }
 0x164   : > { %1639 = vst.msk [vmem:[%s2615_s30 + $0xa0] sm:$0xf] %vm1598_vm7, %v2279_v53  ;;  %v2280_v6 = vpack.c.bf16 %v2175_v62, %v2175_v62  ;;  %v1740_v7 = vadd.f32 %v2175_v62, %v1690_v33  ;;  %v1063_v8 = vadd.f32 %v1013_v55, %v963_v41  ;;  %v1089_v9 = vadd.f32 %v1039_v56, %v989_v42 }
 0x165   : > { %1362 = vst.msk [vmem:[#allocation2 + $0x70] sm:$0xff] %vm1347_vm6, %v1311_v59  ;;  %1388 = vst.msk [vmem:[#allocation2 + $0x140] sm:$0xff] %vm1347_vm6, %v1337_v60  ;;  %v1312_v12 = vmul.f32 %v1262_v63, %v1062_v45  ;;  %v1338_v13 = vmul.f32 %v1288_v3, %v1088_v46  ;;  %v964_v16 = vadd.f32 %v3185_v15, %v907_v36  ;;  %v2365_v28 = vpop.f32.mrf.mxu0  ;;  %v2417_v29 = vpop.f32.mrf.mxu1  ;;  %v1666_v36 = vld [vmem:[#allocation3 + $0x88] sm:$0xff] }
 0x166   : > { %1614 = vst.msk [vmem:[%s2615_s30 + $0x3c] sm:$0xf] %vm1598_vm7, %v2254_v0  ;;  %v990_v17 = vadd.f32 %v3185_v15, %v933_v37  ;;  %1640 = vst.msk [vmem:[%s2615_s30 + $0xa4] sm:$0xf] %vm1598_vm7, %v2280_v6  ;;  %vm1113_vm10 = vcmp.ge.f32.partialorder %v1063_v8, 1.0  ;;  %vm1139_vm11 = vcmp.ge.f32.partialorder %v1089_v9, 1.0  ;;  %v908_v22 = vmul.f32 %v3199_v21, %v3157_v38 }
 0x167   : > { %1764 = vst.msk [vmem:[#allocation3 + $0x78] sm:$0xff] %vm1347_vm6, %v1714_v1  ;;  %1790 = vst.msk [vmem:[#allocation3 + $0x148] sm:$0xff] %vm1347_vm6, %v1740_v7  ;;  %v934_v23 = vmul.f32 %v3199_v21, %v3159_v39  ;;  %v2150_v24 = vsel %vm1113_vm10, 1.0, %v2549_v2  ;;  %v2176_v25 = vsel %vm1139_vm11, 1.0, %v2549_v2  ;;  %v1064_v26 = vadd.f32 %v1014_v10, %v964_v16  ;;  %v1692_v39 = vld [vmem:[#allocation3 + $0x158] sm:$0xff]  ;;  %v767_v40 = vpop.f32.mrf.mxu0  ;;  %v871_v41 = vpop.f32.mrf.mxu1  ;;  %v1016_v3 = vld [vmem:[#allocation2 + $0x98] sm:$0xff] }
 0x168   : > { %1363 = vst.msk [vmem:[#allocation2 + $0x78] sm:$0xff] %vm1347_vm6, %v1312_v12  ;;  %1389 = vst.msk [vmem:[#allocation2 + $0x148] sm:$0xff] %vm1347_vm6, %v1338_v13  ;;  %v1090_v27 = vadd.f32 %v1040_v11, %v990_v17  ;;  %v1263_v34 = vsub.f32 1.0, %v2150_v24  ;;  %v2255_v30 = vpack.c.bf16 %v2150_v24, %v2150_v24  ;;  %v1715_v32 = vadd.f32 %v2150_v24, %v1665_v14  ;;  %v1693_v12 = vld [vmem:[#allocation3 + $0x160] sm:$0xff] }
 0x169   : > { %v1289_v35 = vsub.f32 1.0, %v2176_v25  ;;  %v2281_v37 = vpack.c.bf16 %v2176_v25, %v2176_v25  ;;  %v1741_v38 = vadd.f32 %v2176_v25, %v1691_v20  ;;  %vm1114_vm12 = vcmp.ge.f32.partialorder %v1064_v26, 1.0  ;;  %v2366_v51 = vpop.f32.mrf.mxu0  ;;  %v2418_v52 = vpop.f32.mrf.mxu1 }
 0x16a   : > { %vm1140_vm13 = vcmp.ge.f32.partialorder %v1090_v27, 1.0  ;;  %v1313_v42 = vmul.f32 %v1263_v34, %v1063_v8  ;;  %1615 = vst.msk [vmem:[%s2615_s30 + $0x40] sm:$0xf] %vm1598_vm7, %v2255_v30  ;;  %v2151_v44 = vsel %vm1114_vm12, 1.0, %v2549_v2  ;;  %v965_v33 = vadd.f32 %v3185_v15, %v908_v22  ;;  %v1694_v34 = vld [vmem:[#allocation3 + $0x168] sm:$0xff]  ;;  %v1017_v30 = vld [vmem:[#allocation2 + $0xa0] sm:$0xff] }
 0x16b   : > { %1765 = vst.msk [vmem:[#allocation3 + $0x80] sm:$0xff] %vm1347_vm6, %v1715_v32  ;;  %v1339_v43 = vmul.f32 %v1289_v35, %v1089_v9  ;;  %v2177_v45 = vsel %vm1140_vm13, 1.0, %v2549_v2  ;;  %1791 = vst.msk [vmem:[#allocation3 + $0x150] sm:$0xff] %vm1347_vm6, %v1741_v38  ;;  %v1264_v46 = vsub.f32 1.0, %v2151_v44  ;;  %v2256_v47 = vpack.c.bf16 %v2151_v44, %v2151_v44  ;;  %v3228_v62 = vpop.f32.mrf.mxu0  ;;  %v3230_v63 = vpop.f32.mrf.mxu1  ;;  %v1043_v32 = vld [vmem:[#allocation2 + $0x170] sm:$0xff] }
 0x16c   : > { %1641 = vst.msk [vmem:[%s2615_s30 + $0xa8] sm:$0xf] %vm1598_vm7, %v2281_v37  ;;  %v1716_v48 = vadd.f32 %v2151_v44, %v1666_v36  ;;  %v1290_v31 = vsub.f32 1.0, %v2177_v45  ;;  %v2282_v53 = vpack.c.bf16 %v2177_v45, %v2177_v45  ;;  %v1742_v54 = vadd.f32 %v2177_v45, %v1692_v39 }
 0x16d   : > { %1364 = vst.msk [vmem:[#allocation2 + $0x80] sm:$0xff] %vm1347_vm6, %v1313_v42  ;;  %1390 = vst.msk [vmem:[#allocation2 + $0x150] sm:$0xff] %vm1347_vm6, %v1339_v43  ;;  %v991_v55 = vadd.f32 %v3185_v15, %v934_v23  ;;  %v1314_v56 = vmul.f32 %v1264_v46, %v1064_v26  ;;  %v909_v60 = vmul.f32 %v3199_v21, %v3165_v57  ;;  %v2369_v10 = vpop.f32.mrf.mxu0  ;;  %v2421_v11 = vpop.f32.mrf.mxu1 }
 0x16e   : > { %1616 = vst.msk [vmem:[%s2615_s30 + $0x44] sm:$0xf] %vm1598_vm7, %v2256_v47  ;;  %v1340_v59 = vmul.f32 %v1290_v31, %v1090_v27  ;;  %v935_v61 = vmul.f32 %v3199_v21, %v3167_v58  ;;  %1642 = vst.msk [vmem:[%s2615_s30 + $0xac] sm:$0xf] %vm1598_vm7, %v2282_v53  ;;  %v1065_v0 = vadd.f32 %v1015_v49, %v965_v33  ;;  %v1667_v58 = vld [vmem:[#allocation3 + $0x90] sm:$0xff]  ;;  %v1668_v27 = vld [vmem:[#allocation3 + $0x98] sm:$0xff] }
 0x16f   : > { %1766 = vst.msk [vmem:[#allocation3 + $0x88] sm:$0xff] %vm1347_vm6, %v1716_v48  ;;  %1792 = vst.msk [vmem:[#allocation3 + $0x158] sm:$0xff] %vm1347_vm6, %v1742_v54  ;;  %v1091_v1 = vadd.f32 %v1041_v50, %v991_v55  ;;  %v910_v5 = vmul.f32 %v3199_v21, %v3189_v18  ;;  %v936_v57 = vmul.f32 %v3199_v21, %v3191_v19  ;;  %v3249_v20 = vpop.f32.mrf.mxu0  ;;  %v3251_v22 = vpop.f32.mrf.mxu1  ;;  %v1018_v49 = vld [vmem:[#allocation2 + $0xa8] sm:$0xff]  ;;  %v1044_v50 = vld [vmem:[#allocation2 + $0x178] sm:$0xff] }
 0x170   : > { %1365 = vst.msk [vmem:[#allocation2 + $0x88] sm:$0xff] %vm1347_vm6, %v1314_v56  ;;  %1391 = vst.msk [vmem:[#allocation2 + $0x158] sm:$0xff] %vm1347_vm6, %v1340_v59  ;;  %v966_v6 = vadd.f32 %v3185_v15, %v909_v60  ;;  %v992_v7 = vadd.f32 %v3185_v15, %v935_v61  ;;  %v911_v8 = vmul.f32 %v3199_v21, %v767_v40  ;;  %vm1115_vm14 = vcmp.ge.f32.partialorder %v1065_v0, 1.0  ;;  %v1669_v53 = vld [vmem:[#allocation3 + $0xa0] sm:$0xff]  ;;  %v1695_v56 = vld [vmem:[#allocation3 + $0x170] sm:$0xff] }
 0x171   : > { %v937_v9 = vmul.f32 %v3199_v21, %v871_v41  ;;  %vm1141_vm15 = vcmp.ge.f32.partialorder %v1091_v1, 1.0  ;;  %v967_v13 = vadd.f32 %v3185_v15, %v910_v5  ;;  %v993_v14 = vadd.f32 %v3185_v15, %v936_v57  ;;  %v2370_v35 = vpop.f32.mrf.mxu0  ;;  %v2422_v36 = vpop.f32.mrf.mxu1 }
 0x172   : > { %v2152_v16 = vsel %vm1115_vm14, 1.0, %v2549_v2  ;;  %v2178_v17 = vsel %vm1141_vm15, 1.0, %v2549_v2  ;;  %v1066_v18 = vadd.f32 %v1016_v3, %v966_v6  ;;  %v1092_v19 = vadd.f32 %v1042_v4, %v992_v7  ;;  %v1670_v6 = vld [vmem:[#allocation3 + $0xa8] sm:$0xff] }
 0x173   : > { %v1265_v23 = vsub.f32 1.0, %v2152_v16  ;;  %v2257_v24 = vpack.c.bf16 %v2152_v16, %v2152_v16  ;;  %v1717_v25 = vadd.f32 %v2152_v16, %v1667_v58  ;;  %v1291_v26 = vsub.f32 1.0, %v2178_v17  ;;  %v3261_v45 = vpop.f32.mrf.mxu0  ;;  %v1020_v36 = vld [vmem:[#allocation2 + $0xb8] sm:$0xff] }
 0x174   : > { %v2283_v28 = vpack.c.bf16 %v2178_v17, %v2178_v17  ;;  %v1743_v29 = vadd.f32 %v2178_v17, %v1693_v12  ;;  %vm1116_vm0 = vcmp.ge.f32.partialorder %v1066_v18, 1.0  ;;  %vm1142_vm1 = vcmp.ge.f32.partialorder %v1092_v19, 1.0 }
 0x175   : > { %v1315_v37 = vmul.f32 %v1265_v23, %v1065_v0  ;;  %1617 = vst.msk [vmem:[%s2615_s30 + $0x48] sm:$0xf] %vm1598_vm7, %v2257_v24  ;;  %v1341_v38 = vmul.f32 %v1291_v26, %v1091_v1  ;;  %v2153_v39 = vsel %vm1116_vm0, 1.0, %v2549_v2  ;;  %v2179_v40 = vsel %vm1142_vm1, 1.0, %v2549_v2  ;;  %v2373_v55 = vpop.f32.mrf.mxu0  ;;  %v1045_v23 = vld [vmem:[#allocation2 + $0x180] sm:$0xff] }
 0x176   : > { %1767 = vst.msk [vmem:[#allocation3 + $0x90] sm:$0xff] %vm1347_vm6, %v1717_v25  ;;  %1793 = vst.msk [vmem:[#allocation3 + $0x160] sm:$0xff] %vm1347_vm6, %v1743_v29  ;;  %v1266_v41 = vsub.f32 1.0, %v2153_v39  ;;  %v2258_v42 = vpack.c.bf16 %v2153_v39, %v2153_v39  ;;  %v1718_v43 = vadd.f32 %v2153_v39, %v1668_v27  ;;  %v1292_v44 = vsub.f32 1.0, %v2179_v40 }
 0x177   : > { %1643 = vst.msk [vmem:[%s2615_s30 + $0xb0] sm:$0xf] %vm1598_vm7, %v2283_v28  ;;  %v2284_v46 = vpack.c.bf16 %v2179_v40, %v2179_v40  ;;  %v1744_v47 = vadd.f32 %v2179_v40, %v1694_v34  ;;  %v1067_v48 = vadd.f32 %v1017_v30, %v967_v13  ;;  %v1093_v31 = vadd.f32 %v1043_v32, %v993_v14  ;;  %v783_v4 = vpop.f32.mrf.mxu0 }
 0x178   : > { %1366 = vst.msk [vmem:[#allocation2 + $0x90] sm:$0xff] %vm1347_vm6, %v1315_v37  ;;  %1392 = vst.msk [vmem:[#allocation2 + $0x160] sm:$0xff] %vm1347_vm6, %v1341_v38  ;;  %v1316_v51 = vmul.f32 %v1266_v41, %v1066_v18  ;;  %v1342_v52 = vmul.f32 %v1292_v44, %v1092_v19  ;;  %v968_v54 = vadd.f32 %v3185_v15, %v911_v8  ;;  %v1696_v8 = vld [vmem:[#allocation3 + $0x178] sm:$0xff]  ;;  %v1019_v19 = vld [vmem:[#allocation2 + $0xb0] sm:$0xff] }
 0x179   : > { %1618 = vst.msk [vmem:[%s2615_s30 + $0x4c] sm:$0xf] %vm1598_vm7, %v2258_v42  ;;  %v994_v33 = vadd.f32 %v3185_v15, %v937_v9  ;;  %1644 = vst.msk [vmem:[%s2615_s30 + $0xb4] sm:$0xf] %vm1598_vm7, %v2284_v46  ;;  %vm1117_vm2 = vcmp.ge.f32.partialorder %v1067_v48, 1.0  ;;  %vm1143_vm3 = vcmp.ge.f32.partialorder %v1093_v31, 1.0  ;;  %v912_v59 = vmul.f32 %v3199_v21, %v3228_v62  ;;  %v2374_v9 = vpop.f32.mrf.mxu0 }
 0x17a   : > { %1768 = vst.msk [vmem:[#allocation3 + $0x98] sm:$0xff] %vm1347_vm6, %v1718_v43  ;;  %1794 = vst.msk [vmem:[#allocation3 + $0x168] sm:$0xff] %vm1347_vm6, %v1744_v47  ;;  %v938_v60 = vmul.f32 %v3199_v21, %v3230_v63  ;;  %v2154_v61 = vsel %vm1117_vm2, 1.0, %v2549_v2  ;;  %v2180_v0 = vsel %vm1143_vm3, 1.0, %v2549_v2  ;;  %v1068_v1 = vadd.f32 %v1018_v49, %v968_v54  ;;  %v1046_v37 = vld [vmem:[#allocation2 + $0x188] sm:$0xff]  ;;  %v1697_v41 = vld [vmem:[#allocation3 + $0x180] sm:$0xff] }
 0x17b   : > { %1367 = vst.msk [vmem:[#allocation2 + $0x98] sm:$0xff] %vm1347_vm6, %v1316_v51  ;;  %1393 = vst.msk [vmem:[#allocation2 + $0x168] sm:$0xff] %vm1347_vm6, %v1342_v52  ;;  %v1094_v3 = vadd.f32 %v1044_v50, %v994_v33  ;;  %v1267_v5 = vsub.f32 1.0, %v2154_v61  ;;  %v2259_v57 = vpack.c.bf16 %v2154_v61, %v2154_v61  ;;  %v1719_v58 = vadd.f32 %v2154_v61, %v1669_v53  ;;  %v1672_v50 = vld [vmem:[#allocation3 + $0xb8] sm:$0xff]  ;;  %v1698_v53 = vld [vmem:[#allocation3 + $0x188] sm:$0xff] }
 0x17c   : > { %v1293_v62 = vsub.f32 1.0, %v2180_v0  ;;  %v2285_v7 = vpack.c.bf16 %v2180_v0, %v2180_v0  ;;  %v1745_v63 = vadd.f32 %v2180_v0, %v1695_v56  ;;  %vm1118_vm4 = vcmp.ge.f32.partialorder %v1068_v1, 1.0  ;;  %v1021_v54 = vld [vmem:[#allocation2 + $0xc0] sm:$0xff] }
 0x17d   : > { %vm1144_vm5 = vcmp.ge.f32.partialorder %v1094_v3, 1.0  ;;  %v1317_v10 = vmul.f32 %v1267_v5, %v1067_v48  ;;  %1619 = vst.msk [vmem:[%s2615_s30 + $0x50] sm:$0xf] %vm1598_vm7, %v2259_v57  ;;  %v2155_v12 = vsel %vm1118_vm4, 1.0, %v2549_v2  ;;  %v969_v26 = vadd.f32 %v3185_v15, %v912_v59 }
 0x17e   : > { %1769 = vst.msk [vmem:[#allocation3 + $0xa0] sm:$0xff] %vm1347_vm6, %v1719_v58  ;;  %v1343_v11 = vmul.f32 %v1293_v62, %v1093_v31  ;;  %v2181_v13 = vsel %vm1144_vm5, 1.0, %v2549_v2  ;;  %1795 = vst.msk [vmem:[#allocation3 + $0x170] sm:$0xff] %vm1347_vm6, %v1745_v63  ;;  %v1268_v14 = vsub.f32 1.0, %v2155_v12  ;;  %v2260_v16 = vpack.c.bf16 %v2155_v12, %v2155_v12 }
 0x17f   : > { %1645 = vst.msk [vmem:[%s2615_s30 + $0xb8] sm:$0xf] %vm1598_vm7, %v2285_v7  ;;  %v1720_v17 = vadd.f32 %v2155_v12, %v1670_v6  ;;  %v1294_v18 = vsub.f32 1.0, %v2181_v13  ;;  %v2286_v24 = vpack.c.bf16 %v2181_v13, %v2181_v13  ;;  %v1746_v25 = vadd.f32 %v2181_v13, %v1696_v8  ;;  %v1673_v6 = vld [vmem:[#allocation3 + $0xc0] sm:$0xff]  ;;  %v1674_v7 = vld [vmem:[#allocation3 + $0xc8] sm:$0xff] }
 0x180   : > { %1368 = vst.msk [vmem:[#allocation2 + $0xa0] sm:$0xff] %vm1347_vm6, %v1317_v10  ;;  %1394 = vst.msk [vmem:[#allocation2 + $0x170] sm:$0xff] %vm1347_vm6, %v1343_v11  ;;  %v995_v27 = vadd.f32 %v3185_v15, %v938_v60  ;;  %v1318_v28 = vmul.f32 %v1268_v14, %v1068_v1  ;;  %v913_v34 = vmul.f32 %v3199_v21, %v3249_v20  ;;  %v1671_v20 = vld [vmem:[#allocation3 + $0xb0] sm:$0xff] }
 0x181   : > { %1620 = vst.msk [vmem:[%s2615_s30 + $0x54] sm:$0xf] %vm1598_vm7, %v2260_v16  ;;  %v1344_v29 = vmul.f32 %v1294_v18, %v1094_v3  ;;  %v939_v30 = vmul.f32 %v3199_v21, %v3251_v22  ;;  %1646 = vst.msk [vmem:[%s2615_s30 + $0xbc] sm:$0xf] %vm1598_vm7, %v2286_v24  ;;  %v1069_v32 = vadd.f32 %v1019_v19, %v969_v26 }
 0x182   : > { %1770 = vst.msk [vmem:[#allocation3 + $0xa8] sm:$0xff] %vm1347_vm6, %v1720_v17  ;;  %1796 = vst.msk [vmem:[#allocation3 + $0x178] sm:$0xff] %vm1347_vm6, %v1746_v25  ;;  %v1095_v35 = vadd.f32 %v1045_v23, %v995_v27  ;;  %v914_v38 = vmul.f32 %v3199_v21, %v3261_v45  ;;  %v915_v39 = vmul.f32 %v3199_v21, %v783_v4 }
 0x183   : > { %1369 = vst.msk [vmem:[#allocation2 + $0xa8] sm:$0xff] %vm1347_vm6, %v1318_v28  ;;  %1395 = vst.msk [vmem:[#allocation2 + $0x178] sm:$0xff] %vm1347_vm6, %v1344_v29  ;;  %v970_v22 = vadd.f32 %v3185_v15, %v913_v34  ;;  %v996_v40 = vadd.f32 %v3185_v15, %v939_v30  ;;  %vm1119_vm8 = vcmp.ge.f32.partialorder %v1069_v32, 1.0 }
 0x184   : > { %vm1145_vm9 = vcmp.ge.f32.partialorder %v1095_v35, 1.0  ;;  %v971_v42 = vadd.f32 %v3185_v15, %v914_v38  ;;  %v972_v43 = vadd.f32 %v3185_v15, %v915_v39  ;;  %v2156_v44 = vsel %vm1119_vm8, 1.0, %v2549_v2  ;;  %v1022_v15 = vld [vmem:[#allocation2 + $0xc8] sm:$0xff] }
 0x185   : > { %v2182_v21 = vsel %vm1145_vm9, 1.0, %v2549_v2  ;;  %v1070_v45 = vadd.f32 %v1020_v36, %v970_v22  ;;  %v1096_v46 = vadd.f32 %v1046_v37, %v996_v40  ;;  %v1269_v47 = vsub.f32 1.0, %v2156_v44 }
 0x186   : > { %v2261_v48 = vpack.c.bf16 %v2156_v44, %v2156_v44  ;;  %v1721_v31 = vadd.f32 %v2156_v44, %v1671_v20  ;;  %v1295_v49 = vsub.f32 1.0, %v2182_v21  ;;  %v2287_v51 = vpack.c.bf16 %v2182_v21, %v2182_v21 }
 0x187   : > { %v1747_v52 = vadd.f32 %v2182_v21, %v1697_v41  ;;  %vm1120_vm10 = vcmp.ge.f32.partialorder %v1070_v45, 1.0  ;;  %vm1146_vm11 = vcmp.ge.f32.partialorder %v1096_v46, 1.0  ;;  %v1319_v33 = vmul.f32 %v1269_v47, %v1069_v32 }
 0x188   : > { %1621 = vst.msk [vmem:[%s2615_s30 + $0x58] sm:$0xf] %vm1598_vm7, %v2261_v48  ;;  %v1345_v55 = vmul.f32 %v1295_v49, %v1095_v35  ;;  %v2157_v56 = vsel %vm1120_vm10, 1.0, %v2549_v2  ;;  %v2183_v59 = vsel %vm1146_vm11, 1.0, %v2549_v2  ;;  %1647 = vst.msk [vmem:[%s2615_s30 + $0xc0] sm:$0xf] %vm1598_vm7, %v2287_v51  ;;  %v1071_v5 = vadd.f32 %v1021_v54, %v971_v42 }
 0x189   : > { %1771 = vst.msk [vmem:[#allocation3 + $0xb0] sm:$0xff] %vm1347_vm6, %v1721_v31  ;;  %1797 = vst.msk [vmem:[#allocation3 + $0x180] sm:$0xff] %vm1347_vm6, %v1747_v52  ;;  %v1270_v60 = vsub.f32 1.0, %v2157_v56  ;;  %v2262_v61 = vpack.c.bf16 %v2157_v56, %v2157_v56  ;;  %v1722_v0 = vadd.f32 %v2157_v56, %v1672_v50  ;;  %v1296_v1 = vsub.f32 1.0, %v2183_v59 }
 0x18a   : > { %1370 = vst.msk [vmem:[#allocation2 + $0xb0] sm:$0xff] %vm1347_vm6, %v1319_v33  ;;  %1396 = vst.msk [vmem:[#allocation2 + $0x180] sm:$0xff] %vm1347_vm6, %v1345_v55  ;;  %v2288_v3 = vpack.c.bf16 %v2183_v59, %v2183_v59  ;;  %v1748_v4 = vadd.f32 %v2183_v59, %v1698_v53  ;;  %v1072_v57 = vadd.f32 %v1022_v15, %v972_v43  ;;  %vm1121_vm12 = vcmp.ge.f32.partialorder %v1071_v5, 1.0 }
 0x18b   : > { %v1320_v58 = vmul.f32 %v1270_v60, %v1070_v45  ;;  %1622 = vst.msk [vmem:[%s2615_s30 + $0x5c] sm:$0xf] %vm1598_vm7, %v2262_v61  ;;  %v1346_v62 = vmul.f32 %v1296_v1, %v1096_v46  ;;  %v2158_v63 = vsel %vm1121_vm12, 1.0, %v2549_v2 }
 0x18c   : > { %1772 = vst.msk [vmem:[#allocation3 + $0xb8] sm:$0xff] %vm1347_vm6, %v1722_v0  ;;  %1798 = vst.msk [vmem:[#allocation3 + $0x188] sm:$0xff] %vm1347_vm6, %v1748_v4  ;;  %vm1122_vm13 = vcmp.ge.f32.partialorder %v1072_v57, 1.0  ;;  %v1271_v9 = vsub.f32 1.0, %v2158_v63  ;;  %v2263_v10 = vpack.c.bf16 %v2158_v63, %v2158_v63  ;;  %v1723_v11 = vadd.f32 %v2158_v63, %v1673_v6 }
 0x18d   : > { %1648 = vst.msk [vmem:[%s2615_s30 + $0xc4] sm:$0xf] %vm1598_vm7, %v2288_v3  ;;  %v2159_v8 = vsel %vm1122_vm13, 1.0, %v2549_v2 }
 0x18e   : > { %1371 = vst.msk [vmem:[#allocation2 + $0xb8] sm:$0xff] %vm1347_vm6, %v1320_v58  ;;  %1397 = vst.msk [vmem:[#allocation2 + $0x188] sm:$0xff] %vm1347_vm6, %v1346_v62  ;;  %v1272_v12 = vsub.f32 1.0, %v2159_v8  ;;  %v2264_v13 = vpack.c.bf16 %v2159_v8, %v2159_v8  ;;  %v1724_v14 = vadd.f32 %v2159_v8, %v1674_v7  ;;  %v1321_v16 = vmul.f32 %v1271_v9, %v1071_v5  ;;  %1802 = sbr.rel (%p2234_p6) target bundleno = 431 (0x1af), region = 44 }
 0x18f   : > { %1623 = vst.msk [vmem:[%s2615_s30 + $0x60] sm:$0xf] %vm1598_vm7, %v2263_v10 }
 0x190   : > { %1773 = vst.msk [vmem:[#allocation3 + $0xc0] sm:$0xff] %vm1347_vm6, %v1723_v11  ;;  %v1322_v17 = vmul.f32 %v1272_v12, %v1072_v57  ;;  %1774 = vst.msk [vmem:[#allocation3 + $0xc8] sm:$0xff] %vm1347_vm6, %v1724_v14 }
 0x191   : > { %1624 = vst.msk [vmem:[%s2615_s30 + $0x64] sm:$0xf] %vm1598_vm7, %v2264_v13 }
 0x192   : > { %1372 = vst.msk [vmem:[#allocation2 + $0xc0] sm:$0xff] %vm1347_vm6, %v1321_v16  ;;  %1373 = vst.msk [vmem:[#allocation2 + $0xc8] sm:$0xff] %vm1347_vm6, %v1322_v17 }
 0x193   : > { %v1803_v2 = vld [vmem:[#allocation3] sm:$0xff]  ;;  %v1804_v18 = vld [vmem:[#allocation3 + $0x8] sm:$0xff]  ;;  %v1805_v19 = vld [vmem:[#allocation3 + $0x10] sm:$0xff] }
 0x194   : > { %v1853_v23 = vmul.f32 0.25, %v1803_v2  ;;  %v1854_v24 = vmul.f32 0.25, %v1804_v18  ;;  %v1855_v25 = vmul.f32 0.25, %v1805_v19  ;;  %v1806_v26 = vld [vmem:[#allocation3 + $0x18] sm:$0xff]  ;;  %v1807_v27 = vld [vmem:[#allocation3 + $0x20] sm:$0xff]  ;;  %v1808_v28 = vld [vmem:[#allocation3 + $0x28] sm:$0xff] }
 0x195   : > { %v1856_v29 = vmul.f32 0.25, %v1806_v26  ;;  %v1857_v34 = vmul.f32 0.25, %v1807_v27  ;;  %v1858_v30 = vmul.f32 0.25, %v1808_v28  ;;  %v1809_v32 = vld [vmem:[#allocation3 + $0x30] sm:$0xff]  ;;  %v1810_v35 = vld [vmem:[#allocation3 + $0x38] sm:$0xff]  ;;  %v1811_v36 = vld [vmem:[#allocation3 + $0x40] sm:$0xff] }
 0x196   : > { %1903 = vst.msk [vmem:[#allocation3] sm:$0xff] %vm1347_vm6, %v1853_v23  ;;  %1904 = vst.msk [vmem:[#allocation3 + $0x8] sm:$0xff] %vm1347_vm6, %v1854_v24  ;;  %v1859_v37 = vmul.f32 0.25, %v1809_v32  ;;  %v1860_v38 = vmul.f32 0.25, %v1810_v35  ;;  %v1861_v39 = vmul.f32 0.25, %v1811_v36  ;;  %v1812_v20 = vld [vmem:[#allocation3 + $0x48] sm:$0xff] }
 0x197   : > { %1905 = vst.msk [vmem:[#allocation3 + $0x10] sm:$0xff] %vm1347_vm6, %v1855_v25  ;;  %v1813_v22 = vld [vmem:[#allocation3 + $0x50] sm:$0xff]  ;;  %v1814_v40 = vld [vmem:[#allocation3 + $0x58] sm:$0xff]  ;;  %1906 = vst.msk [vmem:[#allocation3 + $0x18] sm:$0xff] %vm1347_vm6, %v1856_v29  ;;  %v1862_v41 = vmul.f32 0.25, %v1812_v20 }
 0x198   : > { %1907 = vst.msk [vmem:[#allocation3 + $0x20] sm:$0xff] %vm1347_vm6, %v1857_v34  ;;  %1908 = vst.msk [vmem:[#allocation3 + $0x28] sm:$0xff] %vm1347_vm6, %v1858_v30  ;;  %v1863_v42 = vmul.f32 0.25, %v1813_v22  ;;  %v1864_v43 = vmul.f32 0.25, %v1814_v40  ;;  %v1815_v44 = vld [vmem:[#allocation3 + $0x60] sm:$0xff]  ;;  %v1816_v21 = vld [vmem:[#allocation3 + $0x68] sm:$0xff] }
 0x199   : > { %v1817_v45 = vld [vmem:[#allocation3 + $0x70] sm:$0xff]  ;;  %1909 = vst.msk [vmem:[#allocation3 + $0x30] sm:$0xff] %vm1347_vm6, %v1859_v37  ;;  %1910 = vst.msk [vmem:[#allocation3 + $0x38] sm:$0xff] %vm1347_vm6, %v1860_v38  ;;  %v1865_v46 = vmul.f32 0.25, %v1815_v44  ;;  %v1866_v47 = vmul.f32 0.25, %v1816_v21  ;;  %v1818_v31 = vld [vmem:[#allocation3 + $0x78] sm:$0xff] }
 0x19a   : > { %1911 = vst.msk [vmem:[#allocation3 + $0x40] sm:$0xff] %vm1347_vm6, %v1861_v39  ;;  %v1867_v48 = vmul.f32 0.25, %v1817_v45  ;;  %v1819_v49 = vld [vmem:[#allocation3 + $0x80] sm:$0xff]  ;;  %v1820_v50 = vld [vmem:[#allocation3 + $0x88] sm:$0xff]  ;;  %1912 = vst.msk [vmem:[#allocation3 + $0x48] sm:$0xff] %vm1347_vm6, %v1862_v41  ;;  %v1868_v51 = vmul.f32 0.25, %v1818_v31 }
 0x19b   : > { %1913 = vst.msk [vmem:[#allocation3 + $0x50] sm:$0xff] %vm1347_vm6, %v1863_v42  ;;  %1914 = vst.msk [vmem:[#allocation3 + $0x58] sm:$0xff] %vm1347_vm6, %v1864_v43  ;;  %v1869_v52 = vmul.f32 0.25, %v1819_v49  ;;  %v1870_v53 = vmul.f32 0.25, %v1820_v50  ;;  %v1821_v54 = vld [vmem:[#allocation3 + $0x90] sm:$0xff]  ;;  %v1822_v15 = vld [vmem:[#allocation3 + $0x98] sm:$0xff] }
 0x19c   : > { %v1823_v33 = vld [vmem:[#allocation3 + $0xa0] sm:$0xff]  ;;  %1915 = vst.msk [vmem:[#allocation3 + $0x60] sm:$0xff] %vm1347_vm6, %v1865_v46  ;;  %1916 = vst.msk [vmem:[#allocation3 + $0x68] sm:$0xff] %vm1347_vm6, %v1866_v47  ;;  %v1871_v55 = vmul.f32 0.25, %v1821_v54  ;;  %v1872_v56 = vmul.f32 0.25, %v1822_v15  ;;  %v1824_v60 = vld [vmem:[#allocation3 + $0xa8] sm:$0xff] }
 0x19d   : > { %1917 = vst.msk [vmem:[#allocation3 + $0x70] sm:$0xff] %vm1347_vm6, %v1867_v48  ;;  %v1873_v59 = vmul.f32 0.25, %v1823_v33  ;;  %v1825_v61 = vld [vmem:[#allocation3 + $0xb0] sm:$0xff]  ;;  %v1826_v0 = vld [vmem:[#allocation3 + $0xb8] sm:$0xff]  ;;  %1918 = vst.msk [vmem:[#allocation3 + $0x78] sm:$0xff] %vm1347_vm6, %v1868_v51  ;;  %v1874_v1 = vmul.f32 0.25, %v1824_v60 }
 0x19e   : > { %1919 = vst.msk [vmem:[#allocation3 + $0x80] sm:$0xff] %vm1347_vm6, %v1869_v52  ;;  %1920 = vst.msk [vmem:[#allocation3 + $0x88] sm:$0xff] %vm1347_vm6, %v1870_v53  ;;  %v1875_v3 = vmul.f32 0.25, %v1825_v61  ;;  %v1876_v4 = vmul.f32 0.25, %v1826_v0  ;;  %v1827_v5 = vld [vmem:[#allocation3 + $0xc0] sm:$0xff]  ;;  %v1828_v57 = vld [vmem:[#allocation3 + $0xc8] sm:$0xff] }
 0x19f   : > { %v1829_v58 = vld [vmem:[#allocation3 + $0xd0] sm:$0xff]  ;;  %1921 = vst.msk [vmem:[#allocation3 + $0x90] sm:$0xff] %vm1347_vm6, %v1871_v55  ;;  %1922 = vst.msk [vmem:[#allocation3 + $0x98] sm:$0xff] %vm1347_vm6, %v1872_v56  ;;  %v1877_v62 = vmul.f32 0.25, %v1827_v5  ;;  %v1878_v6 = vmul.f32 0.25, %v1828_v57  ;;  %v1830_v63 = vld [vmem:[#allocation3 + $0xd8] sm:$0xff] }
 0x1a0   : > { %1923 = vst.msk [vmem:[#allocation3 + $0xa0] sm:$0xff] %vm1347_vm6, %v1873_v59  ;;  %v1879_v7 = vmul.f32 0.25, %v1829_v58  ;;  %v1831_v8 = vld [vmem:[#allocation3 + $0xe0] sm:$0xff]  ;;  %v1832_v9 = vld [vmem:[#allocation3 + $0xe8] sm:$0xff]  ;;  %1924 = vst.msk [vmem:[#allocation3 + $0xa8] sm:$0xff] %vm1347_vm6, %v1874_v1  ;;  %v1880_v10 = vmul.f32 0.25, %v1830_v63 }
 0x1a1   : > { %1925 = vst.msk [vmem:[#allocation3 + $0xb0] sm:$0xff] %vm1347_vm6, %v1875_v3  ;;  %1926 = vst.msk [vmem:[#allocation3 + $0xb8] sm:$0xff] %vm1347_vm6, %v1876_v4  ;;  %v1881_v11 = vmul.f32 0.25, %v1831_v8  ;;  %v1882_v12 = vmul.f32 0.25, %v1832_v9  ;;  %v1833_v13 = vld [vmem:[#allocation3 + $0xf0] sm:$0xff]  ;;  %v1834_v14 = vld [vmem:[#allocation3 + $0xf8] sm:$0xff] }
 0x1a2   : > { %v1835_v16 = vld [vmem:[#allocation3 + $0x100] sm:$0xff]  ;;  %1927 = vst.msk [vmem:[#allocation3 + $0xc0] sm:$0xff] %vm1347_vm6, %v1877_v62  ;;  %1928 = vst.msk [vmem:[#allocation3 + $0xc8] sm:$0xff] %vm1347_vm6, %v1878_v6  ;;  %v1883_v17 = vmul.f32 0.25, %v1833_v13  ;;  %v1884_v2 = vmul.f32 0.25, %v1834_v14  ;;  %v1836_v19 = vld [vmem:[#allocation3 + $0x108] sm:$0xff] }
 0x1a3   : > { %1929 = vst.msk [vmem:[#allocation3 + $0xd0] sm:$0xff] %vm1347_vm6, %v1879_v7  ;;  %v1885_v18 = vmul.f32 0.25, %v1835_v16  ;;  %v1837_v23 = vld [vmem:[#allocation3 + $0x110] sm:$0xff]  ;;  %v1838_v24 = vld [vmem:[#allocation3 + $0x118] sm:$0xff]  ;;  %1930 = vst.msk [vmem:[#allocation3 + $0xd8] sm:$0xff] %vm1347_vm6, %v1880_v10  ;;  %v1886_v25 = vmul.f32 0.25, %v1836_v19 }
 0x1a4   : > { %1931 = vst.msk [vmem:[#allocation3 + $0xe0] sm:$0xff] %vm1347_vm6, %v1881_v11  ;;  %1932 = vst.msk [vmem:[#allocation3 + $0xe8] sm:$0xff] %vm1347_vm6, %v1882_v12  ;;  %v1887_v26 = vmul.f32 0.25, %v1837_v23  ;;  %v1888_v27 = vmul.f32 0.25, %v1838_v24  ;;  %v1839_v28 = vld [vmem:[#allocation3 + $0x120] sm:$0xff]  ;;  %v1840_v29 = vld [vmem:[#allocation3 + $0x128] sm:$0xff] }
 0x1a5   : > { %v1841_v34 = vld [vmem:[#allocation3 + $0x130] sm:$0xff]  ;;  %1933 = vst.msk [vmem:[#allocation3 + $0xf0] sm:$0xff] %vm1347_vm6, %v1883_v17  ;;  %1934 = vst.msk [vmem:[#allocation3 + $0xf8] sm:$0xff] %vm1347_vm6, %v1884_v2  ;;  %v1889_v30 = vmul.f32 0.25, %v1839_v28  ;;  %v1890_v32 = vmul.f32 0.25, %v1840_v29  ;;  %v1842_v36 = vld [vmem:[#allocation3 + $0x138] sm:$0xff] }
 0x1a6   : > { %1935 = vst.msk [vmem:[#allocation3 + $0x100] sm:$0xff] %vm1347_vm6, %v1885_v18  ;;  %v1891_v35 = vmul.f32 0.25, %v1841_v34  ;;  %v1843_v37 = vld [vmem:[#allocation3 + $0x140] sm:$0xff]  ;;  %v1844_v38 = vld [vmem:[#allocation3 + $0x148] sm:$0xff]  ;;  %1936 = vst.msk [vmem:[#allocation3 + $0x108] sm:$0xff] %vm1347_vm6, %v1886_v25  ;;  %v1892_v39 = vmul.f32 0.25, %v1842_v36 }
 0x1a7   : > { %1937 = vst.msk [vmem:[#allocation3 + $0x110] sm:$0xff] %vm1347_vm6, %v1887_v26  ;;  %1938 = vst.msk [vmem:[#allocation3 + $0x118] sm:$0xff] %vm1347_vm6, %v1888_v27  ;;  %v1893_v20 = vmul.f32 0.25, %v1843_v37  ;;  %v1894_v22 = vmul.f32 0.25, %v1844_v38  ;;  %v1845_v40 = vld [vmem:[#allocation3 + $0x150] sm:$0xff]  ;;  %v1846_v41 = vld [vmem:[#allocation3 + $0x158] sm:$0xff] }
 0x1a8   : > { %v1847_v42 = vld [vmem:[#allocation3 + $0x160] sm:$0xff]  ;;  %1939 = vst.msk [vmem:[#allocation3 + $0x120] sm:$0xff] %vm1347_vm6, %v1889_v30  ;;  %1940 = vst.msk [vmem:[#allocation3 + $0x128] sm:$0xff] %vm1347_vm6, %v1890_v32  ;;  %v1895_v43 = vmul.f32 0.25, %v1845_v40  ;;  %v1896_v44 = vmul.f32 0.25, %v1846_v41  ;;  %v1848_v45 = vld [vmem:[#allocation3 + $0x168] sm:$0xff] }
 0x1a9   : > { %1941 = vst.msk [vmem:[#allocation3 + $0x130] sm:$0xff] %vm1347_vm6, %v1891_v35  ;;  %v1897_v21 = vmul.f32 0.25, %v1847_v42  ;;  %v1849_v46 = vld [vmem:[#allocation3 + $0x170] sm:$0xff]  ;;  %v1850_v47 = vld [vmem:[#allocation3 + $0x178] sm:$0xff]  ;;  %1942 = vst.msk [vmem:[#allocation3 + $0x138] sm:$0xff] %vm1347_vm6, %v1892_v39  ;;  %v1898_v48 = vmul.f32 0.25, %v1848_v45 }
 0x1aa   : > { %1943 = vst.msk [vmem:[#allocation3 + $0x140] sm:$0xff] %vm1347_vm6, %v1893_v20  ;;  %1944 = vst.msk [vmem:[#allocation3 + $0x148] sm:$0xff] %vm1347_vm6, %v1894_v22  ;;  %v1899_v31 = vmul.f32 0.25, %v1849_v46  ;;  %v1900_v49 = vmul.f32 0.25, %v1850_v47  ;;  %v1851_v50 = vld [vmem:[#allocation3 + $0x180] sm:$0xff]  ;;  %v1852_v51 = vld [vmem:[#allocation3 + $0x188] sm:$0xff] }
 0x1ab   : > { %1945 = vst.msk [vmem:[#allocation3 + $0x150] sm:$0xff] %vm1347_vm6, %v1895_v43  ;;  %1946 = vst.msk [vmem:[#allocation3 + $0x158] sm:$0xff] %vm1347_vm6, %v1896_v44  ;;  %v1901_v52 = vmul.f32 0.25, %v1851_v50  ;;  %v1902_v53 = vmul.f32 0.25, %v1852_v51 }
 0x1ac   : > { %1947 = vst.msk [vmem:[#allocation3 + $0x160] sm:$0xff] %vm1347_vm6, %v1897_v21  ;;  %1948 = vst.msk [vmem:[#allocation3 + $0x168] sm:$0xff] %vm1347_vm6, %v1898_v48 }
 0x1ad   : > { %1949 = vst.msk [vmem:[#allocation3 + $0x170] sm:$0xff] %vm1347_vm6, %v1899_v31  ;;  %1950 = vst.msk [vmem:[#allocation3 + $0x178] sm:$0xff] %vm1347_vm6, %v1900_v49 }
 0x1ae   : > { %1951 = vst.msk [vmem:[#allocation3 + $0x180] sm:$0xff] %vm1347_vm6, %v1901_v52  ;;  %1952 = vst.msk [vmem:[#allocation3 + $0x188] sm:$0xff] %vm1347_vm6, %v1902_v53 }
 0x1af PF: > { %p3395_p7 = scmp.eq.s32.totalorder %s2071_s21, 3  ;;  %s2551_s25 = smov [#allocation3]  }
 0x1b0   : > { %s1975_s26 = sshll.u32 %s2551_s25, 4  ;;  %s1976_s26 = int_to_ptr.vmem [resolvable:$true] %s1975_s26 }
 0x1b1   : > { %s2496_s27 = scalar_lea.vmem %s1976_s26, 6400  ;;  %p2503_p11 = scmp.lt.s32.totalorder %s1976_s26, %s1976_s26 }
 0x1b2   : > { %p2497_p8 = scmp.ne.s32.totalorder %s1976_s26, %s2496_s27  ;;  %p2504_p12 = scmp.lt.s32.totalorder %s2496_s27, %s2496_s27 }
 0x1b4   : > { %p2498_p9 = pnand %p2497_p8, %p3395_p7  ;;  %p2505_p13 = por %p2504_p12, %p2503_p11 }
 0x1b6   : > { %p2499_p10 = pneg %p2498_p9 }
 0x1b8   : > { %p2506_p0 = pnand %p2505_p13, %p2499_p10 }
 0x1ba   : > { %2509 = shalt.err (!%p2506_p0)
}
 0x1bb   : > { %s2552_s28 = smov 128   ;;  %s2553_s21 = smov 8  }
 0x1bc   : > { %2431 = dma.vmem_to_hbm [thread:$0]  (%p3395_p7), %s1976_s26, 6400, %s3424_s5, [#allocation4], %s2552_s28, %s2552_s28, %s2553_s21  }
 0x1bd   : > { %2533 = dma.done.wait (%p3395_p7), [#allocation4], 6400  }
 0x1be   : > { %2535 = vsyncadd (%p3395_p7), [#allocation4], 4294960896 }
 0x1bf PF: > { %s17_s20 = sadd.s32 1, %s2546_s20   ;;  %s3426_s18 = smov %s2542_s19 }
 0x1c0   : > { %p14_p1 = scmp.ge.s32.totalorder %s17_s20, 6   ;;  %s3427_s19 = smov %s3429_s22 }
 0x1c2   :  { %16 = sbr.rel (!%p14_p1) target bundleno = 2 (0x2), region = 84 }
 0x1c7   :  { %2003 = vsyncpa [#allocation4], 1 }
 0x1c8   :  { %2005 = vsyncpa [#allocation4 + $0x1], 1 }

// kernel: csnn_forward.6
= control target key start
LH: loop header
LB: loop body
LE: loop exit
PB: predicated region body
PF: predicated region fallthrough
CT: control target
= control target key end

     0   :  { %11 = vsyncpa [#allocation4], 0  ;;  %s806_s18 = smov 0   ;;  %s808_s19 = smov 0   ;;  %s915_s0 = inlined_call_operand.vmem [shape: bf16[4,16,196], index: 0, kind: input, shape index: {}]   ;;  %s916_s1 = inlined_call_operand.vmem [shape: bf16[196,128], index: 1, kind: input, shape index: {}]   ;;  %s917_s2 = inlined_call_operand.vmem [shape: f32[1,128], index: 2, kind: input, shape index: {}]   ;;  %s918_s3 = inlined_call_operand.vmem [shape: f32[1,128], index: 3, kind: input, shape index: {}]   ;;  %s919_s4 = inlined_call_operand.vmem [shape: bf16[4,16,128], index: 4, kind: output, shape index: {0}]   ;;  %s920_s5 = inlined_call_operand.hbm [shape: f32[16,128], index: 5, kind: output, shape index: {1}]  }
   0x1   :  { %s810_s20 = smov 0  }
   0x2 LB: > { %s622_s21 = sadd.s32 4294967295, %s768_s20   ;;  %s26_s22 = sadd.s32 1, %s764_s19  ;;  %s768_s20 = sphi %s810_s20, %s17_s20   ;;  %s764_s19 = sphi %s808_s19, %s923_s19   ;;  %s760_s18 = sphi %s806_s18, %s922_s18  }
   0x3   : > { %p27_p0 = scmp.ge.s32.totalorder %s26_s22, 4  ;;  %p626_p1 = scmp.ge.s32.totalorder %s768_s20, 1 }
   0x4   : > { %p213_p2 = scmp.lt.s32.totalorder %s768_s20, 5 }
   0x5   : > { %s925_s22 = smov (%p27_p0, %s26_s22), 0 }
   0x6   : > { %p214_p3 = pnand %p626_p1, %p213_p2 }
   0x7   : > { %p251_p4 = scmp.lt.s32.totalorder (!%p214_p3), %s760_s18, 3  ;;  %p631_p5 = scmp.ne.s32.totalorder (!%p214_p3), %s760_s18, 0 }
   0x8   : > { %217 = sbr.rel (%p214_p3) target bundleno = 309 (0x135), region = 36 }
   0xd   : > { %s252_s23 = scalar_select %p251_p4, %s760_s18, 3 }
   0xe   : > { %276 = sbr.rel (%p631_p5) target bundleno = 22 (0x16), region = 40 }
   0xf   : > { %s659_s24 = sshll.u32 %s252_s23, 4  ;;  %s660_s25 = sshll.u32 %s252_s23, 3 }
  0x10   : > { %s832_s28 = scalar_lea.vmem %s915_s0, %s659_s24  ;;  %s837_s6 = scalar_lea.vmem %s919_s4, %s660_s25 }
  0x13   : > { %v770_v0 = vmov 0.0  }
  0x14   : > { %277 = vst [vmem:[#allocation2] sm:$0xff] %v770_v0  ;;  %278 = vst [vmem:[#allocation2 + $0x8] sm:$0xff] %v770_v0 }
  0x15   : > { %279 = vst [vmem:[#allocation3] sm:$0xff] %v770_v0  ;;  %280 = vst [vmem:[#allocation3 + $0x8] sm:$0xff] %v770_v0 }
  0x16 PF: > { %v702_v1 = vld [vmem:[%s916_s1 + $0x38] sm:$0xff]   ;;  %v771_v2 = vmov 0   ;;  %v703_v3 = vld [vmem:[%s916_s1 + $0x30] sm:$0xff]   ;;  %v704_v4 = vld [vmem:[%s916_s1 + $0x28] sm:$0xff]   ;;  %vm392_vm0 = vcmask 556032   ;;  %vm396_vm1 = vcmask 1041408  }
  0x17   : > { %400 = vmatprep.subr.bf16.mxu0 %v771_v2  ;;  %v705_v5 = vld [vmem:[%s916_s1 + $0x20] sm:$0xff]   ;;  %v706_v7 = vld [vmem:[%s916_s1 + $0x18] sm:$0xff]   ;;  %v707_v8 = vld [vmem:[%s916_s1 + $0x10] sm:$0xff]   ;;  %v772_v32 = vmov 0.0   ;;  %p654_p6 = scmp.ne.s32.totalorder %s760_s18, 3 }
  0x18   : > { %401 = vmatpush1.bf16.msra.mxu0 %v702_v1  ;;  %v717_v6 = vld [vmem:[%s832_s28 + $0x4] ss:$8 sps:$4 sm:$0xff]   ;;  %v710_v11 = vld [vmem:[%s916_s1 + $0x60] ss:$0 sps:$4 sm:$0x33]   ;;  %v711_v13 = vld [vmem:[%s916_s1 + $0x58] sm:$0xff]  }
  0x19   : > { %402 = vmatprep.subr.bf16.mxu0 %v771_v2  ;;  %647 = vmatprep.mubr.msk.bf16.mxu0 %vm392_vm0, %v717_v6  ;;  %v708_v9 = vld [vmem:[%s916_s1 + $0x8] sm:$0xff]   ;;  %v709_v10 = vld [vmem:[%s916_s1] sm:$0xff]   ;;  %v398_v12 = vsel %vm396_vm1, %v710_v11, 0  ;;  %v712_v14 = vld [vmem:[%s916_s1 + $0x50] sm:$0xff]  }
  0x1a   : > { %v713_v15 = vld [vmem:[%s916_s1 + $0x48] sm:$0xff]   ;;  %v714_v16 = vld [vmem:[%s916_s1 + $0x40] sm:$0xff]  }
  0x1b   : > { %v715_v17 = vld [vmem:[%s832_s28] ss:$8 sps:$4 sm:$0xff]  }
  0x1c   : > { %403 = vmatpush1.bf16.msra.mxu0 %v703_v3  ;;  %v648_v18 = vld [vmem:[%s917_s2] ss:$0 sm:$0xff]  ;;  %v485_v28 = vld [vmem:[#allocation3] sm:$0xff]  ;;  %v460_v29 = vld [vmem:[#allocation2 + $0x8] sm:$0xff] }
  0x1d   : > { %404 = vmatprep.subr.bf16.mxu0 %v771_v2  ;;  %v649_v20 = vld [vmem:[%s918_s3] ss:$0 sm:$0xff]  ;;  %v486_v37 = vld [vmem:[#allocation3 + $0x8] sm:$0xff] }
  0x1e   : > { %v459_v22 = vld [vmem:[#allocation2] sm:$0xff] }
  0x20   : > { %405 = vmatpush1.bf16.msra.mxu0 %v704_v4 }
  0x21   : > { %406 = vmatprep.subr.bf16.mxu0 %v771_v2 }
  0x24   : > { %407 = vmatpush1.bf16.msra.mxu0 %v705_v5 }
  0x25   : > { %408 = vmatprep.subr.bf16.mxu0 %v771_v2 }
  0x28   : > { %409 = vmatpush1.bf16.msra.mxu0 %v706_v7 }
  0x29   : > { %410 = vmatprep.subr.bf16.mxu0 %v771_v2 }
  0x2c   : > { %411 = vmatpush1.bf16.msra.mxu0 %v707_v8 }
  0x2d   : > { %412 = vmatprep.subr.bf16.mxu0 %v771_v2 }
  0x30   : > { %413 = vmatpush1.bf16.msra.mxu0 %v708_v9 }
  0x31   : > { %414 = vmatprep.subr.bf16.mxu0 %v771_v2 }
  0x34   : > { %415 = vmatpush1.bf16.msra.mxu0 %v709_v10 }
  0x35   : > { %422 = vmatprep.subr.bf16.mxu0 %v771_v2 }
  0x38   : > { %423 = vmatpush2.bf16.msra.mxu0 %v398_v12 }
  0x39   : > { %424 = vmatprep.subr.bf16.mxu0 %v771_v2 }
  0x3c   : > { %425 = vmatpush2.bf16.msra.mxu0 %v711_v13 }
  0x3d   : > { %426 = vmatprep.subr.bf16.mxu0 %v771_v2 }
  0x40   : > { %427 = vmatpush2.bf16.msra.mxu0 %v712_v14 }
  0x41   : > { %428 = vmatprep.subr.bf16.mxu0 %v771_v2 }
  0x44   : > { %429 = vmatpush2.bf16.msra.mxu0 %v713_v15 }
  0x45   : > { %430 = vmatprep.subr.bf16.mxu0 %v771_v2 }
  0x48   : > { %431 = vmatpush2.bf16.msra.mxu0 %v714_v16 }
  0x4b   : > { %433 = vmatmul.mubr.bf16.vlgmr.msra.gmra.mxu0 %v715_v17 }
 0x10b   : > { %v434_v19 = vpop.f32.mrf.mxu0 }
 0x10c   : > { %v448_v21 = vmul.f32 %v648_v18, %v434_v19 }
 0x10d   : > { %v436_v23 = vpop.f32.mrf.mxu0 }
 0x10e   : > { %v457_v24 = vadd.f32 %v649_v20, %v448_v21 }
 0x10f   : > { %v437_v25 = vpop.f32.mrf.mxu0 }
 0x110   : > { %v461_v26 = vadd.f32 %v459_v22, %v457_v24  ;;  %v449_v27 = vmul.f32 %v648_v18, %v437_v25 }
 0x111   : > { %v439_v30 = vpop.f32.mrf.mxu0 }
 0x112   : > { %vm463_vm2 = vcmp.ge.f32.partialorder %v461_v26, 1.0  ;;  %v458_v31 = vadd.f32 %v649_v20, %v449_v27 }
 0x113   : > { %v650_v33 = vsel %vm463_vm2, 1.0, %v772_v32 }
 0x114   : > { %v469_v34 = vsub.f32 1.0, %v650_v33  ;;  %v487_v35 = vadd.f32 %v650_v33, %v485_v28  ;;  %v462_v36 = vadd.f32 %v460_v29, %v458_v31 }
 0x116   : > { %v471_v38 = vmul.f32 %v469_v34, %v461_v26  ;;  %489 = vst [vmem:[#allocation3] sm:$0xff] %v487_v35  ;;  %vm464_vm3 = vcmp.ge.f32.partialorder %v462_v36, 1.0 }
 0x117   : > { %v651_v39 = vsel %vm464_vm3, 1.0, %v772_v32 }
 0x118   : > { %473 = vst [vmem:[#allocation2] sm:$0xff] %v471_v38  ;;  %v470_v40 = vsub.f32 1.0, %v651_v39  ;;  %v664_v41 = vpack.c.bf16 %v651_v39, %v650_v33  ;;  %v488_v42 = vadd.f32 %v651_v39, %v486_v37  ;;  %494 = sbr.rel (%p654_p6) target bundleno = 293 (0x125), region = 44 }
 0x11a   : > { %v472_v43 = vmul.f32 %v470_v40, %v462_v36  ;;  %665 = vst [vmem:[%s837_s6] sm:$0xff] %v664_v41   ;;  %490 = vst [vmem:[#allocation3 + $0x8] sm:$0xff] %v488_v42 }
 0x11c   : > { %474 = vst [vmem:[#allocation2 + $0x8] sm:$0xff] %v472_v43 }
 0x11d   : > { %v495_v44 = vld [vmem:[#allocation3] sm:$0xff] }
 0x11e   : > { %v497_v46 = vmul.f32 0.25, %v495_v44 }
 0x120   : > { %499 = vst [vmem:[#allocation3] sm:$0xff] %v497_v46 }
 0x121   : > { %v496_v45 = vld [vmem:[#allocation3 + $0x8] sm:$0xff] }
 0x122   : > { %v498_v47 = vmul.f32 0.25, %v496_v45 }
 0x124   : > { %500 = vst [vmem:[#allocation3 + $0x8] sm:$0xff] %v498_v47 }
 0x125 PF: > { %p891_p7 = scmp.eq.s32.totalorder %s622_s21, 3  ;;  %s773_s6 = smov [#allocation3]  }
 0x126   : > { %s523_s24 = sshll.u32 %s773_s6, 4  ;;  %s524_s24 = int_to_ptr.vmem [resolvable:$true] %s523_s24 }
 0x127   : > { %s718_s25 = scalar_lea.vmem %s524_s24, 256  ;;  %p725_p11 = scmp.lt.s32.totalorder %s524_s24, %s524_s24 }
 0x128   : > { %p719_p8 = scmp.ne.s32.totalorder %s524_s24, %s718_s25  ;;  %p726_p12 = scmp.lt.s32.totalorder %s718_s25, %s718_s25 }
 0x12a   : > { %p720_p9 = pnand %p719_p8, %p891_p7  ;;  %p727_p13 = por %p726_p12, %p725_p11 }
 0x12c   : > { %p721_p10 = pneg %p720_p9 }
 0x12e   : > { %p728_p0 = pnand %p727_p13, %p721_p10 }
 0x130   : > { %731 = shalt.err (!%p728_p0)
}
 0x131   : > { %s774_s18 = smov 128   ;;  %s775_s21 = smov 8  }
 0x132   : > { %667 = dma.vmem_to_hbm [thread:$0]  (%p891_p7), %s524_s24, 256, %s920_s5, [#allocation4], %s774_s18, %s774_s18, %s775_s21  }
 0x133   : > { %755 = dma.done.wait (%p891_p7), [#allocation4], 256  }
 0x134   : > { %757 = vsyncadd (%p891_p7), [#allocation4], 4294967040 }
 0x135 PF: > { %s17_s20 = sadd.s32 1, %s768_s20   ;;  %s922_s18 = smov %s764_s19 }
 0x136   : > { %p14_p1 = scmp.ge.s32.totalorder %s17_s20, 6   ;;  %s923_s19 = smov %s925_s22 }
 0x138   :  { %16 = sbr.rel (!%p14_p1) target bundleno = 2 (0x2), region = 84 }
 0x13d   :  { %551 = vsyncpa [#allocation4], 1 }
 0x13e   :  { %553 = vsyncpa [#allocation4 + $0x1], 1 }

// kernel: csnn_forward.7
= control target key start
LH: loop header
LB: loop body
LE: loop exit
PB: predicated region body
PF: predicated region fallthrough
CT: control target
= control target key end

     0   :  { %11 = vsyncpa [#allocation4], 0  ;;  %s1017_s0 = inlined_call_operand.vmem [shape: bf16[4,16,128], index: 0, kind: input, shape index: {}]   ;;  %s1018_s1 = inlined_call_operand.vmem [shape: bf16[128,128], index: 1, kind: input, shape index: {}]   ;;  %s1019_s2 = inlined_call_operand.vmem [shape: f32[1,128], index: 2, kind: input, shape index: {}]   ;;  %s1020_s3 = inlined_call_operand.vmem [shape: f32[1,128], index: 3, kind: input, shape index: {}]   ;;  %s1021_s4 = inlined_call_operand.hbm [shape: bf16[4,16,128], index: 4, kind: output, shape index: {0}]   ;;  %s1022_s5 = inlined_call_operand.vmem [shape: f32[16,128], index: 5, kind: output, shape index: {1}]  }
   0x1   :  { %13 = vsyncpa [#allocation4 + $0x1], 0  ;;  %s827_s18 = smov 0   ;;  %s829_s19 = smov 0  }
   0x2   :  { %s831_s20 = smov 0   ;;  %s833_s21 = smov 0  }
   0x3   :  { %s835_s22 = smov 0   ;;  %s837_s23 = smov 0  }
   0x4 LB: > { %s576_s24 = sadd.s32 4294967295, %s789_s23   ;;  %s577_s25 = sadd.s32 4294967294, %s789_s23   ;;  %s789_s23 = sphi %s837_s23, %s19_s23   ;;  %s785_s22 = sphi %s835_s22, %s1029_s22   ;;  %s781_s21 = sphi %s833_s21, %s1028_s21   ;;  %s777_s20 = sphi %s831_s20, %s1027_s20   ;;  %s773_s19 = sphi %s829_s19, %s1026_s19   ;;  %s769_s18 = sphi %s827_s18, %s1025_s18  }
   0x5   : > { %s28_s26 = sadd.s32 1, %s785_s22  ;;  %s131_s27 = sadd.s32 1, %s777_s20 }
   0x6   : > { %p29_p0 = scmp.ge.s32.totalorder %s28_s26, 4  ;;  %p141_p1 = scmp.ne.s32.totalorder %s777_s20, %s773_s19 }
   0x7   : > { %p142_p2 = scmp.eq.s32.totalorder %s576_s24, 3  ;;  %p147_p3 = scmp.ne.s32.totalorder %s773_s19, %s769_s18 }
   0x8   : > { %s1031_s26 = smov (%p29_p0, %s28_s26), 0  ;;  %p148_p5 = scmp.eq.s32.totalorder %s577_s25, 3 }
   0x9   : > { %p867_p4 = por %p142_p2, %p141_p1  ;;  %s126_s29 = ssub.s32 %s785_s22, %s1031_s26 }
   0xa   : > { %p580_p6 = scmp.ge.s32.totalorder %s789_s23, 1  ;;  %p129_p7 = scmp.eq.s32.totalorder %s126_s29, 0 }
   0xb   : > { %p874_p8 = por %p148_p5, %p147_p3  ;;  %p214_p9 = scmp.lt.s32.totalorder %s789_s23, 5 }
   0xc   : > { %s880_s6 = scalar_select %p129_p7, %s777_s20, %s131_s27  }
   0xd   : > { %p215_p10 = pnand %p580_p6, %p214_p9 }
   0xe   : > { %s241_s7 = sand.u32 (!%p215_p10), 1, %s773_s19   ;;  %p252_p11 = scmp.lt.s32.totalorder (!%p215_p10), %s781_s21, 3 }
   0xf   : > { %218 = sbr.rel (%p215_p10) target bundleno = 304 (0x130), region = 36  ;;  %s886_s8 = sshll.u32 (!%p215_p10), %s241_s7, 3 }
  0x10   : > { %s243_s14 = scalar_lea.vmem (!%p215_p10), [#allocation3], %s886_s8  ;;  %p584_p12 = scmp.ne.s32.totalorder (!%p215_p10), %s781_s21, 0 }
  0x14   : > { %s253_s9 = scalar_select %p252_p11, %s781_s21, 3 }
  0x15   : > { %272 = sbr.rel (%p584_p12) target bundleno = 29 (0x1d), region = 40 }
  0x16   : > { %s608_s10 = sshll.u32 %s253_s9, 3 }
  0x17   : > { %s892_s13 = scalar_lea.vmem %s1017_s0, %s608_s10 }
  0x1a   : > { %v791_v0 = vmov 0.0  }
  0x1b   : > { %273 = vst [vmem:[#allocation2] sm:$0xff] %v791_v0  ;;  %274 = vst [vmem:[#allocation2 + $0x8] sm:$0xff] %v791_v0 }
  0x1c   : > { %275 = vst [vmem:[%s1022_s5] sm:$0xff] %v791_v0  ;;  %276 = vst [vmem:[%s1022_s5 + $0x8] sm:$0xff] %v791_v0 }
  0x1d PF: > { %v704_v1 = vld [vmem:[%s1018_s1 + $0x38] sm:$0xff]   ;;  %v792_v2 = vmov 0.0   ;;  %v705_v3 = vld [vmem:[%s1018_s1 + $0x30] sm:$0xff]   ;;  %vm793_vm0 = vmmov 0   ;;  %v706_v4 = vld [vmem:[%s1018_s1 + $0x28] sm:$0xff]   ;;  %p600_p13 = scmp.ne.s32.totalorder %s781_s21, 3 }
  0x1e   : > { %624 = vmatprep.subr.bf16.mxu0 %v792_v2  ;;  %640 = vmatprep.mubr.msk.bf16.mxu0 %vm793_vm0, %v792_v2  ;;  %v707_v5 = vld [vmem:[%s1018_s1 + $0x20] sm:$0xff]   ;;  %v708_v6 = vld [vmem:[%s1018_s1 + $0x18] sm:$0xff]   ;;  %v709_v7 = vld [vmem:[%s1018_s1 + $0x10] sm:$0xff]  }
  0x1f   : > { %625 = vmatpush3.bf16.msra.mxu0 %v704_v1  ;;  %v710_v8 = vld [vmem:[%s1018_s1 + $0x8] sm:$0xff]   ;;  %v711_v9 = vld [vmem:[%s1018_s1] sm:$0xff]  }
  0x20   : > { %626 = vmatprep.subr.bf16.mxu0 %v792_v2  ;;  %v712_v10 = vld [vmem:[%s892_s13] sm:$0xff]  }
  0x21   : > { %v594_v11 = vld [vmem:[%s1019_s2] ss:$0 sm:$0xff] }
  0x22   : > { %v595_v13 = vld [vmem:[%s1020_s3] ss:$0 sm:$0xff]  ;;  %v409_v22 = vld [vmem:[#allocation2 + $0x8] sm:$0xff] }
  0x23   : > { %627 = vmatpush3.bf16.msra.mxu0 %v705_v3  ;;  %v408_v15 = vld [vmem:[#allocation2] sm:$0xff]  ;;  %v435_v29 = vld [vmem:[%s1022_s5 + $0x8] sm:$0xff] }
  0x24   : > { %628 = vmatprep.subr.bf16.mxu0 %v792_v2  ;;  %v434_v21 = vld [vmem:[%s1022_s5] sm:$0xff] }
  0x27   : > { %629 = vmatpush3.bf16.msra.mxu0 %v706_v4 }
  0x28   : > { %630 = vmatprep.subr.bf16.mxu0 %v792_v2 }
  0x2b   : > { %631 = vmatpush3.bf16.msra.mxu0 %v707_v5 }
  0x2c   : > { %632 = vmatprep.subr.bf16.mxu0 %v792_v2 }
  0x2f   : > { %633 = vmatpush3.bf16.msra.mxu0 %v708_v6 }
  0x30   : > { %634 = vmatprep.subr.bf16.mxu0 %v792_v2 }
  0x33   : > { %635 = vmatpush3.bf16.msra.mxu0 %v709_v7 }
  0x34   : > { %636 = vmatprep.subr.bf16.mxu0 %v792_v2 }
  0x37   : > { %637 = vmatpush3.bf16.msra.mxu0 %v710_v8 }
  0x38   : > { %638 = vmatprep.subr.bf16.mxu0 %v792_v2 }
  0x3b   : > { %639 = vmatpush3.bf16.msra.mxu0 %v711_v9 }
  0x3e   : > { %641 = vmatmul.mubr.bf16.vlgmr.msra.gmra.mxu0 %v712_v10 }
  0xfe   : > { %v383_v12 = vpop.f32.mrf.mxu0 }
  0xff   : > { %v397_v14 = vmul.f32 %v594_v11, %v383_v12 }
 0x100   : > { %v642_v16 = vpop.f32.mrf.mxu0 }
 0x101   : > { %v406_v17 = vadd.f32 %v595_v13, %v397_v14 }
 0x102   : > { %v386_v18 = vpop.f32.mrf.mxu0 }
 0x103   : > { %v410_v19 = vadd.f32 %v408_v15, %v406_v17  ;;  %v398_v20 = vmul.f32 %v594_v11, %v386_v18 }
 0x104   : > { %v643_v23 = vpop.f32.mrf.mxu0 }
 0x105   : > { %vm412_vm1 = vcmp.ge.f32.partialorder %v410_v19, 1.0  ;;  %v407_v24 = vadd.f32 %v595_v13, %v398_v20 }
 0x106   : > { %v596_v25 = vsel %vm412_vm1, 1.0, %v792_v2 }
 0x107   : > { %v418_v26 = vsub.f32 1.0, %v596_v25  ;;  %v436_v27 = vadd.f32 %v596_v25, %v434_v21  ;;  %v411_v28 = vadd.f32 %v409_v22, %v407_v24 }
 0x109   : > { %v420_v30 = vmul.f32 %v418_v26, %v410_v19  ;;  %438 = vst [vmem:[%s1022_s5] sm:$0xff] %v436_v27  ;;  %vm413_vm2 = vcmp.ge.f32.partialorder %v411_v28, 1.0 }
 0x10a   : > { %v597_v31 = vsel %vm413_vm2, 1.0, %v792_v2 }
 0x10b   : > { %422 = vst [vmem:[#allocation2] sm:$0xff] %v420_v30  ;;  %v419_v32 = vsub.f32 1.0, %v597_v31  ;;  %v613_v33 = vpack.c.bf16 %v597_v31, %v596_v25  ;;  %v437_v34 = vadd.f32 %v597_v31, %v435_v29  ;;  %443 = sbr.rel (%p600_p13) target bundleno = 280 (0x118), region = 44 }
 0x10d   : > { %v421_v35 = vmul.f32 %v419_v32, %v411_v28  ;;  %614 = vst [vmem:[%s243_s14] sm:$0xff] %v613_v33   ;;  %439 = vst [vmem:[%s1022_s5 + $0x8] sm:$0xff] %v437_v34 }
 0x10f   : > { %423 = vst [vmem:[#allocation2 + $0x8] sm:$0xff] %v421_v35 }
 0x110   : > { %v444_v36 = vld [vmem:[%s1022_s5] sm:$0xff] }
 0x111   : > { %v446_v38 = vmul.f32 0.25, %v444_v36 }
 0x113   : > { %448 = vst [vmem:[%s1022_s5] sm:$0xff] %v446_v38 }
 0x114   : > { %v445_v37 = vld [vmem:[%s1022_s5 + $0x8] sm:$0xff] }
 0x115   : > { %v447_v39 = vmul.f32 0.25, %v445_v37 }
 0x117   : > { %449 = vst [vmem:[%s1022_s5 + $0x8] sm:$0xff] %v447_v39 }
 0x118 PF: > { %s611_s27 = sshll.u32 %s781_s21, 7  ;;  %s471_s11 = sshll.u32 %s243_s14, 4  ;;  %s968_s11 = int_to_ptr.vmem [resolvable:$true] %s471_s11 }
 0x119   : > { %s964_s10 = scalar_lea.hbm %s1021_s4, %s611_s27  ;;  %s972_s12 = scalar_lea.sflag [#allocation4], %s241_s7 }
 0x11a   : > { %s713_s15 = scalar_lea.vmem %s968_s11, 128  ;;  %s794_s21 = smov [#allocation3]  }
 0x11b   : > { %p714_p0 = scmp.ne.s32.totalorder %s968_s11, %s713_s15  ;;  %s717_s16 = sshll.u32 %s794_s21, 4  ;;  %s718_s16 = int_to_ptr.vmem [resolvable:$false] %s717_s16 }
 0x11c   : > { %s719_s17 = scalar_lea.vmem %s718_s16, 256  ;;  %p720_p3 = scmp.lt.s32.totalorder %s968_s11, %s718_s16 }
 0x11d   : > { %p715_p1 = pnand %p714_p0, %p867_p4  ;;  %p721_p5 = scmp.lt.s32.totalorder %s719_s17, %s713_s15 }
 0x11f   : > { %p716_p2 = pneg %p715_p1  ;;  %p722_p6 = por %p721_p5, %p720_p3 }
 0x121   : > { %p723_p7 = pnand %p722_p6, %p716_p2 }
 0x123   : > { %726 = shalt.err (!%p723_p7)
}
 0x124   : > { %s727_s7 = scalar_lea.hbm %s964_s10, 128  ;;  %s731_s13 = scalar_lea.hbm %s1021_s4, 512 }
 0x125   : > { %p728_p9 = scmp.ne.s32.totalorder %s964_s10, %s727_s7  ;;  %p732_p12 = scmp.lt.s32.totalorder %s964_s10, %s1021_s4 }
 0x126   : > { %p733_p13 = scmp.lt.s32.totalorder %s731_s13, %s727_s7 }
 0x127   : > { %p729_p10 = pnand %p728_p9, %p867_p4 }
 0x128   : > { %p734_p0 = por %p733_p13, %p732_p12 }
 0x129   : > { %p730_p11 = pneg %p729_p10 }
 0x12b   : > { %p735_p1 = pnand %p734_p0, %p730_p11 }
 0x12d   : > { %738 = shalt.err (!%p735_p1)
}
 0x12e   : > { %s795_s27 = smov 64   ;;  %s796_s29 = smov 4  }
 0x12f   : > { %644 = dma.vmem_to_hbm [thread:$0]  (%p867_p4), %s968_s11, 128, %s964_s10, %s972_s12, %s795_s27, %s795_s27, %s796_s29  }
 0x130 PF: > { %p650_p2 = scmp.ge.s32.totalorder %s789_s23, 2  ;;  %s498_s9 = sand.u32 1, %s769_s18  }
 0x131   : > { %s499_s15 = scalar_lea.sflag [#allocation4], %s498_s9 }
 0x132   : > { %p647_p3 = pnand %p650_p2, %p874_p8 }
 0x134   : > { %p648_p5 = pneg %p647_p3 }
 0x136   : > { %764 = dma.done.wait (%p648_p5), %s499_s15, 128  }
 0x137   : > { %766 = vsyncadd (%p648_p5), %s499_s15, 4294967168  ;;  %s19_s23 = sadd.s32 1, %s789_s23   ;;  %s1025_s18 = smov %s773_s19 }
 0x138   : > { %p16_p6 = scmp.ge.s32.totalorder %s19_s23, 6   ;;  %s1026_s19 = smov %s777_s20 }
 0x139   : > { %s1027_s20 = smov %s880_s6  ;;  %s1028_s21 = smov %s785_s22 }
 0x13a   : > { %s1029_s22 = smov %s1031_s26  ;;  %18 = sbr.rel (!%p16_p6) target bundleno = 4 (0x4), region = 91 }
 0x13f   :  { %504 = vsyncpa [#allocation4], 1 }
 0x140   :  { %506 = vsyncpa [#allocation4 + $0x1], 1 }

</bundles_post_ra>
